<compile_context>
chip_gen: v7x
topology: tpu7x:2x2x1
jax: 0.10.0
libtpu: 0.0.40
codegen_flags: <defaults>
</compile_context>

<pallas_src>
import functools

import jax
import jax.numpy as jnp
from jax.experimental import pallas as pl
from jax.experimental.pallas import tpu as pltpu

CP = 128   # lane-padded channel width (all channel dims zero-padded to CP)


# ----------------------------------------------------------------------------
# In-kernel helpers.
# ----------------------------------------------------------------------------
def _zero_border(pad_ref, h, w):
    """Zero only the 1-px halo border; the interior is fully overwritten."""
    zr = jnp.zeros((1, w + 2, CP), jnp.bfloat16)
    pad_ref[0:1, :, :] = zr
    pad_ref[h + 1:h + 2, :, :] = zr
    zc = jnp.zeros((h + 2, 1, CP), jnp.bfloat16)
    pad_ref[:, 0:1, :] = zc
    pad_ref[:, w + 1:w + 2, :] = zc


def _conv3x3(pad_ref, w_ref, b_ref, h, w):
    """Same-padded 3x3 conv reading a pre-filled halo buffer.

    kw taps are folded into the contraction dim: per kh one matmul of
    (h*w, 3*CP) @ (3*CP, CP), f32 accumulation, bias-initialised accumulator.
    """
    acc = jnp.broadcast_to(b_ref[...], (h * w, CP))            # f32 bias init
    for kh in range(3):                                        # static unroll
        rows = pad_ref[kh:kh + h, :, :]                        # (h, w+2, CP)
        patch = jnp.concatenate(
            [rows[:, 0:w, :], rows[:, 1:w + 1, :], rows[:, 2:w + 2, :]],
            axis=-1).reshape(h * w, 3 * CP)                    # im2col along W
        acc = acc + jnp.dot(patch, w_ref[kh],
                            preferred_element_type=jnp.float32)
    return acc                                                 # (h*w, CP) f32


# ----------------------------------------------------------------------------
# Fused UNet kernel: one image per grid step, all intermediates stay in VMEM.
# ----------------------------------------------------------------------------
def _unet_kernel(x_ref, we_ref, be_ref, wb_ref, bb_ref, wd_ref, bd_ref,
                 o_ref, pad_big, pad_small, *, H, W, cin, c1):
    Hh, Wh = H // 2, W // 2

    # ---- encoder: conv3x3 + bias + ReLU ------------------------------------
    pad_big[...] = jnp.zeros_like(pad_big)          # see header note (step-0)
    pad_big[1:H + 1, 1:W + 1, 0:cin] = x_ref[0]     # only real input lanes
    e1f = jnp.maximum(_conv3x3(pad_big, we_ref, be_ref, H, W), 0.0)
    e1f = e1f.reshape(H, W, CP)                     # f32
    e1 = e1f.astype(jnp.bfloat16)                   # skip tensor, lanes [0:c1]

    # ---- fused 2x2 max-pool (never leaves VMEM) ----------------------------
    p = jnp.max(e1f.reshape(H, Wh, 2, CP), axis=2)
    p = jnp.max(p.reshape(Hh, 2, Wh, CP), axis=1).astype(jnp.bfloat16)

    # ---- bottleneck: conv3x3 + bias + ReLU ----------------------------------
    _zero_border(pad_small, Hh, Wh)
    pad_small[1:Hh + 1, 1:Wh + 1, :] = p            # full-lane interior store
    bf = jnp.maximum(_conv3x3(pad_small, wb_ref, bb_ref, Hh, Wh), 0.0)

    # Lane-roll bottleneck channels to [c1:c1+c2] (XLU, ~free) so they share
    # one decoder conv with the skip tensor that lives in lanes [0:c1].
    b_sh = pltpu.roll(bf, shift=c1, axis=1).astype(jnp.bfloat16)
    b_sh = b_sh.reshape(Hh, Wh, CP)

    # ---- nearest 2x upsample + lane-packed "concat" (no real concat) -------
    up = jnp.broadcast_to(b_sh[:, :, None, :], (Hh, Wh, 2, CP)).reshape(Hh, W, CP)
    up = jnp.broadcast_to(up[:, None, :, :], (Hh, 2, W, CP)).reshape(H, W, CP)
    packed = up + e1                                # disjoint lanes -> exact

    # ---- decoder: ONE conv3x3 over the packed tensor, no ReLU --------------
    pad_big[1:H + 1, 1:W + 1, :] = packed           # border still zero
    y = _conv3x3(pad_big, wd_ref, bd_ref, H, W)
    o_ref[...] = y.reshape(1, H, W, CP).astype(o_ref.dtype)   # bf16, lane-dense


# ----------------------------------------------------------------------------
# Wrapper: NCHW <-> lane-padded NHWC plumbing + pallas_call.
# ----------------------------------------------------------------------------
def _pack_w(w):
    """(3,3,ci,co) f32 -> (3, 3*CP, CP) bf16 with kw folded into the K dim."""
    ci, co = w.shape[2], w.shape[3]
    out = jnp.zeros((3, 3, CP, CP), jnp.float32)
    out = out.at[:, :, :ci, :co].set(w)
    return out.reshape(3, 3 * CP, CP).astype(jnp.bfloat16)


def _pack_w_dec(w_dec, c1, c2):
    """Decoder weight row-packed for the lane-packed skip tensor:
    rows [0:c1] act on e1 (lanes [0:c1]), rows [c1:c1+c2] on up (rolled)."""
    cin = w_dec.shape[3]
    out = jnp.zeros((3, 3, CP, CP), jnp.float32)
    out = out.at[:, :, :c1, :cin].set(w_dec[:, :, c2:c2 + c1, :])   # e1 part
    out = out.at[:, :, c1:c1 + c2, :cin].set(w_dec[:, :, :c2, :])   # up part
    return out.reshape(3, 3 * CP, CP).astype(jnp.bfloat16)


def _pad_b(b):
    return jnp.zeros((1, CP), jnp.float32).at[0, :b.shape[0]].set(b)


def unet_forward(x_nchw, params):
    """NCHW float32 in -> NCHW float32 out (matches PyTorch conventions)."""
    N, cin, H, W = x_nchw.shape
    c1 = params["w_enc"].shape[-1]
    c2 = params["w_bot"].shape[-1]
    assert H % 2 == 0 and W % 2 == 0, "pool/upsample require even H, W"
    assert cin <= CP and c1 + c2 <= CP, "real channel counts must fit 128 lanes"

    # NCHW -> NHWC bf16; channels stay at their real width (no host-side pad).
    x = jnp.transpose(x_nchw, (0, 2, 3, 1)).astype(jnp.bfloat16)

    w_enc, b_enc = _pack_w(params["w_enc"]), _pad_b(params["b_enc"])
    w_bot, b_bot = _pack_w(params["w_bot"]), _pad_b(params["b_bot"])
    w_dec, b_dec = _pack_w_dec(params["w_dec"], c1, c2), _pad_b(params["b_dec"])

    kernel = functools.partial(_unet_kernel, H=H, W=W, cin=cin, c1=c1)
    wspec = pl.BlockSpec((3, 3 * CP, CP), lambda n: (0, 0, 0))
    bspec = pl.BlockSpec((1, CP), lambda n: (0, 0))

    out = pl.pallas_call(
        kernel,
        out_shape=jax.ShapeDtypeStruct((N, H, W, CP), jnp.bfloat16),
        grid=(N,),
        in_specs=[
            pl.BlockSpec((1, H, W, cin), lambda n: (n, 0, 0, 0)),
            wspec, bspec, wspec, bspec, wspec, bspec,
        ],
        out_specs=pl.BlockSpec((1, H, W, CP), lambda n: (n, 0, 0, 0)),
        scratch_shapes=[
            pltpu.VMEM((H + 2, W + 2, CP), jnp.bfloat16),            # halo buf
            pltpu.VMEM((H // 2 + 2, W // 2 + 2, CP), jnp.bfloat16),  # halo buf
        ],
        compiler_params=pltpu.CompilerParams(
            dimension_semantics=("parallel",)),
    )(x, w_enc, b_enc, w_bot, b_bot, w_dec, b_dec)

    return jnp.transpose(out[..., :cin], (0, 3, 1, 2)).astype(jnp.float32)


# ----------------------------------------------------------------------------
# Pure-JAX reference (mimics the kernel's bf16-operand / f32-accumulate math).
# ----------------------------------------------------------------------------
def _ref_conv3x3(x, w, b):
    N, H, W, _ = x.shape
    xq = x.astype(jnp.bfloat16).astype(jnp.float32)
    wq = w.astype(jnp.bfloat16).astype(jnp.float32)
    xp = jnp.pad(xq, ((0, 0), (1, 1), (1, 1), (0, 0)))
    acc = jnp.zeros((N, H, W, w.shape[-1]), jnp.float32)
    for kh in range(3):
        for kw in range(3):
            acc = acc + jnp.einsum("nhwc,cd->nhwd",
                                   xp[:, kh:kh + H, kw:kw + W, :], wq[kh, kw],
                                   preferred_element_type=jnp.float32)
    return acc + b


def _ref_forward(x_nchw, params):
    x = jnp.transpose(x_nchw, (0, 2, 3, 1))
    e1 = jnp.maximum(_ref_conv3x3(x, params["w_enc"], params["b_enc"]), 0.0)
    N, H, W, c1 = e1.shape
    p = jnp.max(e1.reshape(N, H // 2, 2, W // 2, 2, c1), axis=(2, 4))
    bott = jnp.maximum(_ref_conv3x3(p, params["w_bot"], params["b_bot"]), 0.0)
    up = jnp.repeat(jnp.repeat(bott, 2, axis=1), 2, axis=2)
    cat = jnp.concatenate([up, e1], axis=-1)
    y = _ref_conv3x3(cat, params["w_dec"], params["b_dec"])
    return jnp.transpose(y, (0, 3, 1, 2))


def init_params(key, c_in=4, c1=8, c2=16):
    ks = jax.random.split(key, 6)

    def w(k, shape):
        fan_in = shape[0] * shape[1] * shape[2]
        return jax.random.normal(k, shape, jnp.float32) / jnp.sqrt(fan_in)

    return {
        "w_enc": w(ks[0], (3, 3, c_in, c1)),
        "b_enc": 0.01 * jax.random.normal(ks[1], (c1,), jnp.float32),
        "w_bot": w(ks[2], (3, 3, c1, c2)),
        "b_bot": 0.01 * jax.random.normal(ks[3], (c2,), jnp.float32),
        "w_dec": w(ks[4], (3, 3, c2 + c1, c_in)),
        "b_dec": 0.01 * jax.random.normal(ks[5], (c_in,), jnp.float32),
    }


if __name__ == "__main__":
    key = jax.random.PRNGKey(0)
    k_x, k_p = jax.random.split(key)

    N, C, H, W = 2, 4, 16, 16
    x = jax.random.normal(k_x, (N, C, H, W), jnp.float32)   # NCHW, like PyTorch
    params = init_params(k_p, c_in=C, c1=8, c2=16)

    out = jax.block_until_ready(jax.jit(unet_forward)(x, params))
    ref = jax.block_until_ready(jax.jit(_ref_forward)(x, params))

    assert out.shape == (N, C, H, W), out.shape
    assert bool(jnp.all(jnp.isfinite(out)))
    # Kernel output is bf16 (halved HBM writeback): allow one bf16 output ulp
    # (<= 1.6e-2 for |y| < 4) on top of tiny f32 accumulation-order diffs.
    max_err = float(jnp.max(jnp.abs(out - ref)))
    assert max_err < 3e-2, f"max abs error vs reference = {max_err}"
    print("KERNEL_OK")
</pallas_src>

<mosaic_0001>
module attributes {stable_mosaic.version = 11 : i64} {
  func.func @_unet_kernel(%arg0: i32, %arg1: memref<1x16x16x4xbf16, #tpu.memory_space<vmem>>, %arg2: memref<3x384x128xbf16, #tpu.memory_space<vmem>>, %arg3: memref<1x128xf32, #tpu.memory_space<vmem>>, %arg4: memref<3x384x128xbf16, #tpu.memory_space<vmem>>, %arg5: memref<1x128xf32, #tpu.memory_space<vmem>>, %arg6: memref<3x384x128xbf16, #tpu.memory_space<vmem>>, %arg7: memref<1x128xf32, #tpu.memory_space<vmem>>, %arg8: memref<1x16x16x128xbf16, #tpu.memory_space<vmem>>, %arg9: memref<18x18x128xbf16, #tpu.memory_space<vmem>>, %arg10: memref<10x10x128xbf16, #tpu.memory_space<vmem>>) attributes {dimension_semantics = [#tpu.dimension_semantics<parallel>], iteration_bounds = array<i64: 2>, scalar_prefetch = 0 : i64, scratch_operands = 2 : i64, tpu.core_type = #tpu.core_type<tc>, window_params = [{transform_indices = @transform_0, window_bounds = array<i64: 1, 16, 16, 4>}, {pipeline_mode = #tpu.pipeline_mode<synchronous>, transform_indices = @transform_1, window_bounds = array<i64: 3, 384, 128>}, {pipeline_mode = #tpu.pipeline_mode<synchronous>, transform_indices = @transform_2, window_bounds = array<i64: 1, 128>}, {pipeline_mode = #tpu.pipeline_mode<synchronous>, transform_indices = @transform_3, window_bounds = array<i64: 3, 384, 128>}, {pipeline_mode = #tpu.pipeline_mode<synchronous>, transform_indices = @transform_4, window_bounds = array<i64: 1, 128>}, {pipeline_mode = #tpu.pipeline_mode<synchronous>, transform_indices = @transform_5, window_bounds = array<i64: 3, 384, 128>}, {pipeline_mode = #tpu.pipeline_mode<synchronous>, transform_indices = @transform_6, window_bounds = array<i64: 1, 128>}, {transform_indices = @transform_7, window_bounds = array<i64: 1, 16, 16, 128>}]} {
    %cst = arith.constant 0.000000e+00 : bf16
    %0 = vector.broadcast %cst : bf16 to vector<18x18x128xbf16>
    %c0 = arith.constant 0 : index
    %c0_0 = arith.constant 0 : index
    %c0_1 = arith.constant 0 : index
    %1 = vector.load %arg9[%c0, %c0_0, %c0_1] : memref<18x18x128xbf16, #tpu.memory_space<vmem>>, vector<18x18x128xbf16>
    tpu.vector_store %arg9[%c0, %c0_0, %c0_1], %0 {strides = array<i32>} : memref<18x18x128xbf16, #tpu.memory_space<vmem>>, vector<18x18x128xbf16>,
    %c0_2 = arith.constant 0 : index
    %c0_3 = arith.constant 0 : index
    %c0_4 = arith.constant 0 : index
    %c0_5 = arith.constant 0 : index
    %2 = vector.load %arg1[%c0_2, %c0_3, %c0_4, %c0_5] : memref<1x16x16x4xbf16, #tpu.memory_space<vmem>>, vector<1x16x16x4xbf16>
    %3 = vector.shape_cast %2 : vector<1x16x16x4xbf16> to vector<16x16x4xbf16>
    %c1 = arith.constant 1 : index
    %c1_6 = arith.constant 1 : index
    %c0_7 = arith.constant 0 : index
    %4 = vector.load %arg9[%c1, %c1_6, %c0_7] : memref<18x18x128xbf16, #tpu.memory_space<vmem>>, vector<16x16x4xbf16>
    tpu.vector_store %arg9[%c1, %c1_6, %c0_7], %3 {strides = array<i32>} : memref<18x18x128xbf16, #tpu.memory_space<vmem>>, vector<16x16x4xbf16>,
    %c0_8 = arith.constant 0 : index
    %c0_9 = arith.constant 0 : index
    %5 = vector.load %arg3[%c0_8, %c0_9] : memref<1x128xf32, #tpu.memory_space<vmem>>, vector<1x128xf32>
    %6 = vector.shape_cast %5 : vector<1x128xf32> to vector<1x128xf32>
    %7 = vector.broadcast %6 : vector<1x128xf32> to vector<256x128xf32>
    %c0_10 = arith.constant 0 : index
    %c0_11 = arith.constant 0 : index
    %c0_12 = arith.constant 0 : index
    %8 = vector.load %arg9[%c0_10, %c0_11, %c0_12] : memref<18x18x128xbf16, #tpu.memory_space<vmem>>, vector<16x18x128xbf16>
    %9 = vector.extract_strided_slice %8 {offsets = [0, 0, 0], sizes = [16, 16, 128], strides = [1, 1, 1]} : vector<16x18x128xbf16> to vector<16x16x128xbf16>
    %10 = vector.extract_strided_slice %8 {offsets = [0, 1, 0], sizes = [16, 16, 128], strides = [1, 1, 1]} : vector<16x18x128xbf16> to vector<16x16x128xbf16>
    %11 = vector.extract_strided_slice %8 {offsets = [0, 2, 0], sizes = [16, 16, 128], strides = [1, 1, 1]} : vector<16x18x128xbf16> to vector<16x16x128xbf16>
    %12 = tpu.concatenate %9, %10, %11 in 2 : vector<16x16x128xbf16>, vector<16x16x128xbf16>, vector<16x16x128xbf16> -> vector<16x16x384xbf16>
    %13 = vector.shape_cast %12 : vector<16x16x384xbf16> to vector<256x384xbf16>
    %c0_13 = arith.constant 0 : index
    %c0_14 = arith.constant 0 : index
    %c0_15 = arith.constant 0 : index
    %14 = vector.load %arg2[%c0_13, %c0_14, %c0_15] : memref<3x384x128xbf16, #tpu.memory_space<vmem>>, vector<1x384x128xbf16>
    %15 = vector.shape_cast %14 : vector<1x384x128xbf16> to vector<384x128xbf16>
    %cst_16 = arith.constant dense<0.000000e+00> : vector<256x128xf32>
    %16 = tpu.matmul %13, %15, %cst_16 {dimension_numbers = #tpu.dot_dimension_numbers<[1], [0], [0], [1], [0, 0, 1, 1], [], []>} : vector<256x384xbf16>, vector<384x128xbf16>, vector<256x128xf32> -> vector<256x128xf32>
    %17 = arith.addf %7, %16 : vector<256x128xf32>
    %c1_17 = arith.constant 1 : index
    %c0_18 = arith.constant 0 : index
    %c0_19 = arith.constant 0 : index
    %18 = vector.load %arg9[%c1_17, %c0_18, %c0_19] : memref<18x18x128xbf16, #tpu.memory_space<vmem>>, vector<16x18x128xbf16>
    %19 = vector.extract_strided_slice %18 {offsets = [0, 0, 0], sizes = [16, 16, 128], strides = [1, 1, 1]} : vector<16x18x128xbf16> to vector<16x16x128xbf16>
    %20 = vector.extract_strided_slice %18 {offsets = [0, 1, 0], sizes = [16, 16, 128], strides = [1, 1, 1]} : vector<16x18x128xbf16> to vector<16x16x128xbf16>
    %21 = vector.extract_strided_slice %18 {offsets = [0, 2, 0], sizes = [16, 16, 128], strides = [1, 1, 1]} : vector<16x18x128xbf16> to vector<16x16x128xbf16>
    %22 = tpu.concatenate %19, %20, %21 in 2 : vector<16x16x128xbf16>, vector<16x16x128xbf16>, vector<16x16x128xbf16> -> vector<16x16x384xbf16>
    %23 = vector.shape_cast %22 : vector<16x16x384xbf16> to vector<256x384xbf16>
    %c1_20 = arith.constant 1 : index
    %c0_21 = arith.constant 0 : index
    %c0_22 = arith.constant 0 : index
    %24 = vector.load %arg2[%c1_20, %c0_21, %c0_22] : memref<3x384x128xbf16, #tpu.memory_space<vmem>>, vector<1x384x128xbf16>
    %25 = vector.shape_cast %24 : vector<1x384x128xbf16> to vector<384x128xbf16>
    %cst_23 = arith.constant dense<0.000000e+00> : vector<256x128xf32>
    %26 = tpu.matmul %23, %25, %cst_23 {dimension_numbers = #tpu.dot_dimension_numbers<[1], [0], [0], [1], [0, 0, 1, 1], [], []>} : vector<256x384xbf16>, vector<384x128xbf16>, vector<256x128xf32> -> vector<256x128xf32>
    %27 = arith.addf %17, %26 : vector<256x128xf32>
    %c2 = arith.constant 2 : index
    %c0_24 = arith.constant 0 : index
    %c0_25 = arith.constant 0 : index
    %28 = vector.load %arg9[%c2, %c0_24, %c0_25] : memref<18x18x128xbf16, #tpu.memory_space<vmem>>, vector<16x18x128xbf16>
    %29 = vector.extract_strided_slice %28 {offsets = [0, 0, 0], sizes = [16, 16, 128], strides = [1, 1, 1]} : vector<16x18x128xbf16> to vector<16x16x128xbf16>
    %30 = vector.extract_strided_slice %28 {offsets = [0, 1, 0], sizes = [16, 16, 128], strides = [1, 1, 1]} : vector<16x18x128xbf16> to vector<16x16x128xbf16>
    %31 = vector.extract_strided_slice %28 {offsets = [0, 2, 0], sizes = [16, 16, 128], strides = [1, 1, 1]} : vector<16x18x128xbf16> to vector<16x16x128xbf16>
    %32 = tpu.concatenate %29, %30, %31 in 2 : vector<16x16x128xbf16>, vector<16x16x128xbf16>, vector<16x16x128xbf16> -> vector<16x16x384xbf16>
    %33 = vector.shape_cast %32 : vector<16x16x384xbf16> to vector<256x384xbf16>
    %c2_26 = arith.constant 2 : index
    %c0_27 = arith.constant 0 : index
    %c0_28 = arith.constant 0 : index
    %34 = vector.load %arg2[%c2_26, %c0_27, %c0_28] : memref<3x384x128xbf16, #tpu.memory_space<vmem>>, vector<1x384x128xbf16>
    %35 = vector.shape_cast %34 : vector<1x384x128xbf16> to vector<384x128xbf16>
    %cst_29 = arith.constant dense<0.000000e+00> : vector<256x128xf32>
    %36 = tpu.matmul %33, %35, %cst_29 {dimension_numbers = #tpu.dot_dimension_numbers<[1], [0], [0], [1], [0, 0, 1, 1], [], []>} : vector<256x384xbf16>, vector<384x128xbf16>, vector<256x128xf32> -> vector<256x128xf32>
    %37 = arith.addf %27, %36 : vector<256x128xf32>
    %cst_30 = arith.constant 0.000000e+00 : f32
    %38 = vector.broadcast %cst_30 : f32 to vector<256x128xf32>
    %39 = arith.maximumf %37, %38 : vector<256x128xf32>
    %40 = vector.shape_cast %39 : vector<256x128xf32> to vector<16x16x128xf32>
    %41 = arith.truncf %40 : vector<16x16x128xf32> to vector<16x16x128xbf16>
    %42 = vector.shape_cast %40 : vector<16x16x128xf32> to vector<16x8x2x128xf32>
    %cst_31 = arith.constant dense<0xFF800000> : vector<16x8x128xf32>
    %43 = vector.multi_reduction <maximumf>, %42, %cst_31 [2] : vector<16x8x2x128xf32> to vector<16x8x128xf32>
    %44 = vector.shape_cast %43 : vector<16x8x128xf32> to vector<8x2x8x128xf32>
    %cst_32 = arith.constant dense<0xFF800000> : vector<8x8x128xf32>
    %45 = vector.multi_reduction <maximumf>, %44, %cst_32 [1] : vector<8x2x8x128xf32> to vector<8x8x128xf32>
    %46 = arith.truncf %45 : vector<8x8x128xf32> to vector<8x8x128xbf16>
    %cst_33 = arith.constant 0.000000e+00 : bf16
    %47 = vector.broadcast %cst_33 : bf16 to vector<1x10x128xbf16>
    %c0_34 = arith.constant 0 : index
    %c0_35 = arith.constant 0 : index
    %c0_36 = arith.constant 0 : index
    %48 = vector.load %arg10[%c0_34, %c0_35, %c0_36] : memref<10x10x128xbf16, #tpu.memory_space<vmem>>, vector<1x10x128xbf16>
    tpu.vector_store %arg10[%c0_34, %c0_35, %c0_36], %47 {strides = array<i32>} : memref<10x10x128xbf16, #tpu.memory_space<vmem>>, vector<1x10x128xbf16>,
    %c9 = arith.constant 9 : index
    %c0_37 = arith.constant 0 : index
    %c0_38 = arith.constant 0 : index
    %49 = vector.load %arg10[%c9, %c0_37, %c0_38] : memref<10x10x128xbf16, #tpu.memory_space<vmem>>, vector<1x10x128xbf16>
    tpu.vector_store %arg10[%c9, %c0_37, %c0_38], %47 {strides = array<i32>} : memref<10x10x128xbf16, #tpu.memory_space<vmem>>, vector<1x10x128xbf16>,
    %cst_39 = arith.constant 0.000000e+00 : bf16
    %50 = vector.broadcast %cst_39 : bf16 to vector<10x1x128xbf16>
    %c0_40 = arith.constant 0 : index
    %c0_41 = arith.constant 0 : index
    %c0_42 = arith.constant 0 : index
    %51 = vector.load %arg10[%c0_40, %c0_41, %c0_42] : memref<10x10x128xbf16, #tpu.memory_space<vmem>>, vector<10x1x128xbf16>
    tpu.vector_store %arg10[%c0_40, %c0_41, %c0_42], %50 {strides = array<i32>} : memref<10x10x128xbf16, #tpu.memory_space<vmem>>, vector<10x1x128xbf16>,
    %c0_43 = arith.constant 0 : index
    %c9_44 = arith.constant 9 : index
    %c0_45 = arith.constant 0 : index
    %52 = vector.load %arg10[%c0_43, %c9_44, %c0_45] : memref<10x10x128xbf16, #tpu.memory_space<vmem>>, vector<10x1x128xbf16>
    tpu.vector_store %arg10[%c0_43, %c9_44, %c0_45], %50 {strides = array<i32>} : memref<10x10x128xbf16, #tpu.memory_space<vmem>>, vector<10x1x128xbf16>,
    %c1_46 = arith.constant 1 : index
    %c1_47 = arith.constant 1 : index
    %c0_48 = arith.constant 0 : index
    %53 = vector.load %arg10[%c1_46, %c1_47, %c0_48] : memref<10x10x128xbf16, #tpu.memory_space<vmem>>, vector<8x8x128xbf16>
    tpu.vector_store %arg10[%c1_46, %c1_47, %c0_48], %46 {strides = array<i32>} : memref<10x10x128xbf16, #tpu.memory_space<vmem>>, vector<8x8x128xbf16>,
    %c0_49 = arith.constant 0 : index
    %c0_50 = arith.constant 0 : index
    %54 = vector.load %arg5[%c0_49, %c0_50] : memref<1x128xf32, #tpu.memory_space<vmem>>, vector<1x128xf32>
    %55 = vector.shape_cast %54 : vector<1x128xf32> to vector<1x128xf32>
    %56 = vector.broadcast %55 : vector<1x128xf32> to vector<64x128xf32>
    %c0_51 = arith.constant 0 : index
    %c0_52 = arith.constant 0 : index
    %c0_53 = arith.constant 0 : index
    %57 = vector.load %arg10[%c0_51, %c0_52, %c0_53] : memref<10x10x128xbf16, #tpu.memory_space<vmem>>, vector<8x10x128xbf16>
    %58 = vector.extract_strided_slice %57 {offsets = [0, 0, 0], sizes = [8, 8, 128], strides = [1, 1, 1]} : vector<8x10x128xbf16> to vector<8x8x128xbf16>
    %59 = vector.extract_strided_slice %57 {offsets = [0, 1, 0], sizes = [8, 8, 128], strides = [1, 1, 1]} : vector<8x10x128xbf16> to vector<8x8x128xbf16>
    %60 = vector.extract_strided_slice %57 {offsets = [0, 2, 0], sizes = [8, 8, 128], strides = [1, 1, 1]} : vector<8x10x128xbf16> to vector<8x8x128xbf16>
    %61 = tpu.concatenate %58, %59, %60 in 2 : vector<8x8x128xbf16>, vector<8x8x128xbf16>, vector<8x8x128xbf16> -> vector<8x8x384xbf16>
    %62 = vector.shape_cast %61 : vector<8x8x384xbf16> to vector<64x384xbf16>
    %c0_54 = arith.constant 0 : index
    %c0_55 = arith.constant 0 : index
    %c0_56 = arith.constant 0 : index
    %63 = vector.load %arg4[%c0_54, %c0_55, %c0_56] : memref<3x384x128xbf16, #tpu.memory_space<vmem>>, vector<1x384x128xbf16>
    %64 = vector.shape_cast %63 : vector<1x384x128xbf16> to vector<384x128xbf16>
    %cst_57 = arith.constant dense<0.000000e+00> : vector<64x128xf32>
    %65 = tpu.matmul %62, %64, %cst_57 {dimension_numbers = #tpu.dot_dimension_numbers<[1], [0], [0], [1], [0, 0, 1, 1], [], []>} : vector<64x384xbf16>, vector<384x128xbf16>, vector<64x128xf32> -> vector<64x128xf32>
    %66 = arith.addf %56, %65 : vector<64x128xf32>
    %c1_58 = arith.constant 1 : index
    %c0_59 = arith.constant 0 : index
    %c0_60 = arith.constant 0 : index
    %67 = vector.load %arg10[%c1_58, %c0_59, %c0_60] : memref<10x10x128xbf16, #tpu.memory_space<vmem>>, vector<8x10x128xbf16>
    %68 = vector.extract_strided_slice %67 {offsets = [0, 0, 0], sizes = [8, 8, 128], strides = [1, 1, 1]} : vector<8x10x128xbf16> to vector<8x8x128xbf16>
    %69 = vector.extract_strided_slice %67 {offsets = [0, 1, 0], sizes = [8, 8, 128], strides = [1, 1, 1]} : vector<8x10x128xbf16> to vector<8x8x128xbf16>
    %70 = vector.extract_strided_slice %67 {offsets = [0, 2, 0], sizes = [8, 8, 128], strides = [1, 1, 1]} : vector<8x10x128xbf16> to vector<8x8x128xbf16>
    %71 = tpu.concatenate %68, %69, %70 in 2 : vector<8x8x128xbf16>, vector<8x8x128xbf16>, vector<8x8x128xbf16> -> vector<8x8x384xbf16>
    %72 = vector.shape_cast %71 : vector<8x8x384xbf16> to vector<64x384xbf16>
    %c1_61 = arith.constant 1 : index
    %c0_62 = arith.constant 0 : index
    %c0_63 = arith.constant 0 : index
    %73 = vector.load %arg4[%c1_61, %c0_62, %c0_63] : memref<3x384x128xbf16, #tpu.memory_space<vmem>>, vector<1x384x128xbf16>
    %74 = vector.shape_cast %73 : vector<1x384x128xbf16> to vector<384x128xbf16>
    %cst_64 = arith.constant dense<0.000000e+00> : vector<64x128xf32>
    %75 = tpu.matmul %72, %74, %cst_64 {dimension_numbers = #tpu.dot_dimension_numbers<[1], [0], [0], [1], [0, 0, 1, 1], [], []>} : vector<64x384xbf16>, vector<384x128xbf16>, vector<64x128xf32> -> vector<64x128xf32>
    %76 = arith.addf %66, %75 : vector<64x128xf32>
    %c2_65 = arith.constant 2 : index
    %c0_66 = arith.constant 0 : index
    %c0_67 = arith.constant 0 : index
    %77 = vector.load %arg10[%c2_65, %c0_66, %c0_67] : memref<10x10x128xbf16, #tpu.memory_space<vmem>>, vector<8x10x128xbf16>
    %78 = vector.extract_strided_slice %77 {offsets = [0, 0, 0], sizes = [8, 8, 128], strides = [1, 1, 1]} : vector<8x10x128xbf16> to vector<8x8x128xbf16>
    %79 = vector.extract_strided_slice %77 {offsets = [0, 1, 0], sizes = [8, 8, 128], strides = [1, 1, 1]} : vector<8x10x128xbf16> to vector<8x8x128xbf16>
    %80 = vector.extract_strided_slice %77 {offsets = [0, 2, 0], sizes = [8, 8, 128], strides = [1, 1, 1]} : vector<8x10x128xbf16> to vector<8x8x128xbf16>
    %81 = tpu.concatenate %78, %79, %80 in 2 : vector<8x8x128xbf16>, vector<8x8x128xbf16>, vector<8x8x128xbf16> -> vector<8x8x384xbf16>
    %82 = vector.shape_cast %81 : vector<8x8x384xbf16> to vector<64x384xbf16>
    %c2_68 = arith.constant 2 : index
    %c0_69 = arith.constant 0 : index
    %c0_70 = arith.constant 0 : index
    %83 = vector.load %arg4[%c2_68, %c0_69, %c0_70] : memref<3x384x128xbf16, #tpu.memory_space<vmem>>, vector<1x384x128xbf16>
    %84 = vector.shape_cast %83 : vector<1x384x128xbf16> to vector<384x128xbf16>
    %cst_71 = arith.constant dense<0.000000e+00> : vector<64x128xf32>
    %85 = tpu.matmul %82, %84, %cst_71 {dimension_numbers = #tpu.dot_dimension_numbers<[1], [0], [0], [1], [0, 0, 1, 1], [], []>} : vector<64x384xbf16>, vector<384x128xbf16>, vector<64x128xf32> -> vector<64x128xf32>
    %86 = arith.addf %76, %85 : vector<64x128xf32>
    %cst_72 = arith.constant 0.000000e+00 : f32
    %87 = vector.broadcast %cst_72 : f32 to vector<64x128xf32>
    %88 = arith.maximumf %86, %87 : vector<64x128xf32>
    %c8_i32 = arith.constant 8 : i32
    %89 = tpu.dynamic_rotate %88 by %c8_i32 dim 1 : vector<64x128xf32>, i32 -> vector<64x128xf32>
    %90 = arith.truncf %89 : vector<64x128xf32> to vector<64x128xbf16>
    %91 = vector.shape_cast %90 : vector<64x128xbf16> to vector<8x8x128xbf16>
    %92 = vector.shape_cast %91 : vector<8x8x128xbf16> to vector<8x8x1x128xbf16>
    %93 = vector.shape_cast %92 : vector<8x8x1x128xbf16> to vector<8x8x1x128xbf16>
    %94 = vector.broadcast %93 : vector<8x8x1x128xbf16> to vector<8x8x2x128xbf16>
    %95 = vector.shape_cast %94 : vector<8x8x2x128xbf16> to vector<8x16x128xbf16>
    %96 = vector.shape_cast %95 : vector<8x16x128xbf16> to vector<8x1x16x128xbf16>
    %97 = vector.shape_cast %96 : vector<8x1x16x128xbf16> to vector<8x1x16x128xbf16>
    %98 = vector.broadcast %97 : vector<8x1x16x128xbf16> to vector<8x2x16x128xbf16>
    %99 = vector.shape_cast %98 : vector<8x2x16x128xbf16> to vector<16x16x128xbf16>
    %100 = arith.addf %99, %41 : vector<16x16x128xbf16>
    %c1_73 = arith.constant 1 : index
    %c1_74 = arith.constant 1 : index
    %c0_75 = arith.constant 0 : index
    %101 = vector.load %arg9[%c1_73, %c1_74, %c0_75] : memref<18x18x128xbf16, #tpu.memory_space<vmem>>, vector<16x16x128xbf16>
    tpu.vector_store %arg9[%c1_73, %c1_74, %c0_75], %100 {strides = array<i32>} : memref<18x18x128xbf16, #tpu.memory_space<vmem>>, vector<16x16x128xbf16>,
    %c0_76 = arith.constant 0 : index
    %c0_77 = arith.constant 0 : index
    %102 = vector.load %arg7[%c0_76, %c0_77] : memref<1x128xf32, #tpu.memory_space<vmem>>, vector<1x128xf32>
    %103 = vector.shape_cast %102 : vector<1x128xf32> to vector<1x128xf32>
    %104 = vector.broadcast %103 : vector<1x128xf32> to vector<256x128xf32>
    %c0_78 = arith.constant 0 : index
    %c0_79 = arith.constant 0 : index
    %c0_80 = arith.constant 0 : index
    %105 = vector.load %arg9[%c0_78, %c0_79, %c0_80] : memref<18x18x128xbf16, #tpu.memory_space<vmem>>, vector<16x18x128xbf16>
    %106 = vector.extract_strided_slice %105 {offsets = [0, 0, 0], sizes = [16, 16, 128], strides = [1, 1, 1]} : vector<16x18x128xbf16> to vector<16x16x128xbf16>
    %107 = vector.extract_strided_slice %105 {offsets = [0, 1, 0], sizes = [16, 16, 128], strides = [1, 1, 1]} : vector<16x18x128xbf16> to vector<16x16x128xbf16>
    %108 = vector.extract_strided_slice %105 {offsets = [0, 2, 0], sizes = [16, 16, 128], strides = [1, 1, 1]} : vector<16x18x128xbf16> to vector<16x16x128xbf16>
    %109 = tpu.concatenate %106, %107, %108 in 2 : vector<16x16x128xbf16>, vector<16x16x128xbf16>, vector<16x16x128xbf16> -> vector<16x16x384xbf16>
    %110 = vector.shape_cast %109 : vector<16x16x384xbf16> to vector<256x384xbf16>
    %c0_81 = arith.constant 0 : index
    %c0_82 = arith.constant 0 : index
    %c0_83 = arith.constant 0 : index
    %111 = vector.load %arg6[%c0_81, %c0_82, %c0_83] : memref<3x384x128xbf16, #tpu.memory_space<vmem>>, vector<1x384x128xbf16>
    %112 = vector.shape_cast %111 : vector<1x384x128xbf16> to vector<384x128xbf16>
    %cst_84 = arith.constant dense<0.000000e+00> : vector<256x128xf32>
    %113 = tpu.matmul %110, %112, %cst_84 {dimension_numbers = #tpu.dot_dimension_numbers<[1], [0], [0], [1], [0, 0, 1, 1], [], []>} : vector<256x384xbf16>, vector<384x128xbf16>, vector<256x128xf32> -> vector<256x128xf32>
    %114 = arith.addf %104, %113 : vector<256x128xf32>
    %c1_85 = arith.constant 1 : index
    %c0_86 = arith.constant 0 : index
    %c0_87 = arith.constant 0 : index
    %115 = vector.load %arg9[%c1_85, %c0_86, %c0_87] : memref<18x18x128xbf16, #tpu.memory_space<vmem>>, vector<16x18x128xbf16>
    %116 = vector.extract_strided_slice %115 {offsets = [0, 0, 0], sizes = [16, 16, 128], strides = [1, 1, 1]} : vector<16x18x128xbf16> to vector<16x16x128xbf16>
    %117 = vector.extract_strided_slice %115 {offsets = [0, 1, 0], sizes = [16, 16, 128], strides = [1, 1, 1]} : vector<16x18x128xbf16> to vector<16x16x128xbf16>
    %118 = vector.extract_strided_slice %115 {offsets = [0, 2, 0], sizes = [16, 16, 128], strides = [1, 1, 1]} : vector<16x18x128xbf16> to vector<16x16x128xbf16>
    %119 = tpu.concatenate %116, %117, %118 in 2 : vector<16x16x128xbf16>, vector<16x16x128xbf16>, vector<16x16x128xbf16> -> vector<16x16x384xbf16>
    %120 = vector.shape_cast %119 : vector<16x16x384xbf16> to vector<256x384xbf16>
    %c1_88 = arith.constant 1 : index
    %c0_89 = arith.constant 0 : index
    %c0_90 = arith.constant 0 : index
    %121 = vector.load %arg6[%c1_88, %c0_89, %c0_90] : memref<3x384x128xbf16, #tpu.memory_space<vmem>>, vector<1x384x128xbf16>
    %122 = vector.shape_cast %121 : vector<1x384x128xbf16> to vector<384x128xbf16>
    %cst_91 = arith.constant dense<0.000000e+00> : vector<256x128xf32>
    %123 = tpu.matmul %120, %122, %cst_91 {dimension_numbers = #tpu.dot_dimension_numbers<[1], [0], [0], [1], [0, 0, 1, 1], [], []>} : vector<256x384xbf16>, vector<384x128xbf16>, vector<256x128xf32> -> vector<256x128xf32>
    %124 = arith.addf %114, %123 : vector<256x128xf32>
    %c2_92 = arith.constant 2 : index
    %c0_93 = arith.constant 0 : index
    %c0_94 = arith.constant 0 : index
    %125 = vector.load %arg9[%c2_92, %c0_93, %c0_94] : memref<18x18x128xbf16, #tpu.memory_space<vmem>>, vector<16x18x128xbf16>
    %126 = vector.extract_strided_slice %125 {offsets = [0, 0, 0], sizes = [16, 16, 128], strides = [1, 1, 1]} : vector<16x18x128xbf16> to vector<16x16x128xbf16>
    %127 = vector.extract_strided_slice %125 {offsets = [0, 1, 0], sizes = [16, 16, 128], strides = [1, 1, 1]} : vector<16x18x128xbf16> to vector<16x16x128xbf16>
    %128 = vector.extract_strided_slice %125 {offsets = [0, 2, 0], sizes = [16, 16, 128], strides = [1, 1, 1]} : vector<16x18x128xbf16> to vector<16x16x128xbf16>
    %129 = tpu.concatenate %126, %127, %128 in 2 : vector<16x16x128xbf16>, vector<16x16x128xbf16>, vector<16x16x128xbf16> -> vector<16x16x384xbf16>
    %130 = vector.shape_cast %129 : vector<16x16x384xbf16> to vector<256x384xbf16>
    %c2_95 = arith.constant 2 : index
    %c0_96 = arith.constant 0 : index
    %c0_97 = arith.constant 0 : index
    %131 = vector.load %arg6[%c2_95, %c0_96, %c0_97] : memref<3x384x128xbf16, #tpu.memory_space<vmem>>, vector<1x384x128xbf16>
    %132 = vector.shape_cast %131 : vector<1x384x128xbf16> to vector<384x128xbf16>
    %cst_98 = arith.constant dense<0.000000e+00> : vector<256x128xf32>
    %133 = tpu.matmul %130, %132, %cst_98 {dimension_numbers = #tpu.dot_dimension_numbers<[1], [0], [0], [1], [0, 0, 1, 1], [], []>} : vector<256x384xbf16>, vector<384x128xbf16>, vector<256x128xf32> -> vector<256x128xf32>
    %134 = arith.addf %124, %133 : vector<256x128xf32>
    %135 = vector.shape_cast %134 : vector<256x128xf32> to vector<1x16x16x128xf32>
    %136 = arith.truncf %135 : vector<1x16x16x128xf32> to vector<1x16x16x128xbf16>
    %c0_99 = arith.constant 0 : index
    %c0_100 = arith.constant 0 : index
    %c0_101 = arith.constant 0 : index
    %c0_102 = arith.constant 0 : index
    %137 = vector.load %arg8[%c0_99, %c0_100, %c0_101, %c0_102] : memref<1x16x16x128xbf16, #tpu.memory_space<vmem>>, vector<1x16x16x128xbf16>
    tpu.vector_store %arg8[%c0_99, %c0_100, %c0_101, %c0_102], %136 {strides = array<i32>} : memref<1x16x16x128xbf16, #tpu.memory_space<vmem>>, vector<1x16x16x128xbf16>,
    return
  }
  func.func @transform_0(%arg0: i32) -> (i32, i32, i32, i32) {
    %c0_i32 = arith.constant 0 : i32
    %c0_i32_0 = arith.constant 0 : i32
    %c0_i32_1 = arith.constant 0 : i32
    %c0_i32_2 = arith.constant 0 : i32
    return %arg0, %c0_i32, %c0_i32_0, %c0_i32_1 : i32, i32, i32, i32
  }
  func.func @transform_1(%arg0: i32) -> (i32, i32, i32) {
    %c0_i32 = arith.constant 0 : i32
    %c0_i32_0 = arith.constant 0 : i32
    %c0_i32_1 = arith.constant 0 : i32
    %c0_i32_2 = arith.constant 0 : i32
    return %c0_i32, %c0_i32_0, %c0_i32_1 : i32, i32, i32
  }
  func.func @transform_2(%arg0: i32) -> (i32, i32) {
    %c0_i32 = arith.constant 0 : i32
    %c0_i32_0 = arith.constant 0 : i32
    %c0_i32_1 = arith.constant 0 : i32
    return %c0_i32, %c0_i32_0 : i32, i32
  }
  func.func @transform_3(%arg0: i32) -> (i32, i32, i32) {
    %c0_i32 = arith.constant 0 : i32
    %c0_i32_0 = arith.constant 0 : i32
    %c0_i32_1 = arith.constant 0 : i32
    %c0_i32_2 = arith.constant 0 : i32
    return %c0_i32, %c0_i32_0, %c0_i32_1 : i32, i32, i32
  }
  func.func @transform_4(%arg0: i32) -> (i32, i32) {
    %c0_i32 = arith.constant 0 : i32
    %c0_i32_0 = arith.constant 0 : i32
    %c0_i32_1 = arith.constant 0 : i32
    return %c0_i32, %c0_i32_0 : i32, i32
  }
  func.func @transform_5(%arg0: i32) -> (i32, i32, i32) {
    %c0_i32 = arith.constant 0 : i32
    %c0_i32_0 = arith.constant 0 : i32
    %c0_i32_1 = arith.constant 0 : i32
    %c0_i32_2 = arith.constant 0 : i32
    return %c0_i32, %c0_i32_0, %c0_i32_1 : i32, i32, i32
  }
  func.func @transform_6(%arg0: i32) -> (i32, i32) {
    %c0_i32 = arith.constant 0 : i32
    %c0_i32_0 = arith.constant 0 : i32
    %c0_i32_1 = arith.constant 0 : i32
    return %c0_i32, %c0_i32_0 : i32, i32
  }
  func.func @transform_7(%arg0: i32) -> (i32, i32, i32, i32) {
    %c0_i32 = arith.constant 0 : i32
    %c0_i32_0 = arith.constant 0 : i32
    %c0_i32_1 = arith.constant 0 : i32
    %c0_i32_2 = arith.constant 0 : i32
    return %arg0, %c0_i32, %c0_i32_0, %c0_i32_1 : i32, i32, i32, i32
  }
}

</mosaic_0001>

<bundles_post_ra>
// kernel: unet_forward.1
= control target key start
LH: loop header
LB: loop body
LE: loop exit
PB: predicated region body
PF: predicated region fallthrough
CT: control target
= control target key end

     0   :  { %s17763_s24 = smov 0   ;;  %s22360_s0 = inlined_call_operand.vmem [shape: bf16[2,16,16,4], index: 0, kind: input, shape index: {}]   ;;  %s22361_s1 = inlined_call_operand.vmem [shape: bf16[3,384,128], index: 1, kind: input, shape index: {}]   ;;  %s22362_s2 = inlined_call_operand.vmem [shape: f32[1,128], index: 2, kind: input, shape index: {}]   ;;  %s22363_s3 = inlined_call_operand.vmem [shape: bf16[3,384,128], index: 3, kind: input, shape index: {}]   ;;  %s22364_s4 = inlined_call_operand.vmem [shape: f32[1,128], index: 4, kind: input, shape index: {}]   ;;  %s22365_s5 = inlined_call_operand.vmem [shape: bf16[3,384,128], index: 5, kind: input, shape index: {}]   ;;  %s22366_s6 = inlined_call_operand.vmem [shape: f32[1,128], index: 6, kind: input, shape index: {}]   ;;  %s22367_s7 = inlined_call_operand.vmem [shape: bf16[2,16,16,128], index: 7, kind: output, shape index: {}]  }
   0x1 LB: > { %s14266_s25 = sadd.s32 4294967295, %s17716_s24   ;;  %p14270_p0 = scmp.ge.s32.totalorder %s17716_s24, 1  ;;  %s17716_s24 = sphi %s17763_s24, %s17_s24  }
   0x2   : > { %p237_p1 = scmp.lt.s32.totalorder %s17716_s24, 3 }
   0x4   : > { %p238_p2 = pnand %p14270_p0, %p237_p1 }
   0x6   : > { %241 = sbr.rel (%p238_p2) target bundleno = 2192 (0x890), region = 48 }
   0xd   : > { %v17774_v0 = vld [vmem:[%s22361_s1 + $0x40] sm:$0xff]   ;;  %v17785_v2 = vld [vmem:[%s22361_s1 + $0x48] sm:$0xff]   ;;  %p17789_p3 = scmp.lt.s32.totalorder %s14266_s25, 1  ;;  %v17718_v3 = vmov 0   ;;  %v17210_v5 = vld [vmem:[%s22361_s1 + $0x50] sm:$0xff]   ;;  %vm698_vm0 = vcmask 24576  }
   0xe   : > { %v17779_v1 = vld [vmem:[%s22361_s1] sm:$0xff]   ;;  %16725 = vmatprep.subr.bf16.mxu1 %v17774_v0  ;;  %304 = vst [vmem:[#allocation2 + $0x60] sm:$0xf] %v17718_v3  ;;  %305 = vst [vmem:[#allocation2 + $0x64] sm:$0xf] %v17718_v3  ;;  %15393 = vmatprep.subr.bf16.mxu0 %v17774_v0  ;;  %v17209_v4 = vld [vmem:[%s22361_s1 + $0x8] sm:$0xff]  }
   0xf   : > { %306 = vst [vmem:[#allocation2 + $0x68] sm:$0x1] %v17718_v3  ;;  %280 = vst [vmem:[#allocation2] sm:$0xf] %v17718_v3  ;;  %16733 = vmatpush3.bf16.msra.mxu1 %v17779_v1  ;;  %15394 = vmatpush3.bf16.msra.mxu0 %v17779_v1  ;;  %s22718_s25 = smov (!%p17789_p3, %s14266_s25), 1  ;;  %v17211_v6 = vld [vmem:[%s22361_s1 + $0x10] sm:$0xff]  }
  0x10   : > { %281 = vst [vmem:[#allocation2 + $0x4] sm:$0xf] %v17718_v3  ;;  %282 = vst [vmem:[#allocation2 + $0x8] sm:$0x1] %v17718_v3  ;;  %16726 = vmatprep.subr.bf16.mxu1 %v17785_v2  ;;  %15395 = vmatprep.subr.bf16.mxu0 %v17785_v2  ;;  %v17212_v7 = vld [vmem:[%s22361_s1 + $0x58] sm:$0xff]   ;;  %s15192_s18 = sshll.u32 %s22718_s25, 7 }
  0x11   : > { %283 = vst [vmem:[#allocation2 + $0xc] sm:$0xf] %v17718_v3  ;;  %284 = vst [vmem:[#allocation2 + $0x10] sm:$0xf] %v17718_v3  ;;  %v17213_v8 = vld [vmem:[%s22361_s1 + $0x18] sm:$0xff]   ;;  %v17214_v9 = vld [vmem:[%s22361_s1 + $0x60] sm:$0xff]   ;;  %s17828_s27 = scalar_lea.vmem %s22360_s0, %s15192_s18  ;;  %s22310_s13 = scalar_lea.vmem %s22367_s7, %s15192_s18 }
  0x12   : > { %285 = vst [vmem:[#allocation2 + $0x14] sm:$0x1] %v17718_v3  ;;  %286 = vst [vmem:[#allocation2 + $0x18] sm:$0xf] %v17718_v3  ;;  %v17215_v10 = vld [vmem:[%s22361_s1 + $0x20] sm:$0xff]   ;;  %v17216_v11 = vld [vmem:[%s22361_s1 + $0x68] sm:$0xff]  }
  0x13   : > { %287 = vst [vmem:[#allocation2 + $0x1c] sm:$0xf] %v17718_v3  ;;  %288 = vst [vmem:[#allocation2 + $0x20] sm:$0x1] %v17718_v3  ;;  %16734 = vmatpush3.bf16.msra.mxu1 %v17209_v4  ;;  %15396 = vmatpush3.bf16.msra.mxu0 %v17209_v4  ;;  %vm690_vm1 = vcmask 27648   ;;  %v17217_v18 = vld [vmem:[%s22361_s1 + $0x28] sm:$0xff]  }
  0x14   : > { %289 = vst [vmem:[#allocation2 + $0x24] sm:$0xf] %v17718_v3  ;;  %290 = vst [vmem:[#allocation2 + $0x28] sm:$0xf] %v17718_v3  ;;  %16727 = vmatprep.subr.bf16.mxu1 %v17210_v5  ;;  %15397 = vmatprep.subr.bf16.mxu0 %v17210_v5  ;;  %v348_v12 = vld [vmem:[%s17828_s27 + $0x38] sm:$0xf] }
  0x15   : > { %291 = vst [vmem:[#allocation2 + $0x2c] sm:$0x1] %v17718_v3  ;;  %292 = vst [vmem:[#allocation2 + $0x30] sm:$0xf] %v17718_v3  ;;  %v349_v13 = vld [vmem:[%s17828_s27 + $0x3c] sm:$0xf] }
  0x16   : > { %293 = vst [vmem:[#allocation2 + $0x34] sm:$0xf] %v17718_v3  ;;  %294 = vst [vmem:[#allocation2 + $0x38] sm:$0x1] %v17718_v3  ;;  %vm366_vm2 = vsmask.f32 256 }
  0x17   : > { %295 = vst [vmem:[#allocation2 + $0x3c] sm:$0xf] %v17718_v3  ;;  %296 = vst [vmem:[#allocation2 + $0x40] sm:$0xf] %v17718_v3  ;;  %16735 = vmatpush3.bf16.msra.mxu1 %v17211_v6  ;;  %15398 = vmatpush3.bf16.msra.mxu0 %v17211_v6  ;;  %vm367_vm3 = vsmask.f32 4368 }
  0x18   : > { %297 = vst [vmem:[#allocation2 + $0x44] sm:$0x1] %v17718_v3  ;;  %298 = vst [vmem:[#allocation2 + $0x48] sm:$0xf] %v17718_v3  ;;  %16728 = vmatprep.subr.bf16.mxu1 %v17212_v7  ;;  %15399 = vmatprep.subr.bf16.mxu0 %v17212_v7  ;;  %v489_v14 = vshrl.u32 %v348_v12, 16  ;;  %v492_v15 = vshll.u32 %v348_v12, 16 }
  0x19   : > { %299 = vst [vmem:[#allocation2 + $0x4c] sm:$0xf] %v17718_v3  ;;  %300 = vst [vmem:[#allocation2 + $0x50] sm:$0x1] %v17718_v3  ;;  %v497_v16 = vshrl.u32 %v349_v13, 16  ;;  %v22472_v19 = vmov 0 }
  0x1a   : > { %301 = vst [vmem:[#allocation2 + $0x54] sm:$0xf] %v17718_v3  ;;  %302 = vst [vmem:[#allocation2 + $0x58] sm:$0xf] %v17718_v3  ;;  %v500_v20 = vshll.u32 %v349_v13, 16  ;;  %v17218_v21 = vld [vmem:[%s22361_s1 + $0x70] sm:$0xff]  }
  0x1b   : > { %303 = vst [vmem:[#allocation2 + $0x5c] sm:$0x1] %v17718_v3  ;;  %307 = vst [vmem:[#allocation2 + $0x6c] sm:$0xf] %v17718_v3  ;;  %16736 = vmatpush3.bf16.msra.mxu1 %v17213_v8  ;;  %15400 = vmatpush3.bf16.msra.mxu0 %v17213_v8  ;;  %vm691_vm6 = vsmask.f32 7938 }
  0x1c   : > { %308 = vst [vmem:[#allocation2 + $0x70] sm:$0xf] %v17718_v3  ;;  %309 = vst [vmem:[#allocation2 + $0x74] sm:$0x1] %v17718_v3  ;;  %16729 = vmatprep.subr.bf16.mxu1 %v17214_v9  ;;  %15401 = vmatprep.subr.bf16.mxu0 %v17214_v9  ;;  %v491_v22 = vrot.slane %v489_v14, 7  ;;  %v499_v23 = vrot.slane %v497_v16, 7 }
  0x1d   : > { %310 = vst [vmem:[#allocation2 + $0x78] sm:$0xf] %v17718_v3  ;;  %311 = vst [vmem:[#allocation2 + $0x7c] sm:$0xf] %v17718_v3  ;;  %v745_v25 = vld [vmem:[#allocation2 + $0x60] sm:$0xf] }
  0x1e   : > { %312 = vst [vmem:[#allocation2 + $0x80] sm:$0x1] %v17718_v3  ;;  %313 = vst [vmem:[#allocation2 + $0x84] sm:$0xf] %v17718_v3  ;;  %v749_v26 = vld [vmem:[#allocation2 + $0x68] sm:$0x1]  ;;  %v494_v27 = vor.u32 %v492_v15, %v491_v22  ;;  %v502_v29 = vor.u32 %v500_v20, %v499_v23 }
  0x1f   : > { %314 = vst [vmem:[#allocation2 + $0x88] sm:$0xf] %v17718_v3  ;;  %315 = vst [vmem:[#allocation2 + $0x8c] sm:$0x1] %v17718_v3  ;;  %16737 = vmatpush3.bf16.msra.mxu1 %v17215_v10  ;;  %15402 = vmatpush3.bf16.msra.mxu0 %v17215_v10  ;;  %v495_v28 = vrot.slane %v491_v22, 4  ;;  %v504_v30 = vrot.slane %v499_v23, 4 }
  0x20   : > { %316 = vst [vmem:[#allocation2 + $0x90] sm:$0xf] %v17718_v3  ;;  %317 = vst [vmem:[#allocation2 + $0x94] sm:$0xf] %v17718_v3  ;;  %16730 = vmatprep.subr.bf16.mxu1 %v17216_v11  ;;  %15403 = vmatprep.subr.bf16.mxu0 %v17216_v11  ;;  %v350_v31 = vld [vmem:[%s17828_s27 + $0x40] sm:$0xf] }
  0x21   : > { %318 = vst [vmem:[#allocation2 + $0x98] sm:$0x1] %v17718_v3  ;;  %319 = vst [vmem:[#allocation2 + $0x9c] sm:$0xf] %v17718_v3  ;;  %v351_v32 = vld [vmem:[%s17828_s27 + $0x44] sm:$0xf] }
  0x22   : > { %320 = vst [vmem:[#allocation2 + $0xa0] sm:$0xf] %v17718_v3  ;;  %321 = vst [vmem:[#allocation2 + $0xa4] sm:$0x1] %v17718_v3  ;;  %v17219_v33 = vld [vmem:[%s22361_s1 + $0x30] sm:$0xff]   ;;  %v17220_v34 = vld [vmem:[%s22361_s1 + $0x78] sm:$0xff]  }
  0x23   : > { %322 = vst [vmem:[#allocation2 + $0xa8] sm:$0xf] %v17718_v3  ;;  %323 = vst [vmem:[#allocation2 + $0xac] sm:$0xf] %v17718_v3  ;;  %v506_v35 = vshrl.u32 %v350_v31, 16  ;;  %v509_v36 = vshll.u32 %v350_v31, 16  ;;  %16738 = vmatpush3.bf16.msra.mxu1 %v17217_v18  ;;  %15404 = vmatpush3.bf16.msra.mxu0 %v17217_v18 }
  0x24   : > { %324 = vst [vmem:[#allocation2 + $0xb0] sm:$0x1] %v17718_v3  ;;  %325 = vst [vmem:[#allocation2 + $0xb4] sm:$0xf] %v17718_v3  ;;  %v514_v37 = vshrl.u32 %v351_v32, 16  ;;  %v517_v38 = vshll.u32 %v351_v32, 16  ;;  %16731 = vmatprep.subr.bf16.mxu1 %v17218_v21  ;;  %15405 = vmatprep.subr.bf16.mxu0 %v17218_v21 }
  0x25   : > { %326 = vst [vmem:[#allocation2 + $0xb8] sm:$0xf] %v17718_v3  ;;  %327 = vst [vmem:[#allocation2 + $0xbc] sm:$0x1] %v17718_v3  ;;  %v752_v42 = vld [vmem:[#allocation2 + $0x6c] sm:$0xf] }
  0x26   : > { %328 = vst [vmem:[#allocation2 + $0xc0] sm:$0xf] %v17718_v3  ;;  %329 = vst [vmem:[#allocation2 + $0xc4] sm:$0xf] %v17718_v3  ;;  %v508_v43 = vrot.slane %v506_v35, 7  ;;  %v516_v44 = vrot.slane %v514_v37, 7 }
  0x27   : > { %330 = vst [vmem:[#allocation2 + $0xc8] sm:$0x1] %v17718_v3  ;;  %331 = vst [vmem:[#allocation2 + $0xcc] sm:$0xf] %v17718_v3  ;;  %v352_v45 = vld [vmem:[%s17828_s27 + $0x48] sm:$0xf]  ;;  %16739 = vmatpush3.bf16.msra.mxu1 %v17219_v33  ;;  %15406 = vmatpush3.bf16.msra.mxu0 %v17219_v33 }
  0x28   : > { %332 = vst [vmem:[#allocation2 + $0xd0] sm:$0xf] %v17718_v3  ;;  %333 = vst [vmem:[#allocation2 + $0xd4] sm:$0x1] %v17718_v3  ;;  %v353_v46 = vld [vmem:[%s17828_s27 + $0x4c] sm:$0xf]  ;;  %v511_v54 = vor.u32 %v509_v36, %v508_v43  ;;  %v519_v56 = vor.u32 %v517_v38, %v516_v44  ;;  %16732 = vmatprep.subr.bf16.mxu1 %v17220_v34  ;;  %15407 = vmatprep.subr.bf16.mxu0 %v17220_v34 }
  0x29   : > { %5627 = vst [vmem:[#allocation3] sm:$0xf] %v17718_v3  ;;  %5628 = vst [vmem:[#allocation3 + $0x4] sm:$0x1] %v17718_v3  ;;  %v756_v47 = vld [vmem:[#allocation2 + $0x74] sm:$0x1] }
  0x2a   : > { %5630 = vst [vmem:[#allocation3 + $0x48] sm:$0xf] %v17718_v3  ;;  %5631 = vst [vmem:[#allocation3 + $0x4c] sm:$0x1] %v17718_v3  ;;  %v523_v48 = vshrl.u32 %v352_v45, 16  ;;  %v526_v49 = vshll.u32 %v352_v45, 16 }
  0x2b   : > { %vm17839_vm4 = vmand %vm698_vm0, %vm366_vm2  ;;  %v531_v50 = vshrl.u32 %v353_v46, 16  ;;  %v534_v51 = vshll.u32 %v353_v46, 16  ;;  %v17221_v52 = vld [vmem:[%s22361_s1 + $0x38] sm:$0xff]   ;;  %v17883_v53 = vld [vmem:[%s22361_s1 + $0x80] sm:$0xff]   ;;  %v512_v55 = vrot.slane %v508_v43, 4  ;;  %v521_v57 = vrot.slane %v516_v44, 4 }
  0x2c   : > { %vm17847_vm5 = vmor %vm366_vm2, %vm367_vm3  ;;  %v750_v41 = vsel %vm17839_vm4, %v504_v30, %v749_v26  ;;  %v525_v58 = vrot.slane %v523_v48, 7  ;;  %v759_v60 = vld [vmem:[#allocation2 + $0x78] sm:$0xf]  ;;  %v763_v0 = vld [vmem:[#allocation2 + $0x80] sm:$0x1]  ;;  %16740 = vmatpush3.bf16.msra.mxu1 %v17221_v52  ;;  %15408 = vmatpush3.bf16.msra.mxu0 %v17221_v52  ;;  %vm1216_vm9 = vcmask 1046528  }
  0x2d   : > { %v22473_v19 = vsel %vm17847_vm5, 4294967295, %v22472_v19  ;;  %vm17856_vm7 = vmand %vm690_vm1, %vm691_vm6  ;;  %v503_v39 = vsel %vm17847_vm5, %v495_v28, %v502_v29  ;;  %751 = vst [vmem:[#allocation2 + $0x68] sm:$0x1] %v750_v41  ;;  %v533_v59 = vrot.slane %v531_v50, 7  ;;  %v520_v61 = vsel %vm17847_vm5, %v512_v55, %v519_v56  ;;  %v354_v1 = vld [vmem:[%s17828_s27 + $0x50] sm:$0xf]  ;;  %16365 = vmatprep.subr.bf16.mxu1 %v17883_v53 }
  0x2e   : > { %22474 = vst [vmem:[#allocation4_spill] sm:$0xff] %v22473_v19  ;;  %v746_v40 = vsel %vm17856_vm7, %v494_v27, %v745_v25  ;;  %748 = vst.msk [vmem:[#allocation2 + $0x64] sm:$0xf] %vm690_vm1, %v503_v39  ;;  %v753_v62 = vsel %vm17856_vm7, %v511_v54, %v752_v42  ;;  %v757_v63 = vsel %vm17839_vm4, %v521_v57, %v756_v47  ;;  %v355_v2 = vld [vmem:[%s17828_s27 + $0x54] sm:$0xf]  ;;  %v529_v4 = vrot.slane %v525_v58, 4 }
  0x2f   : > { %747 = vst [vmem:[#allocation2 + $0x60] sm:$0xf] %v746_v40  ;;  %vm1007_vm8 = vsmask.f32 7424  ;;  %754 = vst [vmem:[#allocation2 + $0x6c] sm:$0xf] %v753_v62  ;;  %v528_v3 = vor.u32 %v526_v49, %v525_v58  ;;  %v536_v5 = vor.u32 %v534_v51, %v533_v59 }
  0x30   : > { %755 = vst.msk [vmem:[#allocation2 + $0x70] sm:$0xf] %vm690_vm1, %v520_v61  ;;  %758 = vst [vmem:[#allocation2 + $0x74] sm:$0x1] %v757_v63  ;;  %v538_v6 = vrot.slane %v533_v59, 4  ;;  %v540_v7 = vshrl.u32 %v354_v1, 16 }
  0x31   : > { %v543_v8 = vshll.u32 %v354_v1, 16  ;;  %v548_v9 = vshrl.u32 %v355_v2, 16  ;;  %v551_v10 = vshll.u32 %v355_v2, 16  ;;  %v537_v11 = vsel %vm17847_vm5, %v529_v4, %v536_v5  ;;  %v766_v20 = vld [vmem:[#allocation2 + $0x84] sm:$0xf]  ;;  %v17227_v42 = vld [vmem:[%s22361_s1 + $0x88] sm:$0xff]  }
  0x32   : > { %v760_v12 = vsel %vm17856_vm7, %v528_v3, %v759_v60  ;;  %v764_v13 = vsel %vm17839_vm4, %v538_v6, %v763_v0  ;;  %762 = vst.msk [vmem:[#allocation2 + $0x7c] sm:$0xf] %vm690_vm1, %v537_v11  ;;  %v542_v16 = vrot.slane %v540_v7, 7  ;;  %v770_v21 = vld [vmem:[#allocation2 + $0x8c] sm:$0x1]  ;;  %v17230_v7 = vld [vmem:[%s22361_s1 + $0x90] sm:$0xff]  }
  0x33   : > { %761 = vst [vmem:[#allocation2 + $0x78] sm:$0xf] %v760_v12  ;;  %765 = vst [vmem:[#allocation2 + $0x80] sm:$0x1] %v764_v13  ;;  %v550_v18 = vrot.slane %v548_v9, 7  ;;  %vm5632_vm10 = vcmask 1040384  }
  0x34   : > { %v17223_v15 = vld [vmem:[#allocation2 + $0x68] ss:$0 sps:$4 sm:$0x11]   ;;  %v356_v22 = vld [vmem:[%s17828_s27 + $0x58] sm:$0xf]  ;;  %v545_v27 = vor.u32 %v543_v8, %v542_v16  ;;  %v546_v29 = vrot.slane %v542_v16, 4  ;;  %vm18869_vm11 = vmand %vm5632_vm10, %vm691_vm6 }
  0x35   : > { %v1112_v26 = vshll.u32 %v17223_v15, 16  ;;  %v357_v28 = vld [vmem:[%s17828_s27 + $0x5c] sm:$0xf]  ;;  %v553_v30 = vor.u32 %v551_v10, %v550_v18  ;;  %v555_v31 = vrot.slane %v550_v18, 4  ;;  %v557_v32 = vshrl.u32 %v356_v22, 16  ;;  %vm18882_vm12 = vmand %vm5632_vm10, %vm366_vm2  ;;  %s17720_s26 = smov 8  }
  0x36   : > { %v17222_v14 = vld [vmem:[#allocation2 + $0x60] sm:$0xff]   ;;  %v767_v35 = vsel %vm17856_vm7, %v545_v27, %v766_v20  ;;  %v773_v40 = vld [vmem:[#allocation2 + $0x90] sm:$0xf]  ;;  %v560_v44 = vshll.u32 %v356_v22, 16  ;;  %v565_v45 = vshrl.u32 %v357_v28, 16  ;;  %v568_v61 = vshll.u32 %v357_v28, 16 }
  0x37   : > { %v1105_v23 = vshrl.u32 %v17222_v14, 16  ;;  %v1107_v25 = vshll.u32 %v17222_v14, 16  ;;  %v1114_v34 = vrot.slane %v1112_v26, 1  ;;  %v17906_v36 = vld [vmem:[#allocation2 + $0x6c] sm:$0xff]   ;;  %v554_v38 = vsel %vm17847_vm5, %v546_v29, %v553_v30  ;;  %768 = vst [vmem:[#allocation2 + $0x84] sm:$0xf] %v767_v35 }
  0x38   : > { %v17226_v37 = vld [vmem:[#allocation2 + $0x74] ss:$0 sps:$4 sm:$0x11]   ;;  %v771_v39 = vsel %vm17839_vm4, %v555_v31, %v770_v21  ;;  %769 = vst.msk [vmem:[#allocation2 + $0x88] sm:$0xf] %vm690_vm1, %v554_v38  ;;  %v559_v43 = vrot.slane %v557_v32, 7 }
  0x39   : > { %v1109_v33 = vrot.slane %v1107_v25, 1  ;;  %772 = vst [vmem:[#allocation2 + $0x8c] sm:$0x1] %v771_v39  ;;  %v1117_v46 = vshrl.u32 %v17906_v36, 16  ;;  %v1119_v47 = vshll.u32 %v17906_v36, 16  ;;  %v1124_v48 = vshll.u32 %v17226_v37, 16 }
  0x3a   : > { %v17918_v49 = vld [vmem:[#allocation2 + $0x78] sm:$0xff]   ;;  %v562_v52 = vor.u32 %v560_v44, %v559_v43  ;;  %v563_v54 = vrot.slane %v559_v43, 4  ;;  %v567_v55 = vrot.slane %v565_v45, 7  ;;  %v17229_v58 = vld [vmem:[#allocation2 + $0x80] ss:$0 sps:$4 sm:$0x11]  }
  0x3b   : > { %v1110_v41 = vor.u32 %v1109_v33, %v1105_v23  ;;  %v777_v50 = vld [vmem:[#allocation2 + $0x98] sm:$0x1]  ;;  %v1121_v56 = vrot.slane %v1119_v47, 1  ;;  %v1126_v57 = vrot.slane %v1124_v48, 1  ;;  %v1129_v59 = vshrl.u32 %v17918_v49, 16 }
  0x3c   : > { %v1131_v60 = vshll.u32 %v17918_v49, 16  ;;  %v572_v62 = vrot.slane %v567_v55, 4  ;;  %v774_v63 = vsel %vm17856_vm7, %v562_v52, %v773_v40  ;;  %v358_v0 = vld [vmem:[%s17828_s27 + $0x60] sm:$0xf]  ;;  %v1136_v2 = vshll.u32 %v17229_v58, 16  ;;  %v17233_v23 = vld [vmem:[%s22361_s1 + $0x98] sm:$0xff]  }
  0x3d   : > { %v1115_v51 = vsel %vm1007_vm8, %v1110_v41, %v1114_v34  ;;  %v1122_v1 = vor.u32 %v1121_v56, %v1117_v46  ;;  %775 = vst [vmem:[#allocation2 + $0x90] sm:$0xf] %v774_v63  ;;  %v359_v3 = vld [vmem:[%s17828_s27 + $0x64] sm:$0xf]  ;;  %v574_v4 = vshrl.u32 %v358_v0, 16  ;;  %v577_v5 = vshll.u32 %v358_v0, 16 }
  0x3e   : > { %1569 = vmatprep.mubr.bf16.mxu1 %v1115_v51  ;;  %v1133_v6 = vrot.slane %v1131_v60, 1  ;;  %v570_v8 = vor.u32 %v568_v61, %v567_v55  ;;  %v778_v9 = vsel %vm17839_vm4, %v572_v62, %v777_v50  ;;  %v582_v10 = vshrl.u32 %v359_v3, 16  ;;  %v780_v13 = vld [vmem:[#allocation2 + $0x9c] sm:$0xf]  ;;  %v784_v26 = vld [vmem:[#allocation2 + $0xa4] sm:$0x1] }
  0x3f   : > { %1570 = vmatmul.mubr.bf16.vlgmr.msra.gmra.mrb[0].mxu1 %v17222_v14  ;;  %v1127_v11 = vsel %vm1007_vm8, %v1122_v1, %v1126_v57  ;;  %v17934_v12 = vld [vmem:[#allocation2 + $0x84] sm:$0xff]   ;;  %779 = vst [vmem:[#allocation2 + $0x98] sm:$0x1] %v778_v9  ;;  %v576_v18 = vrot.slane %v574_v4, 7  ;;  %v585_v25 = vshll.u32 %v359_v3, 16  ;;  %vm4602_vm13 = vcmask 1041408  }
  0x40   : > { %16366 = vmatpush3.bf16.msra.mxu1 %v17883_v53  ;;  %v1138_v53 = vrot.slane %v1136_v2, 1  ;;  %1577 = vmatprep.mubr.bf16.mxu1 %v1127_v11  ;;  %v1134_v14 = vor.u32 %v1133_v6, %v1129_v59  ;;  %v17232_v15 = vld [vmem:[#allocation2 + $0x8c] ss:$0 sps:$4 sm:$0x11]   ;;  %v571_v16 = vsel %vm17847_vm5, %v563_v54, %v570_v8  ;;  %v584_v20 = vrot.slane %v582_v10, 7  ;;  %v17957_v46 = vld [vmem:[#allocation2] sm:$0xff]  }
  0x41   : > { %16367 = vmatprep.subr.bf16.mxu1 %v17227_v42  ;;  %v1141_v21 = vshrl.u32 %v17934_v12, 16  ;;  %v1143_v22 = vshll.u32 %v17934_v12, 16  ;;  %776 = vst.msk [vmem:[#allocation2 + $0x94] sm:$0xf] %vm690_vm1, %v571_v16  ;;  %v1148_v28 = vshll.u32 %v17232_v15, 16  ;;  %v579_v29 = vor.u32 %v577_v5, %v576_v18  ;;  %v17239_v2 = vld [vmem:[%s22361_s1 + $0xa8] sm:$0xff]  }
  0x42   : > { %v1139_v27 = vsel %vm1007_vm8, %v1134_v14, %v1138_v53  ;;  %v580_v30 = vrot.slane %v576_v18, 4  ;;  %v587_v32 = vor.u32 %v585_v25, %v584_v20  ;;  %v589_v33 = vrot.slane %v584_v20, 4  ;;  %v360_v34 = vld [vmem:[%s17828_s27 + $0x68] sm:$0xf]  ;;  %v361_v35 = vld [vmem:[%s17828_s27 + $0x6c] sm:$0xf] }
  0x43   : > { %v1145_v31 = vrot.slane %v1143_v22, 1  ;;  %v1150_v37 = vrot.slane %v1148_v28, 1  ;;  %v781_v38 = vsel %vm17856_vm7, %v579_v29, %v780_v13  ;;  %v591_v39 = vshrl.u32 %v360_v34, 16  ;;  %v787_v45 = vld [vmem:[#allocation2 + $0xa8] sm:$0xf]  ;;  %v17242_v11 = vld [vmem:[%s22361_s1 + $0xb0] sm:$0xff]  }
  0x44   : > { %16368 = vmatpush3.bf16.msra.mxu1 %v17227_v42  ;;  %v594_v40 = vshll.u32 %v360_v34, 16  ;;  %v17236_v42 = vld [vmem:[%s22361_s1 + $0xa0] sm:$0xff]   ;;  %v588_v43 = vsel %vm17847_vm5, %v580_v30, %v587_v32  ;;  %782 = vst [vmem:[#allocation2 + $0x9c] sm:$0xf] %v781_v38  ;;  %v599_v44 = vshrl.u32 %v361_v35, 16  ;;  %v602_v52 = vshll.u32 %v361_v35, 16 }
  0x45   : > { %16369 = vmatprep.subr.bf16.mxu1 %v17230_v7  ;;  %v1146_v41 = vor.u32 %v1145_v31, %v1141_v21  ;;  %783 = vst.msk [vmem:[#allocation2 + $0xa0] sm:$0xf] %vm690_vm1, %v588_v43  ;;  %v593_v48 = vrot.slane %v591_v39, 7  ;;  %v791_v50 = vld [vmem:[#allocation2 + $0xb0] sm:$0x1]  ;;  %v1009_v63 = vshrl.u32 %v17957_v46, 16 }
  0x46   : > { %v17235_v47 = vld [vmem:[#allocation2 + $0x98] ss:$0 sps:$4 sm:$0x11]   ;;  %v601_v51 = vrot.slane %v599_v44, 7  ;;  %v362_v61 = vld [vmem:[%s17828_s27 + $0x70] sm:$0xf] }
  0x47   : > { %1578 = vmatmul.mubr.bf16.gmra.mrb[4].mxu1 %v17906_v36  ;;  %v785_v36 = vsel %vm17839_vm4, %v589_v33, %v784_v26  ;;  %v1160_v55 = vshll.u32 %v17235_v47, 16  ;;  %v596_v56 = vor.u32 %v594_v40, %v593_v48  ;;  %v597_v57 = vrot.slane %v593_v48, 4  ;;  %v363_v62 = vld [vmem:[%s17828_s27 + $0x74] sm:$0xf]  ;;  %v798_v18 = vld [vmem:[#allocation2 + $0xbc] sm:$0x1] }
  0x48   : > { %1585 = vmatprep.mubr.bf16.mxu1 %v1139_v27  ;;  %16370 = vmatpush3.bf16.msra.mxu1 %v17230_v7  ;;  %786 = vst [vmem:[#allocation2 + $0xa4] sm:$0x1] %v785_v36  ;;  %v17960_v54 = vld [vmem:[#allocation2 + $0x90] sm:$0xff]   ;;  %v1151_v58 = vsel %vm1007_vm8, %v1146_v41, %v1150_v37  ;;  %v604_v59 = vor.u32 %v602_v52, %v601_v51  ;;  %v606_v60 = vrot.slane %v601_v51, 4  ;;  %v1011_v4 = vshll.u32 %v17957_v46, 16  ;;  %v17245_v30 = vld [vmem:[%s22361_s1 + $0xb8] sm:$0xff]  }
  0x49   : > { %16371 = vmatprep.subr.bf16.mxu1 %v17233_v23  ;;  %v1153_v0 = vshrl.u32 %v17960_v54, 16  ;;  %v1155_v1 = vshll.u32 %v17960_v54, 16  ;;  %v788_v3 = vsel %vm17856_vm7, %v596_v56, %v787_v45  ;;  %v608_v7 = vshrl.u32 %v362_v61, 16  ;;  %v794_v14 = vld [vmem:[#allocation2 + $0xb4] sm:$0xf] }
  0x4a   : > { %v605_v5 = vsel %vm17847_vm5, %v597_v57, %v604_v59  ;;  %789 = vst [vmem:[#allocation2 + $0xa8] sm:$0xf] %v788_v3  ;;  %v792_v6 = vsel %vm17839_vm4, %v606_v60, %v791_v50  ;;  %v611_v8 = vshll.u32 %v362_v61, 16  ;;  %v1162_v10 = vrot.slane %v1160_v55, 1  ;;  %v334_v35 = vld [vmem:[%s17828_s27] sm:$0xf] }
  0x4b   : > { %v1157_v9 = vrot.slane %v1155_v1, 1  ;;  %790 = vst.msk [vmem:[#allocation2 + $0xac] sm:$0xf] %vm690_vm1, %v605_v5  ;;  %793 = vst [vmem:[#allocation2 + $0xb0] sm:$0x1] %v792_v6  ;;  %v616_v53 = vshrl.u32 %v363_v62, 16 }
  0x4c   : > { %16372 = vmatpush3.bf16.msra.mxu1 %v17233_v23  ;;  %v619_v13 = vshll.u32 %v363_v62, 16  ;;  %v17983_v15 = vld [vmem:[#allocation2 + $0x9c] sm:$0xff]   ;;  %v610_v16 = vrot.slane %v608_v7, 7  ;;  %v1013_v26 = vrot.slane %v1011_v4, 1  ;;  %v335_v40 = vld [vmem:[%s17828_s27 + $0x4] sm:$0xf] }
  0x4d   : > { %16373 = vmatprep.subr.bf16.mxu1 %v17236_v42  ;;  %v1158_v20 = vor.u32 %v1157_v9, %v1153_v0  ;;  %v618_v21 = vrot.slane %v616_v53, 7  ;;  %v1167_v22 = vshll.u32 %v17983_v15, 16  ;;  %v1165_v27 = vshrl.u32 %v17983_v15, 16  ;;  %v17993_v34 = vld [vmem:[#allocation2 + $0x8] ss:$0 sps:$4 sm:$0x11]  }
  0x4e   : > { %v613_v23 = vor.u32 %v611_v8, %v610_v16  ;;  %v614_v25 = vrot.slane %v610_v16, 4  ;;  %v370_v41 = vshrl.u32 %v334_v35, 16  ;;  %v373_v44 = vshll.u32 %v334_v35, 16  ;;  %v693_v48 = vld [vmem:[#allocation2 + $0xc] sm:$0xf]  ;;  %v17250_v50 = vld [vmem:[%s22361_s1 + $0x100] sm:$0xff]  }
  0x4f   : > { %1586 = vmatmul.mubr.bf16.gmra.mrb[8].mxu1 %v17918_v49  ;;  %v17238_v49 = vld [vmem:[#allocation2 + $0xa4] ss:$0 sps:$4 sm:$0x11]   ;;  %v621_v28 = vor.u32 %v619_v13, %v618_v21  ;;  %v623_v29 = vrot.slane %v618_v21, 4  ;;  %v1163_v31 = vsel %vm1007_vm8, %v1158_v20, %v1162_v10  ;;  %v1169_v37 = vrot.slane %v1167_v22, 1 }
  0x50   : > { %1593 = vmatprep.mubr.bf16.mxu1 %v1151_v58  ;;  %16374 = vmatpush3.bf16.msra.mxu1 %v17236_v42  ;;  %v1172_v32 = vshll.u32 %v17238_v49, 16  ;;  %v795_v33 = vsel %vm17856_vm7, %v613_v23, %v794_v14  ;;  %v372_v36 = vrot.slane %v370_v41, 7  ;;  %v378_v45 = vshrl.u32 %v335_v40, 16  ;;  %v700_v57 = vld [vmem:[#allocation2 + $0x14] sm:$0x1] }
  0x51   : > { %16375 = vmatprep.subr.bf16.mxu1 %v17239_v2  ;;  %v622_v38 = vsel %vm17847_vm5, %v614_v25, %v621_v28  ;;  %796 = vst [vmem:[#allocation2 + $0xb4] sm:$0xf] %v795_v33  ;;  %v799_v39 = vsel %vm17839_vm4, %v623_v29, %v798_v18  ;;  %v1014_v51 = vor.u32 %v1013_v26, %v1009_v63  ;;  %v381_v60 = vshll.u32 %v335_v40, 16  ;;  %v336_v4 = vld [vmem:[%s17828_s27 + $0x8] sm:$0xf] }
  0x52   : > { %v18001_v42 = vld [vmem:[#allocation2 + $0xa8] sm:$0xff]   ;;  %797 = vst.msk [vmem:[#allocation2 + $0xb8] sm:$0xf] %vm690_vm1, %v622_v38  ;;  %800 = vst [vmem:[#allocation2 + $0xbc] sm:$0x1] %v799_v39  ;;  %v1170_v52 = vor.u32 %v1169_v37, %v1165_v27  ;;  %v1174_v55 = vrot.slane %v1172_v32, 1 }
  0x53   : > { %v18005_v43 = vld [vmem:[#allocation2 + $0xb0] ss:$0 sps:$4 sm:$0x11]   ;;  %v1179_v47 = vshll.u32 %v18001_v42, 16  ;;  %v380_v56 = vrot.slane %v378_v45, 7  ;;  %v1177_v58 = vshrl.u32 %v18001_v42, 16 }
  0x54   : > { %16376 = vmatpush3.bf16.msra.mxu1 %v17239_v2  ;;  %v376_v59 = vrot.slane %v372_v36, 4  ;;  %v1016_v61 = vshll.u32 %v17993_v34, 16  ;;  %v1184_v62 = vshll.u32 %v18005_v43, 16  ;;  %v1175_v5 = vsel %vm1007_vm8, %v1170_v52, %v1174_v55  ;;  %v703_v21 = vld [vmem:[#allocation2 + $0x18] sm:$0xf] }
  0x55   : > { %16377 = vmatprep.subr.bf16.mxu1 %v17242_v11  ;;  %v385_v0 = vrot.slane %v380_v56, 4  ;;  %v1181_v1 = vrot.slane %v1179_v47, 1  ;;  %v383_v2 = vor.u32 %v381_v60, %v380_v56  ;;  %v387_v8 = vshrl.u32 %v336_v4, 16  ;;  %v338_v22 = vld [vmem:[%s17828_s27 + $0x10] sm:$0xf] }
  0x56   : > { %v1018_v3 = vrot.slane %v1016_v61, 1  ;;  %v390_v53 = vshll.u32 %v336_v4, 16  ;;  %v1186_v20 = vrot.slane %v1184_v62, 1  ;;  %v339_v27 = vld [vmem:[%s17828_s27 + $0x14] sm:$0xf]  ;;  %vm5951_vm14 = vcmask 1042434  }
  0x57   : > { %1594 = vmatmul.mubr.bf16.gmra.mrb[12].mxu1 %v17934_v12  ;;  %v375_v12 = vor.u32 %v373_v44, %v372_v36  ;;  %v701_v7 = vsel %vm17839_vm4, %v385_v0, %v700_v57  ;;  %v384_v9 = vsel %vm17847_vm5, %v376_v59, %v383_v2  ;;  %v389_v16 = vrot.slane %v387_v8, 7  ;;  %v707_v29 = vld [vmem:[#allocation2 + $0x20] sm:$0x1]  ;;  %v710_v39 = vld [vmem:[#allocation2 + $0x24] sm:$0xf] }
  0x58   : > { %1601 = vmatprep.mubr.bf16.mxu1 %v1163_v31  ;;  %16378 = vmatpush3.bf16.msra.mxu1 %v17242_v11  ;;  %702 = vst [vmem:[#allocation2 + $0x14] sm:$0x1] %v701_v7  ;;  %v1019_v10 = vsel %vm1007_vm8, %v1014_v51, %v1018_v3  ;;  %v337_v11 = vld [vmem:[%s17828_s27 + $0xc] sm:$0xf]  ;;  %697 = vst.msk [vmem:[#allocation2 + $0x10] sm:$0xf] %vm690_vm1, %v384_v9  ;;  %v1182_v23 = vor.u32 %v1181_v1, %v1177_v58 }
  0x59   : > { %16379 = vmatprep.subr.bf16.mxu1 %v17245_v30  ;;  %v694_v63 = vsel %vm17856_vm7, %v375_v12, %v693_v48  ;;  %v18020_v6 = vld [vmem:[#allocation2 + $0xb4] sm:$0xff]   ;;  %v18029_v13 = vld [vmem:[#allocation2 + $0xbc] ss:$0 sps:$4 sm:$0x11]   ;;  %1505 = vmatprep.mubr.bf16.mxu0 %v1019_v10  ;;  %v395_v18 = vshrl.u32 %v337_v11, 16  ;;  %v398_v49 = vshll.u32 %v337_v11, 16  ;;  %v392_v25 = vor.u32 %v390_v53, %v389_v16 }
  0x5a   : > { %695 = vst [vmem:[#allocation2 + $0xc] sm:$0xf] %v694_v63  ;;  %v1191_v14 = vshll.u32 %v18020_v6, 16  ;;  %1506 = vmatmul.mubr.bf16.vlgmr.msra.gmra.mrb[0].mxu0 %v17957_v46  ;;  %v1189_v28 = vshrl.u32 %v18020_v6, 16  ;;  %v407_v31 = vshll.u32 %v338_v22, 16  ;;  %v412_v32 = vshrl.u32 %v339_v27, 16 }
  0x5b   : > { %v397_v26 = vrot.slane %v395_v18, 7  ;;  %v704_v38 = vsel %vm17856_vm7, %v392_v25, %v703_v21  ;;  %v714_v40 = vld [vmem:[#allocation2 + $0x2c] sm:$0x1]  ;;  %v1196_v41 = vshll.u32 %v18029_v13, 16  ;;  %v415_v45 = vshll.u32 %v339_v27, 16  ;;  %v17272_v57 = vld [vmem:[%s22361_s1 + $0x1c0] sm:$0xff]  }
  0x5c   : > { %16380 = vmatpush3.bf16.msra.mxu1 %v17245_v30  ;;  %v404_v30 = vshrl.u32 %v338_v22, 16  ;;  %v1193_v33 = vrot.slane %v1191_v14, 1  ;;  %705 = vst [vmem:[#allocation2 + $0x18] sm:$0xf] %v704_v38  ;;  %v414_v44 = vrot.slane %v412_v32, 7  ;;  %v1187_v47 = vsel %vm1007_vm8, %v1182_v23, %v1186_v20  ;;  %15665 = vmatprep.subr.bf16.mxu0 %v17272_v57  ;;  %v17274_v53 = vld [vmem:[%s22361_s1 + $0x1c8] sm:$0xff]  }
  0x5d   : > { %15529 = vmatprep.subr.bf16.mxu1 %v17250_v50  ;;  %v400_v35 = vor.u32 %v398_v49, %v397_v26  ;;  %v402_v37 = vrot.slane %v397_v26, 4  ;;  %v1198_v61 = vrot.slane %v1196_v41, 1  ;;  %v340_v1 = vld [vmem:[%s17828_s27 + $0x18] sm:$0xf]  ;;  %v717_v11 = vld [vmem:[#allocation2 + $0x30] sm:$0xf] }
  0x5e   : > { %v406_v36 = vrot.slane %v404_v30, 7  ;;  %v417_v12 = vor.u32 %v415_v45, %v414_v44  ;;  %v419_v56 = vrot.slane %v414_v44, 4  ;;  %v1194_v58 = vor.u32 %v1193_v33, %v1189_v28  ;;  %v721_v18 = vld [vmem:[#allocation2 + $0x38] sm:$0x1]  ;;  %v342_v49 = vld [vmem:[%s17828_s27 + $0x20] sm:$0xf] }
  0x5f   : > { %1602 = vmatmul.mubr.bf16.gmra.mrb[16].mxu1 %v17960_v54  ;;  %v393_v54 = vrot.slane %v389_v16, 4  ;;  %v18041_v48 = vld [vmem:[#allocation2 + $0x14] ss:$0 sps:$4 sm:$0x11]   ;;  %v708_v51 = vsel %vm17839_vm4, %v402_v37, %v707_v29  ;;  %v421_v7 = vshrl.u32 %v340_v1, 16  ;;  %v424_v8 = vshll.u32 %v340_v1, 16 }
  0x60   : > { %1609 = vmatprep.mubr.bf16.mxu1 %v1175_v5  ;;  %709 = vst [vmem:[#allocation2 + $0x20] sm:$0x1] %v708_v51  ;;  %v409_v52 = vor.u32 %v407_v31, %v406_v36  ;;  %v410_v55 = vrot.slane %v406_v36, 4  ;;  %v1028_v60 = vshll.u32 %v18041_v48, 16  ;;  %v715_v63 = vsel %vm17839_vm4, %v419_v56, %v714_v40  ;;  %v341_v5 = vld [vmem:[%s17828_s27 + $0x1c] sm:$0xf] }
  0x61   : > { %v401_v50 = vsel %vm17847_vm5, %v393_v54, %v400_v35  ;;  %v18052_v59 = vld [vmem:[#allocation2 + $0xc] sm:$0xff]   ;;  %716 = vst [vmem:[#allocation2 + $0x2c] sm:$0x1] %v715_v63  ;;  %v429_v9 = vshrl.u32 %v341_v5, 16  ;;  %v432_v10 = vshll.u32 %v341_v5, 16  ;;  %v423_v16 = vrot.slane %v421_v7, 7 }
  0x62   : > { %706 = vst.msk [vmem:[#allocation2 + $0x1c] sm:$0xf] %vm690_vm1, %v401_v50  ;;  %v418_v62 = vsel %vm17847_vm5, %v410_v55, %v417_v12  ;;  %v711_v0 = vsel %vm17856_vm7, %v409_v52, %v710_v39  ;;  %v1021_v2 = vshrl.u32 %v18052_v59, 16  ;;  %v1023_v3 = vshll.u32 %v18052_v59, 16  ;;  %v343_v21 = vld [vmem:[%s17828_s27 + $0x24] sm:$0xf] }
  0x63   : > { %712 = vst [vmem:[#allocation2 + $0x24] sm:$0xf] %v711_v0  ;;  %713 = vst.msk [vmem:[#allocation2 + $0x28] sm:$0xf] %vm690_vm1, %v418_v62  ;;  %v1030_v4 = vrot.slane %v1028_v60, 1  ;;  %v431_v20 = vrot.slane %v429_v9, 7  ;;  %v1199_v22 = vsel %vm1007_vm8, %v1194_v58, %v1198_v61  ;;  %v426_v25 = vor.u32 %v424_v8, %v423_v16 }
  0x64   : > { %v1025_v14 = vrot.slane %v1023_v3, 1  ;;  %v427_v54 = vrot.slane %v423_v16, 4  ;;  %v1217_v26 = vrot.slane %v17957_v46, 1  ;;  %v438_v30 = vshrl.u32 %v342_v49, 16  ;;  %v724_v36 = vld [vmem:[#allocation2 + $0x3c] sm:$0xf] }
  0x65   : > { %v434_v28 = vor.u32 %v432_v10, %v431_v20  ;;  %v436_v29 = vrot.slane %v431_v20, 4  ;;  %v718_v32 = vsel %vm17856_vm7, %v426_v25, %v717_v11  ;;  %v441_v33 = vshll.u32 %v342_v49, 16  ;;  %v728_v52 = vld [vmem:[#allocation2 + $0x44] sm:$0x1]  ;;  %v344_v61 = vld [vmem:[%s17828_s27 + $0x28] sm:$0xf] }
  0x66   : > { %v1026_v23 = vor.u32 %v1025_v14, %v1021_v2  ;;  %v446_v35 = vshrl.u32 %v343_v21, 16  ;;  %v1218_v37 = vrot.slane %v17993_v34, 1  ;;  %v1221_v38 = vrot.slane %v18041_v48, 1  ;;  %719 = vst [vmem:[#allocation2 + $0x30] sm:$0xf] %v718_v32  ;;  %v17275_v48 = vld [vmem:[%s22361_s1 + $0x188] sm:$0xff]  }
  0x67   : > { %1610 = vmatmul.mubr.bf16.gmra.mrb[20].mxu1 %v17983_v15  ;;  %v17273_v15 = vld [vmem:[%s22361_s1 + $0x180] sm:$0xff]   ;;  %v435_v39 = vsel %vm17847_vm5, %v427_v54, %v434_v28  ;;  %v722_v40 = vsel %vm17839_vm4, %v436_v29, %v721_v18  ;;  %v1220_v41 = vrot.slane %v18052_v59, 1  ;;  %v440_v34 = vrot.slane %v438_v30, 7  ;;  %v345_v62 = vld [vmem:[%s17828_s27 + $0x2c] sm:$0xf] }
  0x68   : > { %1617 = vmatprep.mubr.bf16.mxu1 %v1187_v47  ;;  %15666 = vmatpush3.bf16.msra.mxu0 %v17273_v15  ;;  %v1031_v31 = vsel %vm1007_vm8, %v1026_v23, %v1030_v4  ;;  %v18084_v46 = vld [vmem:[#allocation2 + $0x20] ss:$0 sps:$4 sm:$0x11]   ;;  %720 = vst.msk [vmem:[#allocation2 + $0x34] sm:$0xf] %vm690_vm1, %v435_v39  ;;  %v448_v45 = vrot.slane %v446_v35, 7 }
  0x69   : > { %15667 = vmatprep.subr.bf16.mxu0 %v17274_v53  ;;  %v18076_v27 = vld [vmem:[#allocation2 + $0x18] sm:$0xff]   ;;  %1513 = vmatprep.mubr.bf16.mxu0 %v1031_v31  ;;  %723 = vst [vmem:[#allocation2 + $0x38] sm:$0x1] %v722_v40  ;;  %v449_v47 = vshll.u32 %v343_v21, 16  ;;  %v443_v50 = vor.u32 %v441_v33, %v440_v34  ;;  %v444_v51 = vrot.slane %v440_v34, 4  ;;  %v1040_v58 = vshll.u32 %v18084_v46, 16 }
  0x6a   : > { %1514 = vmatmul.mubr.bf16.gmra.mrb[4].mxu0 %v18052_v59  ;;  %v1223_v44 = vrot.slane %v18076_v27, 1  ;;  %v1033_v55 = vshrl.u32 %v18076_v27, 16  ;;  %v453_v56 = vrot.slane %v448_v45, 4  ;;  %v1035_v57 = vshll.u32 %v18076_v27, 16  ;;  %v18114_v9 = vld [vmem:[#allocation2 + $0x24] sm:$0xff]  }
  0x6b   : > { %v451_v12 = vor.u32 %v449_v47, %v448_v45  ;;  %v1219_v59 = vsel %vm1216_vm9, %v1217_v26, %v1218_v37  ;;  %v725_v60 = vsel %vm17856_vm7, %v443_v50, %v724_v36  ;;  %v1042_v15 = vrot.slane %v1040_v58, 1  ;;  %v18110_v2 = vld [vmem:[#allocation2 + $0x2c] ss:$0 sps:$4 sm:$0x11]   ;;  %v731_v14 = vld [vmem:[#allocation2 + $0x48] sm:$0xf] }
  0x6c   : > { %15668 = vmatpush3.bf16.msra.mxu0 %v17275_v48  ;;  %726 = vst [vmem:[#allocation2 + $0x3c] sm:$0xf] %v725_v60  ;;  %v729_v63 = vsel %vm17839_vm4, %v453_v56, %v728_v52  ;;  %v1037_v1 = vrot.slane %v1035_v57, 1  ;;  %v455_v3 = vshrl.u32 %v344_v61, 16  ;;  %v458_v4 = vshll.u32 %v344_v61, 16  ;;  %v17251_v20 = vld [vmem:[%s22361_s1 + $0xc0] sm:$0xff]  }
  0x6d   : > { %v452_v0 = vsel %vm17847_vm5, %v444_v51, %v451_v12  ;;  %730 = vst [vmem:[#allocation2 + $0x44] sm:$0x1] %v729_v63  ;;  %v463_v5 = vshrl.u32 %v345_v62, 16  ;;  %v466_v7 = vshll.u32 %v345_v62, 16  ;;  %v1224_v8 = vrot.slane %v18084_v46, 1  ;;  %v17256_v54 = vld [vmem:[%s22361_s1 + $0x108] sm:$0xff]  }
  0x6e   : > { %727 = vst.msk [vmem:[#allocation2 + $0x40] sm:$0xf] %vm690_vm1, %v452_v0  ;;  %v1038_v10 = vor.u32 %v1037_v1, %v1033_v55  ;;  %v457_v11 = vrot.slane %v455_v3, 7  ;;  %v735_v16 = vld [vmem:[#allocation2 + $0x50] sm:$0x1]  ;;  %v1222_v18 = vsel %vm1216_vm9, %v1220_v41, %v1221_v38  ;;  %v1045_v23 = vshrl.u32 %v18114_v9, 16 }
  0x6f   : > { %1618 = vmatmul.mubr.bf16.gmra.mrb[24].mxu1 %v18001_v42  ;;  %v465_v53 = vrot.slane %v463_v5, 7  ;;  %v346_v21 = vld [vmem:[%s17828_s27 + $0x30] sm:$0xf]  ;;  %v1047_v25 = vshll.u32 %v18114_v9, 16  ;;  %v1052_v32 = vshll.u32 %v18110_v2, 16  ;;  %v1225_v46 = vsel %vm1216_vm9, %v1223_v44, %v1224_v8  ;;  %v17257_v45 = vld [vmem:[%s22361_s1 + $0xc8] sm:$0xff]  }
  0x70   : > { %1625 = vmatprep.mubr.bf16.mxu1 %v1199_v22  ;;  %v1043_v49 = vsel %vm1007_vm8, %v1038_v10, %v1042_v15  ;;  %v347_v22 = vld [vmem:[%s17828_s27 + $0x34] sm:$0xf]  ;;  %v18130_v28 = vld [vmem:[#allocation2 + $0x38] ss:$0 sps:$4 sm:$0x11]   ;;  %v460_v29 = vor.u32 %v458_v4, %v457_v11  ;;  %v461_v30 = vrot.slane %v457_v11, 4 }
  0x71   : > { %v18128_v26 = vld [vmem:[#allocation2 + $0x30] sm:$0xff]   ;;  %1521 = vmatprep.mubr.bf16.mxu0 %v1043_v49  ;;  %v468_v31 = vor.u32 %v466_v7, %v465_v53  ;;  %v470_v33 = vrot.slane %v465_v53, 4  ;;  %v472_v35 = vshrl.u32 %v346_v21, 16  ;;  %v475_v37 = vshll.u32 %v346_v21, 16  ;;  %v742_v52 = vld [vmem:[#allocation2 + $0x5c] sm:$0x1] }
  0x72   : > { %1522 = vmatmul.mubr.bf16.gmra.mrb[8].mxu0 %v18076_v27  ;;  %v480_v38 = vshrl.u32 %v347_v22, 16  ;;  %v732_v40 = vsel %vm17856_vm7, %v460_v29, %v731_v14  ;;  %v483_v41 = vshll.u32 %v347_v22, 16  ;;  %v738_v34 = vld [vmem:[#allocation2 + $0x54] sm:$0xf]  ;;  %v1226_v27 = vrot.slane %v18114_v9, 1  ;;  %v17268_v8 = vld [vmem:[%s22361_s1 + $0x118] sm:$0xff]  }
  0x73   : > { %v469_v39 = vsel %vm17847_vm5, %v461_v30, %v468_v31  ;;  %v17278_v36 = vld [vmem:[%s22361_s1 + $0x1d0] sm:$0xff]   ;;  %733 = vst [vmem:[#allocation2 + $0x48] sm:$0xf] %v732_v40  ;;  %v736_v44 = vsel %vm17839_vm4, %v470_v33, %v735_v16  ;;  %v474_v47 = vrot.slane %v472_v35, 7  ;;  %v1227_v48 = vrot.slane %v18110_v2, 1  ;;  %v17269_v49 = vld [vmem:[%s22361_s1 + $0xd8] sm:$0xff]  }
  0x74   : > { %734 = vst.msk [vmem:[#allocation2 + $0x4c] sm:$0xf] %vm690_vm1, %v469_v39  ;;  %v17262_v50 = vld [vmem:[%s22361_s1 + $0x110] sm:$0xff]   ;;  %737 = vst [vmem:[#allocation2 + $0x50] sm:$0x1] %v736_v44  ;;  %v482_v51 = vrot.slane %v480_v38, 7  ;;  %15669 = vmatprep.subr.bf16.mxu0 %v17278_v36 }
  0x75   : > { %v1049_v55 = vrot.slane %v1047_v25, 1  ;;  %v1054_v12 = vrot.slane %v1052_v32, 1  ;;  %v1229_v56 = vrot.slane %v18128_v26, 1  ;;  %v477_v57 = vor.u32 %v475_v37, %v474_v47  ;;  %v18155_v0 = vld [vmem:[#allocation2 + $0x3c] sm:$0xff]   ;;  %v17263_v1 = vld [vmem:[%s22361_s1 + $0xd0] sm:$0xff]  }
  0x76   : > { %v478_v58 = vrot.slane %v474_v47, 4  ;;  %v485_v60 = vor.u32 %v483_v41, %v482_v51  ;;  %v487_v61 = vrot.slane %v482_v51, 4  ;;  %v17261_v63 = vld [vmem:[#allocation2 + $0x44] ss:$0 sps:$4 sm:$0x11]   ;;  %v1057_v2 = vshrl.u32 %v18128_v26, 16 }
  0x77   : > { %1626 = vmatmul.mubr.bf16.gmra.mrb[28].mxu1 %v18020_v6  ;;  %v1050_v62 = vor.u32 %v1049_v55, %v1045_v23  ;;  %v739_v15 = vsel %vm17856_vm7, %v477_v57, %v738_v34  ;;  %v1059_v3 = vshll.u32 %v18128_v26, 16  ;;  %v17279_v4 = vld [vmem:[%s22361_s1 + $0x190] sm:$0xff]   ;;  %v1228_v11 = vsel %vm1216_vm9, %v1226_v27, %v1227_v48  ;;  %v17270_v25 = vld [vmem:[%s22361_s1 + $0x120] sm:$0xff]   ;;  %v17280_v40 = vld [vmem:[%s22361_s1 + $0x1d8] sm:$0xff]  }
  0x78   : > { %16381 = vmatprep.mubr.bf16.mxu1 %v1219_v59  ;;  %v1230_v59 = vrot.slane %v18130_v28, 1  ;;  %v486_v5 = vsel %vm17847_vm5, %v478_v58, %v485_v60  ;;  %740 = vst [vmem:[#allocation2 + $0x54] sm:$0xf] %v739_v15  ;;  %v743_v7 = vsel %vm17839_vm4, %v487_v61, %v742_v52  ;;  %v1064_v14 = vshll.u32 %v18130_v28, 16  ;;  %15670 = vmatpush3.bf16.msra.mxu0 %v17279_v4  ;;  %v17271_v31 = vld [vmem:[%s22361_s1 + $0xe0] sm:$0xff]   ;;  %v17276_v27 = vld [vmem:[%s22361_s1 + $0x128] sm:$0xff]  }
  0x79   : > { %v1055_v10 = vsel %vm1007_vm8, %v1050_v62, %v1054_v12  ;;  %741 = vst.msk [vmem:[#allocation2 + $0x58] sm:$0xf] %vm690_vm1, %v486_v5  ;;  %744 = vst [vmem:[#allocation2 + $0x5c] sm:$0x1] %v743_v7  ;;  %v1061_v53 = vrot.slane %v1059_v3, 1  ;;  %v1232_v23 = vrot.slane %v18155_v0, 1  ;;  %15671 = vmatprep.subr.bf16.mxu0 %v17280_v40 }
  0x7a   : > { %1529 = vmatprep.mubr.bf16.mxu0 %v1055_v10  ;;  %v1231_v16 = vsel %vm1216_vm9, %v1229_v56, %v1230_v59  ;;  %v1066_v22 = vrot.slane %v1064_v14, 1  ;;  %v1069_v30 = vshrl.u32 %v18155_v0, 16  ;;  %v1071_v32 = vshll.u32 %v18155_v0, 16  ;;  %v17650_v34 = vld [vmem:[#allocation2 + $0x60] sm:$0xff]   ;;  %v17277_v48 = vld [vmem:[%s22361_s1 + $0xe8] sm:$0xff]   ;;  %v17282_v55 = vld [vmem:[%s22361_s1 + $0x130] sm:$0xff]  }
  0x7b   : > { %1530 = vmatmul.mubr.bf16.gmra.mrb[12].mxu0 %v18114_v9  ;;  %v1062_v21 = vor.u32 %v1061_v53, %v1057_v2  ;;  %v1076_v33 = vshll.u32 %v17261_v63, 16  ;;  %v1241_v36 = vrot.slane %v17650_v34, 1  ;;  %v17652_v58 = vld [vmem:[#allocation2 + $0x6c] sm:$0xff]   ;;  %v17285_v15 = vld [vmem:[%s22361_s1 + $0x1a0] sm:$0xff]   ;;  %vm5953_vm15 = vcmask 1043459  }
  0x7c   : > { %v1244_v59 = vrot.slane %v17652_v58, 1  ;;  %v17283_v60 = vld [vmem:[%s22361_s1 + $0xf0] sm:$0xff]   ;;  %v17286_v7 = vld [vmem:[%s22361_s1 + $0x1e8] sm:$0xff]   ;;  %v17659_v34 = vld [vmem:[#allocation2 + $0x98] ss:$0 sps:$4 sm:$0x11]  }
  0x7d   : > { %v1067_v28 = vsel %vm1007_vm8, %v1062_v21, %v1066_v22  ;;  %v1078_v39 = vrot.slane %v1076_v33, 1  ;;  %v17653_v3 = vld [vmem:[#allocation2 + $0x74] ss:$0 sps:$4 sm:$0x11]   ;;  %v17287_v14 = vld [vmem:[%s22361_s1 + $0x1a8] sm:$0xff]   ;;  %v17289_v22 = vld [vmem:[%s22361_s1 + $0xf8] sm:$0xff]  }
  0x7e   : > { %1537 = vmatprep.mubr.bf16.mxu0 %v1067_v28  ;;  %v1245_v4 = vrot.slane %v17653_v3, 1  ;;  %v17658_v40 = vld [vmem:[#allocation2 + $0x90] sm:$0xff]   ;;  %v1260_v3 = vrot.slane %v18005_v43, 1  ;;  %vm5955_vm0 = vcmask 1044484   ;;  %vm6038_vm2 = vcmask 1043456  }
  0x7f   : > { %16382 = vmatmul.mubr.bf16.vlgmr.msra.gmra.mrb[32].mxu1 %v1222_v18  ;;  %v18179_v18 = vld [vmem:[#allocation2 + $0x48] sm:$0xff]   ;;  %v17352_v24 = vld [vmem:[#allocation2 + $0xb0] ss:$0 sps:$4 sm:$0x11]   ;;  %vm5959_vm3 = vcmask 1046534  }
  0x80   : > { %15530 = vmatpush3.bf16.msra.mxu1 %v17251_v20  ;;  %16385 = vmatprep.mubr.bf16.mxu1 %v1225_v46  ;;  %v17265_v20 = vld [vmem:[#allocation2 + $0x50] ss:$0 sps:$4 sm:$0x11]   ;;  %v1235_v9 = vrot.slane %v18179_v18, 1  ;;  %v18196_v35 = vld [vmem:[#allocation2 + $0x54] sm:$0xff]   ;;  %v1073_v46 = vrot.slane %v1071_v32, 1 }
  0x81   : > { %15531 = vmatprep.subr.bf16.mxu1 %v17256_v54  ;;  %v1233_v54 = vrot.slane %v17261_v63, 1  ;;  %v1236_v29 = vrot.slane %v17265_v20, 1  ;;  %v18199_v38 = vld [vmem:[#allocation2 + $0x5c] ss:$0 sps:$4 sm:$0x11]   ;;  %v1081_v12 = vshrl.u32 %v18179_v18, 16 }
  0x82   : > { %v1074_v47 = vor.u32 %v1073_v46, %v1069_v30  ;;  %v1239_v51 = vrot.slane %v18199_v38, 1  ;;  %v1083_v56 = vshll.u32 %v18179_v18, 16  ;;  %v1088_v57 = vshll.u32 %v17265_v20, 16  ;;  %v17656_v32 = vld [vmem:[#allocation2 + $0x84] sm:$0xff]  }
  0x83   : > { %v1234_v37 = vsel %vm1216_vm9, %v1232_v23, %v1233_v54  ;;  %v1237_v41 = vsel %vm1216_vm9, %v1235_v9, %v1236_v29  ;;  %1538 = vmatmul.mubr.bf16.gmra.mrb[16].mxu0 %v18128_v26  ;;  %v1238_v26 = vrot.slane %v18196_v35, 1  ;;  %v1093_v20 = vshrl.u32 %v18196_v35, 16  ;;  %v17291_v29 = vld [vmem:[%s22361_s1 + $0x1b0] sm:$0xff]  }
  0x84   : > { %15532 = vmatpush3.bf16.msra.mxu1 %v17257_v45  ;;  %v17651_v45 = vld [vmem:[#allocation2 + $0x68] ss:$0 sps:$4 sm:$0x11]   ;;  %v1079_v52 = vsel %vm1007_vm8, %v1074_v47, %v1078_v39  ;;  %v1085_v62 = vrot.slane %v1083_v56, 1  ;;  %v1090_v63 = vrot.slane %v1088_v57, 1  ;;  %v1100_v21 = vshll.u32 %v18199_v38, 16 }
  0x85   : > { %15533 = vmatprep.subr.bf16.mxu1 %v17262_v50  ;;  %v1242_v44 = vrot.slane %v17651_v45, 1  ;;  %v17281_v50 = vld [vmem:[%s22361_s1 + $0x198] sm:$0xff]   ;;  %1545 = vmatprep.mubr.bf16.mxu0 %v1079_v52  ;;  %v1240_v61 = vsel %vm1216_vm9, %v1238_v26, %v1239_v51  ;;  %v1246_v9 = vsel %vm1216_vm9, %v1244_v59, %v1245_v4  ;;  %v1250_v33 = vrot.slane %v17656_v32, 1  ;;  %v17657_v38 = vld [vmem:[#allocation2 + $0x8c] ss:$0 sps:$4 sm:$0x11]  }
  0x86   : > { %15672 = vmatpush3.bf16.msra.mxu0 %v17281_v50  ;;  %v1086_v5 = vor.u32 %v1085_v62, %v1081_v12  ;;  %v1102_v54 = vrot.slane %v1100_v21, 1  ;;  %v1251_v46 = vrot.slane %v17657_v38, 1  ;;  %v17295_v39 = vld [vmem:[%s22361_s1 + $0x1b8] sm:$0xff]   ;;  %v18272_v45 = vld [vmem:[#allocation2 + $0xc] sm:$0xff]   ;;  %v17301_v51 = vld [vmem:[#allocation2 + $0x24] sm:$0xff]  }
  0x87   : > { %16386 = vmatmul.mubr.bf16.gmra.mrb[36].mxu1 %v1228_v11  ;;  %v1243_v2 = vsel %vm1216_vm9, %v1241_v36, %v1242_v44  ;;  %v17655_v11 = vld [vmem:[#allocation2 + $0x80] ss:$0 sps:$4 sm:$0x11]   ;;  %v1254_v36 = vrot.slane %v17659_v34, 1  ;;  %v2022_v59 = vshll.u32 %v18272_v45, 16  ;;  %v3044_v62 = vshrl.u32 %v17301_v51, 16 }
  0x88   : > { %16389 = vmatprep.mubr.bf16.mxu1 %v1231_v16  ;;  %15534 = vmatpush3.bf16.msra.mxu1 %v17263_v1  ;;  %v17284_v1 = vld [vmem:[%s22361_s1 + $0x1e0] sm:$0xff]   ;;  %v1248_v53 = vrot.slane %v17655_v11, 1  ;;  %v1091_v16 = vsel %vm1007_vm8, %v1086_v5, %v1090_v63  ;;  %v1252_v50 = vsel %vm1216_vm9, %v1250_v33, %v1251_v46  ;;  %v17294_v57 = vld [vmem:[#allocation2 + $0x14] ss:$0 sps:$4 sm:$0x11]   ;;  %v3046_v63 = vshll.u32 %v17301_v51, 16 }
  0x89   : > { %15535 = vmatprep.subr.bf16.mxu1 %v17268_v8  ;;  %15673 = vmatprep.subr.bf16.mxu0 %v17284_v1  ;;  %v17654_v8 = vld [vmem:[#allocation2 + $0x78] sm:$0xff]   ;;  %v17298_v44 = vld [vmem:[#allocation2 + $0x20] ss:$0 sps:$4 sm:$0x11]   ;;  %v2024_v11 = vrot.slane %v2022_v59, 1  ;;  %v18297_v34 = vld [vmem:[#allocation2 + $0x48] sm:$0xff]  }
  0x8a   : > { %v1247_v10 = vrot.slane %v17654_v8, 1  ;;  %15674 = vmatpush3.bf16.msra.mxu0 %v17285_v15  ;;  %v3039_v26 = vshll.u32 %v17298_v44, 16  ;;  %v17661_v1 = vld [vmem:[#allocation2 + $0xa4] ss:$0 sps:$4 sm:$0x11]   ;;  %v2027_v8 = vshll.u32 %v17294_v57, 16 }
  0x8b   : > { %1546 = vmatmul.mubr.bf16.gmra.mrb[20].mxu0 %v18155_v0  ;;  %v17288_v0 = vld [vmem:[%s22361_s1 + $0x138] sm:$0xff]   ;;  %15675 = vmatprep.subr.bf16.mxu0 %v17286_v7  ;;  %v1257_v15 = vrot.slane %v17661_v1, 1  ;;  %v2020_v7 = vshrl.u32 %v18272_v45, 16 }
  0x8c   : > { %15536 = vmatpush3.bf16.msra.mxu1 %v17269_v49  ;;  %v1095_v49 = vshll.u32 %v18196_v35, 16  ;;  %1553 = vmatprep.mubr.bf16.mxu0 %v1091_v16  ;;  %v1249_v30 = vsel %vm1216_vm9, %v1247_v10, %v1248_v53  ;;  %v3041_v58 = vrot.slane %v3039_v26, 1  ;;  %v17306_v10 = vld [vmem:[#allocation2 + $0x30] sm:$0xff]   ;;  %v18284_v16 = vld [vmem:[#allocation2 + $0x18] sm:$0xff]  }
  0x8d   : > { %15537 = vmatprep.subr.bf16.mxu1 %v17270_v25  ;;  %v17290_v25 = vld [vmem:[%s22361_s1 + $0x1f0] sm:$0xff]   ;;  %v3058_v21 = vshll.u32 %v17306_v10, 16 }
  0x8e   : > { %v1097_v23 = vrot.slane %v1095_v49, 1  ;;  %15676 = vmatpush3.bf16.msra.mxu0 %v17287_v14  ;;  %v17307_v49 = vld [vmem:[#allocation2 + $0x38] ss:$0 sps:$4 sm:$0x11]  }
  0x8f   : > { %16390 = vmatmul.mubr.bf16.gmra.mrb[40].mxu1 %v1234_v37  ;;  %15677 = vmatprep.subr.bf16.mxu0 %v17290_v25  ;;  %v3060_v25 = vrot.slane %v3058_v21, 1 }
  0x90   : > { %16393 = vmatprep.mubr.bf16.mxu1 %v1237_v41  ;;  %15538 = vmatpush3.bf16.msra.mxu1 %v17271_v31  ;;  %v1098_v28 = vor.u32 %v1097_v23, %v1093_v20  ;;  %v17292_v31 = vld [vmem:[%s22361_s1 + $0x1f8] sm:$0xff]   ;;  %v1253_v41 = vrot.slane %v17658_v40, 1  ;;  %v3056_v20 = vshrl.u32 %v17306_v10, 16  ;;  %v17300_v23 = vld [vmem:[#allocation2 + $0x20] ss:$0 sps:$4 sm:$0x11]  }
  0x91   : > { %15539 = vmatprep.subr.bf16.mxu1 %v17276_v27  ;;  %v17297_v27 = vld [vmem:[#allocation2 + $0x18] sm:$0xff]   ;;  %v2039_v44 = vshll.u32 %v17300_v23, 16 }
  0x92   : > { %v1103_v37 = vsel %vm1007_vm8, %v1098_v28, %v1102_v54  ;;  %15678 = vmatpush3.bf16.msra.mxu0 %v17291_v29  ;;  %v3032_v47 = vshrl.u32 %v17297_v27, 16  ;;  %v1255_v52 = vsel %vm1216_vm9, %v1253_v41, %v1254_v36  ;;  %v3063_v54 = vshll.u32 %v17307_v49, 16  ;;  %v18330_v23 = vld [vmem:[#allocation2 + $0x3c] sm:$0xff]  }
  0x93   : > { %1554 = vmatmul.mubr.bf16.gmra.mrb[24].mxu0 %v18179_v18  ;;  %v18270_v18 = vld [vmem:[%s22361_s1 + $0x140] sm:$0xff]   ;;  %15679 = vmatprep.subr.bf16.mxu0 %v17292_v31  ;;  %v1263_v28 = vrot.slane %v18029_v13, 1  ;;  %v2029_v29 = vrot.slane %v2027_v8, 1  ;;  %v2034_v31 = vshll.u32 %v18284_v16, 16  ;;  %v3061_v32 = vor.u32 %v3060_v25, %v3056_v20  ;;  %v17323_v25 = vld [vmem:[%s22361_s1 + $0x158] sm:$0xff]  }
  0x94   : > { %15540 = vmatpush3.bf16.msra.mxu1 %v17277_v48  ;;  %1561 = vmatprep.mubr.bf16.mxu0 %v1103_v37  ;;  %v3034_v48 = vshll.u32 %v17297_v27, 16  ;;  %v3065_v33 = vrot.slane %v3063_v54, 1  ;;  %v17311_v37 = vld [vmem:[#allocation2 + $0x44] ss:$0 sps:$4 sm:$0x11]   ;;  %v2032_v36 = vshrl.u32 %v18284_v16, 16 }
  0x95   : > { %15541 = vmatprep.subr.bf16.mxu1 %v17282_v55  ;;  %v17660_v55 = vld [vmem:[#allocation2 + $0x9c] sm:$0xff]   ;;  %v3075_v41 = vshll.u32 %v17311_v37, 16  ;;  %v17325_v54 = vld [vmem:[#allocation2 + $0x68] ss:$0 sps:$4 sm:$0x11]  }
  0x96   : > { %15680 = vmatpush3.bf16.msra.mxu0 %v17295_v39  ;;  %v1256_v12 = vrot.slane %v17660_v55, 1  ;;  %v3036_v56 = vrot.slane %v3034_v48, 1  ;;  %v17304_v48 = vld [vmem:[#allocation2 + $0x2c] ss:$0 sps:$4 sm:$0x11]   ;;  %v3082_v55 = vshll.u32 %v18297_v34, 16 }
  0x97   : > { %16394 = vmatmul.mubr.bf16.gmra.mrb[44].mxu1 %v1240_v61  ;;  %v17302_v61 = vld [vmem:[#allocation2 + $0x2c] ss:$0 sps:$4 sm:$0x11]   ;;  %v3077_v26 = vrot.slane %v3075_v41, 1  ;;  %v17332_v37 = vld [vmem:[%s22361_s1 + $0x160] sm:$0xff]  }
  0x98   : > { %16397 = vmatprep.mubr.bf16.mxu1 %v1243_v2  ;;  %15542 = vmatpush3.bf16.msra.mxu1 %v17283_v60  ;;  %v3037_v60 = vor.u32 %v3036_v56, %v3032_v47  ;;  %v1259_v2 = vrot.slane %v18001_v42, 1  ;;  %v3051_v5 = vshll.u32 %v17302_v61, 16  ;;  %v18301_v47 = vld [vmem:[#allocation2 + $0x24] sm:$0xff]   ;;  %v2041_v56 = vrot.slane %v2039_v44, 1 }
  0x99   : > { %15543 = vmatprep.subr.bf16.mxu1 %v17288_v0  ;;  %v1258_v0 = vsel %vm1216_vm9, %v1256_v12, %v1257_v15  ;;  %v2046_v57 = vshll.u32 %v18301_v47, 16  ;;  %v3084_v59 = vrot.slane %v3082_v55, 1  ;;  %v2044_v61 = vshrl.u32 %v18301_v47, 16 }
  0x9a   : > { %v3042_v4 = vsel %vm1007_vm8, %v3037_v60, %v3041_v58  ;;  %v3053_v14 = vrot.slane %v3051_v5, 1  ;;  %v1261_v42 = vsel %vm1216_vm9, %v1259_v2, %v1260_v3  ;;  %v3080_v58 = vshrl.u32 %v18297_v34, 16  ;;  %v17305_v2 = vld [vmem:[%s22361_s1 + $0x148] sm:$0xff]   ;;  %v18314_v3 = vld [vmem:[#allocation2 + $0x30] sm:$0xff]  }
  0x9b   : > { %1562 = vmatmul.mubr.bf16.gmra.mrb[28].mxu0 %v18196_v35  ;;  %v3048_v35 = vrot.slane %v3046_v63, 1  ;;  %v2048_v1 = vrot.slane %v2046_v57, 1  ;;  %v2051_v15 = vshll.u32 %v17304_v48, 16 }
  0x9c   : > { %15544 = vmatpush3.bf16.msra.mxu1 %v17289_v22  ;;  %3528 = vmatprep.mubr.bf16.mxu0 %v3042_v4  ;;  %v1262_v22 = vrot.slane %v18020_v6, 1  ;;  %v3066_v6 = vsel %vm1007_vm8, %v3061_v32, %v3065_v33  ;;  %v17309_v4 = vld [vmem:[#allocation2 + $0x38] ss:$0 sps:$4 sm:$0x11]   ;;  %v2070_v33 = vshll.u32 %v18330_v23, 16 }
  0x9d   : > { %16413 = vmatprep.subr.bf16.mxu1 %v18270_v18  ;;  %v3049_v53 = vor.u32 %v3048_v35, %v3044_v62  ;;  %v18308_v62 = vld [vmem:[#allocation2 + $0x54] sm:$0xff]   ;;  %v3085_v35 = vor.u32 %v3084_v59, %v3080_v58  ;;  %v2063_v49 = vshll.u32 %v17309_v4, 16  ;;  %v17313_v32 = vld [vmem:[#allocation2 + $0x44] ss:$0 sps:$4 sm:$0x11]  }
  0x9e   : > { %v1264_v39 = vsel %vm1216_vm9, %v1262_v22, %v1263_v28  ;;  %v3094_v8 = vshll.u32 %v18308_v62, 16  ;;  %v3092_v20 = vshrl.u32 %v18308_v62, 16 }
  0x9f   : > { %16398 = vmatmul.mubr.bf16.gmra.mrb[48].mxu1 %v1246_v9  ;;  %v3054_v43 = vsel %vm1007_vm8, %v3049_v53, %v3053_v14  ;;  %v18289_v9 = vld [vmem:[#allocation2 + $0x3c] sm:$0xff]   ;;  %v2053_v53 = vrot.slane %v2051_v15, 1  ;;  %v2058_v14 = vshll.u32 %v18314_v3, 16 }
  0xa0   : > { %16401 = vmatprep.mubr.bf16.mxu1 %v1249_v30  ;;  %v2025_v30 = vor.u32 %v2024_v11, %v2020_v7  ;;  %v3070_v38 = vshll.u32 %v18289_v9, 16  ;;  %v3068_v46 = vshrl.u32 %v18289_v9, 16  ;;  %v17320_v7 = vld [vmem:[#allocation2 + $0x5c] ss:$0 sps:$4 sm:$0x11]   ;;  %v2049_v11 = vor.u32 %v2048_v1, %v2044_v61  ;;  %v18360_v1 = vld [vmem:[#allocation2 + $0x54] sm:$0xff]  }
  0xa1   : > { %v2060_v22 = vrot.slane %v2058_v14, 1  ;;  %v17334_v15 = vld [vmem:[#allocation2 + $0x80] ss:$0 sps:$4 sm:$0x11]  }
  0xa2   : > { %v3072_v40 = vrot.slane %v3070_v38, 1  ;;  %v2030_v13 = vsel %vm1007_vm8, %v2025_v30, %v2029_v29  ;;  %v2054_v21 = vsel %vm1007_vm8, %v2049_v11, %v2053_v53 }
  0xa3   : > { %3529 = vmatmul.mubr.bf16.vlgmr.msra.gmra.mrb[32].mxu0 %v17297_v27  ;;  %v2036_v27 = vrot.slane %v2034_v31, 1  ;;  %v2065_v31 = vrot.slane %v2063_v49, 1  ;;  %v18375_v49 = vld [vmem:[#allocation2 + $0x60] sm:$0xff]  }
  0xa4   : > { %3536 = vmatprep.mubr.bf16.mxu0 %v3054_v43  ;;  %v3099_v43 = vshll.u32 %v17320_v7, 16  ;;  %v17322_v7 = vld [vmem:[#allocation2 + $0x5c] ss:$0 sps:$4 sm:$0x11]  }
  0xa5   : > { %v2037_v12 = vor.u32 %v2036_v27, %v2032_v36  ;;  %v2072_v36 = vrot.slane %v2070_v33, 1  ;;  %v18348_v27 = vld [vmem:[#allocation2 + $0x48] sm:$0xff]  }
  0xa6   : > { %v3101_v30 = vrot.slane %v3099_v43, 1 }
  0xa7   : > { %16402 = vmatmul.mubr.bf16.gmra.mrb[52].mxu1 %v1252_v50  ;;  %v3073_v50 = vor.u32 %v3072_v40, %v3068_v46  ;;  %v2042_v63 = vsel %vm1007_vm8, %v2037_v12, %v2041_v56  ;;  %v3111_v46 = vshll.u32 %v17325_v54, 16  ;;  %v2075_v40 = vshll.u32 %v17313_v32, 16  ;;  %v17318_v12 = vld [vmem:[#allocation2 + $0x50] ss:$0 sps:$4 sm:$0x11]  }
  0xa8   : > { %16405 = vmatprep.mubr.bf16.mxu1 %v1255_v52  ;;  %v17316_v52 = vld [vmem:[#allocation2 + $0x50] ss:$0 sps:$4 sm:$0x11]   ;;  %v2082_v56 = vshll.u32 %v18348_v27, 16 }
  0xa9   : > { %v3087_v60 = vshll.u32 %v17316_v52, 16  ;;  %v2077_v52 = vrot.slane %v2075_v40, 1  ;;  %v18383_v32 = vld [vmem:[#allocation2 + $0x6c] sm:$0xff]   ;;  %v2104_v40 = vshrl.u32 %v18375_v49, 16 }
  0xaa   : > { %v2084_v61 = vrot.slane %v2082_v56, 1 }
  0xab   : > { %3537 = vmatmul.mubr.bf16.gmra.mrb[36].mxu0 %v17301_v51  ;;  %v3078_v51 = vsel %vm1007_vm8, %v3073_v50, %v3077_v26  ;;  %v3089_v5 = vrot.slane %v3087_v60, 1  ;;  %v3113_v50 = vrot.slane %v3111_v46, 1  ;;  %v17329_v26 = vld [vmem:[#allocation2 + $0x74] ss:$0 sps:$4 sm:$0x11]   ;;  %v18355_v60 = vld [vmem:[#allocation2 + $0x78] sm:$0xff]  }
  0xac   : > { %3544 = vmatprep.mubr.bf16.mxu0 %v3066_v6  ;;  %v3123_v59 = vshll.u32 %v17329_v26, 16  ;;  %v3128_v14 = vshrl.u32 %v18355_v60, 16 }
  0xaf   : > { %16406 = vmatmul.mubr.bf16.gmra.mrb[56].mxu1 %v1258_v0  ;;  %v18323_v0 = vld [vmem:[#allocation2 + $0x60] sm:$0xff]  }
  0xb0   : > { %16409 = vmatprep.mubr.bf16.mxu1 %v1261_v42  ;;  %v3096_v42 = vrot.slane %v3094_v8, 1  ;;  %v3106_v28 = vshll.u32 %v18323_v0, 16  ;;  %v3104_v38 = vshrl.u32 %v18323_v0, 16 }
  0xb2   : > { %v3097_v29 = vor.u32 %v3096_v42, %v3092_v20  ;;  %v3108_v6 = vrot.slane %v3106_v28, 1  ;;  %v18370_v20 = vld [vmem:[#allocation2 + $0x84] sm:$0xff]  }
  0xb3   : > { %3545 = vmatmul.mubr.bf16.gmra.mrb[40].mxu0 %v17306_v10  ;;  %v17314_v10 = vld [vmem:[%s22361_s1 + $0x150] sm:$0xff]   ;;  %v3142_v54 = vshll.u32 %v18370_v20, 16  ;;  %v17327_v28 = vld [vmem:[#allocation2 + $0x68] ss:$0 sps:$4 sm:$0x11]   ;;  %v3140_v33 = vshrl.u32 %v18370_v20, 16 }
  0xb4   : > { %3552 = vmatprep.mubr.bf16.mxu0 %v3078_v51  ;;  %v3109_v48 = vor.u32 %v3108_v6, %v3104_v38  ;;  %v2080_v51 = vshrl.u32 %v18348_v27, 16  ;;  %v18387_v6 = vld [vmem:[#allocation2 + $0x90] sm:$0xff]   ;;  %v2111_v46 = vshll.u32 %v17327_v28, 16 }
  0xb6   : > { %v3114_v58 = vsel %vm1007_vm8, %v3109_v48, %v3113_v50  ;;  %v2085_v8 = vor.u32 %v2084_v61, %v2080_v51  ;;  %v3154_v50 = vshll.u32 %v18387_v6, 16  ;;  %v2113_v26 = vrot.slane %v2111_v46, 1  ;;  %v364_v51 = vld [vmem:[%s17828_s27 + $0x78] sm:$0xf] }
  0xb7   : > { %16410 = vmatmul.mubr.bf16.gmra.mrb[60].mxu1 %v1264_v39  ;;  %v18342_v39 = vld [vmem:[#allocation2 + $0x6c] sm:$0xff]  }
  0xb8   : > { %2516 = vmatprep.mubr.bf16.mxu1 %v2030_v13  ;;  %v2068_v13 = vshrl.u32 %v18330_v23, 16  ;;  %v3118_v44 = vshll.u32 %v18342_v39, 16 }
  0xba   : > { %v2073_v55 = vor.u32 %v2072_v36, %v2068_v13  ;;  %v3120_v57 = vrot.slane %v3118_v44, 1  ;;  %v2118_v13 = vshll.u32 %v18383_v32, 16  ;;  %v17343_v36 = vld [vmem:[#allocation2 + $0x98] ss:$0 sps:$4 sm:$0x11]  }
  0xbb   : > { %3553 = vmatmul.mubr.bf16.gmra.mrb[44].mxu0 %v18289_v9 }
  0xbc   : > { %v2120_v56 = vrot.slane %v2118_v13, 1 }
  0xbf   : > { %2517 = vmatmul.mubr.bf16.vlgmr.msra.gmra.mrb[64].mxu1 %v18272_v45  ;;  %v3090_v45 = vsel %vm1007_vm8, %v3085_v35, %v3089_v5  ;;  %v3125_v35 = vrot.slane %v3123_v59, 1  ;;  %v3130_v5 = vshll.u32 %v18355_v60, 16  ;;  %v18400_v59 = vld [vmem:[#allocation2 + $0x80] ss:$0 sps:$4 sm:$0x11]  }
  0xc0   : > { %16414 = vmatpush3.bf16.msra.mxu1 %v18270_v18  ;;  %2524 = vmatprep.mubr.bf16.mxu1 %v2042_v63  ;;  %v2056_v18 = vshrl.u32 %v18314_v3, 16  ;;  %v2087_v63 = vshll.u32 %v17318_v12, 16  ;;  %v2116_v12 = vshrl.u32 %v18383_v32, 16 }
  0xc1   : > { %16415 = vmatprep.subr.bf16.mxu1 %v17305_v2  ;;  %3560 = vmatprep.mubr.bf16.mxu0 %v3090_v45  ;;  %v3135_v45 = vshll.u32 %v17334_v15, 16  ;;  %v18408_v15 = vld [vmem:[#allocation2 + $0x78] sm:$0xff]  }
  0xc2   : > { %v2061_v9 = vor.u32 %v2060_v22, %v2056_v18  ;;  %v2089_v11 = vrot.slane %v2087_v63, 1  ;;  %v2099_v18 = vshll.u32 %v17322_v7, 16 }
  0xc3   : > { %3561 = vmatmul.mubr.bf16.gmra.mrb[48].mxu0 %v18297_v34  ;;  %v3116_v34 = vshrl.u32 %v18342_v39, 16 }
  0xc4   : > { %16416 = vmatpush3.bf16.msra.mxu1 %v17305_v2  ;;  %v2066_v41 = vsel %vm1007_vm8, %v2061_v9, %v2065_v31  ;;  %v17341_v2 = vld [vmem:[%s22361_s1 + $0x168] sm:$0xff]   ;;  %v2090_v42 = vsel %vm1007_vm8, %v2085_v8, %v2089_v11  ;;  %v2101_v31 = vrot.slane %v2099_v18, 1  ;;  %v17331_v9 = vld [vmem:[#allocation2 + $0x74] ss:$0 sps:$4 sm:$0x11]   ;;  %v18414_v11 = vld [vmem:[%s22361_s1 + $0x200] sm:$0xff]  }
  0xc5   : > { %16417 = vmatprep.subr.bf16.mxu1 %v17314_v10  ;;  %v3121_v4 = vor.u32 %v3120_v57, %v3116_v34  ;;  %v3159_v34 = vshll.u32 %v17343_v36, 16 }
  0xc7   : > { %2525 = vmatmul.mubr.bf16.gmra.mrb[68].mxu1 %v18284_v16  ;;  %v3102_v16 = vsel %vm1007_vm8, %v3097_v29, %v3101_v30  ;;  %v3126_v53 = vsel %vm1007_vm8, %v3121_v4, %v3125_v35  ;;  %v17350_v29 = vld [vmem:[%s22361_s1 + $0x170] sm:$0xff]   ;;  %v625_v4 = vshrl.u32 %v364_v51, 16  ;;  %v628_v35 = vshll.u32 %v364_v51, 16 }
  0xc8   : > { %2532 = vmatprep.mubr.bf16.mxu1 %v2054_v21  ;;  %16418 = vmatpush3.bf16.msra.mxu1 %v17314_v10  ;;  %v3132_v10 = vrot.slane %v3130_v5, 1  ;;  %v17338_v21 = vld [vmem:[#allocation2 + $0x8c] ss:$0 sps:$4 sm:$0x11]  }
  0xc9   : > { %16419 = vmatprep.subr.bf16.mxu1 %v17323_v25  ;;  %3568 = vmatprep.mubr.bf16.mxu0 %v3102_v16  ;;  %v3147_v38 = vshll.u32 %v17338_v21, 16  ;;  %v17347_v5 = vld [vmem:[#allocation2 + $0xa4] ss:$0 sps:$4 sm:$0x11]  }
  0xca   : > { %v3133_v22 = vor.u32 %v3132_v10, %v3128_v14  ;;  %v627_v14 = vrot.slane %v625_v4, 7  ;;  %v801_v10 = vld [vmem:[#allocation2 + $0xc0] sm:$0xf] }
  0xcb   : > { %3569 = vmatmul.mubr.bf16.gmra.mrb[52].mxu0 %v18308_v62  ;;  %v2094_v62 = vshll.u32 %v18360_v1, 16  ;;  %v3149_v48 = vrot.slane %v3147_v38, 1 }
  0xcc   : > { %16420 = vmatpush3.bf16.msra.mxu1 %v17323_v25  ;;  %3576 = vmatprep.mubr.bf16.mxu0 %v3114_v58  ;;  %v3137_v25 = vrot.slane %v3135_v45, 1  ;;  %v3156_v58 = vrot.slane %v3154_v50, 1  ;;  %v2128_v45 = vshrl.u32 %v18408_v15, 16  ;;  %v630_v18 = vor.u32 %v628_v35, %v627_v14  ;;  %v18444_v50 = vld [vmem:[#allocation2 + $0x90] sm:$0xff]  }
  0xcd   : > { %16421 = vmatprep.subr.bf16.mxu1 %v17332_v37  ;;  %v2096_v43 = vrot.slane %v2094_v62, 1  ;;  %v631_v21 = vrot.slane %v627_v14, 4  ;;  %v18468_v14 = vld [vmem:[#allocation2 + $0xb0] ss:$0 sps:$4 sm:$0x11]  }
  0xcf   : > { %2533 = vmatmul.mubr.bf16.gmra.mrb[72].mxu1 %v18301_v47  ;;  %v2078_v47 = vsel %vm1007_vm8, %v2073_v55, %v2077_v52  ;;  %v2123_v52 = vshll.u32 %v17331_v9, 16  ;;  %v3171_v9 = vshll.u32 %v17347_v5, 16 }
  0xd0   : > { %2540 = vmatprep.mubr.bf16.mxu1 %v2066_v41  ;;  %16422 = vmatpush3.bf16.msra.mxu1 %v17332_v37  ;;  %v3144_v37 = vrot.slane %v3142_v54, 1 }
  0xd1   : > { %16423 = vmatprep.subr.bf16.mxu1 %v17341_v2  ;;  %v2125_v63 = vrot.slane %v2123_v52, 1  ;;  %v3173_v36 = vrot.slane %v3171_v9, 1 }
  0xd2   : > { %v3145_v44 = vor.u32 %v3144_v37, %v3140_v33  ;;  %v802_v33 = vsel %vm17856_vm7, %v630_v18, %v801_v10  ;;  %v18472_v18 = vld [vmem:[#allocation2 + $0xcc] sm:$0xff]   ;;  %vm19057_vm7 = vmand %vm6038_vm2, %vm691_vm6 }
  0xd3   : > { %3577 = vmatmul.mubr.bf16.gmra.mrb[56].mxu0 %v18323_v0  ;;  %v2106_v0 = vshll.u32 %v18375_v49, 16  ;;  %803 = vst [vmem:[#allocation2 + $0xc0] sm:$0xf] %v802_v33 }
  0xd4   : > { %16424 = vmatpush3.bf16.msra.mxu1 %v17341_v2  ;;  %3584 = vmatprep.mubr.bf16.mxu0 %v3126_v53  ;;  %v3150_v57 = vsel %vm1007_vm8, %v3145_v44, %v3149_v48  ;;  %v365_v2 = vld [vmem:[%s17828_s27 + $0x7c] sm:$0xf]  ;;  %v3161_v53 = vrot.slane %v3159_v34, 1  ;;  %v18442_v48 = vld [vmem:[#allocation2 + $0x98] ss:$0 sps:$4 sm:$0x11]  }
  0xd5   : > { %16425 = vmatprep.subr.bf16.mxu1 %v17350_v29  ;;  %v2108_v41 = vrot.slane %v2106_v0, 1  ;;  %v633_v7 = vshrl.u32 %v365_v2, 16  ;;  %v636_v8 = vshll.u32 %v365_v2, 16  ;;  %v3183_v34 = vshll.u32 %v17352_v24, 16 }
  0xd7   : > { %2541 = vmatmul.mubr.bf16.gmra.mrb[76].mxu1 %v18314_v3  ;;  %v2092_v3 = vshrl.u32 %v18360_v1, 16  ;;  %v2109_v55 = vor.u32 %v2108_v41, %v2104_v40  ;;  %v18436_v40 = vld [vmem:[#allocation2 + $0x8c] ss:$0 sps:$4 sm:$0x11]  }
  0xd8   : > { %2548 = vmatprep.mubr.bf16.mxu1 %v2078_v47  ;;  %16426 = vmatpush3.bf16.msra.mxu1 %v17350_v29  ;;  %v17359_v47 = vld [vmem:[%s22361_s1 + $0x178] sm:$0xff]   ;;  %v2147_v52 = vshll.u32 %v18436_v40, 16 }
  0xd9   : > { %v2097_v30 = vor.u32 %v2096_v43, %v2092_v3  ;;  %v2114_v61 = vsel %vm1007_vm8, %v2109_v55, %v2113_v26  ;;  %16427 = vmatprep.subr.bf16.mxu1 %v17359_v47  ;;  %v635_v3 = vrot.slane %v633_v7, 7  ;;  %v2130_v43 = vshll.u32 %v18408_v15, 16  ;;  %v18446_v26 = vld [vmem:[#allocation2 + $0xa4] ss:$0 sps:$4 sm:$0x11]   ;;  %v18449_v55 = vld [vmem:[#allocation2 + $0x9c] sm:$0xff]  }
  0xda   : > { %v2149_v51 = vrot.slane %v2147_v52, 1  ;;  %v2166_v4 = vshll.u32 %v18449_v55, 16  ;;  %v2171_v35 = vshll.u32 %v18446_v26, 16  ;;  %v3185_v7 = vrot.slane %v3183_v34, 1 }
  0xdb   : > { %v2102_v16 = vsel %vm1007_vm8, %v2097_v30, %v2101_v31  ;;  %3585 = vmatmul.mubr.bf16.gmra.mrb[60].mxu0 %v18342_v39  ;;  %v3152_v39 = vshrl.u32 %v18387_v6, 16  ;;  %v638_v28 = vor.u32 %v636_v8, %v635_v3  ;;  %v640_v29 = vrot.slane %v635_v3, 4  ;;  %v18423_v30 = vld [vmem:[#allocation2 + $0x84] sm:$0xff]   ;;  %v17356_v8 = vld [vmem:[#allocation2 + $0xbc] ss:$0 sps:$4 sm:$0x11]  }
  0xdc   : > { %16428 = vmatpush3.bf16.msra.mxu1 %v17359_v47  ;;  %v2142_v44 = vshll.u32 %v18423_v30, 16  ;;  %v17365_v3 = vld [vmem:[#allocation2 + $0xd4] ss:$0 sps:$4 sm:$0x11]   ;;  %v2173_v9 = vrot.slane %v2171_v35, 1 }
  0xdd   : > { %v3157_v62 = vor.u32 %v3156_v58, %v3152_v39  ;;  %16461 = vmatprep.subr.bf16.mxu1 %v18414_v11  ;;  %v639_v37 = vsel %vm17847_vm5, %v631_v21, %v638_v28  ;;  %v18489_v52 = vld [vmem:[#allocation2 + $0xbc] ss:$0 sps:$4 sm:$0x11]  }
  0xde   : > { %804 = vst.msk [vmem:[#allocation2 + $0xc4] sm:$0xf] %vm690_vm1, %v639_v37  ;;  %v2144_v58 = vrot.slane %v2142_v44, 1  ;;  %v2183_v37 = vshll.u32 %v18468_v14, 16  ;;  %v2195_v35 = vshll.u32 %v18489_v52, 16  ;;  %vm5957_vm1 = vcmask 1045509  }
  0xdf   : > { %2549 = vmatmul.mubr.bf16.gmra.mrb[80].mxu1 %v18330_v23  ;;  %v3138_v23 = vsel %vm1007_vm8, %v3133_v22, %v3137_v25  ;;  %v805_v22 = vld [vmem:[#allocation2 + $0xc8] sm:$0x1]  ;;  %v2135_v25 = vshll.u32 %v18400_v59, 16  ;;  %v3162_v31 = vsel %vm1007_vm8, %v3157_v62, %v3161_v53 }
  0xe0   : > { %2556 = vmatprep.mubr.bf16.mxu1 %v2090_v42  ;;  %3592 = vmatprep.mubr.bf16.mxu0 %v3138_v23  ;;  %v2121_v42 = vor.u32 %v2120_v56, %v2116_v12  ;;  %v18426_v23 = vld [vmem:[#allocation2 + $0xa8] sm:$0xff]   ;;  %v806_v38 = vsel %vm17839_vm4, %v640_v29, %v805_v22  ;;  %v18452_v12 = vld [vmem:[#allocation2 + $0xb4] sm:$0xff]   ;;  %vm5961_vm4 = vcmask 1047559  }
  0xe1   : > { %807 = vst [vmem:[#allocation2 + $0xc8] sm:$0x1] %v806_v38  ;;  %v2137_v41 = vrot.slane %v2135_v25, 1  ;;  %v3178_v17 = vshll.u32 %v18426_v23, 16  ;;  %v3190_v2 = vshll.u32 %v18452_v12, 16  ;;  %v3188_v10 = vshrl.u32 %v18452_v12, 16 }
  0xe2   : > { %v2126_v46 = vsel %vm1007_vm8, %v2121_v42, %v2125_v63  ;;  %v2159_v63 = vshll.u32 %v18442_v48, 16 }
  0xe3   : > { %3593 = vmatmul.mubr.bf16.gmra.mrb[64].mxu0 %v18355_v60  ;;  %v3180_v39 = vrot.slane %v3178_v17, 1 }
  0xe4   : > { %3600 = vmatprep.mubr.bf16.mxu0 %v3150_v57  ;;  %v2140_v57 = vshrl.u32 %v18423_v30, 16  ;;  %v2161_v29 = vrot.slane %v2159_v63, 1 }
  0xe6   : > { %v2145_v62 = vor.u32 %v2144_v58, %v2140_v57 }
  0xe7   : > { %2557 = vmatmul.mubr.bf16.gmra.mrb[84].mxu1 %v18348_v27  ;;  %v18398_v27 = vld [vmem:[#allocation2 + $0x9c] sm:$0xff]  }
  0xe8   : > { %2564 = vmatprep.mubr.bf16.mxu1 %v2102_v16  ;;  %v3166_v60 = vshll.u32 %v18398_v27, 16  ;;  %v3164_v54 = vshrl.u32 %v18398_v27, 16  ;;  %v2132_v16 = vrot.slane %v2130_v43, 1  ;;  %v17361_v53 = vld [vmem:[#allocation2 + $0xc8] ss:$0 sps:$4 sm:$0x11]   ;;  %v2150_v21 = vsel %vm1007_vm8, %v2145_v62, %v2149_v51 }
  0xe9   : > { %v3195_v43 = vshll.u32 %v17356_v8, 16  ;;  %v3207_v25 = vshll.u32 %v17361_v53, 16  ;;  %v3212_v51 = vshrl.u32 %v18472_v18, 16  ;;  %v18503_v53 = vld [vmem:[#allocation2 + $0xc0] sm:$0xff]  }
  0xea   : > { %v3168_v0 = vrot.slane %v3166_v60, 1  ;;  %v18466_v60 = vld [vmem:[#allocation2 + $0xa8] sm:$0xff]  }
  0xeb   : > { %3601 = vmatmul.mubr.bf16.gmra.mrb[68].mxu0 %v18370_v20  ;;  %v2133_v20 = vor.u32 %v2132_v16, %v2128_v45  ;;  %v3192_v45 = vrot.slane %v3190_v2, 1  ;;  %v2178_v33 = vshll.u32 %v18466_v60, 16  ;;  %v3214_v16 = vshll.u32 %v18472_v18, 16 }
  0xec   : > { %3608 = vmatprep.mubr.bf16.mxu0 %v3162_v31  ;;  %v3169_v13 = vor.u32 %v3168_v0, %v3164_v54  ;;  %v2152_v54 = vshrl.u32 %v18444_v50, 16  ;;  %v2164_v31 = vshrl.u32 %v18449_v55, 16  ;;  %v2168_v0 = vrot.slane %v2166_v4, 1 }
  0xed   : > { %v2138_v47 = vsel %vm1007_vm8, %v2133_v20, %v2137_v41  ;;  %v3193_v38 = vor.u32 %v3192_v45, %v3188_v10  ;;  %v18487_v20 = vld [vmem:[#allocation2 + $0xb4] sm:$0xff]   ;;  %v2176_v34 = vshrl.u32 %v18466_v60, 16  ;;  %v2180_v58 = vrot.slane %v2178_v33, 1  ;;  %v18506_v10 = vld [vmem:[#allocation2 + $0xc8] ss:$0 sps:$4 sm:$0x11]  }
  0xee   : > { %v3174_v56 = vsel %vm1007_vm8, %v3169_v13, %v3173_v36  ;;  %v3219_v13 = vshll.u32 %v17365_v3, 16  ;;  %v2185_v2 = vrot.slane %v2183_v37, 1  ;;  %v2190_v4 = vshll.u32 %v18487_v20, 16 }
  0xef   : > { %2565 = vmatmul.mubr.bf16.gmra.mrb[88].mxu1 %v18360_v1  ;;  %v2181_v3 = vor.u32 %v2180_v58, %v2176_v34 }
  0xf0   : > { %2572 = vmatprep.mubr.bf16.mxu1 %v2114_v61  ;;  %v2154_v61 = vshll.u32 %v18444_v50, 16  ;;  %v3221_v8 = vrot.slane %v3219_v13, 1 }
  0xf2   : > { %v2156_v28 = vrot.slane %v2154_v61, 1 }
  0xf3   : > { %3609 = vmatmul.mubr.bf16.gmra.mrb[72].mxu0 %v18387_v6  ;;  %v18464_v6 = vld [vmem:[#allocation2 + $0xc0] sm:$0xff]  }
  0xf4   : > { %3616 = vmatprep.mubr.bf16.mxu0 %v3174_v56  ;;  %v3202_v22 = vshll.u32 %v18464_v6, 16  ;;  %v3200_v41 = vshrl.u32 %v18464_v6, 16  ;;  %v2157_v36 = vor.u32 %v2156_v28, %v2152_v54  ;;  %v2169_v56 = vor.u32 %v2168_v0, %v2164_v31 }
  0xf5   : > { %v2192_v54 = vrot.slane %v2190_v4, 1  ;;  %v2197_v28 = vrot.slane %v2195_v35, 1  ;;  %v2186_v0 = vsel %vm1007_vm8, %v2181_v3, %v2185_v2  ;;  %v17664_v35 = vld [vmem:[#allocation2 + $0x18] sm:$0xff]  }
  0xf6   : > { %v3204_v24 = vrot.slane %v3202_v22, 1  ;;  %v2162_v44 = vsel %vm1007_vm8, %v2157_v36, %v2161_v29  ;;  %v2202_v29 = vshll.u32 %v18503_v53, 16 }
  0xf7   : > { %2573 = vmatmul.mubr.bf16.gmra.mrb[92].mxu1 %v18375_v49  ;;  %v3176_v49 = vshrl.u32 %v18426_v23, 16 }
  0xf8   : > { %2580 = vmatprep.mubr.bf16.mxu1 %v2126_v46  ;;  %v3197_v46 = vrot.slane %v3195_v43, 1 }
  0xf9   : > { %v3181_v5 = vor.u32 %v3180_v39, %v3176_v49  ;;  %v3205_v49 = vor.u32 %v3204_v24, %v3200_v41  ;;  %v2200_v24 = vshrl.u32 %v18503_v53, 16 }
  0xfa   : > { %v3198_v17 = vsel %vm1007_vm8, %v3193_v38, %v3197_v46 }
  0xfb   : > { %v3186_v42 = vsel %vm1007_vm8, %v3181_v5, %v3185_v7  ;;  %3617 = vmatmul.mubr.bf16.gmra.mrb[76].mxu0 %v18398_v27  ;;  %v3209_v27 = vrot.slane %v3207_v25, 1  ;;  %v2174_v7 = vsel %vm1007_vm8, %v2169_v56, %v2173_v9  ;;  %v2207_v9 = vshll.u32 %v18506_v10, 16 }
  0xfc   : > { %3624 = vmatprep.mubr.bf16.mxu0 %v3186_v42 }
  0xfd   : > { %v2209_v36 = vrot.slane %v2207_v9, 1 }
  0xff   : > { %2581 = vmatmul.mubr.bf16.gmra.mrb[96].mxu1 %v18383_v32 }
 0x100   : > { %2588 = vmatprep.mubr.bf16.mxu1 %v2138_v47  ;;  %v3210_v47 = vsel %vm1007_vm8, %v3205_v49, %v3209_v27  ;;  %v2204_v27 = vrot.slane %v2202_v29, 1 }
 0x103   : > { %3625 = vmatmul.mubr.bf16.gmra.mrb[80].mxu0 %v18426_v23  ;;  %v3216_v23 = vrot.slane %v3214_v16, 1 }
 0x104   : > { %3632 = vmatprep.mubr.bf16.mxu0 %v3198_v17 }
 0x105   : > { %v3217_v45 = vor.u32 %v3216_v23, %v3212_v51  ;;  %v17663_v23 = vld [vmem:[#allocation2 + $0x14] ss:$0 sps:$4 sm:$0x11]  }
 0x107   : > { %2589 = vmatmul.mubr.bf16.gmra.mrb[100].mxu1 %v18408_v15  ;;  %v3222_v22 = vsel %vm1007_vm8, %v3217_v45, %v3221_v8 }
 0x108   : > { %2596 = vmatprep.mubr.bf16.mxu1 %v2150_v21  ;;  %v2188_v21 = vshrl.u32 %v18487_v20, 16 }
 0x10a   : > { %v2193_v37 = vor.u32 %v2192_v54, %v2188_v21 }
 0x10b   : > { %3633 = vmatmul.mubr.bf16.gmra.mrb[84].mxu0 %v18452_v12 }
 0x10c   : > { %3640 = vmatprep.mubr.bf16.mxu0 %v3210_v47 }
 0x10f   : > { %2597 = vmatmul.mubr.bf16.gmra.mrb[104].mxu1 %v18423_v30 }
 0x110   : > { %2604 = vmatprep.mubr.bf16.mxu1 %v2162_v44  ;;  %v2205_v44 = vor.u32 %v2204_v27, %v2200_v24  ;;  %v17669_v27 = vld [vmem:[#allocation2 + $0x38] ss:$0 sps:$4 sm:$0x11]  }
 0x112   : > { %v15457_v39 = vpop.f32.mrb[0].mxu1  ;;  %v2210_v51 = vsel %vm1007_vm8, %v2205_v44, %v2209_v36  ;;  %v17367_v36 = vld [vmem:[%s22361_s1 + $0x208] sm:$0xff]   ;;  %v17670_v44 = vld [vmem:[#allocation2 + $0x3c] sm:$0xff]  }
 0x113   : > { %v15458_v57 = vpop.f32.mrb[1].mxu1  ;;  %3641 = vmatmul.mubr.bf16.gmra.mrb[88].mxu0 %v18464_v6  ;;  %v2198_v6 = vsel %vm1007_vm8, %v2193_v37, %v2197_v28  ;;  %v17668_v37 = vld [vmem:[#allocation2 + $0x30] sm:$0xff]  }
 0x114   : > { %v18495_v61 = vadd.f32 %v15458_v57, %v15457_v39  ;;  %v15460_v63 = vpop.f32.mrb[2].mxu1  ;;  %3648 = vmatprep.mubr.bf16.mxu0 %v3222_v22  ;;  %v17662_v57 = vld [vmem:[#allocation2 + $0xc] sm:$0xff]  }
 0x115   : > { %v15461_v5 = vpop.f32.mrb[3].mxu1  ;;  %v2227_v58 = vrot.slane %v17662_v57, 1  ;;  %v17667_v22 = vld [vmem:[#allocation2 + $0x2c] ss:$0 sps:$4 sm:$0x11]  }
 0x116   : > { %v18501_v62 = vadd.f32 %v15461_v5, %v15460_v63  ;;  %v2228_v63 = vrot.slane %v17663_v23, 1  ;;  %v2230_v5 = vrot.slane %v17664_v35, 1  ;;  %v17368_v35 = vld [vmem:[%s22361_s1 + $0x210] sm:$0xff]  }
 0x117   : > { %2605 = vmatmul.mubr.bf16.gmra.mrb[108].mxu1 %v18444_v50 }
 0x118   : > { %2612 = vmatprep.mubr.bf16.mxu1 %v2174_v7  ;;  %v17665_v7 = vld [vmem:[#allocation2 + $0x20] ss:$0 sps:$4 sm:$0x11]   ;;  %v2229_v29 = vsel %vm1216_vm9, %v2227_v58, %v2228_v63  ;;  %v17671_v58 = vld [vmem:[#allocation2 + $0x44] ss:$0 sps:$4 sm:$0x11]  }
 0x119   : > { %v2231_v8 = vrot.slane %v17665_v7, 1  ;;  %v17672_v63 = vld [vmem:[#allocation2 + $0x48] sm:$0xff]  }
 0x11a   : > { %v15463_v42 = vpop.f32.mrb[4].mxu1 }
 0x11b   : > { %v15464_v43 = vpop.f32.mrb[5].mxu1  ;;  %3649 = vmatmul.mubr.bf16.gmra.mrb[92].mxu0 %v18472_v18  ;;  %v2232_v57 = vsel %vm1216_vm9, %v2230_v5, %v2231_v8  ;;  %v17673_v5 = vld [vmem:[#allocation2 + $0x50] ss:$0 sps:$4 sm:$0x11]  }
 0x11c   : > { %v18510_v12 = vadd.f32 %v15464_v43, %v15463_v42  ;;  %v15466_v25 = vpop.f32.mrb[6].mxu1  ;;  %v17666_v43 = vld [vmem:[#allocation2 + $0x24] sm:$0xff]   ;;  %v2243_v8 = vrot.slane %v17673_v5, 1 }
 0x11d   : > { %v15467_v31 = vpop.f32.mrb[7].mxu1  ;;  %v2233_v21 = vrot.slane %v17666_v43, 1  ;;  %v17369_v43 = vld [vmem:[%s22361_s1 + $0x218] sm:$0xff]  }
 0x11e   : > { %v18516_v33 = vadd.f32 %v15467_v31, %v15466_v25  ;;  %v2234_v25 = vrot.slane %v17667_v22, 1 }
 0x11f   : > { %2613 = vmatmul.mubr.bf16.gmra.mrb[112].mxu1 %v18449_v55 }
 0x120   : > { %2620 = vmatprep.mubr.bf16.mxu1 %v2186_v0  ;;  %v2235_v23 = vsel %vm1216_vm9, %v2233_v21, %v2234_v25 }
 0x122   : > { %v15469_v38 = vpop.f32.mrb[8].mxu1 }
 0x123   : > { %v15470_v46 = vpop.f32.mrb[9].mxu1 }
 0x124   : > { %v18519_v16 = vadd.f32 %v15470_v46, %v15469_v38  ;;  %v15472_v41 = vpop.f32.mrb[10].mxu1  ;;  %v2236_v38 = vrot.slane %v17668_v37, 1  ;;  %v17674_v37 = vld [vmem:[#allocation2 + $0x5c] ss:$0 sps:$4 sm:$0x11]  }
 0x125   : > { %v15473_v13 = vpop.f32.mrb[11].mxu1 }
 0x126   : > { %v18524_v17 = vadd.f32 %v15473_v13, %v15472_v41  ;;  %v2237_v13 = vrot.slane %v17669_v27, 1  ;;  %v17370_v27 = vld [vmem:[%s22361_s1 + $0x220] sm:$0xff]  }
 0x127   : > { %2621 = vmatmul.mubr.bf16.gmra.mrb[116].mxu1 %v18466_v60 }
 0x128   : > { %2628 = vmatprep.mubr.bf16.mxu1 %v2198_v6  ;;  %v2238_v25 = vsel %vm1216_vm9, %v2236_v38, %v2237_v13 }
 0x12a   : > { %v15475_v49 = vpop.f32.mrb[12].mxu1 }
 0x12b   : > { %v15476_v56 = vpop.f32.mrb[13].mxu1 }
 0x12c   : > { %v18527_v39 = vadd.f32 %v15476_v56, %v15475_v49  ;;  %v15478_v34 = vpop.f32.mrb[14].mxu1  ;;  %v2239_v49 = vrot.slane %v17670_v44, 1  ;;  %v17675_v44 = vld [vmem:[#allocation2 + $0x60] sm:$0xff]  }
 0x12d   : > { %v15479_v47 = vpop.f32.mrb[15].mxu1  ;;  %v15409_v45 = vpop.f32.mrb[0].mxu0 }
 0x12e   : > { %v18530_v2 = vadd.f32 %v15479_v47, %v15478_v34  ;;  %v15410_v54 = vpop.f32.mrb[1].mxu0  ;;  %v2240_v47 = vrot.slane %v17671_v58, 1 }
 0x12f   : > { %2629 = vmatmul.mubr.bf16.gmra.mrb[120].mxu1 %v18487_v20  ;;  %v18536_v31 = vadd.f32 %v15410_v54, %v15409_v45  ;;  %v15412_v0 = vpop.f32.mrb[2].mxu0 }
 0x130   : > { %2636 = vmatprep.mubr.bf16.mxu1 %v2210_v51  ;;  %v15413_v46 = vpop.f32.mrb[3].mxu0 }
 0x131   : > { %v18541_v41 = vadd.f32 %v15413_v46, %v15412_v0 }
 0x132   : > { %v15481_v18 = vpop.f32.mrb[16].mxu1 }
 0x133   : > { %v15482_v4 = vpop.f32.mrb[17].mxu1 }
 0x134   : > { %v18533_v3 = vadd.f32 %v15482_v4, %v15481_v18  ;;  %v15484_v42 = vpop.f32.mrb[18].mxu1  ;;  %v2242_v18 = vrot.slane %v17672_v63, 1 }
 0x135   : > { %v15485_v28 = vpop.f32.mrb[19].mxu1 }
 0x136   : > { %v18538_v9 = vadd.f32 %v15485_v28, %v15484_v42  ;;  %v2245_v42 = vrot.slane %v18360_v1, 1  ;;  %v2241_v28 = vsel %vm1216_vm9, %v2239_v49, %v2240_v47  ;;  %v2246_v1 = vrot.slane %v17674_v37, 1 }
 0x137   : > { %2637 = vmatmul.mubr.bf16.gmra.mrb[124].mxu1 %v18503_v53  ;;  %v2248_v49 = vrot.slane %v17675_v44, 1  ;;  %v2244_v47 = vsel %vm1216_vm9, %v2242_v18, %v2243_v8  ;;  %v2261_v44 = vrot.slane %v18442_v48, 1 }
 0x138   : > { %16429 = vmatprep.mubr.bf16.mxu1 %v2229_v29 }
 0x13a   : > { %v15487_v24 = vpop.f32.mrb[20].mxu1 }
 0x13b   : > { %v15488_v6 = vpop.f32.mrb[21].mxu1 }
 0x13c   : > { %v18546_v56 = vadd.f32 %v15488_v6, %v15487_v24  ;;  %v15490_v34 = vpop.f32.mrb[22].mxu1 }
 0x13d   : > { %v15491_v51 = vpop.f32.mrb[23].mxu1  ;;  %v15415_v54 = vpop.f32.mrb[4].mxu0 }
 0x13e   : > { %v18550_v4 = vadd.f32 %v15491_v51, %v15490_v34  ;;  %v15416_v29 = vpop.f32.mrb[5].mxu0  ;;  %v17371_v34 = vld [vmem:[%s22361_s1 + $0x228] sm:$0xff]  }
 0x13f   : > { %16430 = vmatmul.mubr.bf16.vlgmr.msra.gmra.mrb[32].mxu1 %v2232_v57  ;;  %v18566_v46 = vadd.f32 %v15416_v29, %v15415_v54  ;;  %v15418_v24 = vpop.f32.mrb[6].mxu0  ;;  %v17676_v51 = vld [vmem:[#allocation2 + $0x68] ss:$0 sps:$4 sm:$0x11]   ;;  %v2255_v54 = vrot.slane %v18400_v59, 1  ;;  %v2258_v59 = vrot.slane %v18436_v40, 1 }
 0x140   : > { %16462 = vmatpush3.bf16.msra.mxu1 %v18414_v11  ;;  %16433 = vmatprep.mubr.bf16.mxu1 %v2235_v23  ;;  %v15419_v38 = vpop.f32.mrb[7].mxu0  ;;  %v2249_v23 = vrot.slane %v17676_v51, 1  ;;  %v2263_v40 = vrot.slane %v18449_v55, 1  ;;  %v2269_v55 = vrot.slane %v18487_v20, 1  ;;  %v17678_v20 = vld [vmem:[#allocation2 + $0x18] sm:$0xff]  }
 0x141   : > { %16463 = vmatprep.subr.bf16.mxu1 %v17367_v36  ;;  %v18571_v13 = vadd.f32 %v15419_v38, %v15418_v24  ;;  %v2260_v38 = vrot.slane %v18444_v50, 1  ;;  %v2264_v50 = vrot.slane %v18446_v26, 1 }
 0x142   : > { %v15493_v7 = vpop.f32.mrb[24].mxu1  ;;  %v2250_v37 = vsel %vm1216_vm9, %v2248_v49, %v2249_v23  ;;  %v2266_v23 = vrot.slane %v18466_v60, 1 }
 0x143   : > { %v15494_v45 = vpop.f32.mrb[25].mxu1 }
 0x144   : > { %v18560_v21 = vadd.f32 %v15494_v45, %v15493_v7  ;;  %v15496_v22 = vpop.f32.mrb[26].mxu1  ;;  %16464 = vmatpush3.bf16.msra.mxu1 %v17367_v36  ;;  %v2251_v7 = vrot.slane %v18383_v32, 1  ;;  %v17372_v45 = vld [vmem:[%s22361_s1 + $0x230] sm:$0xff]  }
 0x145   : > { %v15497_v11 = vpop.f32.mrb[27].mxu1  ;;  %16465 = vmatprep.subr.bf16.mxu1 %v17368_v35 }
 0x146   : > { %v18564_v0 = vadd.f32 %v15497_v11, %v15496_v22  ;;  %v15421_v22 = vpop.f32.mrb[8].mxu0 }
 0x147   : > { %16434 = vmatmul.mubr.bf16.gmra.mrb[36].mxu1 %v2238_v25  ;;  %v17677_v25 = vld [vmem:[#allocation2 + $0x74] ss:$0 sps:$4 sm:$0x11]   ;;  %v15422_v8 = vpop.f32.mrb[9].mxu0 }
 0x148   : > { %16437 = vmatprep.mubr.bf16.mxu1 %v2241_v28  ;;  %16466 = vmatpush3.bf16.msra.mxu1 %v17368_v35  ;;  %v2247_v35 = vsel %vm1216_vm9, %v2245_v42, %v2246_v1  ;;  %v2252_v18 = vrot.slane %v17677_v25, 1  ;;  %v18587_v42 = vadd.f32 %v15422_v8, %v15421_v22  ;;  %v15424_v32 = vpop.f32.mrb[10].mxu0  ;;  %v17373_v28 = vld [vmem:[%s22361_s1 + $0x238] sm:$0xff]   ;;  %v2265_v25 = vsel %vm1216_vm9, %v2263_v40, %v2264_v50 }
 0x149   : > { %16467 = vmatprep.subr.bf16.mxu1 %v17369_v43  ;;  %v15425_v11 = vpop.f32.mrb[11].mxu0  ;;  %v2272_v8 = vrot.slane %v18503_v53, 1 }
 0x14a   : > { %v15499_v6 = vpop.f32.mrb[28].mxu1  ;;  %v18593_v29 = vadd.f32 %v15425_v11, %v15424_v32  ;;  %v2253_v1 = vsel %vm1216_vm9, %v2251_v7, %v2252_v18  ;;  %v2270_v18 = vrot.slane %v18489_v52, 1  ;;  %v2273_v32 = vrot.slane %v18506_v10, 1 }
 0x14b   : > { %v15500_v36 = vpop.f32.mrb[29].mxu1 }
 0x14c   : > { %v18576_v57 = vadd.f32 %v15500_v36, %v15499_v6  ;;  %v15502_v58 = vpop.f32.mrb[30].mxu1  ;;  %16468 = vmatpush3.bf16.msra.mxu1 %v17369_v43  ;;  %v2254_v43 = vrot.slane %v18408_v15, 1  ;;  %v2257_v15 = vrot.slane %v18423_v30, 1 }
 0x14d   : > { %v15503_v63 = vpop.f32.mrb[31].mxu1  ;;  %16469 = vmatprep.subr.bf16.mxu1 %v17370_v27 }
 0x14e   : > { %v18581_v5 = vadd.f32 %v15503_v63, %v15502_v58  ;;  %v15427_v24 = vpop.f32.mrb[12].mxu0  ;;  %v2259_v30 = vsel %vm1216_vm9, %v2257_v15, %v2258_v59  ;;  %v17679_v15 = vld [vmem:[#allocation2 + $0x20] ss:$0 sps:$4 sm:$0x11]   ;;  %v17680_v59 = vld [vmem:[#allocation2 + $0x24] sm:$0xff]  }
 0x14f   : > { %16438 = vmatmul.mubr.bf16.gmra.mrb[40].mxu1 %v2244_v47 }
 0x150   : > { %16441 = vmatprep.mubr.bf16.mxu1 %v2247_v35  ;;  %16470 = vmatpush3.bf16.msra.mxu1 %v17370_v27  ;;  %v15428_v27 = vpop.f32.mrb[13].mxu0  ;;  %v2267_v35 = vrot.slane %v18468_v14, 1 }
 0x151   : > { %16471 = vmatprep.subr.bf16.mxu1 %v17371_v34  ;;  %v18600_v6 = vadd.f32 %v15428_v27, %v15427_v24  ;;  %v15430_v36 = vpop.f32.mrb[14].mxu0  ;;  %v3240_v24 = vrot.slane %v17679_v15, 1  ;;  %v3242_v27 = vrot.slane %v17680_v59, 1 }
 0x152   : > { %v15431_v49 = vpop.f32.mrb[15].mxu0  ;;  %v2268_v11 = vsel %vm1216_vm9, %v2266_v23, %v2267_v35  ;;  %v17683_v23 = vld [vmem:[#allocation2 + $0x38] ss:$0 sps:$4 sm:$0x11]  }
 0x153   : > { %v18604_v58 = vadd.f32 %v15431_v49, %v15430_v36  ;;  %v17681_v36 = vld [vmem:[#allocation2 + $0x2c] ss:$0 sps:$4 sm:$0x11]  }
 0x154   : > { %16472 = vmatpush3.bf16.msra.mxu1 %v17371_v34  ;;  %v2256_v34 = vsel %vm1216_vm9, %v2254_v43, %v2255_v54 }
 0x155   : > { %16473 = vmatprep.subr.bf16.mxu1 %v17372_v45 }
 0x156   : > { %v15433_v47 = vpop.f32.mrb[16].mxu0 }
 0x157   : > { %16442 = vmatmul.mubr.bf16.gmra.mrb[44].mxu1 %v2250_v37  ;;  %v15434_v51 = vpop.f32.mrb[17].mxu0  ;;  %v2271_v37 = vsel %vm1216_vm9, %v2269_v55, %v2270_v18 }
 0x158   : > { %16445 = vmatprep.mubr.bf16.mxu1 %v2253_v1  ;;  %16474 = vmatpush3.bf16.msra.mxu1 %v17372_v45  ;;  %v18610_v63 = vadd.f32 %v15434_v51, %v15433_v47  ;;  %v15436_v48 = vpop.f32.mrb[18].mxu0  ;;  %v2262_v45 = vsel %vm1216_vm9, %v2260_v38, %v2261_v44  ;;  %v3239_v1 = vrot.slane %v17678_v20, 1  ;;  %v3243_v44 = vrot.slane %v17681_v36, 1  ;;  %v17682_v47 = vld [vmem:[#allocation2 + $0x30] sm:$0xff]  }
 0x159   : > { %16475 = vmatprep.subr.bf16.mxu1 %v17373_v28  ;;  %v15437_v7 = vpop.f32.mrb[19].mxu0  ;;  %v3245_v50 = vrot.slane %v17682_v47, 1  ;;  %v17687_v20 = vld [vmem:[#allocation2 + $0x50] ss:$0 sps:$4 sm:$0x11]   ;;  %v17688_v36 = vld [vmem:[#allocation2 + $0x54] sm:$0xff]  }
 0x15a   : > { %v18614_v22 = vadd.f32 %v15437_v7, %v15436_v48  ;;  %v3241_v40 = vsel %vm1216_vm9, %v3239_v1, %v3240_v24  ;;  %v3246_v48 = vrot.slane %v17683_v23, 1  ;;  %v3244_v55 = vsel %vm1216_vm9, %v3242_v27, %v3243_v44  ;;  %v17690_v47 = vld [vmem:[#allocation2 + $0x60] sm:$0xff]  }
 0x15b   : > { %v3252_v1 = vrot.slane %v17687_v20, 1  ;;  %v3254_v44 = vrot.slane %v17688_v36, 1  ;;  %v17375_v20 = vld [vmem:[%s22363_s3] sm:$0xff]  }
 0x15c   : > { %16476 = vmatpush3.bf16.msra.mxu1 %v17373_v28  ;;  %v3247_v18 = vsel %vm1216_vm9, %v3245_v50, %v3246_v48  ;;  %v3257_v50 = vrot.slane %v17690_v47, 1 }
 0x15e   : > { %v15439_v26 = vpop.f32.mrb[20].mxu0 }
 0x15f   : > { %16446 = vmatmul.mubr.bf16.gmra.mrb[48].mxu1 %v2256_v34  ;;  %v15440_v60 = vpop.f32.mrb[21].mxu0  ;;  %v2274_v34 = vsel %vm1216_vm9, %v2272_v8, %v2273_v32 }
 0x160   : > { %16449 = vmatprep.mubr.bf16.mxu1 %v2259_v30  ;;  %v18620_v43 = vadd.f32 %v15440_v60, %v15439_v26  ;;  %v15442_v14 = vpop.f32.mrb[22].mxu0  ;;  %v17684_v60 = vld [vmem:[#allocation2 + $0x3c] sm:$0xff]  }
 0x161   : > { %v15443_v54 = vpop.f32.mrb[23].mxu0  ;;  %v3248_v8 = vrot.slane %v17684_v60, 1 }
 0x162   : > { %v18624_v28 = vadd.f32 %v15443_v54, %v15442_v14  ;;  %v17685_v14 = vld [vmem:[#allocation2 + $0x44] ss:$0 sps:$4 sm:$0x11]  }
 0x163   : > { %v3249_v32 = vrot.slane %v17685_v14, 1 }
 0x165   : > { %v3250_v59 = vsel %vm1216_vm9, %v3248_v8, %v3249_v32  ;;  %v17692_v8 = vld [vmem:[#allocation2 + $0x6c] sm:$0xff]   ;;  %v17693_v32 = vld [vmem:[#allocation2 + $0x74] ss:$0 sps:$4 sm:$0x11]  }
 0x166   : > { %v15445_v52 = vpop.f32.mrb[24].mxu0  ;;  %v3260_v14 = vrot.slane %v17692_v8, 1 }
 0x167   : > { %16450 = vmatmul.mubr.bf16.gmra.mrb[52].mxu1 %v2262_v45  ;;  %v15446_v53 = vpop.f32.mrb[25].mxu0 }
 0x168   : > { %16453 = vmatprep.mubr.bf16.mxu1 %v2265_v25  ;;  %v18627_v38 = vadd.f32 %v15446_v53, %v15445_v52  ;;  %v15448_v10 = vpop.f32.mrb[26].mxu0 }
 0x169   : > { %v15449_v49 = vpop.f32.mrb[27].mxu0 }
 0x16a   : > { %v18630_v30 = vadd.f32 %v15449_v49, %v15448_v10  ;;  %v17689_v49 = vld [vmem:[#allocation2 + $0x5c] ss:$0 sps:$4 sm:$0x11]  }
 0x16e   : > { %v15451_v51 = vpop.f32.mrb[28].mxu0 }
 0x16f   : > { %16454 = vmatmul.mubr.bf16.gmra.mrb[56].mxu1 %v2268_v11  ;;  %v15452_v35 = vpop.f32.mrb[29].mxu0  ;;  %v17686_v11 = vld [vmem:[#allocation2 + $0x48] sm:$0xff]  }
 0x170   : > { %16457 = vmatprep.mubr.bf16.mxu1 %v2271_v37  ;;  %v18633_v7 = vadd.f32 %v15452_v35, %v15451_v51  ;;  %v15454_v45 = vpop.f32.mrb[30].mxu0  ;;  %v3251_v37 = vrot.slane %v17686_v11, 1  ;;  %v17691_v51 = vld [vmem:[#allocation2 + $0x68] ss:$0 sps:$4 sm:$0x11]  }
 0x171   : > { %v15455_v25 = vpop.f32.mrb[31].mxu0  ;;  %v3258_v23 = vrot.slane %v17691_v51, 1  ;;  %v17377_v51 = vld [vmem:[%s22363_s3 + $0x8] sm:$0xff]  }
 0x172   : > { %v18636_v26 = vadd.f32 %v15455_v25, %v15454_v45  ;;  %v3253_v10 = vsel %vm1216_vm9, %v3251_v37, %v3252_v1  ;;  %v17374_v37 = vld [vmem:[%s22363_s3 + $0x40] sm:$0xff]   ;;  %v17376_v1 = vld [vmem:[%s22363_s3 + $0x48] sm:$0xff]  }
 0x173   : > { %v3259_v60 = vsel %vm1216_vm9, %v3257_v50, %v3258_v23  ;;  %15801 = vmatprep.subr.bf16.mxu0 %v17374_v37 }
 0x174   : > { %15802 = vmatpush3.bf16.msra.mxu0 %v17375_v20  ;;  %v17697_v20 = vld [vmem:[#allocation2 + $0x8c] ss:$0 sps:$4 sm:$0x11]  }
 0x175   : > { %15803 = vmatprep.subr.bf16.mxu0 %v17376_v1  ;;  %v3267_v1 = vrot.slane %v17697_v20, 1 }
 0x176   : > { %v15681_v54 = vpop.f32.mrb[32].mxu0 }
 0x177   : > { %16458 = vmatmul.mubr.bf16.gmra.mrb[60].mxu1 %v2274_v34  ;;  %v15682_v52 = vpop.f32.mrb[33].mxu0  ;;  %v3255_v34 = vrot.slane %v17689_v49, 1 }
 0x178   : > { %16477 = vmatprep.mubr.bf16.mxu1 %v3241_v40  ;;  %v18639_v15 = vadd.f32 %v15682_v52, %v15681_v54  ;;  %v15684_v24 = vpop.f32.mrb[34].mxu0  ;;  %v3261_v54 = vrot.slane %v17693_v32, 1  ;;  %v18663_v52 = vld [vmem:[%s22362_s2] ss:$0 sm:$0xff]  ;;  %15804 = vmatpush3.bf16.msra.mxu0 %v17377_v51 }
 0x179   : > { %v15685_v53 = vpop.f32.mrb[35].mxu0  ;;  %v16753_v23 = vadd.f32 %v18541_v41, %v18663_v52  ;;  %v17379_v41 = vld [vmem:[%s22363_s3 + $0x10] sm:$0xff]  }
 0x17a   : > { %v18642_v27 = vadd.f32 %v15685_v53, %v15684_v24  ;;  %v17694_v24 = vld [vmem:[#allocation2 + $0x78] sm:$0xff]  }
 0x17b   : > { %v3263_v53 = vrot.slane %v17694_v24, 1 }
 0x17e   : > { %v15687_v40 = vpop.f32.mrb[36].mxu0 }
 0x17f   : > { %16478 = vmatmul.mubr.bf16.vlgmr.msra.gmra.mrb[32].mxu1 %v3244_v55  ;;  %v15688_v48 = vpop.f32.mrb[37].mxu0  ;;  %v3256_v55 = vsel %vm1216_vm9, %v3254_v44, %v3255_v34  ;;  %v16745_v44 = vadd.f32 %v18536_v31, %v18663_v52 }
 0x180   : > { %16481 = vmatprep.mubr.bf16.mxu1 %v3247_v18  ;;  %v18645_v35 = vadd.f32 %v15688_v48, %v15687_v40  ;;  %v15690_v45 = vpop.f32.mrb[38].mxu0 }
 0x181   : > { %v15691_v25 = vpop.f32.mrb[39].mxu0 }
 0x182   : > { %v18648_v18 = vadd.f32 %v15691_v25, %v15690_v45  ;;  %v3262_v25 = vsel %vm1216_vm9, %v3260_v14, %v3261_v54  ;;  %v17696_v14 = vld [vmem:[#allocation2 + $0x84] sm:$0xff]  }
 0x183   : > { %v3266_v54 = vrot.slane %v17696_v14, 1 }
 0x186   : > { %v15693_v11 = vpop.f32.mrb[40].mxu0 }
 0x187   : > { %16482 = vmatmul.mubr.bf16.gmra.mrb[36].mxu1 %v3250_v59  ;;  %v17695_v59 = vld [vmem:[#allocation2 + $0x80] ss:$0 sps:$4 sm:$0x11]   ;;  %v15694_v36 = vpop.f32.mrb[41].mxu0 }
 0x188   : > { %16485 = vmatprep.mubr.bf16.mxu1 %v3253_v10  ;;  %v3264_v10 = vrot.slane %v17695_v59, 1  ;;  %v18667_v34 = vadd.f32 %v15694_v36, %v15693_v11  ;;  %v15696_v40 = vpop.f32.mrb[42].mxu0  ;;  %v17699_v36 = vld [vmem:[#allocation2 + $0x98] ss:$0 sps:$4 sm:$0x11]  }
 0x189   : > { %v15697_v50 = vpop.f32.mrb[43].mxu0 }
 0x18a   : > { %v18675_v31 = vadd.f32 %v15697_v50, %v15696_v40  ;;  %v3265_v8 = vsel %vm1216_vm9, %v3263_v53, %v3264_v10  ;;  %v17698_v53 = vld [vmem:[#allocation2 + $0x90] sm:$0xff]   ;;  %v16741_v40 = vadd.f32 %v18566_v46, %v18663_v52 }
 0x18b   : > { %v3269_v10 = vrot.slane %v17698_v53, 1 }
 0x18e   : > { %v15699_v24 = vpop.f32.mrb[44].mxu0 }
 0x18f   : > { %16486 = vmatmul.mubr.bf16.gmra.mrb[40].mxu1 %v3256_v55  ;;  %v17378_v55 = vld [vmem:[%s22363_s3 + $0x50] sm:$0xff]  }
 0x190   : > { %16489 = vmatprep.mubr.bf16.mxu1 %v3259_v60  ;;  %15805 = vmatprep.subr.bf16.mxu0 %v17378_v55 }
 0x191   : > { %15806 = vmatpush3.bf16.msra.mxu0 %v17379_v41  ;;  %v17701_v41 = vld [vmem:[#allocation2 + $0xa4] ss:$0 sps:$4 sm:$0x11]  }
 0x192   : > { %v15545_v49 = vpop.f32.mrb[64].mxu1 }
 0x193   : > { %v15546_v47 = vpop.f32.mrb[65].mxu1 }
 0x194   : > { %v15547_v48 = vadd.f32 %v15546_v47, %v15545_v49  ;;  %v15548_v45 = vpop.f32.mrb[66].mxu1  ;;  %v15700_v49 = vpop.f32.mrb[45].mxu0 }
 0x195   : > { %v15549_v60 = vpop.f32.mrb[67].mxu1  ;;  %v18689_v50 = vadd.f32 %v15700_v49, %v15699_v24  ;;  %v15702_v51 = vpop.f32.mrb[46].mxu0  ;;  %v3273_v24 = vrot.slane %v17701_v41, 1  ;;  %v17705_v41 = vld [vmem:[#allocation2 + $0xbc] ss:$0 sps:$4 sm:$0x11]  }
 0x196   : > { %v16746_v32 = vadd.f32 %v16745_v44, %v15547_v48  ;;  %v15550_v11 = vadd.f32 %v15549_v60, %v15548_v45  ;;  %v3270_v44 = vrot.slane %v17699_v36, 1  ;;  %v15703_v45 = vpop.f32.mrb[47].mxu0  ;;  %v3268_v60 = vsel %vm1216_vm9, %v3266_v54, %v3267_v1  ;;  %v17702_v36 = vld [vmem:[#allocation2 + $0xa8] sm:$0xff]   ;;  %v17703_v1 = vld [vmem:[#allocation2 + $0xb0] ss:$0 sps:$4 sm:$0x11]  }
 0x197   : > { %16490 = vmatmul.mubr.bf16.gmra.mrb[44].mxu1 %v3262_v25  ;;  %v15705_v53 = vpop.f32.mrb[48].mxu0  ;;  %v3275_v54 = vrot.slane %v17702_v36, 1  ;;  %v3276_v49 = vrot.slane %v17703_v1, 1  ;;  %v17706_v1 = vld [vmem:[#allocation2 + $0xc0] sm:$0xff]  }
 0x198   : > { %v16754_v37 = vadd.f32 %v16753_v23, %v15550_v11  ;;  %16493 = vmatprep.mubr.bf16.mxu1 %v3265_v8  ;;  %v18685_v59 = vadd.f32 %v16746_v32, %v18639_v15  ;;  %v16749_v15 = vadd.f32 %v18571_v13, %v18663_v52  ;;  %v18697_v8 = vadd.f32 %v15703_v45, %v15702_v51 }
 0x199   : > { %v3271_v32 = vsel %vm1216_vm9, %v3269_v10, %v3270_v44  ;;  %v16761_v10 = vadd.f32 %v18587_v42, %v18663_v52  ;;  %v3277_v42 = vsel %vm1216_vm9, %v3275_v54, %v3276_v49  ;;  %v16757_v54 = vadd.f32 %v18600_v6, %v18663_v52 }
 0x19a   : > { %v15551_v47 = vpop.f32.mrb[68].mxu1  ;;  %v18692_v23 = vadd.f32 %v16754_v37, %v18642_v27  ;;  %v17700_v37 = vld [vmem:[#allocation2 + $0x9c] sm:$0xff]  }
 0x19b   : > { %v15552_v48 = vpop.f32.mrb[69].mxu1  ;;  %v3272_v20 = vrot.slane %v17700_v37, 1 }
 0x19c   : > { %v15553_v25 = vadd.f32 %v15552_v48, %v15551_v47  ;;  %v15554_v55 = vpop.f32.mrb[70].mxu1  ;;  %v15706_v47 = vpop.f32.mrb[49].mxu0 }
 0x19d   : > { %v15555_v46 = vpop.f32.mrb[71].mxu1  ;;  %v15708_v51 = vpop.f32.mrb[50].mxu0 }
 0x19e   : > { %v16742_v11 = vadd.f32 %v16741_v40, %v15553_v25  ;;  %v15556_v14 = vadd.f32 %v15555_v46, %v15554_v55  ;;  %v18705_v40 = vadd.f32 %v15706_v47, %v15705_v53  ;;  %v3279_v53 = vrot.slane %v17705_v41, 1  ;;  %v17709_v41 = vld [vmem:[#allocation2 + $0xd4] ss:$0 sps:$4 sm:$0x11]  }
 0x19f   : > { %16494 = vmatmul.mubr.bf16.gmra.mrb[48].mxu1 %v3268_v60  ;;  %v3274_v60 = vsel %vm1216_vm9, %v3272_v20, %v3273_v24  ;;  %v3281_v20 = vrot.slane %v17706_v1, 1  ;;  %v17707_v24 = vld [vmem:[#allocation2 + $0xc8] ss:$0 sps:$4 sm:$0x11]  }
 0x1a0   : > { %v16750_v27 = vadd.f32 %v16749_v15, %v15556_v14  ;;  %16497 = vmatprep.mubr.bf16.mxu1 %v3271_v32  ;;  %v18701_v13 = vadd.f32 %v16742_v11, %v18645_v35  ;;  %v15709_v15 = vpop.f32.mrb[51].mxu0  ;;  %v16769_v35 = vadd.f32 %v18593_v29, %v18663_v52  ;;  %v3282_v47 = vrot.slane %v17707_v24, 1 }
 0x1a1   : > { %v18713_v46 = vadd.f32 %v15709_v15, %v15708_v51  ;;  %v15711_v36 = vpop.f32.mrb[52].mxu0 }
 0x1a2   : > { %v15557_v44 = vpop.f32.mrb[72].mxu1  ;;  %v18708_v48 = vadd.f32 %v16750_v27, %v18648_v18  ;;  %v17704_v18 = vld [vmem:[#allocation2 + $0xb4] sm:$0xff]  }
 0x1a3   : > { %v15558_v45 = vpop.f32.mrb[73].mxu1  ;;  %v3278_v27 = vrot.slane %v17704_v18, 1 }
 0x1a4   : > { %v15559_v25 = vadd.f32 %v15558_v45, %v15557_v44  ;;  %v15560_v55 = vpop.f32.mrb[74].mxu1  ;;  %v15712_v44 = vpop.f32.mrb[53].mxu0 }
 0x1a5   : > { %v15561_v32 = vpop.f32.mrb[75].mxu1  ;;  %v15714_v51 = vpop.f32.mrb[54].mxu0 }
 0x1a6   : > { %v16762_v11 = vadd.f32 %v16761_v10, %v15559_v25  ;;  %v15562_v14 = vadd.f32 %v15561_v32, %v15560_v55  ;;  %v15713_v10 = vadd.f32 %v15712_v44, %v15711_v36  ;;  %v3285_v36 = vrot.slane %v17709_v41, 1 }
 0x1a7   : > { %16498 = vmatmul.mubr.bf16.gmra.mrb[52].mxu1 %v3274_v60  ;;  %v3280_v60 = vsel %vm1216_vm9, %v3278_v27, %v3279_v53  ;;  %v16777_v27 = vadd.f32 %v18610_v63, %v18663_v52 }
 0x1a8   : > { %v16770_v37 = vadd.f32 %v16769_v35, %v15562_v14  ;;  %16501 = vmatprep.mubr.bf16.mxu1 %v3277_v42  ;;  %v18717_v29 = vadd.f32 %v16762_v11, %v18667_v34  ;;  %v15715_v35 = vpop.f32.mrb[55].mxu0  ;;  %v16765_v34 = vadd.f32 %v18604_v58, %v18663_v52  ;;  %v3283_v11 = vsel %vm1216_vm9, %v3281_v20, %v3282_v47 }
 0x1a9   : > { %v15716_v32 = vadd.f32 %v15715_v35, %v15714_v51  ;;  %v15717_v1 = vpop.f32.mrb[56].mxu0  ;;  %v16785_v51 = vadd.f32 %v18614_v22, %v18663_v52 }
 0x1aa   : > { %v15563_v49 = vpop.f32.mrb[76].mxu1  ;;  %v18722_v45 = vadd.f32 %v16770_v37, %v18675_v31  ;;  %v17708_v31 = vld [vmem:[#allocation2 + $0xcc] sm:$0xff]   ;;  %v15718_v24 = vpop.f32.mrb[57].mxu0 }
 0x1ab   : > { %v15564_v15 = vpop.f32.mrb[77].mxu1  ;;  %v3284_v37 = vrot.slane %v17708_v31, 1  ;;  %v15719_v44 = vadd.f32 %v15718_v24, %v15717_v1  ;;  %v15720_v20 = vpop.f32.mrb[58].mxu0 }
 0x1ac   : > { %v15565_v25 = vadd.f32 %v15564_v15, %v15563_v49  ;;  %v15566_v55 = vpop.f32.mrb[78].mxu1  ;;  %v15721_v49 = vpop.f32.mrb[59].mxu0 }
 0x1ad   : > { %v15567_v42 = vpop.f32.mrb[79].mxu1 }
 0x1ae   : > { %v16758_v6 = vadd.f32 %v16757_v54, %v15565_v25  ;;  %v15568_v14 = vadd.f32 %v15567_v42, %v15566_v55  ;;  %v15723_v42 = vpop.f32.mrb[60].mxu0 }
 0x1af   : > { %16502 = vmatmul.mubr.bf16.gmra.mrb[56].mxu1 %v3280_v60 }
 0x1b0   : > { %v16766_v18 = vadd.f32 %v16765_v34, %v15568_v14  ;;  %16505 = vmatprep.mubr.bf16.mxu1 %v3283_v11  ;;  %v18729_v58 = vadd.f32 %v16758_v6, %v18689_v50  ;;  %v3286_v50 = vsel %vm1216_vm9, %v3284_v37, %v3285_v36  ;;  %v18739_v34 = vadd.f32 %v15721_v49, %v15720_v20  ;;  %v15724_v11 = vpop.f32.mrb[61].mxu0 }
 0x1b1   : > { %v16773_v6 = vadd.f32 %v18620_v43, %v18663_v52  ;;  %v15725_v14 = vadd.f32 %v15724_v11, %v15723_v42  ;;  %v16781_v36 = vadd.f32 %v18624_v28, %v18663_v52 }
 0x1b2   : > { %v15569_v53 = vpop.f32.mrb[80].mxu1  ;;  %v18734_v47 = vadd.f32 %v16766_v18, %v18697_v8  ;;  %v15726_v18 = vpop.f32.mrb[62].mxu0 }
 0x1b3   : > { %v15570_v54 = vpop.f32.mrb[81].mxu1  ;;  %v15727_v41 = vpop.f32.mrb[63].mxu0 }
 0x1b4   : > { %v15571_v15 = vadd.f32 %v15570_v54, %v15569_v53  ;;  %v15572_v35 = vpop.f32.mrb[82].mxu1 }
 0x1b5   : > { %v15573_v25 = vpop.f32.mrb[83].mxu1 }
 0x1b6   : > { %v16778_v55 = vadd.f32 %v16777_v27, %v15571_v15  ;;  %v15574_v63 = vadd.f32 %v15573_v25, %v15572_v35  ;;  %v15728_v27 = vadd.f32 %v15727_v41, %v15726_v18  ;;  %v15729_v49 = vpop.f32.mrb[64].mxu0 }
 0x1b7   : > { %16506 = vmatmul.mubr.bf16.gmra.mrb[60].mxu1 %v3286_v50 }
 0x1b8   : > { %v16786_v60 = vadd.f32 %v16785_v51, %v15574_v63  ;;  %v18742_v8 = vadd.f32 %v16778_v55, %v18705_v40  ;;  %v15730_v51 = vpop.f32.mrb[65].mxu0  ;;  %v16801_v63 = vadd.f32 %v18630_v30, %v18663_v52 }
 0x1b9   : > { %v18755_v35 = vadd.f32 %v15730_v51, %v15729_v49  ;;  %v15732_v50 = vpop.f32.mrb[66].mxu0 }
 0x1ba   : > { %v15575_v22 = vpop.f32.mrb[84].mxu1  ;;  %v18747_v31 = vadd.f32 %v16786_v60, %v18713_v46  ;;  %v16793_v46 = vadd.f32 %v18627_v38, %v18663_v52  ;;  %v15733_v55 = vpop.f32.mrb[67].mxu0 }
 0x1bb   : > { %v15576_v37 = vpop.f32.mrb[85].mxu1  ;;  %v18761_v11 = vadd.f32 %v15733_v55, %v15732_v50 }
 0x1bc   : > { %v15577_v1 = vadd.f32 %v15576_v37, %v15575_v22  ;;  %v15578_v24 = vpop.f32.mrb[86].mxu1 }
 0x1bd   : > { %v15579_v40 = vpop.f32.mrb[87].mxu1 }
 0x1be   : > { %v16774_v53 = vadd.f32 %v16773_v6, %v15577_v1  ;;  %v15580_v20 = vadd.f32 %v15579_v40, %v15578_v24  ;;  %v15735_v38 = vpop.f32.mrb[68].mxu0 }
 0x1bf   : > { %v15736_v41 = vpop.f32.mrb[69].mxu0 }
 0x1c0   : > { %v16782_v54 = vadd.f32 %v16781_v36, %v15580_v20  ;;  %v18751_v43 = vadd.f32 %v16774_v53, %v15713_v10  ;;  %v18767_v1 = vadd.f32 %v15736_v41, %v15735_v38  ;;  %v15738_v24 = vpop.f32.mrb[70].mxu0  ;;  %v16797_v53 = vadd.f32 %v18636_v26, %v18663_v52 }
 0x1c1   : > { %v15739_v40 = vpop.f32.mrb[71].mxu0  ;;  %v16809_v26 = vadd.f32 %v18495_v61, %v18663_v52 }
 0x1c2   : > { %v15581_v15 = vpop.f32.mrb[88].mxu1  ;;  %v18757_v25 = vadd.f32 %v16782_v54, %v15716_v32  ;;  %v16789_v32 = vadd.f32 %v18633_v7, %v18663_v52  ;;  %v18771_v49 = vadd.f32 %v15739_v40, %v15738_v24 }
 0x1c3   : > { %v15582_v28 = vpop.f32.mrb[89].mxu1 }
 0x1c4   : > { %v15583_v60 = vadd.f32 %v15582_v28, %v15581_v15  ;;  %v15584_v42 = vpop.f32.mrb[90].mxu1 }
 0x1c5   : > { %v15585_v10 = vpop.f32.mrb[91].mxu1 }
 0x1c6   : > { %v16794_v6 = vadd.f32 %v16793_v46, %v15583_v60  ;;  %v15586_v22 = vadd.f32 %v15585_v10, %v15584_v42  ;;  %v15741_v50 = vpop.f32.mrb[72].mxu0 }
 0x1c7   : > { %v15742_v7 = vpop.f32.mrb[73].mxu0 }
 0x1c8   : > { %v16802_v18 = vadd.f32 %v16801_v63, %v15586_v22  ;;  %v18763_v37 = vadd.f32 %v16794_v6, %v15719_v44  ;;  %v18775_v63 = vadd.f32 %v15742_v7, %v15741_v50  ;;  %v15744_v60 = vpop.f32.mrb[74].mxu0  ;;  %v16805_v50 = vadd.f32 %v18510_v12, %v18663_v52 }
 0x1c9   : > { %v15745_v10 = vpop.f32.mrb[75].mxu0 }
 0x1ca   : > { %v15587_v36 = vpop.f32.mrb[92].mxu1  ;;  %v18779_v38 = vadd.f32 %v15745_v10, %v15744_v60  ;;  %v16813_v60 = vadd.f32 %v18516_v33, %v18663_v52 }
 0x1cb   : > { %v15588_v30 = vpop.f32.mrb[93].mxu1 }
 0x1cc   : > { %v15589_v20 = vadd.f32 %v15588_v30, %v15587_v36  ;;  %v15590_v54 = vpop.f32.mrb[94].mxu1 }
 0x1cd   : > { %v15591_v51 = vpop.f32.mrb[95].mxu1 }
 0x1ce   : > { %v16790_v44 = vadd.f32 %v16789_v32, %v15589_v20  ;;  %v15592_v46 = vadd.f32 %v15591_v51, %v15590_v54  ;;  %v15747_v40 = vpop.f32.mrb[76].mxu0 }
 0x1d0   : > { %v16798_v15 = vadd.f32 %v16797_v53, %v15592_v46  ;;  %v18773_v28 = vadd.f32 %v16790_v44, %v15725_v14  ;;  %v16817_v14 = vadd.f32 %v18501_v62, %v18663_v52  ;;  %v15748_v53 = vpop.f32.mrb[77].mxu0 }
 0x1d1   : > { %v18789_v54 = vadd.f32 %v15748_v53, %v15747_v40  ;;  %v15750_v61 = vpop.f32.mrb[78].mxu0  ;;  %v16825_v53 = vadd.f32 %v18519_v16, %v18663_v52 }
 0x1d2   : > { %v15593_v55 = vpop.f32.mrb[96].mxu1  ;;  %v18785_v24 = vadd.f32 %v16798_v15, %v15728_v27  ;;  %v15751_v44 = vpop.f32.mrb[79].mxu0 }
 0x1d3   : > { %v15594_v42 = vpop.f32.mrb[97].mxu1 }
 0x1d4   : > { %v15595_v6 = vadd.f32 %v15594_v42, %v15593_v55  ;;  %v15596_v22 = vpop.f32.mrb[98].mxu1  ;;  %v18793_v55 = vadd.f32 %v15751_v44, %v15750_v61 }
 0x1d5   : > { %v15597_v41 = vpop.f32.mrb[99].mxu1 }
 0x1d6   : > { %v18781_v32 = vadd.f32 %v16809_v26, %v15595_v6  ;;  %v15598_v36 = vadd.f32 %v15597_v41, %v15596_v22  ;;  %v15753_v10 = vpop.f32.mrb[80].mxu0  ;;  %v18802_v6 = vadd.f32 %v16802_v18, %v18739_v34  ;;  %v16833_v34 = vadd.f32 %v18524_v17, %v18663_v52 }
 0x1d7   : > { %v15754_v26 = vpop.f32.mrb[81].mxu0 }
 0x1d8   : > { %v18787_v30 = vadd.f32 %v16817_v14, %v15598_v36  ;;  %v18804_v41 = vadd.f32 %v15754_v26, %v15753_v10  ;;  %v15756_v12 = vpop.f32.mrb[82].mxu0  ;;  %v16821_v26 = vadd.f32 %v18527_v39, %v18663_v52 }
 0x1d9   : > { %v15757_v14 = vpop.f32.mrb[83].mxu0 }
 0x1da   : > { %v15599_v20 = vpop.f32.mrb[100].mxu1  ;;  %22477 = vst [vmem:[#allocation5_spill] sm:$0xff] %v18804_v41  ;;  %v18808_v61 = vadd.f32 %v15757_v14, %v15756_v12 }
 0x1db   : > { %v15600_v51 = vpop.f32.mrb[101].mxu1 }
 0x1dc   : > { %v15601_v46 = vadd.f32 %v15600_v51, %v15599_v20  ;;  %v15602_v7 = vpop.f32.mrb[102].mxu1  ;;  %22478 = vst [vmem:[#allocation6_spill] sm:$0xff] %v18808_v61 }
 0x1dd   : > { %v15603_v62 = vpop.f32.mrb[103].mxu1 }
 0x1de   : > { %v18795_v27 = vadd.f32 %v16805_v50, %v15601_v46  ;;  %v15604_v15 = vadd.f32 %v15603_v62, %v15602_v7  ;;  %v15759_v46 = vpop.f32.mrb[84].mxu0 }
 0x1df   : > { %v15760_v50 = vpop.f32.mrb[85].mxu0 }
 0x1e0   : > { %v18799_v42 = vadd.f32 %v16813_v60, %v15604_v15  ;;  %v18816_v62 = vadd.f32 %v15760_v50, %v15759_v46  ;;  %v15762_v15 = vpop.f32.mrb[86].mxu0 }
 0x1e1   : > { %v15763_v16 = vpop.f32.mrb[87].mxu0 }
 0x1e2   : > { %v15605_v22 = vpop.f32.mrb[104].mxu1  ;;  %22479 = vst [vmem:[#allocation7_spill] sm:$0xff] %v18816_v62  ;;  %v18820_v12 = vadd.f32 %v15763_v16, %v15762_v15  ;;  %v16841_v15 = vadd.f32 %v18533_v3, %v18663_v52 }
 0x1e3   : > { %v15606_v36 = vpop.f32.mrb[105].mxu1 }
 0x1e4   : > { %v15607_v40 = vadd.f32 %v15606_v36, %v15605_v22  ;;  %v15608_v20 = vpop.f32.mrb[106].mxu1  ;;  %22480 = vst [vmem:[#allocation8_spill] sm:$0xff] %v18820_v12 }
 0x1e5   : > { %v15609_v33 = vpop.f32.mrb[107].mxu1 }
 0x1e6   : > { %v18810_v51 = vadd.f32 %v16825_v53, %v15607_v40  ;;  %v15610_v44 = vadd.f32 %v15609_v33, %v15608_v20  ;;  %v16829_v40 = vadd.f32 %v18530_v2, %v18663_v52  ;;  %v15765_v20 = vpop.f32.mrb[88].mxu0 }
 0x1e7   : > { %v15766_v33 = vpop.f32.mrb[89].mxu0 }
 0x1e8   : > { %v18814_v18 = vadd.f32 %v16833_v34, %v15610_v44  ;;  %v18828_v34 = vadd.f32 %v15766_v33, %v15765_v20  ;;  %v15768_v46 = vpop.f32.mrb[90].mxu0  ;;  %v17381_v20 = vld [vmem:[%s22363_s3 + $0x18] sm:$0xff]  }
 0x1e9   : > { %v15769_v39 = vpop.f32.mrb[91].mxu0 }
 0x1ea   : > { %v15611_v7 = vpop.f32.mrb[108].mxu1  ;;  %22481 = vst [vmem:[#allocation9_spill] sm:$0xff] %v18828_v34  ;;  %v18835_v2 = vadd.f32 %v15769_v39, %v15768_v46 }
 0x1eb   : > { %v15612_v60 = vpop.f32.mrb[109].mxu1 }
 0x1ec   : > { %v15613_v10 = vadd.f32 %v15612_v60, %v15611_v7  ;;  %v15614_v22 = vpop.f32.mrb[110].mxu1  ;;  %v17380_v7 = vld [vmem:[%s22363_s3 + $0x58] sm:$0xff]   ;;  %22482 = vst [vmem:[#allocation10_spill] sm:$0xff] %v18835_v2 }
 0x1ed   : > { %v15615_v36 = vpop.f32.mrb[111].mxu1  ;;  %15807 = vmatprep.subr.bf16.mxu0 %v17380_v7  ;;  %v16837_v7 = vadd.f32 %v18546_v56, %v18663_v52  ;;  %v16857_v56 = vadd.f32 %v18560_v21, %v18663_v52 }
 0x1ee   : > { %v18822_v14 = vadd.f32 %v16821_v26, %v15613_v10  ;;  %v15616_v17 = vadd.f32 %v15615_v36, %v15614_v22  ;;  %v16849_v26 = vadd.f32 %v18538_v9, %v18663_v52  ;;  %15808 = vmatpush3.bf16.msra.mxu0 %v17381_v20 }
 0x1f0   : > { %v18826_v53 = vadd.f32 %v16829_v40, %v15616_v17  ;;  %v15771_v40 = vpop.f32.mrb[92].mxu0 }
 0x1f1   : > { %v15772_v3 = vpop.f32.mrb[93].mxu0 }
 0x1f2   : > { %v15617_v44 = vpop.f32.mrb[112].mxu1  ;;  %v15774_v46 = vpop.f32.mrb[94].mxu0 }
 0x1f3   : > { %v15618_v50 = vpop.f32.mrb[113].mxu1  ;;  %v15775_v39 = vpop.f32.mrb[95].mxu0 }
 0x1f4   : > { %v15619_v60 = vadd.f32 %v15618_v50, %v15617_v44  ;;  %v15620_v16 = vpop.f32.mrb[114].mxu1  ;;  %v18846_v44 = vadd.f32 %v15772_v3, %v15771_v40  ;;  %v18850_v50 = vadd.f32 %v18781_v32, %v18755_v35  ;;  %v18864_v35 = vadd.f32 %v18795_v27, %v18767_v1 }
 0x1f5   : > { %v15621_v10 = vpop.f32.mrb[115].mxu1 }
 0x1f6   : > { %v18839_v22 = vadd.f32 %v16841_v15, %v15619_v60  ;;  %v15622_v36 = vadd.f32 %v15621_v10, %v15620_v16  ;;  %22485 = vst [vmem:[#allocation13_spill] sm:$0xff] %v18846_v44  ;;  %v18854_v16 = vadd.f32 %v15775_v39, %v15774_v46  ;;  %v5668_v39 = vld [vmem:[#allocation3 + $0xc] sm:$0x1] }
 0x1f8   : > { %22483 = vst [vmem:[#allocation11_spill] sm:$0xff] %v18839_v22  ;;  %v18841_v17 = vadd.f32 %v16849_v26, %v15622_v36  ;;  %22486 = vst [vmem:[#allocation14_spill] sm:$0xff] %v18854_v16  ;;  %v16845_v26 = vadd.f32 %v18550_v4, %v18663_v52 }
 0x1fa   : > { %22484 = vst [vmem:[#allocation12_spill] sm:$0xff] %v18841_v17  ;;  %v15623_v33 = vpop.f32.mrb[116].mxu1 }
 0x1fb   : > { %v15624_v9 = vpop.f32.mrb[117].mxu1 }
 0x1fc   : > { %v15625_v15 = vadd.f32 %v15624_v9, %v15623_v33  ;;  %v15626_v60 = vpop.f32.mrb[118].mxu1 }
 0x1fd   : > { %v15627_v10 = vpop.f32.mrb[119].mxu1 }
 0x1fe   : > { %v18858_v36 = vadd.f32 %v16837_v7, %v15625_v15  ;;  %v15628_v40 = vadd.f32 %v15627_v10, %v15626_v60  ;;  %v16865_v7 = vadd.f32 %v18564_v0, %v18663_v52  ;;  %v5669_v15 = vsel %vm18869_vm11, 0, %v5668_v39 }
 0x1ff   : > { %5670 = vst [vmem:[#allocation3 + $0xc] sm:$0x1] %v5669_v15  ;;  %v16853_v0 = vadd.f32 %v18576_v57, %v18663_v52  ;;  %v18902_v57 = vadd.f32 %v18787_v30, %v18761_v11  ;;  %v5671_v15 = vld [vmem:[#allocation3 + $0x14] sm:$0x1]  ;;  %v18918_v11 = vadd.f32 %v18826_v53, %v18793_v55  ;;  %v17719_v30 = vmov 1983009808  }
 0x200   : > { %22487 = vst [vmem:[#allocation15_spill] sm:$0xff] %v18858_v36  ;;  %v18860_v20 = vadd.f32 %v16845_v26, %v15628_v40  ;;  %v5637_v40 = vld [vmem:[#allocation3 + $0x8] sm:$0x1] }
 0x201   : > { %22497 = vst [vmem:[#allocation21_spill] sm:$0xff] %v18902_v57  ;;  %22500 = vst [vmem:[#allocation24_spill] sm:$0xff] %v18918_v11  ;;  %v17382_v55 = vld [vmem:[%s22363_s3 + $0x60] sm:$0xff]  }
 0x202   : > { %22488 = vst [vmem:[#allocation16_spill] sm:$0xff] %v18860_v20  ;;  %v15629_v32 = vpop.f32.mrb[120].mxu1  ;;  %15809 = vmatprep.subr.bf16.mxu0 %v17382_v55 }
 0x203   : > { %v15630_v3 = vpop.f32.mrb[121].mxu1 }
 0x204   : > { %v15631_v33 = vadd.f32 %v15630_v3, %v15629_v32  ;;  %v15632_v46 = vpop.f32.mrb[122].mxu1 }
 0x205   : > { %v15633_v9 = vpop.f32.mrb[123].mxu1 }
 0x206   : > { %v18875_v1 = vadd.f32 %v16857_v56, %v15631_v33  ;;  %v15634_v27 = vadd.f32 %v15633_v9, %v15632_v46  ;;  %v5638_v56 = vsel %vm18882_vm12, 0, %v5637_v40  ;;  %v16861_v46 = vadd.f32 %v18581_v5, %v18663_v52 }
 0x207   : > { %5639 = vst [vmem:[#allocation3 + $0x8] sm:$0x1] %v5638_v56  ;;  %v5672_v5 = vsel %vm18869_vm11, 0, %v5671_v15  ;;  %v18912_v52 = vadd.f32 %v18822_v14, %v18789_v54 }
 0x208   : > { %22491 = vst [vmem:[#allocation17_spill] sm:$0xff] %v18875_v1  ;;  %v18879_v21 = vadd.f32 %v16865_v7, %v15634_v27  ;;  %v18898_v27 = vadd.f32 %v18799_v42, %v18771_v49  ;;  %5673 = vst [vmem:[#allocation3 + $0x14] sm:$0x1] %v5672_v5  ;;  %v3934_v42 = vlaneseq }
 0x209   : > { %22499 = vst [vmem:[#allocation23_spill] sm:$0xff] %v18912_v52 }
 0x20a   : > { %22492 = vst [vmem:[#allocation18_spill] sm:$0xff] %v18879_v21  ;;  %v15635_v60 = vpop.f32.mrb[124].mxu1  ;;  %v18920_v40 = vshrl.u32 %v3934_v42, 7 }
 0x20b   : > { %v15636_v10 = vpop.f32.mrb[125].mxu1 }
 0x20c   : > { %v15637_v32 = vadd.f32 %v15636_v10, %v15635_v60  ;;  %v15638_v3 = vpop.f32.mrb[126].mxu1  ;;  %v18906_v60 = vadd.f32 %v18810_v51, %v18775_v63  ;;  %v5640_v10 = vld [vmem:[#allocation3 + $0x10] sm:$0x1]  ;;  %v3932_v63 = vunpack.c.l.s4 %v17719_v30  ;;  %22501 = vst [vmem:[#allocation25_spill] sm:$0xff] %v18920_v40 }
 0x20d   : > { %v15639_v33 = vpop.f32.mrb[127].mxu1  ;;  %v5641_v49 = vsel %vm18882_vm12, 0, %v5640_v10 }
 0x20e   : > { %v18892_v9 = vadd.f32 %v16853_v0, %v15637_v32  ;;  %v15640_v39 = vadd.f32 %v15639_v33, %v15638_v3  ;;  %22498 = vst [vmem:[#allocation22_spill] sm:$0xff] %v18906_v60  ;;  %5642 = vst [vmem:[#allocation3 + $0x10] sm:$0x1] %v5641_v49  ;;  %v3933_v51 = vunpack.c.0.s8 %v3932_v63 }
 0x210   : > { %22495 = vst [vmem:[#allocation19_spill] sm:$0xff] %v18892_v9  ;;  %v18894_v7 = vadd.f32 %v16861_v46, %v15640_v39  ;;  %v18924_v54 = vsub.s32 %v3933_v51, %v18920_v40  ;;  %v18935_v39 = vadd.f32 %v18814_v18, %v18779_v38 }
 0x212   : > { %22496 = vst [vmem:[#allocation20_spill] sm:$0xff] %v18894_v7  ;;  %22503 = vst [vmem:[#allocation27_spill] sm:$0xff] %v18935_v39 }
 0x252   : > { %v16479_v0 = vpop.f32.mrb[32].mxu1 }
 0x253   : > { %v16744_v32 = vadd.f32 %v18701_v13, %v16479_v0  ;;  %v3691_v14 = vpop.f32.mrb[33].mxu1 }
 0x254   : > { %v16748_v3 = vadd.f32 %v18685_v59, %v3691_v14  ;;  %v16480_v56 = vpop.f32.mrb[34].mxu1 }
 0x255   : > { %v18930_v53 = vmax.f32 %v16744_v32, 0.0  ;;  %v16752_v33 = vadd.f32 %v18708_v48, %v16480_v56  ;;  %v3694_v46 = vpop.f32.mrb[35].mxu1 }
 0x256   : > { %v18937_v13 = vmax.f32 %v16748_v3, 0.0  ;;  %v18940_v15 = vadd.f32 %v18692_v23, %v3694_v46 }
 0x257   : > { %22502 = vst [vmem:[#allocation26_spill] sm:$0xff] %v18930_v53  ;;  %v3964_v59 = vcombine.high %v18930_v53, %v18930_v53  ;;  %v3971_v5 = vrot.slane %v18930_v53, %v18924_v54  ;;  %v18946_v10 = vmax.f32 %v16752_v33, 0.0 }
 0x258   : > { %22504 = vst [vmem:[#allocation28_spill] sm:$0xff] %v18937_v13  ;;  %v3930_v48 = vcombine.high %v18937_v13, %v18937_v13  ;;  %v3937_v38 = vrot.slane %v18937_v13, %v18924_v54 }
 0x259   : > { %22505 = vst [vmem:[#allocation29_spill] sm:$0xff] %v18946_v10  ;;  %v3978_v18 = vrot.slane %v3964_v59, %v18924_v54  ;;  %v3979_v49 = vcombine.high %v3971_v5, %v3971_v5  ;;  %v4659_v23 = vsel %vm4602_vm13, %v3971_v5, -inf }
 0x25a   : > { %v4660_v63 = vrot.slane %v4659_v23, 4  ;;  %v3944_v42 = vrot.slane %v3930_v48, %v18924_v54  ;;  %v3945_v51 = vcombine.high %v3937_v38, %v3937_v38  ;;  %v4603_v0 = vsel %vm4602_vm13, %v3937_v38, -inf  ;;  %v18958_v32 = vpop.f32.mrb[36].mxu1 }
 0x25b   : > { %v3980_v14 = vcombine.high %v3978_v18, %v3978_v18  ;;  %v4666_v3 = vsel %vm4602_vm13, %v3979_v49, -inf  ;;  %v4673_v56 = vsel %vm4602_vm13, %v3978_v18, -inf  ;;  %v4604_v55 = vrot.slane %v4603_v0, 4  ;;  %v18962_v33 = vpop.f32.mrb[37].mxu1  ;;  %v17383_v18 = vld [vmem:[%s22363_s3 + $0x20] sm:$0xff]  }
 0x25c   : > { %v4661_v46 = vmax.f32 %v4659_v23, %v4660_v63  ;;  %v4667_v59 = vrot.slane %v4666_v3, 4  ;;  %v4674_v5 = vrot.slane %v4673_v56, 4  ;;  %v3946_v30 = vcombine.high %v3944_v42, %v3944_v42  ;;  %v18964_v19 = vpop.f32.mrb[38].mxu1  ;;  %15810 = vmatpush3.bf16.msra.mxu0 %v17383_v18 }
 0x25d   : > { %v4680_v48 = vsel %vm4602_vm13, %v3980_v14, -inf  ;;  %v4605_v53 = vmax.f32 %v4603_v0, %v4604_v55  ;;  %v4610_v38 = vsel %vm4602_vm13, %v3945_v51, -inf  ;;  %v4617_v40 = vsel %vm4602_vm13, %v3944_v42, -inf  ;;  %v18969_v21 = vpop.f32.mrb[39].mxu1 }
 0x25e   : > { %v4662_v49 = vrot.slane %v4661_v46, 2  ;;  %v4668_v23 = vmax.f32 %v4666_v3, %v4667_v59  ;;  %v4675_v63 = vmax.f32 %v4673_v56, %v4674_v5  ;;  %v4681_v2 = vrot.slane %v4680_v48, 4 }
 0x25f   : > { %v4606_v7 = vrot.slane %v4605_v53, 2  ;;  %v4611_v16 = vrot.slane %v4610_v38, 4  ;;  %v4618_v1 = vrot.slane %v4617_v40, 4  ;;  %v4624_v14 = vsel %vm4602_vm13, %v3946_v30, -inf }
 0x260   : > { %v4663_v0 = vmax.f32 %v4661_v46, %v4662_v49  ;;  %v4669_v51 = vrot.slane %v4668_v23, 2  ;;  %v4676_v55 = vrot.slane %v4675_v63, 2  ;;  %v4682_v42 = vmax.f32 %v4680_v48, %v4681_v2 }
 0x261   : > { %v4607_v34 = vmax.f32 %v4605_v53, %v4606_v7  ;;  %v4612_v9 = vmax.f32 %v4610_v38, %v4611_v16  ;;  %v4619_v44 = vmax.f32 %v4617_v40, %v4618_v1  ;;  %v4625_v17 = vrot.slane %v4624_v14, 4 }
 0x262   : > { %v4664_v61 = vrot.slane %v4663_v0, 1  ;;  %v4670_v20 = vmax.f32 %v4668_v23, %v4669_v51  ;;  %v4677_v12 = vmax.f32 %v4675_v63, %v4676_v55  ;;  %v4683_v3 = vrot.slane %v4682_v42, 2  ;;  %v18975_v56 = vpop.f32.mrb[40].mxu1 }
 0x263   : > { %v4608_v59 = vrot.slane %v4607_v34, 1  ;;  %v4613_v5 = vrot.slane %v4612_v9, 2  ;;  %v4620_v22 = vrot.slane %v4619_v44, 2  ;;  %v4626_v41 = vmax.f32 %v4624_v14, %v4625_v17  ;;  %v18977_v30 = vpop.f32.mrb[41].mxu1 }
 0x264   : > { %v4665_v46 = vmax.f32 %v4663_v0, %v4664_v61  ;;  %v4671_v18 = vrot.slane %v4670_v20, 1  ;;  %v4678_v49 = vrot.slane %v4677_v12, 1  ;;  %v4684_v2 = vmax.f32 %v4682_v42, %v4683_v3  ;;  %v18979_v7 = vpop.f32.mrb[42].mxu1 }
 0x265   : > { %v4609_v16 = vmax.f32 %v4607_v34, %v4608_v59  ;;  %v4614_v1 = vmax.f32 %v4612_v9, %v4613_v5  ;;  %v4621_v40 = vmax.f32 %v4619_v44, %v4620_v22  ;;  %v4627_v53 = vrot.slane %v4626_v41, 2  ;;  %v18981_v48 = vpop.f32.mrb[43].mxu1 }
 0x266   : > { %v4672_v38 = vmax.f32 %v4670_v20, %v4671_v18  ;;  %v4679_v23 = vmax.f32 %v4677_v12, %v4678_v49  ;;  %v4685_v63 = vrot.slane %v4684_v2, 1  ;;  %v3981_v17 = vcombine.high %v18946_v10, %v18946_v10 }
 0x267   : > { %v4615_v14 = vrot.slane %v4614_v1, 1  ;;  %v4622_v51 = vrot.slane %v4621_v40, 1  ;;  %v4628_v61 = vmax.f32 %v4626_v41, %v4627_v53  ;;  %v5499_v0 = vmax.f32 %v4609_v16, %v4665_v46 }
 0x268   : > { %v4686_v55 = vmax.f32 %v4684_v2, %v4685_v63  ;;  %v3988_v42 = vrot.slane %v18946_v10, %v18924_v54  ;;  %v3995_v34 = vrot.slane %v3981_v17, %v18924_v54 }
 0x269   : > { %v4616_v22 = vmax.f32 %v4614_v1, %v4615_v14  ;;  %v4623_v44 = vmax.f32 %v4621_v40, %v4622_v51  ;;  %v4629_v9 = vrot.slane %v4628_v61, 1  ;;  %v15194_v3 = vpack.c.bf16 %v5499_v0, %v5499_v0 }
 0x26a   : > { %v3996_v20 = vcombine.high %v3988_v42, %v3988_v42  ;;  %v3997_v12 = vcombine.high %v3995_v34, %v3995_v34  ;;  %v4687_v59 = vsel %vm4602_vm13, %v3988_v42, -inf  ;;  %v4701_v5 = vsel %vm4602_vm13, %v3995_v34, -inf  ;;  %v18990_v18 = vpop.f32.mrb[44].mxu1 }
 0x26b   : > { %v4630_v41 = vmax.f32 %v4628_v61, %v4629_v9  ;;  %v5500_v46 = vmax.f32 %v4616_v22, %v4672_v38  ;;  %v5501_v49 = vmax.f32 %v4623_v44, %v4679_v23  ;;  %v18992_v2 = vpop.f32.mrb[45].mxu1  ;;  %v4688_v16 = vrot.slane %v4687_v59, 4 }
 0x26c   : > { %v4694_v1 = vsel %vm4602_vm13, %v3996_v20, -inf  ;;  %v4702_v40 = vrot.slane %v4701_v5, 4  ;;  %v4708_v53 = vsel %vm4602_vm13, %v3997_v12, -inf  ;;  %v5887_v0 = vunpack.c.l.b16 %v15194_v3  ;;  %v18996_v44 = vpop.f32.mrb[46].mxu1 }
 0x26d   : > { %v5502_v63 = vmax.f32 %v4630_v41, %v4686_v55  ;;  %v15195_v17 = vpack.c.bf16 %v5500_v46, %v5500_v46  ;;  %v15196_v14 = vpack.c.bf16 %v5501_v49, %v5501_v49  ;;  %v4695_v51 = vrot.slane %v4694_v1, 4 }
 0x26e   : > { %v4689_v42 = vmax.f32 %v4687_v59, %v4688_v16  ;;  %v4709_v34 = vrot.slane %v4708_v53, 4  ;;  %v4703_v22 = vmax.f32 %v4701_v5, %v4702_v40  ;;  %v19004_v46 = vmax.f32 %v18940_v15, 0.0 }
 0x26f   : > { %v15197_v61 = vpack.c.bf16 %v5502_v63, %v5502_v63  ;;  %v5888_v38 = vunpack.c.l.b16 %v15195_v17  ;;  %v5889_v23 = vunpack.c.l.b16 %v15196_v14  ;;  %v4696_v10 = vmax.f32 %v4694_v1, %v4695_v51 }
 0x270   : > { %v4710_v12 = vmax.f32 %v4708_v53, %v4709_v34  ;;  %v4690_v3 = vrot.slane %v4689_v42, 2  ;;  %v4704_v59 = vrot.slane %v4703_v22, 2  ;;  %22506 = vst [vmem:[#allocation30_spill] sm:$0xff] %v19004_v46  ;;  %v3947_v1 = vcombine.high %v19004_v46, %v19004_v46 }
 0x271   : > { %v5890_v9 = vunpack.c.l.b16 %v15197_v61  ;;  %v5952_v20 = vsel %vm5951_vm14, %v5888_v38, %v5887_v0  ;;  %v4697_v49 = vrot.slane %v4696_v10, 2  ;;  %v3954_v53 = vrot.slane %v19004_v46, %v18924_v54 }
 0x272   : > { %v5954_v55 = vsel %vm5953_vm15, %v5889_v23, %v5952_v20  ;;  %v4711_v5 = vrot.slane %v4710_v12, 2  ;;  %v4691_v16 = vmax.f32 %v4689_v42, %v4690_v3  ;;  %v4705_v40 = vmax.f32 %v4703_v22, %v4704_v59 }
 0x273   : > { %v19001_v41 = vsel %vm5955_vm0, %v5890_v9, %v5954_v55  ;;  %v4698_v17 = vmax.f32 %v4696_v10, %v4697_v49  ;;  %v16760_v14 = vadd.f32 %v18729_v58, %v18958_v32  ;;  %v19016_v15 = vadd.f32 %v18717_v29, %v18962_v33 }
 0x274   : > { %v19020_v51 = vadd.f32 %v18734_v47, %v18964_v19  ;;  %v4712_v0 = vmax.f32 %v4710_v12, %v4711_v5  ;;  %v3961_v42 = vrot.slane %v3947_v1, %v18924_v54  ;;  %v3962_v34 = vcombine.high %v3954_v53, %v3954_v53 }
 0x275   : > { %v4631_v61 = vsel %vm4602_vm13, %v3954_v53, -inf  ;;  %v4692_v38 = vrot.slane %v4691_v16, 1  ;;  %v4706_v23 = vrot.slane %v4705_v40, 1  ;;  %v19026_v29 = vmax.f32 %v16760_v14, 0.0 }
 0x276   : > { %v4632_v10 = vrot.slane %v4631_v61, 4  ;;  %v3963_v22 = vcombine.high %v3961_v42, %v3961_v42  ;;  %v4638_v58 = vsel %vm4602_vm13, %v3962_v34, -inf  ;;  %v4645_v32 = vsel %vm4602_vm13, %v3961_v42, -inf }
 0x277   : > { %22507 = vst [vmem:[#allocation31_spill] sm:$0xff] %v19026_v29  ;;  %v4639_v9 = vrot.slane %v4638_v58, 4  ;;  %v4646_v19 = vrot.slane %v4645_v32, 4  ;;  %v4699_v47 = vrot.slane %v4698_v17, 1  ;;  %v4713_v20 = vrot.slane %v4712_v0, 1 }
 0x278   : > { %v4633_v33 = vmax.f32 %v4631_v61, %v4632_v10  ;;  %v4652_v55 = vsel %vm4602_vm13, %v3963_v22, -inf  ;;  %v4693_v5 = vmax.f32 %v4691_v16, %v4692_v38  ;;  %v4707_v1 = vmax.f32 %v4705_v40, %v4706_v23  ;;  %v19034_v16 = vpop.f32.mrb[47].mxu1 }
 0x279   : > { %v4640_v3 = vmax.f32 %v4638_v58, %v4639_v9  ;;  %v4647_v59 = vmax.f32 %v4645_v32, %v4646_v19  ;;  %v4653_v49 = vrot.slane %v4652_v55, 4  ;;  %v4032_v53 = vcombine.high %v19026_v29, %v19026_v29 }
 0x27a   : > { %v4634_v12 = vrot.slane %v4633_v33, 2  ;;  %v4700_v61 = vmax.f32 %v4698_v17, %v4699_v47  ;;  %v4714_v10 = vmax.f32 %v4712_v0, %v4713_v20  ;;  %v4039_v13 = vrot.slane %v19026_v29, %v18924_v54 }
 0x27b   : > { %v4641_v42 = vrot.slane %v4640_v3, 2  ;;  %v4648_v14 = vrot.slane %v4647_v59, 2  ;;  %v4654_v63 = vmax.f32 %v4652_v55, %v4653_v49  ;;  %v4046_v22 = vrot.slane %v4032_v53, %v18924_v54 }
 0x27c   : > { %v4635_v34 = vmax.f32 %v4633_v33, %v4634_v12  ;;  %v4047_v40 = vcombine.high %v4039_v13, %v4039_v13  ;;  %v4771_v23 = vsel %vm4602_vm13, %v4039_v13, -inf }
 0x27d   : > { %v4642_v58 = vmax.f32 %v4640_v3, %v4641_v42  ;;  %v4649_v32 = vmax.f32 %v4647_v59, %v4648_v14  ;;  %v4655_v9 = vrot.slane %v4654_v63, 2  ;;  %v4048_v38 = vcombine.high %v4046_v22, %v4046_v22 }
 0x27e   : > { %v4636_v46 = vrot.slane %v4635_v34, 1  ;;  %v4785_v33 = vsel %vm4602_vm13, %v4046_v22, -inf  ;;  %v4772_v20 = vrot.slane %v4771_v23, 4  ;;  %v4778_v55 = vsel %vm4602_vm13, %v4047_v40, -inf }
 0x27f   : > { %v4643_v17 = vrot.slane %v4642_v58, 1  ;;  %v4650_v0 = vrot.slane %v4649_v32, 1  ;;  %v4656_v47 = vmax.f32 %v4654_v63, %v4655_v9  ;;  %v4786_v12 = vrot.slane %v4785_v33, 4 }
 0x280   : > { %v4637_v19 = vmax.f32 %v4635_v34, %v4636_v46  ;;  %v4792_v3 = vsel %vm4602_vm13, %v4048_v38, -inf  ;;  %v4773_v14 = vmax.f32 %v4771_v23, %v4772_v20  ;;  %v4779_v36 = vrot.slane %v4778_v55, 4 }
 0x281   : > { %v4644_v59 = vmax.f32 %v4642_v58, %v4643_v17  ;;  %v4651_v49 = vmax.f32 %v4649_v32, %v4650_v0  ;;  %v4657_v53 = vrot.slane %v4656_v47, 1  ;;  %v4787_v62 = vmax.f32 %v4785_v33, %v4786_v12 }
 0x282   : > { %v5503_v42 = vmax.f32 %v4637_v19, %v4693_v5  ;;  %v4793_v13 = vrot.slane %v4792_v3, 4  ;;  %v4774_v63 = vrot.slane %v4773_v14, 2  ;;  %v4780_v9 = vmax.f32 %v4778_v55, %v4779_v36  ;;  %v6043_v5 = vld [vmem:[#allocation3 + $0xc] sm:$0x1] }
 0x283   : > { %v4658_v39 = vmax.f32 %v4656_v47, %v4657_v53  ;;  %v5504_v22 = vmax.f32 %v4644_v59, %v4700_v61  ;;  %v5505_v46 = vmax.f32 %v4651_v49, %v4707_v1  ;;  %v19041_v40 = vmax.f32 %v19016_v15, 0.0 }
 0x284   : > { %v15198_v34 = vpack.c.bf16 %v5503_v42, %v5503_v42  ;;  %v4788_v23 = vrot.slane %v4787_v62, 2  ;;  %v4794_v19 = vmax.f32 %v4792_v3, %v4793_v13  ;;  %v4775_v36 = vmax.f32 %v4773_v14, %v4774_v63 }
 0x285   : > { %22508 = vst [vmem:[#allocation32_spill] sm:$0xff] %v19041_v40  ;;  %v5506_v11 = vmax.f32 %v4658_v39, %v4714_v10  ;;  %v15199_v38 = vpack.c.bf16 %v5504_v22, %v5504_v22  ;;  %v15200_v58 = vpack.c.bf16 %v5505_v46, %v5505_v46  ;;  %v4781_v0 = vrot.slane %v4780_v9, 2  ;;  %v19068_v22 = vpop.f32.mrb[48].mxu1 }
 0x286   : > { %v5891_v32 = vunpack.c.l.b16 %v15198_v34  ;;  %v19046_v15 = vmax.f32 %v19020_v51, 0.0  ;;  %v3998_v47 = vcombine.high %v19041_v40, %v19041_v40  ;;  %v4005_v20 = vrot.slane %v19041_v40, %v18924_v54  ;;  %v6040_v51 = vld [vmem:[#allocation3 + $0x8] sm:$0xf] }
 0x287   : > { %v5892_v33 = vunpack.c.l.b16 %v15199_v38  ;;  %v15258_v61 = vpack.c.bf16 %v5506_v11, %v5506_v11  ;;  %v5893_v17 = vunpack.c.l.b16 %v15200_v58  ;;  %v4789_v55 = vmax.f32 %v4787_v62, %v4788_v23 }
 0x288   : > { %v5958_v1 = vsel %vm5957_vm1, %v5891_v32, %v19001_v41  ;;  %22509 = vst [vmem:[#allocation33_spill] sm:$0xff] %v19046_v15  ;;  %v4795_v3 = vrot.slane %v4794_v19, 2  ;;  %v4012_v59 = vrot.slane %v3998_v47, %v18924_v54  ;;  %v4013_v49 = vcombine.high %v4005_v20, %v4005_v20 }
 0x289   : > { %v5960_v39 = vsel %vm5959_vm3, %v5892_v33, %v5958_v1  ;;  %v6044_v10 = vsel %vm18882_vm12, %v15258_v61, %v6043_v5  ;;  %v4776_v53 = vrot.slane %v4775_v36, 1  ;;  %v4715_v42 = vsel %vm4602_vm13, %v4005_v20, -inf }
 0x28a   : > { %v5962_v41 = vsel %vm5961_vm4, %v5893_v17, %v5960_v39  ;;  %6045 = vst [vmem:[#allocation3 + $0xc] sm:$0x1] %v6044_v10  ;;  %v4049_v13 = vcombine.high %v19046_v15, %v19046_v15  ;;  %v4782_v62 = vmax.f32 %v4780_v9, %v4781_v0  ;;  %v4014_v34 = vcombine.high %v4012_v59, %v4012_v59  ;;  %v19078_v17 = vpop.f32.mrb[49].mxu1 }
 0x28b   : > { %v6005_v12 = vpack.c.b16 %v5962_v41, %v5962_v41  ;;  %v4716_v63 = vrot.slane %v4715_v42, 4  ;;  %v4722_v38 = vsel %vm4602_vm13, %v4013_v49, -inf  ;;  %v4729_v58 = vsel %vm4602_vm13, %v4012_v59, -inf }
 0x28c   : > { %v4056_v32 = vrot.slane %v19046_v15, %v18924_v54  ;;  %v4063_v5 = vrot.slane %v4049_v13, %v18924_v54  ;;  %v4723_v33 = vrot.slane %v4722_v38, 4  ;;  %v4730_v1 = vrot.slane %v4729_v58, 4 }
 0x28d   : > { %v6041_v46 = vsel %vm19057_vm7, %v6005_v12, %v6040_v51  ;;  %v4717_v23 = vmax.f32 %v4715_v42, %v4716_v63  ;;  %v4736_v61 = vsel %vm4602_vm13, %v4014_v34, -inf  ;;  %v4790_v9 = vrot.slane %v4789_v55, 1 }
 0x28e   : > { %6042 = vst [vmem:[#allocation3 + $0x8] sm:$0xf] %v6041_v46  ;;  %v4796_v0 = vmax.f32 %v4794_v19, %v4795_v3  ;;  %v4737_v39 = vrot.slane %v4736_v61, 4  ;;  %v4064_v10 = vcombine.high %v4056_v32, %v4056_v32  ;;  %v4783_v47 = vrot.slane %v4782_v62, 1 }
 0x28f   : > { %v4718_v20 = vrot.slane %v4717_v23, 2  ;;  %v4724_v41 = vmax.f32 %v4722_v38, %v4723_v33  ;;  %v4731_v51 = vmax.f32 %v4729_v58, %v4730_v1  ;;  %v4777_v12 = vmax.f32 %v4775_v36, %v4776_v53 }
 0x290   : > { %v4738_v59 = vmax.f32 %v4736_v61, %v4737_v39  ;;  %v4065_v49 = vcombine.high %v4063_v5, %v4063_v5  ;;  %v4799_v63 = vsel %vm4602_vm13, %v4056_v32, -inf  ;;  %v4791_v14 = vmax.f32 %v4789_v55, %v4790_v9 }
 0x291   : > { %v4719_v46 = vmax.f32 %v4717_v23, %v4718_v20  ;;  %v4725_v13 = vrot.slane %v4724_v41, 2  ;;  %v4732_v42 = vrot.slane %v4731_v51, 2  ;;  %v4797_v34 = vrot.slane %v4796_v0, 1 }
 0x292   : > { %v4739_v29 = vrot.slane %v4738_v59, 2  ;;  %v4806_v15 = vsel %vm4602_vm13, %v4064_v10, -inf  ;;  %v4784_v19 = vmax.f32 %v4782_v62, %v4783_v47  ;;  %v4800_v38 = vrot.slane %v4799_v63, 4 }
 0x293   : > { %v4720_v3 = vrot.slane %v4719_v46, 1  ;;  %v4726_v60 = vmax.f32 %v4724_v41, %v4725_v13  ;;  %v4733_v52 = vmax.f32 %v4731_v51, %v4732_v42  ;;  %v4813_v36 = vsel %vm4602_vm13, %v4063_v5, -inf  ;;  %v19084_v42 = vpop.f32.mrb[50].mxu1 }
 0x294   : > { %v4740_v57 = vmax.f32 %v4738_v59, %v4739_v29  ;;  %v4820_v53 = vsel %vm4602_vm13, %v4065_v49, -inf  ;;  %v4807_v1 = vrot.slane %v4806_v15, 4  ;;  %v4798_v32 = vmax.f32 %v4796_v0, %v4797_v34 }
 0x295   : > { %v4721_v58 = vmax.f32 %v4719_v46, %v4720_v3  ;;  %v4727_v23 = vrot.slane %v4726_v60, 1  ;;  %v4734_v33 = vrot.slane %v4733_v52, 1  ;;  %v4814_v10 = vrot.slane %v4813_v36, 4 }
 0x296   : > { %v4741_v55 = vrot.slane %v4740_v57, 1  ;;  %v4801_v47 = vmax.f32 %v4799_v63, %v4800_v38  ;;  %v4821_v20 = vrot.slane %v4820_v53, 4  ;;  %v4808_v59 = vmax.f32 %v4806_v15, %v4807_v1 }
 0x297   : > { %v4728_v61 = vmax.f32 %v4726_v60, %v4727_v23  ;;  %v4735_v9 = vmax.f32 %v4733_v52, %v4734_v33  ;;  %v5507_v39 = vmax.f32 %v4721_v58, %v4777_v12  ;;  %v4815_v46 = vmax.f32 %v4813_v36, %v4814_v10 }
 0x298   : > { %v4742_v62 = vmax.f32 %v4740_v57, %v4741_v55  ;;  %v4802_v0 = vrot.slane %v4801_v47, 2  ;;  %v4822_v34 = vmax.f32 %v4820_v53, %v4821_v20  ;;  %v4809_v58 = vrot.slane %v4808_v59, 2 }
 0x299   : > { %v5508_v41 = vmax.f32 %v4728_v61, %v4784_v19  ;;  %v5509_v29 = vmax.f32 %v4735_v9, %v4791_v14  ;;  %v15202_v51 = vpack.c.bf16 %v5507_v39, %v5507_v39  ;;  %v16772_v63 = vadd.f32 %v18722_v45, %v18969_v21  ;;  %v17384_v39 = vld [vmem:[%s22363_s3 + $0x68] sm:$0xff]  }
 0x29a   : > { %v5510_v5 = vmax.f32 %v4742_v62, %v4798_v32  ;;  %v16776_v15 = vadd.f32 %v18751_v43, %v18975_v56  ;;  %v19092_v14 = vadd.f32 %v18742_v8, %v18977_v30  ;;  %v4816_v38 = vrot.slane %v4815_v46, 2  ;;  %15811 = vmatprep.subr.bf16.mxu0 %v17384_v39 }
 0x29b   : > { %v15203_v13 = vpack.c.bf16 %v5508_v41, %v5508_v41  ;;  %v15204_v49 = vpack.c.bf16 %v5509_v29, %v5509_v29  ;;  %v5895_v60 = vunpack.c.l.b16 %v15202_v51  ;;  %v19096_v53 = vmax.f32 %v16772_v63, 0.0 }
 0x29c   : > { %v15205_v3 = vpack.c.bf16 %v5510_v5, %v5510_v5  ;;  %v19098_v23 = vmax.f32 %v16776_v15, 0.0  ;;  %v4803_v45 = vmax.f32 %v4801_v47, %v4802_v0  ;;  %v4823_v21 = vrot.slane %v4822_v34, 2 }
 0x29d   : > { %v5896_v52 = vunpack.c.l.b16 %v15203_v13  ;;  %v5897_v12 = vunpack.c.l.b16 %v15204_v49  ;;  %v4810_v1 = vmax.f32 %v4808_v59, %v4809_v58  ;;  %v4015_v8 = vcombine.high %v19096_v53, %v19096_v53 }
 0x29e   : > { %v5898_v57 = vunpack.c.l.b16 %v15205_v3  ;;  %v4022_v56 = vrot.slane %v19096_v53, %v18924_v54  ;;  %v4817_v30 = vmax.f32 %v4815_v46, %v4816_v38  ;;  %v4100_v9 = vcombine.high %v19098_v23, %v19098_v23 }
 0x29f   : > { %v5963_v19 = vsel %vm5951_vm14, %v5896_v52, %v5895_v60  ;;  %v4029_v32 = vrot.slane %v4015_v8, %v18924_v54  ;;  %v4804_v10 = vrot.slane %v4803_v45, 1  ;;  %v4824_v62 = vmax.f32 %v4822_v34, %v4823_v21 }
 0x2a0   : > { %v5964_v36 = vsel %vm5953_vm15, %v5897_v12, %v5963_v19  ;;  %v4030_v55 = vcombine.high %v4022_v56, %v4022_v56  ;;  %v4743_v61 = vsel %vm4602_vm13, %v4022_v56, -inf  ;;  %v4811_v20 = vrot.slane %v4810_v1, 1 }
 0x2a1   : > { %v19101_v33 = vsel %vm5955_vm0, %v5898_v57, %v5964_v36  ;;  %v4744_v47 = vrot.slane %v4743_v61, 4  ;;  %v4031_v41 = vcombine.high %v4029_v32, %v4029_v32  ;;  %v4757_v51 = vsel %vm4602_vm13, %v4029_v32, -inf }
 0x2a2   : > { %v4750_v29 = vsel %vm4602_vm13, %v4030_v55, -inf  ;;  %v4758_v13 = vrot.slane %v4757_v51, 4  ;;  %v4818_v49 = vrot.slane %v4817_v30, 1  ;;  %v4107_v3 = vrot.slane %v19098_v23, %v18924_v54 }
 0x2a3   : > { %v4745_v59 = vmax.f32 %v4743_v61, %v4744_v47  ;;  %v4751_v5 = vrot.slane %v4750_v29, 4  ;;  %v4764_v46 = vsel %vm4602_vm13, %v4031_v41, -inf  ;;  %v4114_v0 = vrot.slane %v4100_v9, %v18924_v54 }
 0x2a4   : > { %v4759_v52 = vmax.f32 %v4757_v51, %v4758_v13  ;;  %v4765_v12 = vrot.slane %v4764_v46, 4  ;;  %v4805_v58 = vmax.f32 %v4803_v45, %v4804_v10  ;;  %v4812_v57 = vmax.f32 %v4810_v1, %v4811_v20  ;;  %v19126_v10 = vpop.f32.mrb[51].mxu1 }
 0x2a5   : > { %v4746_v34 = vrot.slane %v4745_v59, 2  ;;  %v4752_v60 = vmax.f32 %v4750_v29, %v4751_v5  ;;  %v4825_v63 = vrot.slane %v4824_v62, 1  ;;  %v4819_v21 = vmax.f32 %v4817_v30, %v4818_v49 }
 0x2a6   : > { %v4760_v38 = vrot.slane %v4759_v52, 2  ;;  %v4766_v36 = vmax.f32 %v4764_v46, %v4765_v12  ;;  %v4115_v8 = vcombine.high %v4107_v3, %v4107_v3  ;;  %v4116_v56 = vcombine.high %v4114_v0, %v4114_v0 }
 0x2a7   : > { %v4747_v15 = vmax.f32 %v4745_v59, %v4746_v34  ;;  %v4753_v19 = vrot.slane %v4752_v60, 2  ;;  %v4883_v32 = vsel %vm4602_vm13, %v4107_v3, -inf  ;;  %v4897_v45 = vsel %vm4602_vm13, %v4114_v0, -inf }
 0x2a8   : > { %v4761_v39 = vmax.f32 %v4759_v52, %v4760_v38  ;;  %v4767_v9 = vrot.slane %v4766_v36, 2  ;;  %v4884_v47 = vrot.slane %v4883_v32, 4  ;;  %v4890_v41 = vsel %vm4602_vm13, %v4115_v8, -inf }
 0x2a9   : > { %v4748_v55 = vrot.slane %v4747_v15, 1  ;;  %v4754_v61 = vmax.f32 %v4752_v60, %v4753_v19  ;;  %v4904_v1 = vsel %vm4602_vm13, %v4116_v56, -inf  ;;  %v4826_v59 = vmax.f32 %v4824_v62, %v4825_v63 }
 0x2aa   : > { %v4762_v30 = vrot.slane %v4761_v39, 1  ;;  %v4768_v51 = vmax.f32 %v4766_v36, %v4767_v9  ;;  %v4885_v5 = vmax.f32 %v4883_v32, %v4884_v47  ;;  %v4891_v13 = vrot.slane %v4890_v41, 4  ;;  %v6049_v36 = vld [vmem:[#allocation3 + $0x14] sm:$0x1] }
 0x2ab   : > { %v4749_v20 = vmax.f32 %v4747_v15, %v4748_v55  ;;  %v4755_v29 = vrot.slane %v4754_v61, 1  ;;  %v4898_v52 = vrot.slane %v4897_v45, 4  ;;  %v4905_v12 = vrot.slane %v4904_v1, 4 }
 0x2ac   : > { %v4763_v46 = vmax.f32 %v4761_v39, %v4762_v30  ;;  %v4769_v3 = vrot.slane %v4768_v51, 1  ;;  %v4892_v60 = vmax.f32 %v4890_v41, %v4891_v13  ;;  %v4886_v56 = vrot.slane %v4885_v5, 2 }
 0x2ad   : > { %v4756_v49 = vmax.f32 %v4754_v61, %v4755_v29  ;;  %v5511_v34 = vmax.f32 %v4749_v20, %v4805_v58  ;;  %v4899_v63 = vmax.f32 %v4897_v45, %v4898_v52  ;;  %v4906_v32 = vmax.f32 %v4904_v1, %v4905_v12  ;;  %v5643_v1 = vld [vmem:[#allocation3 + $0x18] sm:$0x1] }
 0x2ae   : > { %v4770_v19 = vmax.f32 %v4768_v51, %v4769_v3  ;;  %v5513_v38 = vmax.f32 %v4763_v46, %v4819_v21  ;;  %v4893_v62 = vrot.slane %v4892_v60, 2  ;;  %v4887_v9 = vmax.f32 %v4885_v5, %v4886_v56 }
 0x2af   : > { %v5512_v0 = vmax.f32 %v4756_v49, %v4812_v57  ;;  %v15206_v8 = vpack.c.bf16 %v5511_v34, %v5511_v34  ;;  %v17385_v57 = vld [vmem:[%s22363_s3 + $0x28] sm:$0xff]   ;;  %v19137_v20 = vmax.f32 %v19092_v14, 0.0  ;;  %v16784_v45 = vadd.f32 %v18757_v25, %v18979_v7  ;;  %v19148_v25 = vpop.f32.mrb[52].mxu1 }
 0x2b0   : > { %v5514_v43 = vmax.f32 %v4770_v19, %v4826_v59  ;;  %v15208_v55 = vpack.c.bf16 %v5513_v38, %v5513_v38  ;;  %15812 = vmatpush3.bf16.msra.mxu0 %v17385_v57  ;;  %v4894_v29 = vmax.f32 %v4892_v60, %v4893_v62  ;;  %v4900_v30 = vrot.slane %v4899_v63, 2 }
 0x2b1   : > { %v15207_v15 = vpack.c.bf16 %v5512_v0, %v5512_v0  ;;  %v5899_v40 = vunpack.c.l.b16 %v15206_v8  ;;  %v4907_v51 = vrot.slane %v4906_v32, 2  ;;  %v4066_v5 = vcombine.high %v19137_v20, %v19137_v20 }
 0x2b2   : > { %v15259_v39 = vpack.c.bf16 %v5514_v43, %v5514_v43  ;;  %v5901_v21 = vunpack.c.l.b16 %v15208_v55  ;;  %v6046_v43 = vld [vmem:[#allocation3 + $0x10] sm:$0xf]  ;;  %v4073_v14 = vrot.slane %v19137_v20, %v18924_v54  ;;  %v19146_v13 = vmax.f32 %v16784_v45, 0.0 }
 0x2b3   : > { %v5900_v61 = vunpack.c.l.b16 %v15207_v15  ;;  %v5966_v58 = vsel %vm5957_vm1, %v5899_v40, %v19101_v33  ;;  %v5674_v40 = vld [vmem:[#allocation3 + $0x1c] sm:$0x1]  ;;  %v19152_v7 = vadd.f32 %v18747_v31, %v18981_v48  ;;  %v5644_v49 = vsel %vm18882_vm12, 0, %v5643_v1 }
 0x2b4   : > { %v6050_v41 = vsel %vm18882_vm12, %v15259_v39, %v6049_v36  ;;  %v5675_v46 = vsel %vm18869_vm11, 0, %v5674_v40  ;;  %v19160_v3 = vadd.f32 %v18773_v28, %v18990_v18  ;;  %v4080_v60 = vrot.slane %v4066_v5, %v18924_v54  ;;  %5645 = vst [vmem:[#allocation3 + $0x18] sm:$0x1] %v5644_v49 }
 0x2b5   : > { %v5967_v47 = vsel %vm5959_vm3, %v5900_v61, %v5966_v58  ;;  %6051 = vst [vmem:[#allocation3 + $0x14] sm:$0x1] %v6050_v41  ;;  %v4081_v52 = vcombine.high %v4073_v14, %v4073_v14  ;;  %v4827_v12 = vsel %vm4602_vm13, %v4073_v14, -inf  ;;  %5676 = vst [vmem:[#allocation3 + $0x1c] sm:$0x1] %v5675_v46  ;;  %v4117_v19 = vcombine.high %v19146_v13, %v19146_v13 }
 0x2b6   : > { %v5968_v33 = vsel %vm5961_vm4, %v5901_v21, %v5967_v47  ;;  %v4828_v31 = vrot.slane %v4827_v12, 4  ;;  %v4124_v28 = vrot.slane %v19146_v13, %v18924_v54  ;;  %v4901_v18 = vmax.f32 %v4899_v63, %v4900_v30  ;;  %v19176_v63 = vpop.f32.mrb[53].mxu1 }
 0x2b7   : > { %v6007_v59 = vpack.c.b16 %v5968_v33, %v5968_v33  ;;  %v4082_v0 = vcombine.high %v4080_v60, %v4080_v60  ;;  %v4834_v38 = vsel %vm4602_vm13, %v4081_v52, -inf  ;;  %v4841_v8 = vsel %vm4602_vm13, %v4080_v60, -inf }
 0x2b8   : > { %v4829_v56 = vmax.f32 %v4827_v12, %v4828_v31  ;;  %v4835_v15 = vrot.slane %v4834_v38, 4  ;;  %v4842_v55 = vrot.slane %v4841_v8, 4  ;;  %v4131_v36 = vrot.slane %v4117_v19, %v18924_v54 }
 0x2b9   : > { %v6047_v34 = vsel %vm19057_vm7, %v6007_v59, %v6046_v43  ;;  %v4888_v62 = vrot.slane %v4887_v9, 1  ;;  %v4908_v61 = vmax.f32 %v4906_v32, %v4907_v51  ;;  %v4848_v58 = vsel %vm4602_vm13, %v4082_v0, -inf }
 0x2ba   : > { %6048 = vst [vmem:[#allocation3 + $0x10] sm:$0xf] %v6047_v34  ;;  %v4132_v39 = vcombine.high %v4124_v28, %v4124_v28  ;;  %v4830_v57 = vrot.slane %v4829_v56, 2  ;;  %v4836_v21 = vmax.f32 %v4834_v38, %v4835_v15  ;;  %v4843_v47 = vmax.f32 %v4841_v8, %v4842_v55 }
 0x2bb   : > { %v4849_v41 = vrot.slane %v4848_v58, 4  ;;  %v4895_v45 = vrot.slane %v4894_v29, 1  ;;  %v4902_v1 = vrot.slane %v4901_v18, 1  ;;  %v4133_v40 = vcombine.high %v4131_v36, %v4131_v36 }
 0x2bc   : > { %v4831_v33 = vmax.f32 %v4829_v56, %v4830_v57  ;;  %v4837_v43 = vrot.slane %v4836_v21, 2  ;;  %v4844_v30 = vrot.slane %v4843_v47, 2  ;;  %v4889_v5 = vmax.f32 %v4887_v9, %v4888_v62 }
 0x2bd   : > { %v4850_v59 = vmax.f32 %v4848_v58, %v4849_v41  ;;  %v4909_v14 = vrot.slane %v4908_v61, 1  ;;  %v4911_v32 = vsel %vm4602_vm13, %v4124_v28, -inf  ;;  %v4918_v51 = vsel %vm4602_vm13, %v4132_v39, -inf  ;;  %v17386_v28 = vld [vmem:[%s22363_s3 + $0x1c0] sm:$0xff]  }
 0x2be   : > { %v4832_v49 = vrot.slane %v4831_v33, 1  ;;  %v4838_v46 = vmax.f32 %v4836_v21, %v4837_v43  ;;  %v4845_v34 = vmax.f32 %v4843_v47, %v4844_v30  ;;  %v4896_v52 = vmax.f32 %v4894_v29, %v4895_v45  ;;  %15905 = vmatprep.subr.bf16.mxu1 %v17386_v28  ;;  %v19185_v45 = vpop.f32.mrb[54].mxu1 }
 0x2bf   : > { %v4851_v60 = vrot.slane %v4850_v59, 2  ;;  %v4903_v12 = vmax.f32 %v4901_v18, %v4902_v1  ;;  %v4925_v31 = vsel %vm4602_vm13, %v4131_v36, -inf  ;;  %v4932_v19 = vsel %vm4602_vm13, %v4133_v40, -inf }
 0x2c0   : > { %v4833_v0 = vmax.f32 %v4831_v33, %v4832_v49  ;;  %v4839_v38 = vrot.slane %v4838_v46, 1  ;;  %v4846_v8 = vrot.slane %v4845_v34, 1  ;;  %v4910_v9 = vmax.f32 %v4908_v61, %v4909_v14 }
 0x2c1   : > { %v4852_v56 = vmax.f32 %v4850_v59, %v4851_v60  ;;  %v4912_v15 = vrot.slane %v4911_v32, 4  ;;  %v4919_v55 = vrot.slane %v4918_v51, 4  ;;  %v4926_v18 = vrot.slane %v4925_v31, 4 }
 0x2c2   : > { %v4840_v62 = vmax.f32 %v4838_v46, %v4839_v38  ;;  %v4847_v58 = vmax.f32 %v4845_v34, %v4846_v8  ;;  %v5515_v29 = vmax.f32 %v4833_v0, %v4889_v5  ;;  %v4933_v57 = vrot.slane %v4932_v19, 4 }
 0x2c3   : > { %v4853_v39 = vrot.slane %v4852_v56, 1  ;;  %v4913_v61 = vmax.f32 %v4911_v32, %v4912_v15  ;;  %v4920_v1 = vmax.f32 %v4918_v51, %v4919_v55  ;;  %v4927_v30 = vmax.f32 %v4925_v31, %v4926_v18 }
 0x2c4   : > { %v5516_v21 = vmax.f32 %v4840_v62, %v4896_v52  ;;  %v5517_v47 = vmax.f32 %v4847_v58, %v4903_v12  ;;  %v15210_v41 = vpack.c.bf16 %v5515_v29, %v5515_v29  ;;  %v4934_v59 = vmax.f32 %v4932_v19, %v4933_v57 }
 0x2c5   : > { %v4854_v36 = vmax.f32 %v4852_v56, %v4853_v39  ;;  %v4914_v34 = vrot.slane %v4913_v61, 2  ;;  %v4921_v60 = vrot.slane %v4920_v1, 2  ;;  %v19189_v12 = vmax.f32 %v19152_v7, 0.0 }
 0x2c6   : > { %v15211_v33 = vpack.c.bf16 %v5516_v21, %v5516_v21  ;;  %v15212_v43 = vpack.c.bf16 %v5517_v47, %v5517_v47  ;;  %v5903_v49 = vunpack.c.l.b16 %v15210_v41  ;;  %v4928_v51 = vrot.slane %v4927_v30, 2 }
 0x2c7   : > { %v5518_v40 = vmax.f32 %v4854_v36, %v4910_v9  ;;  %v4935_v38 = vrot.slane %v4934_v59, 2  ;;  %v4083_v19 = vcombine.high %v19189_v12, %v19189_v12  ;;  %v4915_v56 = vmax.f32 %v4913_v61, %v4914_v34  ;;  %v17387_v34 = vld [vmem:[%s22363_s3 + $0x180] sm:$0xff]  }
 0x2c8   : > { %v5904_v46 = vunpack.c.l.b16 %v15211_v33  ;;  %v5905_v5 = vunpack.c.l.b16 %v15212_v43  ;;  %v4922_v9 = vmax.f32 %v4920_v1, %v4921_v60  ;;  %v4090_v15 = vrot.slane %v19189_v12, %v18924_v54  ;;  %15906 = vmatpush3.bf16.msra.mxu1 %v17387_v34 }
 0x2c9   : > { %v15213_v14 = vpack.c.bf16 %v5518_v40, %v5518_v40  ;;  %v4097_v7 = vrot.slane %v4083_v19, %v18924_v54  ;;  %v19203_v55 = vmax.f32 %v19160_v3, 0.0  ;;  %v19207_v28 = vadd.f32 %v18763_v37, %v18992_v2 }
 0x2ca   : > { %v5969_v52 = vsel %vm5951_vm14, %v5904_v46, %v5903_v49  ;;  %v19211_v62 = vadd.f32 %v18785_v24, %v18996_v44  ;;  %v4929_v58 = vmax.f32 %v4927_v30, %v4928_v51  ;;  %v4936_v39 = vmax.f32 %v4934_v59, %v4935_v38 }
 0x2cb   : > { %v5906_v0 = vunpack.c.l.b16 %v15213_v14  ;;  %v5970_v32 = vsel %vm5953_vm15, %v5905_v5, %v5969_v52  ;;  %v4098_v29 = vcombine.high %v4090_v15, %v4090_v15  ;;  %v4855_v18 = vsel %vm4602_vm13, %v4090_v15, -inf }
 0x2cc   : > { %v4099_v57 = vcombine.high %v4097_v7, %v4097_v7  ;;  %v4856_v36 = vrot.slane %v4855_v18, 4  ;;  %v4869_v21 = vsel %vm4602_vm13, %v4097_v7, -inf  ;;  %v4916_v47 = vrot.slane %v4915_v56, 1 }
 0x2cd   : > { %v19193_v8 = vsel %vm5955_vm0, %v5906_v0, %v5970_v32  ;;  %v4923_v3 = vrot.slane %v4922_v9, 1  ;;  %v4862_v41 = vsel %vm4602_vm13, %v4098_v29, -inf  ;;  %v4870_v61 = vrot.slane %v4869_v21, 4 }
 0x2ce   : > { %v4857_v37 = vmax.f32 %v4855_v18, %v4856_v36  ;;  %v4863_v2 = vrot.slane %v4862_v41, 4  ;;  %v4876_v1 = vsel %vm4602_vm13, %v4099_v57, -inf  ;;  %v4168_v24 = vcombine.high %v19203_v55, %v19203_v55  ;;  %v19225_v18 = vpop.f32.mrb[55].mxu1 }
 0x2cf   : > { %v4930_v44 = vrot.slane %v4929_v58, 1  ;;  %v4937_v40 = vrot.slane %v4936_v39, 1  ;;  %v4871_v33 = vmax.f32 %v4869_v21, %v4870_v61  ;;  %v4877_v43 = vrot.slane %v4876_v1, 4 }
 0x2d0   : > { %v4858_v30 = vrot.slane %v4857_v37, 2  ;;  %v4864_v59 = vmax.f32 %v4862_v41, %v4863_v2  ;;  %v4917_v14 = vmax.f32 %v4915_v56, %v4916_v47  ;;  %v4924_v49 = vmax.f32 %v4922_v9, %v4923_v3 }
 0x2d1   : > { %v4872_v46 = vrot.slane %v4871_v33, 2  ;;  %v4878_v5 = vmax.f32 %v4876_v1, %v4877_v43  ;;  %v4175_v52 = vrot.slane %v19203_v55, %v18924_v54  ;;  %v4182_v32 = vrot.slane %v4168_v24, %v18924_v54 }
 0x2d2   : > { %v4859_v60 = vmax.f32 %v4857_v37, %v4858_v30  ;;  %v4865_v0 = vrot.slane %v4864_v59, 2  ;;  %v4931_v51 = vmax.f32 %v4929_v58, %v4930_v44  ;;  %v4938_v38 = vmax.f32 %v4936_v39, %v4937_v40 }
 0x2d3   : > { %v4873_v19 = vmax.f32 %v4871_v33, %v4872_v46  ;;  %v4879_v15 = vrot.slane %v4878_v5, 2  ;;  %v4183_v7 = vcombine.high %v4175_v52, %v4175_v52  ;;  %v4184_v29 = vcombine.high %v4182_v32, %v4182_v32 }
 0x2d4   : > { %v4860_v56 = vrot.slane %v4859_v60, 1  ;;  %v4866_v9 = vmax.f32 %v4864_v59, %v4865_v0  ;;  %v4995_v21 = vsel %vm4602_vm13, %v4175_v52, -inf  ;;  %v5009_v47 = vsel %vm4602_vm13, %v4182_v32, -inf }
 0x2d5   : > { %v4874_v57 = vrot.slane %v4873_v19, 1  ;;  %v4880_v36 = vmax.f32 %v4878_v5, %v4879_v15  ;;  %v4996_v61 = vrot.slane %v4995_v21, 4  ;;  %v5002_v58 = vsel %vm4602_vm13, %v4183_v7, -inf }
 0x2d6   : > { %v4861_v3 = vmax.f32 %v4859_v60, %v4860_v56  ;;  %v4867_v41 = vrot.slane %v4866_v9, 1  ;;  %v5003_v2 = vrot.slane %v5002_v58, 4  ;;  %v5010_v1 = vrot.slane %v5009_v47, 4  ;;  %v6055_v56 = vld [vmem:[#allocation3 + $0x1c] sm:$0x1] }
 0x2d7   : > { %v4875_v39 = vmax.f32 %v4873_v19, %v4874_v57  ;;  %v4881_v37 = vrot.slane %v4880_v36, 1  ;;  %v5016_v40 = vsel %vm4602_vm13, %v4184_v29, -inf  ;;  %v4997_v30 = vmax.f32 %v4995_v21, %v4996_v61 }
 0x2d8   : > { %v4868_v24 = vmax.f32 %v4866_v9, %v4867_v41  ;;  %v5519_v44 = vmax.f32 %v4861_v3, %v4917_v14  ;;  %v5004_v59 = vmax.f32 %v5002_v58, %v5003_v2  ;;  %v5011_v34 = vmax.f32 %v5009_v47, %v5010_v1 }
 0x2d9   : > { %v4882_v33 = vmax.f32 %v4880_v36, %v4881_v37  ;;  %v5521_v43 = vmax.f32 %v4875_v39, %v4931_v51  ;;  %v5017_v60 = vrot.slane %v5016_v40, 4  ;;  %v19232_v32 = vmax.f32 %v19207_v28, 0.0  ;;  %v17388_v51 = vld [vmem:[%s22363_s3 + $0x1c8] sm:$0xff]   ;;  %v6052_v39 = vld [vmem:[#allocation3 + $0x18] sm:$0xf] }
 0x2da   : > { %v5520_v46 = vmax.f32 %v4868_v24, %v4924_v49  ;;  %v15214_v5 = vpack.c.bf16 %v5519_v44, %v5519_v44  ;;  %v4998_v7 = vrot.slane %v4997_v30, 2  ;;  %v5005_v29 = vrot.slane %v5004_v59, 2  ;;  %v17389_v28 = vld [vmem:[%s22363_s3 + $0x188] sm:$0xff]   ;;  %15907 = vmatprep.subr.bf16.mxu1 %v17388_v51 }
 0x2db   : > { %v5522_v0 = vmax.f32 %v4882_v33, %v4938_v38  ;;  %v15216_v52 = vpack.c.bf16 %v5521_v43, %v5521_v43  ;;  %v5018_v9 = vmax.f32 %v5016_v40, %v5017_v60  ;;  %v5012_v38 = vrot.slane %v5011_v34, 2  ;;  %15908 = vmatpush3.bf16.msra.mxu1 %v17389_v28  ;;  %v19255_v33 = vpop.f32.mrb[56].mxu1 }
 0x2dc   : > { %v15215_v19 = vpack.c.bf16 %v5520_v46, %v5520_v46  ;;  %v5907_v15 = vunpack.c.l.b16 %v15214_v5  ;;  %v4134_v47 = vcombine.high %v19232_v32, %v19232_v32  ;;  %v19247_v3 = vmax.f32 %v19211_v62, 0.0 }
 0x2dd   : > { %v15260_v14 = vpack.c.bf16 %v5522_v0, %v5522_v0  ;;  %v5909_v36 = vunpack.c.l.b16 %v15216_v52  ;;  %v4141_v61 = vrot.slane %v19232_v32, %v18924_v54  ;;  %v4999_v37 = vmax.f32 %v4997_v30, %v4998_v7 }
 0x2de   : > { %v5908_v49 = vunpack.c.l.b16 %v15215_v19  ;;  %v5972_v57 = vsel %vm5957_vm1, %v5907_v15, %v19193_v8  ;;  %v5019_v8 = vrot.slane %v5018_v9, 2  ;;  %v5006_v2 = vmax.f32 %v5004_v59, %v5005_v29 }
 0x2df   : > { %v6056_v21 = vsel %vm18882_vm12, %v15260_v14, %v6055_v56  ;;  %v4148_v1 = vrot.slane %v4134_v47, %v18924_v54  ;;  %v5013_v44 = vmax.f32 %v5011_v34, %v5012_v38  ;;  %v4149_v62 = vcombine.high %v4141_v61, %v4141_v61 }
 0x2e0   : > { %v5973_v41 = vsel %vm5959_vm3, %v5908_v49, %v5972_v57  ;;  %6057 = vst [vmem:[#allocation3 + $0x1c] sm:$0x1] %v6056_v21  ;;  %v4939_v40 = vsel %vm4602_vm13, %v4141_v61, -inf  ;;  %v5020_v59 = vmax.f32 %v5018_v9, %v5019_v8  ;;  %v4185_v56 = vcombine.high %v19247_v3, %v19247_v3 }
 0x2e1   : > { %v5974_v58 = vsel %vm5961_vm4, %v5909_v36, %v5973_v41  ;;  %v4150_v43 = vcombine.high %v4148_v1, %v4148_v1  ;;  %v4940_v46 = vrot.slane %v4939_v40, 4  ;;  %v4953_v5 = vsel %vm4602_vm13, %v4148_v1, -inf }
 0x2e2   : > { %v6009_v24 = vpack.c.b16 %v5974_v58, %v5974_v58  ;;  %v4946_v0 = vsel %vm4602_vm13, %v4149_v62, -inf  ;;  %v4954_v52 = vrot.slane %v4953_v5, 4  ;;  %v5000_v14 = vrot.slane %v4999_v37, 1 }
 0x2e3   : > { %v4941_v34 = vmax.f32 %v4939_v40, %v4940_v46  ;;  %v4947_v19 = vrot.slane %v4946_v0, 4  ;;  %v4960_v15 = vsel %vm4602_vm13, %v4150_v43, -inf  ;;  %v4192_v51 = vrot.slane %v19247_v3, %v18924_v54 }
 0x2e4   : > { %v6053_v30 = vsel %vm19057_vm7, %v6009_v24, %v6052_v39  ;;  %v4955_v7 = vmax.f32 %v4953_v5, %v4954_v52  ;;  %v4961_v29 = vrot.slane %v4960_v15, 4  ;;  %v5007_v49 = vrot.slane %v5006_v2, 1 }
 0x2e5   : > { %6054 = vst [vmem:[#allocation3 + $0x18] sm:$0xf] %v6053_v30  ;;  %v4942_v57 = vrot.slane %v4941_v34, 2  ;;  %v4948_v9 = vmax.f32 %v4946_v0, %v4947_v19  ;;  %v4199_v38 = vrot.slane %v4185_v56, %v18924_v54  ;;  %v5014_v28 = vrot.slane %v5013_v44, 1 }
 0x2e6   : > { %v4956_v36 = vrot.slane %v4955_v7, 2  ;;  %v4962_v21 = vmax.f32 %v4960_v15, %v4961_v29  ;;  %v4200_v47 = vcombine.high %v4192_v51, %v4192_v51  ;;  %v5021_v41 = vrot.slane %v5020_v59, 1 }
 0x2e7   : > { %v4943_v8 = vmax.f32 %v4941_v34, %v4942_v57  ;;  %v4949_v61 = vrot.slane %v4948_v9, 2  ;;  %v4201_v1 = vcombine.high %v4199_v38, %v4199_v38  ;;  %v5023_v24 = vsel %vm4602_vm13, %v4192_v51, -inf }
 0x2e8   : > { %v4957_v58 = vmax.f32 %v4955_v7, %v4956_v36  ;;  %v4963_v39 = vrot.slane %v4962_v21, 2  ;;  %v5001_v62 = vmax.f32 %v4999_v37, %v5000_v14  ;;  %v5008_v40 = vmax.f32 %v5006_v2, %v5007_v49 }
 0x2e9   : > { %v4944_v43 = vrot.slane %v4943_v8, 1  ;;  %v4950_v46 = vmax.f32 %v4948_v9, %v4949_v61  ;;  %v5015_v5 = vmax.f32 %v5013_v44, %v5014_v28  ;;  %v5030_v52 = vsel %vm4602_vm13, %v4200_v47, -inf }
 0x2ea   : > { %v4958_v30 = vrot.slane %v4957_v58, 1  ;;  %v4964_v0 = vmax.f32 %v4962_v21, %v4963_v39  ;;  %v5024_v56 = vrot.slane %v5023_v24, 4  ;;  %v5037_v34 = vsel %vm4602_vm13, %v4199_v38, -inf }
 0x2eb   : > { %v4945_v19 = vmax.f32 %v4943_v8, %v4944_v43  ;;  %v4951_v15 = vrot.slane %v4950_v46, 1  ;;  %v5022_v29 = vmax.f32 %v5020_v59, %v5021_v41  ;;  %v5044_v36 = vsel %vm4602_vm13, %v4201_v1, -inf }
 0x2ec   : > { %v4959_v7 = vmax.f32 %v4957_v58, %v4958_v30  ;;  %v4965_v57 = vrot.slane %v4964_v0, 1  ;;  %v5031_v2 = vrot.slane %v5030_v52, 4  ;;  %v5038_v44 = vrot.slane %v5037_v34, 4 }
 0x2ed   : > { %v4952_v51 = vmax.f32 %v4950_v46, %v4951_v15  ;;  %v5523_v37 = vmax.f32 %v4945_v19, %v5001_v62  ;;  %v5025_v21 = vmax.f32 %v5023_v24, %v5024_v56  ;;  %v5045_v47 = vrot.slane %v5044_v36, 4  ;;  %v5646_v19 = vld [vmem:[#allocation3 + $0x20] sm:$0x1] }
 0x2ee   : > { %v4966_v14 = vmax.f32 %v4964_v0, %v4965_v57  ;;  %v5525_v49 = vmax.f32 %v4959_v7, %v5015_v5  ;;  %v5032_v43 = vmax.f32 %v5030_v52, %v5031_v2  ;;  %v5039_v41 = vmax.f32 %v5037_v34, %v5038_v44  ;;  %v22512_v2 = vld [vmem:[#allocation21_spill] sm:$0xff] }
 0x2ef   : > { %v5524_v9 = vmax.f32 %v4952_v51, %v5008_v40  ;;  %v15218_v28 = vpack.c.bf16 %v5523_v37, %v5523_v37  ;;  %v5026_v1 = vrot.slane %v5025_v21, 2  ;;  %v5046_v46 = vmax.f32 %v5044_v36, %v5045_v47  ;;  %v5677_v40 = vld [vmem:[#allocation3 + $0x24] sm:$0x1] }
 0x2f0   : > { %v5526_v8 = vmax.f32 %v4966_v14, %v5022_v29  ;;  %v15220_v61 = vpack.c.bf16 %v5525_v49, %v5525_v49  ;;  %v5033_v5 = vrot.slane %v5032_v43, 2  ;;  %v5040_v15 = vrot.slane %v5039_v41, 2 }
 0x2f1   : > { %v15219_v39 = vpack.c.bf16 %v5524_v9, %v5524_v9  ;;  %v5911_v58 = vunpack.c.l.b16 %v15218_v28  ;;  %v16804_v56 = vadd.f32 %v18802_v6, %v19034_v16  ;;  %v5027_v34 = vmax.f32 %v5025_v21, %v5026_v1 }
 0x2f2   : > { %v15221_v38 = vpack.c.bf16 %v5526_v8, %v5526_v8  ;;  %v5913_v59 = vunpack.c.l.b16 %v15220_v61  ;;  %v5047_v29 = vrot.slane %v5046_v46, 2  ;;  %v5647_v57 = vsel %vm18882_vm12, 0, %v5646_v19 }
 0x2f3   : > { %v5912_v30 = vunpack.c.l.b16 %v15219_v39  ;;  %v19280_v7 = vmax.f32 %v16804_v56, 0.0  ;;  %v5678_v36 = vsel %vm18869_vm11, 0, %v5677_v40  ;;  %v16808_v51 = vadd.f32 %v18864_v35, %v19068_v22  ;;  %5648 = vst [vmem:[#allocation3 + $0x20] sm:$0x1] %v5647_v57 }
 0x2f4   : > { %v5914_v62 = vunpack.c.l.b16 %v15221_v38  ;;  %v5034_v37 = vmax.f32 %v5032_v43, %v5033_v5  ;;  %5679 = vst [vmem:[#allocation3 + $0x24] sm:$0x1] %v5678_v36  ;;  %v19290_v6 = vadd.f32 %v18850_v50, %v19078_v17  ;;  %v19294_v16 = vadd.f32 %v18898_v27, %v19084_v42  ;;  %v19306_v17 = vpop.f32.mrb[57].mxu1 }
 0x2f5   : > { %v5975_v0 = vsel %vm5951_vm14, %v5912_v30, %v5911_v58  ;;  %v19298_v14 = vadd.f32 %v22512_v2, %v19126_v10  ;;  %v5041_v49 = vmax.f32 %v5039_v41, %v5040_v15  ;;  %v4151_v35 = vcombine.high %v19280_v7, %v19280_v7 }
 0x2f6   : > { %v5976_v24 = vsel %vm5953_vm15, %v5913_v59, %v5975_v0  ;;  %v4158_v22 = vrot.slane %v19280_v7, %v18924_v54  ;;  %v5048_v50 = vmax.f32 %v5046_v46, %v5047_v29  ;;  %v19310_v10 = vmax.f32 %v16808_v51, 0.0 }
 0x2f7   : > { %v19278_v52 = vsel %vm5955_vm0, %v5914_v62, %v5976_v24  ;;  %v4165_v27 = vrot.slane %v4151_v35, %v18924_v54  ;;  %v5028_v28 = vrot.slane %v5027_v34, 1  ;;  %v5035_v21 = vrot.slane %v5034_v37, 1 }
 0x2f8   : > { %v4166_v42 = vcombine.high %v4158_v22, %v4158_v22  ;;  %v4967_v9 = vsel %vm4602_vm13, %v4158_v22, -inf  ;;  %v5042_v8 = vrot.slane %v5041_v49, 1  ;;  %v5049_v58 = vrot.slane %v5048_v50, 1 }
 0x2f9   : > { %v4968_v47 = vrot.slane %v4967_v9, 4  ;;  %v4167_v61 = vcombine.high %v4165_v27, %v4165_v27  ;;  %v4981_v43 = vsel %vm4602_vm13, %v4165_v27, -inf  ;;  %v4236_v1 = vcombine.high %v19310_v10, %v19310_v10 }
 0x2fa   : > { %v4974_v39 = vsel %vm4602_vm13, %v4166_v42, -inf  ;;  %v4982_v41 = vrot.slane %v4981_v43, 4  ;;  %v4243_v46 = vrot.slane %v19310_v10, %v18924_v54  ;;  %v5029_v40 = vmax.f32 %v5027_v34, %v5028_v28 }
 0x2fb   : > { %v4969_v38 = vmax.f32 %v4967_v9, %v4968_v47  ;;  %v4975_v59 = vrot.slane %v4974_v39, 4  ;;  %v4988_v30 = vsel %vm4602_vm13, %v4167_v61, -inf  ;;  %v5036_v24 = vmax.f32 %v5034_v37, %v5035_v21 }
 0x2fc   : > { %v4983_v5 = vmax.f32 %v4981_v43, %v4982_v41  ;;  %v4989_v19 = vrot.slane %v4988_v30, 4  ;;  %v5043_v15 = vmax.f32 %v5041_v49, %v5042_v8  ;;  %v5050_v51 = vmax.f32 %v5048_v50, %v5049_v58 }
 0x2fd   : > { %v4970_v62 = vrot.slane %v4969_v38, 2  ;;  %v4976_v0 = vmax.f32 %v4974_v39, %v4975_v59  ;;  %v4250_v2 = vrot.slane %v4236_v1, %v18924_v54  ;;  %v4251_v35 = vcombine.high %v4243_v46, %v4243_v46 }
 0x2fe   : > { %v4984_v57 = vrot.slane %v4983_v5, 2  ;;  %v4990_v36 = vmax.f32 %v4988_v30, %v4989_v19  ;;  %v5107_v22 = vsel %vm4602_vm13, %v4243_v46, -inf }
 0x2ff   : > { %v4971_v56 = vmax.f32 %v4969_v38, %v4970_v62  ;;  %v4977_v29 = vrot.slane %v4976_v0, 2  ;;  %v4252_v61 = vcombine.high %v4250_v2, %v4250_v2  ;;  %v5108_v39 = vrot.slane %v5107_v22, 4 }
 0x300   : > { %v4985_v9 = vmax.f32 %v4983_v5, %v4984_v57  ;;  %v4991_v47 = vrot.slane %v4990_v36, 2  ;;  %v5114_v34 = vsel %vm4602_vm13, %v4251_v35, -inf  ;;  %v5121_v37 = vsel %vm4602_vm13, %v4250_v2, -inf }
 0x301   : > { %v4972_v27 = vrot.slane %v4971_v56, 1  ;;  %v4978_v42 = vmax.f32 %v4976_v0, %v4977_v29  ;;  %v5109_v50 = vmax.f32 %v5107_v22, %v5108_v39  ;;  %v5115_v43 = vrot.slane %v5114_v34, 4 }
 0x302   : > { %v4986_v21 = vrot.slane %v4985_v9, 1  ;;  %v4992_v8 = vmax.f32 %v4990_v36, %v4991_v47  ;;  %v5122_v38 = vrot.slane %v5121_v37, 4  ;;  %v5128_v59 = vsel %vm4602_vm13, %v4252_v61, -inf }
 0x303   : > { %v4973_v49 = vmax.f32 %v4971_v56, %v4972_v27  ;;  %v4979_v28 = vrot.slane %v4978_v42, 1  ;;  %v5110_v46 = vrot.slane %v5109_v50, 2  ;;  %v5116_v62 = vmax.f32 %v5114_v34, %v5115_v43  ;;  %v17390_v34 = vld [vmem:[%s22363_s3 + $0x70] sm:$0xff]  }
 0x304   : > { %v4987_v58 = vmax.f32 %v4985_v9, %v4986_v21  ;;  %v4993_v30 = vrot.slane %v4992_v8, 1  ;;  %v5123_v0 = vmax.f32 %v5121_v37, %v5122_v38  ;;  %v5129_v5 = vrot.slane %v5128_v59, 4  ;;  %v6061_v9 = vld [vmem:[#allocation3 + $0x24] sm:$0x1]  ;;  %15813 = vmatprep.subr.bf16.mxu0 %v17390_v34 }
 0x305   : > { %v4980_v41 = vmax.f32 %v4978_v42, %v4979_v28  ;;  %v5527_v1 = vmax.f32 %v4973_v49, %v5029_v40  ;;  %v5111_v2 = vmax.f32 %v5109_v50, %v5110_v46  ;;  %v5117_v35 = vrot.slane %v5116_v62, 2 }
 0x306   : > { %v4994_v19 = vmax.f32 %v4992_v8, %v4993_v30  ;;  %v5529_v57 = vmax.f32 %v4987_v58, %v5043_v15  ;;  %v19325_v36 = vmax.f32 %v19290_v6, 0.0  ;;  %v5124_v40 = vrot.slane %v5123_v0, 2  ;;  %v19333_v15 = vpop.f32.mrb[58].mxu1  ;;  %v6058_v58 = vld [vmem:[#allocation3 + $0x20] sm:$0xf] }
 0x307   : > { %v5528_v29 = vmax.f32 %v4980_v41, %v5036_v24  ;;  %v15222_v56 = vpack.c.bf16 %v5527_v1, %v5527_v1  ;;  %v5112_v61 = vrot.slane %v5111_v2, 1  ;;  %v5130_v39 = vmax.f32 %v5128_v59, %v5129_v5  ;;  %v17391_v24 = vld [vmem:[%s22363_s3 + $0x1d0] sm:$0xff]   ;;  %v19353_v59 = vpop.f32.mrb[59].mxu1 }
 0x308   : > { %v5530_v22 = vmax.f32 %v4994_v19, %v5050_v51  ;;  %v15224_v47 = vpack.c.bf16 %v5529_v57, %v5529_v57  ;;  %v5118_v28 = vmax.f32 %v5116_v62, %v5117_v35  ;;  %v19338_v21 = vmax.f32 %v19294_v16, 0.0  ;;  %15909 = vmatprep.subr.bf16.mxu1 %v17391_v24  ;;  %v17393_v16 = vld [vmem:[%s22363_s3 + $0x190] sm:$0xff]  }
 0x309   : > { %v15223_v27 = vpack.c.bf16 %v5528_v29, %v5528_v29  ;;  %v5915_v42 = vunpack.c.l.b16 %v15222_v56  ;;  %v4202_v43 = vcombine.high %v19325_v36, %v19325_v36  ;;  %v4209_v38 = vrot.slane %v19325_v36, %v18924_v54  ;;  %15910 = vmatpush3.bf16.msra.mxu1 %v17393_v16 }
 0x30a   : > { %v15261_v37 = vpack.c.bf16 %v5530_v22, %v5530_v22  ;;  %v5917_v49 = vunpack.c.l.b16 %v15224_v47  ;;  %v5113_v30 = vmax.f32 %v5111_v2, %v5112_v61  ;;  %v5125_v1 = vmax.f32 %v5123_v0, %v5124_v40 }
 0x30b   : > { %v5916_v6 = vunpack.c.l.b16 %v15223_v27  ;;  %v5978_v51 = vsel %vm5957_vm1, %v5915_v42, %v19278_v52  ;;  %v17392_v52 = vld [vmem:[%s22363_s3 + $0x30] sm:$0xff]   ;;  %v5131_v46 = vrot.slane %v5130_v39, 2  ;;  %v4216_v5 = vrot.slane %v4202_v43, %v18924_v54 }
 0x30c   : > { %v6062_v50 = vsel %vm18882_vm12, %v15261_v37, %v6061_v9  ;;  %v4217_v19 = vcombine.high %v4209_v38, %v4209_v38  ;;  %v5051_v29 = vsel %vm4602_vm13, %v4209_v38, -inf  ;;  %15814 = vmatpush3.bf16.msra.mxu0 %v17392_v52  ;;  %v5119_v57 = vrot.slane %v5118_v28, 1 }
 0x30d   : > { %v5979_v8 = vsel %vm5959_vm3, %v5916_v6, %v5978_v51  ;;  %6063 = vst [vmem:[#allocation3 + $0x24] sm:$0x1] %v6062_v50  ;;  %v5052_v56 = vrot.slane %v5051_v29, 4  ;;  %v4253_v22 = vcombine.high %v19338_v21, %v19338_v21  ;;  %v4218_v2 = vcombine.high %v4216_v5, %v4216_v5 }
 0x30e   : > { %v5980_v41 = vsel %vm5961_vm4, %v5917_v49, %v5979_v8  ;;  %v5058_v27 = vsel %vm4602_vm13, %v4217_v19, -inf  ;;  %v5065_v47 = vsel %vm4602_vm13, %v4216_v5, -inf  ;;  %v4260_v40 = vrot.slane %v19338_v21, %v18924_v54 }
 0x30f   : > { %v6011_v62 = vpack.c.b16 %v5980_v41, %v5980_v41  ;;  %v5053_v42 = vmax.f32 %v5051_v29, %v5052_v56  ;;  %v5059_v9 = vrot.slane %v5058_v27, 4  ;;  %v5066_v61 = vrot.slane %v5065_v47, 4 }
 0x310   : > { %v5126_v34 = vrot.slane %v5125_v1, 1  ;;  %v5132_v24 = vmax.f32 %v5130_v39, %v5131_v46  ;;  %v5072_v6 = vsel %vm4602_vm13, %v4218_v2, -inf  ;;  %v4267_v51 = vrot.slane %v4253_v22, %v18924_v54 }
 0x311   : > { %v6059_v0 = vsel %vm19057_vm7, %v6011_v62, %v6058_v58  ;;  %v5054_v37 = vrot.slane %v5053_v42, 2  ;;  %v5060_v49 = vmax.f32 %v5058_v27, %v5059_v9  ;;  %v5067_v8 = vmax.f32 %v5065_v47, %v5066_v61 }
 0x312   : > { %6060 = vst [vmem:[#allocation3 + $0x20] sm:$0xf] %v6059_v0  ;;  %v5073_v50 = vrot.slane %v5072_v6, 4  ;;  %v4268_v43 = vcombine.high %v4260_v40, %v4260_v40  ;;  %v4269_v38 = vcombine.high %v4267_v51, %v4267_v51  ;;  %v5135_v52 = vsel %vm4602_vm13, %v4260_v40, -inf }
 0x313   : > { %v5149_v16 = vsel %vm4602_vm13, %v4267_v51, -inf  ;;  %v5055_v41 = vmax.f32 %v5053_v42, %v5054_v37  ;;  %v5061_v58 = vrot.slane %v5060_v49, 2  ;;  %v5068_v62 = vrot.slane %v5067_v8, 2 }
 0x314   : > { %v5074_v5 = vmax.f32 %v5072_v6, %v5073_v50  ;;  %v5133_v19 = vrot.slane %v5132_v24, 1  ;;  %v5136_v39 = vrot.slane %v5135_v52, 4  ;;  %v5142_v46 = vsel %vm4602_vm13, %v4268_v43, -inf }
 0x315   : > { %v5156_v29 = vsel %vm4602_vm13, %v4269_v38, -inf  ;;  %v5056_v56 = vrot.slane %v5055_v41, 1  ;;  %v5062_v22 = vmax.f32 %v5060_v49, %v5061_v58  ;;  %v5069_v0 = vmax.f32 %v5067_v8, %v5068_v62 }
 0x316   : > { %v5075_v2 = vrot.slane %v5074_v5, 2  ;;  %v5120_v27 = vmax.f32 %v5118_v28, %v5119_v57  ;;  %v5127_v47 = vmax.f32 %v5125_v1, %v5126_v34  ;;  %v5150_v9 = vrot.slane %v5149_v16, 4 }
 0x317   : > { %v5057_v61 = vmax.f32 %v5055_v41, %v5056_v56  ;;  %v5063_v40 = vrot.slane %v5062_v22, 1  ;;  %v5070_v51 = vrot.slane %v5069_v0, 1  ;;  %v5134_v37 = vmax.f32 %v5132_v24, %v5133_v19 }
 0x318   : > { %v5076_v42 = vmax.f32 %v5074_v5, %v5075_v2  ;;  %v5137_v35 = vmax.f32 %v5135_v52, %v5136_v39  ;;  %v5143_v6 = vrot.slane %v5142_v46, 4  ;;  %v5157_v50 = vrot.slane %v5156_v29, 4 }
 0x319   : > { %v5064_v44 = vmax.f32 %v5062_v22, %v5063_v40  ;;  %v5071_v60 = vmax.f32 %v5069_v0, %v5070_v51  ;;  %v5531_v31 = vmax.f32 %v5057_v61, %v5113_v30  ;;  %v5151_v38 = vmax.f32 %v5149_v16, %v5150_v9  ;;  %v5649_v22 = vld [vmem:[#allocation3 + $0x28] sm:$0x1] }
 0x31a   : > { %v5077_v43 = vrot.slane %v5076_v42, 1  ;;  %v5138_v28 = vrot.slane %v5137_v35, 2  ;;  %v5144_v1 = vmax.f32 %v5142_v46, %v5143_v6  ;;  %v5158_v62 = vmax.f32 %v5156_v29, %v5157_v50  ;;  %v5680_v46 = vld [vmem:[#allocation3 + $0x2c] sm:$0x1] }
 0x31b   : > { %v5532_v49 = vmax.f32 %v5064_v44, %v5120_v27  ;;  %v5533_v8 = vmax.f32 %v5071_v60, %v5127_v47  ;;  %v15226_v58 = vpack.c.bf16 %v5531_v31, %v5531_v31  ;;  %v5152_v5 = vrot.slane %v5151_v38, 2  ;;  %v22513_v6 = vld [vmem:[#allocation23_spill] sm:$0xff] }
 0x31c   : > { %v5078_v48 = vmax.f32 %v5076_v42, %v5077_v43  ;;  %v19375_v24 = vmax.f32 %v19298_v14, 0.0  ;;  %v5145_v30 = vrot.slane %v5144_v1, 2  ;;  %v5139_v60 = vmax.f32 %v5137_v35, %v5138_v28  ;;  %v22514_v43 = vld [vmem:[#allocation22_spill] sm:$0xff] }
 0x31d   : > { %v15227_v34 = vpack.c.bf16 %v5532_v49, %v5532_v49  ;;  %v15228_v41 = vpack.c.bf16 %v5533_v8, %v5533_v8  ;;  %v5919_v19 = vunpack.c.l.b16 %v15226_v58  ;;  %v5159_v31 = vrot.slane %v5158_v62, 2  ;;  %v17394_v28 = vld [vmem:[%s22363_s3 + $0x78] sm:$0xff]  }
 0x31e   : > { %v5534_v57 = vmax.f32 %v5078_v48, %v5134_v37  ;;  %v5153_v0 = vmax.f32 %v5151_v38, %v5152_v5  ;;  %v4219_v2 = vcombine.high %v19375_v24, %v19375_v24  ;;  %v5146_v27 = vmax.f32 %v5144_v1, %v5145_v30  ;;  %v17395_v1 = vld [vmem:[%s22363_s3 + $0x1d8] sm:$0xff]   ;;  %15815 = vmatprep.subr.bf16.mxu0 %v17394_v28 }
 0x31f   : > { %v5920_v39 = vunpack.c.l.b16 %v15227_v34  ;;  %v5921_v56 = vunpack.c.l.b16 %v15228_v41  ;;  %v4226_v47 = vrot.slane %v19375_v24, %v18924_v54  ;;  %v5650_v35 = vsel %vm18882_vm12, 0, %v5649_v22  ;;  %v17397_v5 = vld [vmem:[%s22363_s3 + $0x198] sm:$0xff]   ;;  %15911 = vmatprep.subr.bf16.mxu1 %v17395_v1 }
 0x320   : > { %v15229_v52 = vpack.c.bf16 %v5534_v57, %v5534_v57  ;;  %v5681_v9 = vsel %vm18869_vm11, 0, %v5680_v46  ;;  %v5140_v61 = vrot.slane %v5139_v60, 1  ;;  %v5160_v40 = vmax.f32 %v5158_v62, %v5159_v31  ;;  %5651 = vst [vmem:[#allocation3 + $0x28] sm:$0x1] %v5650_v35  ;;  %v17396_v57 = vld [vmem:[%s22363_s3 + $0x38] sm:$0xff]   ;;  %15912 = vmatpush3.bf16.msra.mxu1 %v17397_v5 }
 0x321   : > { %v5981_v44 = vsel %vm5951_vm14, %v5920_v39, %v5919_v19  ;;  %v4233_v51 = vrot.slane %v4219_v2, %v18924_v54  ;;  %5682 = vst [vmem:[#allocation3 + $0x2c] sm:$0x1] %v5681_v9  ;;  %v4234_v42 = vcombine.high %v4226_v47, %v4226_v47  ;;  %v5079_v37 = vsel %vm4602_vm13, %v4226_v47, -inf  ;;  %15816 = vmatpush3.bf16.msra.mxu0 %v17396_v57 }
 0x322   : > { %v5922_v16 = vunpack.c.l.b16 %v15229_v52  ;;  %v5982_v48 = vsel %vm5953_vm15, %v5921_v56, %v5981_v44  ;;  %v16824_v50 = vadd.f32 %v22513_v6, %v19148_v25  ;;  %v16828_v38 = vadd.f32 %v22514_v43, %v19176_v63  ;;  %v19408_v25 = vpop.f32.mrb[60].mxu1 }
 0x323   : > { %v4235_v49 = vcombine.high %v4233_v51, %v4233_v51  ;;  %v5080_v8 = vrot.slane %v5079_v37, 4  ;;  %v5093_v58 = vsel %vm4602_vm13, %v4233_v51, -inf  ;;  %v5147_v34 = vrot.slane %v5146_v27, 1  ;;  %v19415_v46 = vpop.f32.mrb[61].mxu1 }
 0x324   : > { %v19382_v14 = vsel %vm5955_vm0, %v5922_v16, %v5982_v48  ;;  %v5154_v63 = vrot.slane %v5153_v0, 1  ;;  %v5086_v41 = vsel %vm4602_vm13, %v4234_v42, -inf  ;;  %v5094_v62 = vrot.slane %v5093_v58, 4 }
 0x325   : > { %v5161_v52 = vrot.slane %v5160_v40, 1  ;;  %v5081_v19 = vmax.f32 %v5079_v37, %v5080_v8  ;;  %v5087_v39 = vrot.slane %v5086_v41, 4  ;;  %v5100_v56 = vsel %vm4602_vm13, %v4235_v49, -inf  ;;  %v22516_v8 = vld [vmem:[#allocation24_spill] sm:$0xff] }
 0x326   : > { %v5095_v30 = vmax.f32 %v5093_v58, %v5094_v62  ;;  %v5101_v16 = vrot.slane %v5100_v56, 4  ;;  %v5141_v44 = vmax.f32 %v5139_v60, %v5140_v61  ;;  %v5148_v48 = vmax.f32 %v5146_v27, %v5147_v34 }
 0x327   : > { %v5082_v31 = vrot.slane %v5081_v19, 2  ;;  %v5088_v22 = vmax.f32 %v5086_v41, %v5087_v39  ;;  %v5155_v2 = vmax.f32 %v5153_v0, %v5154_v63  ;;  %v5162_v9 = vmax.f32 %v5160_v40, %v5161_v52 }
 0x328   : > { %v5096_v47 = vrot.slane %v5095_v30, 2  ;;  %v5102_v35 = vmax.f32 %v5100_v56, %v5101_v16  ;;  %v19417_v37 = vmax.f32 %v16824_v50, 0.0  ;;  %v19419_v49 = vmax.f32 %v16828_v38, 0.0 }
 0x329   : > { %v5083_v51 = vmax.f32 %v5081_v19, %v5082_v31  ;;  %v5089_v42 = vrot.slane %v5088_v22, 2  ;;  %v19423_v60 = vadd.f32 %v22516_v8, %v19185_v45 }
 0x32a   : > { %v5097_v6 = vmax.f32 %v5095_v30, %v5096_v47  ;;  %v5103_v43 = vrot.slane %v5102_v35, 2  ;;  %22515 = vst [vmem:[#allocation21_spill] sm:$0xff] %v19419_v49  ;;  %v4304_v0 = vcombine.high %v19417_v37, %v19417_v37  ;;  %v4311_v27 = vrot.slane %v19417_v37, %v18924_v54 }
 0x32b   : > { %v5084_v61 = vrot.slane %v5083_v51, 1  ;;  %v5090_v58 = vmax.f32 %v5088_v22, %v5089_v42  ;;  %v4270_v50 = vcombine.high %v19419_v49, %v19419_v49  ;;  %v4277_v38 = vrot.slane %v19419_v49, %v18924_v54 }
 0x32c   : > { %v5098_v40 = vrot.slane %v5097_v6, 1  ;;  %v5104_v28 = vmax.f32 %v5102_v35, %v5103_v43  ;;  %v4318_v45 = vrot.slane %v4304_v0, %v18924_v54  ;;  %v4319_v34 = vcombine.high %v4311_v27, %v4311_v27 }
 0x32d   : > { %v5085_v1 = vmax.f32 %v5083_v51, %v5084_v61  ;;  %v5091_v57 = vrot.slane %v5090_v58, 1  ;;  %v5219_v62 = vsel %vm4602_vm13, %v4311_v27, -inf  ;;  %v4284_v5 = vrot.slane %v4270_v50, %v18924_v54 }
 0x32e   : > { %v5099_v63 = vmax.f32 %v5097_v6, %v5098_v40  ;;  %v5105_v41 = vrot.slane %v5104_v28, 1  ;;  %v4320_v39 = vcombine.high %v4318_v45, %v4318_v45  ;;  %v5220_v56 = vrot.slane %v5219_v62, 4 }
 0x32f   : > { %v5092_v52 = vmax.f32 %v5090_v58, %v5091_v57  ;;  %v5535_v19 = vmax.f32 %v5085_v1, %v5141_v44  ;;  %v5226_v31 = vsel %vm4602_vm13, %v4319_v34, -inf  ;;  %v5233_v22 = vsel %vm4602_vm13, %v4318_v45, -inf  ;;  %v6067_v44 = vld [vmem:[#allocation3 + $0x2c] sm:$0x1] }
 0x330   : > { %v5106_v30 = vmax.f32 %v5104_v28, %v5105_v41  ;;  %v5537_v16 = vmax.f32 %v5099_v63, %v5155_v2  ;;  %v5221_v51 = vmax.f32 %v5219_v62, %v5220_v56  ;;  %v5227_v42 = vrot.slane %v5226_v31, 4 }
 0x331   : > { %v5536_v47 = vmax.f32 %v5092_v52, %v5148_v48  ;;  %v15230_v35 = vpack.c.bf16 %v5535_v19, %v5535_v19  ;;  %v5234_v8 = vrot.slane %v5233_v22, 4  ;;  %v5240_v61 = vsel %vm4602_vm13, %v4320_v39, -inf }
 0x332   : > { %v5538_v6 = vmax.f32 %v5106_v30, %v5162_v9  ;;  %v15232_v43 = vpack.c.bf16 %v5537_v16, %v5537_v16  ;;  %v5222_v27 = vrot.slane %v5221_v51, 2  ;;  %v5228_v40 = vmax.f32 %v5226_v31, %v5227_v42  ;;  %v6064_v30 = vld [vmem:[#allocation3 + $0x28] sm:$0xf] }
 0x333   : > { %v15231_v0 = vpack.c.bf16 %v5536_v47, %v5536_v47  ;;  %v5923_v58 = vunpack.c.l.b16 %v15230_v35  ;;  %v5235_v50 = vmax.f32 %v5233_v22, %v5234_v8  ;;  %v5241_v1 = vrot.slane %v5240_v61, 4 }
 0x334   : > { %v5925_v28 = vunpack.c.l.b16 %v15232_v43  ;;  %v15262_v2 = vpack.c.bf16 %v5538_v6, %v5538_v6  ;;  %v5223_v45 = vmax.f32 %v5221_v51, %v5222_v27  ;;  %v5229_v34 = vrot.slane %v5228_v40, 2 }
 0x335   : > { %v5924_v57 = vunpack.c.l.b16 %v15231_v0  ;;  %v5984_v48 = vsel %vm5957_vm1, %v5923_v58, %v19382_v14  ;;  %v5236_v63 = vrot.slane %v5235_v50, 2  ;;  %v5242_v41 = vmax.f32 %v5240_v61, %v5241_v1  ;;  %v5652_v0 = vld [vmem:[#allocation3 + $0x30] sm:$0x1] }
 0x336   : > { %v6068_v9 = vsel %vm18882_vm12, %v15262_v2, %v6067_v44  ;;  %v4285_v62 = vcombine.high %v4277_v38, %v4277_v38  ;;  %v5224_v19 = vrot.slane %v5223_v45, 1  ;;  %v5230_v39 = vmax.f32 %v5228_v40, %v5229_v34 }
 0x337   : > { %v5985_v52 = vsel %vm5959_vm3, %v5924_v57, %v5984_v48  ;;  %6069 = vst [vmem:[#allocation3 + $0x2c] sm:$0x1] %v6068_v9  ;;  %v5243_v16 = vrot.slane %v5242_v41, 2  ;;  %v4286_v31 = vcombine.high %v4284_v5, %v4284_v5  ;;  %v5163_v14 = vsel %vm4602_vm13, %v4277_v38, -inf  ;;  %v22517_v57 = vld [vmem:[#allocation27_spill] sm:$0xff] }
 0x338   : > { %v5986_v56 = vsel %vm5961_vm4, %v5925_v28, %v5985_v52  ;;  %v5164_v47 = vrot.slane %v5163_v14, 4  ;;  %v5237_v35 = vmax.f32 %v5235_v50, %v5236_v63  ;;  %v5170_v51 = vsel %vm4602_vm13, %v4285_v62, -inf }
 0x339   : > { %v6013_v22 = vpack.c.b16 %v5986_v56, %v5986_v56  ;;  %v5177_v42 = vsel %vm4602_vm13, %v4284_v5, -inf  ;;  %v5225_v43 = vmax.f32 %v5223_v45, %v5224_v19  ;;  %v5171_v61 = vrot.slane %v5170_v51, 4  ;;  %v19469_v56 = vpop.f32.mrb[62].mxu1 }
 0x33a   : > { %v5165_v8 = vmax.f32 %v5163_v14, %v5164_v47  ;;  %v5231_v58 = vrot.slane %v5230_v39, 1  ;;  %v5244_v44 = vmax.f32 %v5242_v41, %v5243_v16  ;;  %v5178_v27 = vrot.slane %v5177_v42, 4 }
 0x33b   : > { %v6065_v6 = vsel %vm19057_vm7, %v6013_v22, %v6064_v30  ;;  %v5184_v38 = vsel %vm4602_vm13, %v4286_v31, -inf  ;;  %v5172_v28 = vmax.f32 %v5170_v51, %v5171_v61  ;;  %v19452_v50 = vmax.f32 %v19423_v60, 0.0  ;;  %v17402_v30 = vld [vmem:[%s22363_s3 + $0x1a0] sm:$0xff]   ;;  %v19474_v22 = vpop.f32.mrb[63].mxu1 }
 0x33c   : > { %6066 = vst [vmem:[#allocation3 + $0x28] sm:$0xf] %v6065_v6  ;;  %v5166_v40 = vrot.slane %v5165_v8, 2  ;;  %v5185_v2 = vrot.slane %v5184_v38, 4  ;;  %v5238_v5 = vrot.slane %v5237_v35, 1  ;;  %v5179_v1 = vmax.f32 %v5177_v42, %v5178_v27 }
 0x33d   : > { %v19456_v48 = vadd.f32 %v22517_v57, %v19225_v18  ;;  %v5653_v45 = vsel %vm18882_vm12, 0, %v5652_v0  ;;  %v5173_v9 = vrot.slane %v5172_v28, 2  ;;  %v5232_v62 = vmax.f32 %v5230_v39, %v5231_v58  ;;  %v17401_v18 = vld [vmem:[%s22363_s3 + $0x1e0] sm:$0xff]  }
 0x33e   : > { %v5167_v34 = vmax.f32 %v5165_v8, %v5166_v40  ;;  %v5186_v63 = vmax.f32 %v5184_v38, %v5185_v2  ;;  %5654 = vst [vmem:[#allocation3 + $0x30] sm:$0x1] %v5653_v45  ;;  %v5180_v52 = vrot.slane %v5179_v1, 2  ;;  %v4321_v60 = vcombine.high %v19452_v50, %v19452_v50  ;;  %15913 = vmatprep.subr.bf16.mxu1 %v17401_v18 }
 0x33f   : > { %v4328_v19 = vrot.slane %v19452_v50, %v18924_v54  ;;  %v5245_v16 = vrot.slane %v5244_v44, 1  ;;  %v5174_v39 = vmax.f32 %v5172_v28, %v5173_v9  ;;  %v5239_v47 = vmax.f32 %v5237_v35, %v5238_v5  ;;  %15914 = vmatpush3.bf16.msra.mxu1 %v17402_v30 }
 0x340   : > { %v5168_v31 = vrot.slane %v5167_v34, 1  ;;  %v5187_v14 = vrot.slane %v5186_v63, 2  ;;  %v5181_v51 = vmax.f32 %v5179_v1, %v5180_v52  ;;  %v4335_v42 = vrot.slane %v4321_v60, %v18924_v54 }
 0x341   : > { %v4336_v6 = vcombine.high %v4328_v19, %v4328_v19  ;;  %v5175_v61 = vrot.slane %v5174_v39, 1  ;;  %v5247_v58 = vsel %vm4602_vm13, %v4328_v19, -inf  ;;  %v5246_v2 = vmax.f32 %v5244_v44, %v5245_v16 }
 0x342   : > { %v5169_v8 = vmax.f32 %v5167_v34, %v5168_v31  ;;  %v5188_v0 = vmax.f32 %v5186_v63, %v5187_v14  ;;  %v5182_v27 = vrot.slane %v5181_v51, 1  ;;  %v4337_v38 = vcombine.high %v4335_v42, %v4335_v42 }
 0x343   : > { %v5254_v40 = vsel %vm4602_vm13, %v4336_v6, -inf  ;;  %v5261_v28 = vsel %vm4602_vm13, %v4335_v42, -inf  ;;  %v5176_v57 = vmax.f32 %v5174_v39, %v5175_v61  ;;  %v5248_v45 = vrot.slane %v5247_v58, 4 }
 0x344   : > { %v5189_v35 = vrot.slane %v5188_v0, 1  ;;  %v5539_v5 = vmax.f32 %v5169_v8, %v5225_v43  ;;  %v5183_v1 = vmax.f32 %v5181_v51, %v5182_v27  ;;  %v5255_v9 = vrot.slane %v5254_v40, 4 }
 0x345   : > { %v5268_v34 = vsel %vm4602_vm13, %v4337_v38, -inf  ;;  %v5540_v63 = vmax.f32 %v5176_v57, %v5232_v62  ;;  %v5262_v19 = vrot.slane %v5261_v28, 4  ;;  %v5249_v41 = vmax.f32 %v5247_v58, %v5248_v45  ;;  %v5683_v57 = vld [vmem:[#allocation3 + $0x34] sm:$0x1]  ;;  %v22520_v45 = vld [vmem:[#allocation15_spill] sm:$0xff] }
 0x346   : > { %v5190_v52 = vmax.f32 %v5188_v0, %v5189_v35  ;;  %v15234_v60 = vpack.c.bf16 %v5539_v5, %v5539_v5  ;;  %v5541_v18 = vmax.f32 %v5183_v1, %v5239_v47  ;;  %v5269_v14 = vrot.slane %v5268_v34, 4  ;;  %v22519_v1 = vld [vmem:[#allocation7_spill] sm:$0xff] }
 0x347   : > { %v15235_v31 = vpack.c.bf16 %v5540_v63, %v5540_v63  ;;  %v5256_v42 = vmax.f32 %v5254_v40, %v5255_v9  ;;  %v5263_v43 = vmax.f32 %v5261_v28, %v5262_v19  ;;  %v5250_v0 = vrot.slane %v5249_v41, 2  ;;  %v22522_v19 = vld [vmem:[#allocation11_spill] sm:$0xff] }
 0x348   : > { %v5542_v30 = vmax.f32 %v5190_v52, %v5246_v2  ;;  %v15236_v6 = vpack.c.bf16 %v5541_v18, %v5541_v18  ;;  %v5927_v16 = vunpack.c.l.b16 %v15234_v60  ;;  %v5270_v27 = vmax.f32 %v5268_v34, %v5269_v14 }
 0x349   : > { %v5928_v39 = vunpack.c.l.b16 %v15235_v31  ;;  %v5257_v38 = vrot.slane %v5256_v42, 2  ;;  %v5264_v2 = vrot.slane %v5263_v43, 2  ;;  %v19487_v40 = vmax.f32 %v19456_v48, 0.0  ;;  %v22524_v31 = vld [vmem:[#allocation16_spill] sm:$0xff] }
 0x34a   : > { %v15237_v44 = vpack.c.bf16 %v5542_v30, %v5542_v30  ;;  %v5929_v51 = vunpack.c.l.b16 %v15236_v6  ;;  %v5271_v58 = vrot.slane %v5270_v27, 2  ;;  %v5251_v35 = vmax.f32 %v5249_v41, %v5250_v0  ;;  %v22521_v41 = vld [vmem:[#allocation5_spill] sm:$0xff]  ;;  %v22523_v30 = vld [vmem:[#allocation8_spill] sm:$0xff] }
 0x34b   : > { %v5987_v61 = vsel %vm5951_vm14, %v5928_v39, %v5927_v16  ;;  %22518 = vst [vmem:[#allocation23_spill] sm:$0xff] %v19487_v40  ;;  %v5258_v28 = vmax.f32 %v5256_v42, %v5257_v38  ;;  %v5684_v5 = vsel %vm18869_vm11, 0, %v5683_v57  ;;  %v16839_v9 = vadd.f32 %v22520_v45, %v22519_v1 }
 0x34c   : > { %v5930_v8 = vunpack.c.l.b16 %v15237_v44  ;;  %v5988_v62 = vsel %vm5953_vm15, %v5929_v51, %v5987_v61  ;;  %v5265_v34 = vmax.f32 %v5263_v43, %v5264_v2  ;;  %v4287_v63 = vcombine.high %v19487_v40, %v19487_v40  ;;  %5685 = vst [vmem:[#allocation3 + $0x34] sm:$0x1] %v5684_v5 }
 0x34d   : > { %v4294_v60 = vrot.slane %v19487_v40, %v18924_v54  ;;  %v16840_v48 = vadd.f32 %v16839_v9, %v19255_v33  ;;  %v16843_v18 = vadd.f32 %v22522_v19, %v22521_v41  ;;  %v19504_v14 = vadd.f32 %v22524_v31, %v22523_v30  ;;  %v19761_v40 = vld [vmem:[#allocation3 + $0x20] sm:$0xf] }
 0x34e   : > { %v19484_v47 = vsel %vm5955_vm0, %v5930_v8, %v5988_v62  ;;  %v5272_v6 = vmax.f32 %v5270_v27, %v5271_v58  ;;  %v4301_v42 = vrot.slane %v4287_v63, %v18924_v54  ;;  %v5252_v39 = vrot.slane %v5251_v35, 1 }
 0x34f   : > { %v4302_v44 = vcombine.high %v4294_v60, %v4294_v60  ;;  %v5191_v16 = vsel %vm4602_vm13, %v4294_v60, -inf  ;;  %v5259_v43 = vrot.slane %v5258_v28, 1  ;;  %v16844_v8 = vadd.f32 %v16843_v18, %v19306_v17 }
 0x350   : > { %v5192_v51 = vrot.slane %v5191_v16, 4  ;;  %v5266_v61 = vrot.slane %v5265_v34, 1  ;;  %v4303_v33 = vcombine.high %v4301_v42, %v4301_v42  ;;  %v5205_v0 = vsel %vm4602_vm13, %v4301_v42, -inf  ;;  %v17403_v42 = vld [vmem:[%s22363_s3 + $0x1e8] sm:$0xff]  }
 0x351   : > { %v5198_v62 = vsel %vm4602_vm13, %v4302_v44, -inf  ;;  %v5206_v57 = vrot.slane %v5205_v0, 4  ;;  %v5273_v27 = vrot.slane %v5272_v6, 1  ;;  %v19512_v5 = vmax.f32 %v16840_v48, 0.0  ;;  %v17404_v48 = vld [vmem:[%s22363_s3 + $0x1a8] sm:$0xff]   ;;  %v17405_v44 = vld [vmem:[%s22363_s3 + $0x1f0] sm:$0xff]   ;;  %15915 = vmatprep.subr.bf16.mxu1 %v17403_v42 }
 0x352   : > { %v5193_v38 = vmax.f32 %v5191_v16, %v5192_v51  ;;  %v5199_v2 = vrot.slane %v5198_v62, 4  ;;  %v5212_v58 = vsel %vm4602_vm13, %v4303_v33, -inf  ;;  %v5253_v60 = vmax.f32 %v5251_v35, %v5252_v39  ;;  %15916 = vmatpush3.bf16.msra.mxu1 %v17404_v48 }
 0x353   : > { %22525 = vst [vmem:[#allocation22_spill] sm:$0xff] %v19512_v5  ;;  %v5207_v9 = vmax.f32 %v5205_v0, %v5206_v57  ;;  %v5213_v63 = vrot.slane %v5212_v58, 4  ;;  %v5260_v17 = vmax.f32 %v5258_v28, %v5259_v43  ;;  %v5267_v41 = vmax.f32 %v5265_v34, %v5266_v61  ;;  %15917 = vmatprep.subr.bf16.mxu1 %v17405_v44 }
 0x354   : > { %v5194_v1 = vrot.slane %v5193_v38, 2  ;;  %v5200_v45 = vmax.f32 %v5198_v62, %v5199_v2  ;;  %v5274_v16 = vmax.f32 %v5272_v6, %v5273_v27  ;;  %v4372_v35 = vcombine.high %v19512_v5, %v19512_v5 }
 0x355   : > { %v5208_v30 = vrot.slane %v5207_v9, 2  ;;  %v5214_v31 = vmax.f32 %v5212_v58, %v5213_v63  ;;  %v4379_v28 = vrot.slane %v19512_v5, %v18924_v54  ;;  %v19527_v34 = vmax.f32 %v16844_v8, 0.0  ;;  %v19539_v8 = vld [vmem:[%s22363_s3 + $0x80] sm:$0xff]  }
 0x356   : > { %v5195_v19 = vmax.f32 %v5193_v38, %v5194_v1  ;;  %v5201_v18 = vrot.slane %v5200_v45, 2  ;;  %v4386_v33 = vrot.slane %v4372_v35, %v18924_v54  ;;  %v17406_v38 = vld [vmem:[%s22363_s3 + $0x1b0] sm:$0xff]   ;;  %v17407_v1 = vld [vmem:[%s22363_s3 + $0x1f8] sm:$0xff]   ;;  %16509 = vmatprep.subr.bf16.mxu0 %v19539_v8 }
 0x357   : > { %22526 = vst [vmem:[#allocation24_spill] sm:$0xff] %v19527_v34  ;;  %v5209_v51 = vmax.f32 %v5207_v9, %v5208_v30  ;;  %v5215_v61 = vrot.slane %v5214_v31, 2  ;;  %v4387_v62 = vcombine.high %v4379_v28, %v4379_v28  ;;  %v5331_v0 = vsel %vm4602_vm13, %v4379_v28, -inf  ;;  %15918 = vmatpush3.bf16.msra.mxu1 %v17406_v38 }
 0x358   : > { %v5196_v39 = vrot.slane %v5195_v19, 1  ;;  %v5202_v43 = vmax.f32 %v5200_v45, %v5201_v18  ;;  %v4338_v6 = vcombine.high %v19527_v34, %v19527_v34  ;;  %v4388_v45 = vcombine.high %v4386_v33, %v4386_v33  ;;  %15919 = vmatprep.subr.bf16.mxu1 %v17407_v1 }
 0x359   : > { %v5210_v27 = vrot.slane %v5209_v51, 1  ;;  %v5216_v58 = vmax.f32 %v5214_v31, %v5215_v61  ;;  %v5332_v9 = vrot.slane %v5331_v0, 4  ;;  %v5338_v63 = vsel %vm4602_vm13, %v4387_v62, -inf }
 0x35a   : > { %v5197_v2 = vmax.f32 %v5195_v19, %v5196_v39  ;;  %v5203_v57 = vrot.slane %v5202_v43, 1  ;;  %v5345_v18 = vsel %vm4602_vm13, %v4386_v33, -inf  ;;  %v5339_v28 = vrot.slane %v5338_v63, 4  ;;  %v17408_v39 = vld [vmem:[%s22363_s3 + $0x1b8] sm:$0xff]  }
 0x35b   : > { %v5211_v42 = vmax.f32 %v5209_v51, %v5210_v27  ;;  %v5217_v48 = vrot.slane %v5216_v58, 1  ;;  %v5333_v35 = vmax.f32 %v5331_v0, %v5332_v9  ;;  %v5346_v31 = vrot.slane %v5345_v18, 4  ;;  %v6073_v9 = vld [vmem:[#allocation3 + $0x34] sm:$0x1]  ;;  %15920 = vmatpush3.bf16.msra.mxu1 %v17408_v39 }
 0x35c   : > { %v5204_v30 = vmax.f32 %v5202_v43, %v5203_v57  ;;  %v5543_v19 = vmax.f32 %v5197_v2, %v5253_v60  ;;  %v5352_v44 = vsel %vm4602_vm13, %v4388_v45, -inf  ;;  %v5340_v43 = vmax.f32 %v5338_v63, %v5339_v28  ;;  %v6070_v28 = vld [vmem:[#allocation3 + $0x30] sm:$0xf] }
 0x35d   : > { %v5218_v61 = vmax.f32 %v5216_v58, %v5217_v48  ;;  %v5545_v52 = vmax.f32 %v5211_v42, %v5267_v41  ;;  %v5334_v29 = vrot.slane %v5333_v35, 2  ;;  %v5347_v51 = vmax.f32 %v5345_v18, %v5346_v31 }
 0x35e   : > { %v5544_v62 = vmax.f32 %v5204_v30, %v5260_v17  ;;  %v15238_v33 = vpack.c.bf16 %v5543_v19, %v5543_v19  ;;  %v5353_v57 = vrot.slane %v5352_v44, 4  ;;  %v5341_v45 = vrot.slane %v5340_v43, 2 }
 0x35f   : > { %v5546_v60 = vmax.f32 %v5218_v61, %v5274_v16  ;;  %v15240_v2 = vpack.c.bf16 %v5545_v52, %v5545_v52  ;;  %v5348_v38 = vrot.slane %v5347_v51, 2  ;;  %v5335_v1 = vmax.f32 %v5333_v35, %v5334_v29 }
 0x360   : > { %v15239_v0 = vpack.c.bf16 %v5544_v62, %v5544_v62  ;;  %v5931_v27 = vunpack.c.l.b16 %v15238_v33  ;;  %v5354_v41 = vmax.f32 %v5352_v44, %v5353_v57  ;;  %v5342_v42 = vmax.f32 %v5340_v43, %v5341_v45 }
 0x361   : > { %v15263_v17 = vpack.c.bf16 %v5546_v60, %v5546_v60  ;;  %v5933_v30 = vunpack.c.l.b16 %v15240_v2  ;;  %v5349_v63 = vmax.f32 %v5347_v51, %v5348_v38  ;;  %v4345_v16 = vrot.slane %v19527_v34, %v18924_v54  ;;  %v5655_v51 = vld [vmem:[#allocation3 + $0x38] sm:$0x1] }
 0x362   : > { %v5932_v49 = vunpack.c.l.b16 %v15239_v0  ;;  %v5990_v58 = vsel %vm5957_vm1, %v5931_v27, %v19484_v47  ;;  %v4352_v48 = vrot.slane %v4338_v6, %v18924_v54  ;;  %v5355_v31 = vrot.slane %v5354_v41, 2  ;;  %v5686_v27 = vld [vmem:[#allocation3 + $0x3c] sm:$0x1] }
 0x363   : > { %v6074_v52 = vsel %vm18882_vm12, %v15263_v17, %v6073_v9  ;;  %v4353_v44 = vcombine.high %v4345_v16, %v4345_v16  ;;  %v5336_v35 = vrot.slane %v5335_v1, 1  ;;  %v5343_v39 = vrot.slane %v5342_v42, 1  ;;  %v22528_v17 = vld [vmem:[#allocation12_spill] sm:$0xff] }
 0x364   : > { %v5991_v18 = vsel %vm5959_vm3, %v5932_v49, %v5990_v58  ;;  %6075 = vst [vmem:[#allocation3 + $0x34] sm:$0x1] %v6074_v52  ;;  %v4354_v29 = vcombine.high %v4352_v48, %v4352_v48  ;;  %v5275_v49 = vsel %vm4602_vm13, %v4345_v16, -inf  ;;  %v5289_v61 = vsel %vm4602_vm13, %v4352_v48, -inf  ;;  %v22527_v58 = vld [vmem:[#allocation6_spill] sm:$0xff] }
 0x365   : > { %v5992_v19 = vsel %vm5961_vm4, %v5933_v30, %v5991_v18  ;;  %v5350_v33 = vrot.slane %v5349_v63, 1  ;;  %v5276_v43 = vrot.slane %v5275_v49, 4  ;;  %v5282_v6 = vsel %vm4602_vm13, %v4353_v44, -inf }
 0x366   : > { %v6015_v47 = vpack.c.b16 %v5992_v19, %v5992_v19  ;;  %v5283_v57 = vrot.slane %v5282_v6, 4  ;;  %v5290_v60 = vrot.slane %v5289_v61, 4  ;;  %v5296_v0 = vsel %vm4602_vm13, %v4354_v29, -inf }
 0x367   : > { %v16848_v2 = vadd.f32 %v19504_v14, %v19333_v15  ;;  %v5356_v9 = vmax.f32 %v5354_v41, %v5355_v31  ;;  %v5277_v45 = vmax.f32 %v5275_v49, %v5276_v43  ;;  %v5297_v38 = vrot.slane %v5296_v0, 4 }
 0x368   : > { %v6071_v62 = vsel %vm19057_vm7, %v6015_v47, %v6070_v28  ;;  %v16851_v30 = vadd.f32 %v22528_v17, %v22527_v58  ;;  %v5284_v18 = vmax.f32 %v5282_v6, %v5283_v57  ;;  %v5291_v52 = vmax.f32 %v5289_v61, %v5290_v60 }
 0x369   : > { %6072 = vst [vmem:[#allocation3 + $0x30] sm:$0xf] %v6071_v62  ;;  %v19570_v16 = vmax.f32 %v16848_v2, 0.0  ;;  %v5656_v48 = vsel %vm18882_vm12, 0, %v5655_v51  ;;  %v5278_v19 = vrot.slane %v5277_v45, 2  ;;  %v5298_v28 = vmax.f32 %v5296_v0, %v5297_v38 }
 0x36a   : > { %v16852_v47 = vadd.f32 %v16851_v30, %v19353_v59  ;;  %5657 = vst [vmem:[#allocation3 + $0x38] sm:$0x1] %v5656_v48  ;;  %v5687_v15 = vsel %vm18869_vm11, 0, %v5686_v27  ;;  %v5285_v14 = vrot.slane %v5284_v18, 2  ;;  %v5292_v41 = vrot.slane %v5291_v52, 2 }
 0x36b   : > { %22529 = vst [vmem:[#allocation27_spill] sm:$0xff] %v19570_v16  ;;  %v4389_v44 = vcombine.high %v19570_v16, %v19570_v16  ;;  %5688 = vst [vmem:[#allocation3 + $0x3c] sm:$0x1] %v5687_v15  ;;  %v5357_v29 = vrot.slane %v5356_v9, 1  ;;  %v5279_v49 = vmax.f32 %v5277_v45, %v5278_v19  ;;  %v5299_v61 = vrot.slane %v5298_v28, 2 }
 0x36c   : > { %v4396_v62 = vrot.slane %v19570_v16, %v18924_v54  ;;  %v5337_v59 = vmax.f32 %v5335_v1, %v5336_v35  ;;  %v5286_v43 = vmax.f32 %v5284_v18, %v5285_v14  ;;  %v5293_v6 = vmax.f32 %v5291_v52, %v5292_v41 }
 0x36d   : > { %v5344_v51 = vmax.f32 %v5342_v42, %v5343_v39  ;;  %v5280_v57 = vrot.slane %v5279_v49, 1  ;;  %v5300_v60 = vmax.f32 %v5298_v28, %v5299_v61  ;;  %v4403_v0 = vrot.slane %v4389_v44, %v18924_v54 }
 0x36e   : > { %v5351_v2 = vmax.f32 %v5349_v63, %v5350_v33  ;;  %v5287_v27 = vrot.slane %v5286_v43, 1  ;;  %v5294_v38 = vrot.slane %v5293_v6, 1  ;;  %v4404_v58 = vcombine.high %v4396_v62, %v4396_v62 }
 0x36f   : > { %v5358_v17 = vmax.f32 %v5356_v9, %v5357_v29  ;;  %v5281_v30 = vmax.f32 %v5279_v49, %v5280_v57  ;;  %v5301_v48 = vrot.slane %v5300_v60, 1  ;;  %v5359_v15 = vsel %vm4602_vm13, %v4396_v62, -inf }
 0x370   : > { %v5288_v45 = vmax.f32 %v5286_v43, %v5287_v27  ;;  %v5295_v19 = vmax.f32 %v5293_v6, %v5294_v38  ;;  %v4405_v35 = vcombine.high %v4403_v0, %v4403_v0  ;;  %v5366_v39 = vsel %vm4602_vm13, %v4404_v58, -inf  ;;  %v5634_v27 = vld [vmem:[#allocation3] sm:$0x1] }
 0x371   : > { %v5302_v31 = vmax.f32 %v5300_v60, %v5301_v48  ;;  %v5547_v1 = vmax.f32 %v5281_v30, %v5337_v59  ;;  %v5360_v63 = vrot.slane %v5359_v15, 4  ;;  %v5373_v33 = vsel %vm4602_vm13, %v4403_v0, -inf  ;;  %v22531_v30 = vld [vmem:[#allocation13_spill] sm:$0xff]  ;;  %v22532_v48 = vld [vmem:[#allocation19_spill] sm:$0xff] }
 0x372   : > { %v5548_v18 = vmax.f32 %v5288_v45, %v5344_v51  ;;  %v5549_v42 = vmax.f32 %v5295_v19, %v5351_v2  ;;  %v5367_v44 = vrot.slane %v5366_v39, 4  ;;  %v5380_v29 = vsel %vm4602_vm13, %v4405_v35, -inf  ;;  %v5665_v19 = vld [vmem:[#allocation3 + $0x4] sm:$0x1] }
 0x373   : > { %v5550_v52 = vmax.f32 %v5302_v31, %v5358_v17  ;;  %v15242_v28 = vpack.c.bf16 %v5547_v1, %v5547_v1  ;;  %v5374_v59 = vrot.slane %v5373_v33, 4  ;;  %v5361_v6 = vmax.f32 %v5359_v15, %v5360_v63 }
 0x374   : > { %v15243_v14 = vpack.c.bf16 %v5548_v18, %v5548_v18  ;;  %v15244_v9 = vpack.c.bf16 %v5549_v42, %v5549_v42  ;;  %v5381_v57 = vrot.slane %v5380_v29, 4  ;;  %v5368_v60 = vmax.f32 %v5366_v39, %v5367_v44 }
 0x375   : > { %v15245_v41 = vpack.c.bf16 %v5550_v52, %v5550_v52  ;;  %v5935_v49 = vunpack.c.l.b16 %v15242_v28  ;;  %v5375_v2 = vmax.f32 %v5373_v33, %v5374_v59  ;;  %v5362_v38 = vrot.slane %v5361_v6, 2 }
 0x376   : > { %v5936_v61 = vunpack.c.l.b16 %v15243_v14  ;;  %v5937_v62 = vunpack.c.l.b16 %v15244_v9  ;;  %v5382_v58 = vmax.f32 %v5380_v29, %v5381_v57  ;;  %v19593_v17 = vmax.f32 %v16852_v47, 0.0 }
 0x377   : > { %v5938_v43 = vunpack.c.l.b16 %v15245_v41  ;;  %v16855_v45 = vadd.f32 %v22532_v48, %v22531_v30  ;;  %v5369_v15 = vrot.slane %v5368_v60, 2  ;;  %v5635_v1 = vsel %vm18882_vm12, 0, %v5634_v27 }
 0x378   : > { %v5993_v51 = vsel %vm5951_vm14, %v5936_v61, %v5935_v49  ;;  %22530 = vst [vmem:[#allocation7_spill] sm:$0xff] %v19593_v17  ;;  %v5376_v35 = vrot.slane %v5375_v2, 2  ;;  %v4355_v42 = vcombine.high %v19593_v17, %v19593_v17  ;;  %v4362_v39 = vrot.slane %v19593_v17, %v18924_v54  ;;  %5636 = vst [vmem:[#allocation3] sm:$0x1] %v5635_v1 }
 0x379   : > { %v5994_v31 = vsel %vm5953_vm15, %v5937_v62, %v5993_v51  ;;  %v5363_v47 = vmax.f32 %v5361_v6, %v5362_v38  ;;  %v16856_v52 = vadd.f32 %v16855_v45, %v19408_v25  ;;  %v5666_v28 = vsel %vm18869_vm11, 0, %v5665_v19 }
 0x37a   : > { %v19591_v0 = vsel %vm5955_vm0, %v5938_v43, %v5994_v31  ;;  %v5383_v63 = vrot.slane %v5382_v58, 2  ;;  %v4369_v33 = vrot.slane %v4355_v42, %v18924_v54  ;;  %v4370_v14 = vcombine.high %v4362_v39, %v4362_v39  ;;  %5667 = vst [vmem:[#allocation3 + $0x4] sm:$0x1] %v5666_v28 }
 0x37b   : > { %v5303_v9 = vsel %vm4602_vm13, %v4362_v39, -inf  ;;  %v5370_v41 = vmax.f32 %v5368_v60, %v5369_v15  ;;  %v5377_v29 = vmax.f32 %v5375_v2, %v5376_v35  ;;  %v5364_v6 = vrot.slane %v5363_v47, 1 }
 0x37c   : > { %v5304_v44 = vrot.slane %v5303_v9, 4  ;;  %v4371_v49 = vcombine.high %v4369_v33, %v4369_v33  ;;  %v5310_v61 = vsel %vm4602_vm13, %v4370_v14, -inf  ;;  %v5317_v62 = vsel %vm4602_vm13, %v4369_v33, -inf }
 0x37d   : > { %v5311_v25 = vrot.slane %v5310_v61, 4  ;;  %v5318_v43 = vrot.slane %v5317_v62, 4  ;;  %v5384_v51 = vmax.f32 %v5382_v58, %v5383_v63  ;;  %v19613_v31 = vmax.f32 %v16856_v52, 0.0 }
 0x37e   : > { %v5305_v59 = vmax.f32 %v5303_v9, %v5304_v44  ;;  %v5324_v57 = vsel %vm4602_vm13, %v4371_v49, -inf  ;;  %v5371_v48 = vrot.slane %v5370_v41, 1  ;;  %v5378_v2 = vrot.slane %v5377_v29, 1 }
 0x37f   : > { %22533 = vst [vmem:[#allocation15_spill] sm:$0xff] %v19613_v31  ;;  %v5312_v38 = vmax.f32 %v5310_v61, %v5311_v25  ;;  %v5319_v30 = vmax.f32 %v5317_v62, %v5318_v43  ;;  %v5325_v60 = vrot.slane %v5324_v57, 4  ;;  %v5365_v35 = vmax.f32 %v5363_v47, %v5364_v6  ;;  %v19621_v6 = vld [vmem:[#allocation3 + $0x8] sm:$0xf] }
 0x380   : > { %v5306_v27 = vrot.slane %v5305_v59, 2  ;;  %v5385_v42 = vrot.slane %v5384_v51, 1  ;;  %v4440_v39 = vcombine.high %v19613_v31, %v19613_v31  ;;  %v4447_v58 = vrot.slane %v19613_v31, %v18924_v54 }
 0x381   : > { %v5313_v19 = vrot.slane %v5312_v38, 2  ;;  %v5320_v15 = vrot.slane %v5319_v30, 2  ;;  %v5326_v1 = vmax.f32 %v5324_v57, %v5325_v60  ;;  %v5372_v14 = vmax.f32 %v5370_v41, %v5371_v48  ;;  %v6096_v41 = vld [vmem:[#allocation3 + $0x4] sm:$0x1] }
 0x382   : > { %v5307_v45 = vmax.f32 %v5305_v59, %v5306_v27  ;;  %v5379_v9 = vmax.f32 %v5377_v29, %v5378_v2  ;;  %v5443_v44 = vsel %vm4602_vm13, %v4447_v58, -inf  ;;  %v5386_v47 = vmax.f32 %v5384_v51, %v5385_v42 }
 0x383   : > { %v5314_v28 = vmax.f32 %v5312_v38, %v5313_v19  ;;  %v5321_v63 = vmax.f32 %v5319_v30, %v5320_v15  ;;  %v5327_v33 = vrot.slane %v5326_v1, 2  ;;  %v4454_v25 = vrot.slane %v4440_v39, %v18924_v54  ;;  %v19623_v30 = vld [vmem:[#allocation3] sm:$0xf]  ;;  %v6098_v15 = vld [vmem:[#allocation3 + $0xc] sm:$0x1] }
 0x384   : > { %v5308_v52 = vrot.slane %v5307_v45, 1  ;;  %v4455_v43 = vcombine.high %v4447_v58, %v4447_v58  ;;  %v5444_v29 = vrot.slane %v5443_v44, 4  ;;  %v19627_v42 = vcombine.low %v19623_v30, %v6096_v41 }
 0x385   : > { %v5315_v61 = vrot.slane %v5314_v28, 1  ;;  %v5322_v62 = vrot.slane %v5321_v63, 1  ;;  %v5328_v59 = vmax.f32 %v5326_v1, %v5327_v33  ;;  %v4456_v1 = vcombine.high %v4454_v25, %v4454_v25 }
 0x386   : > { %v5309_v49 = vmax.f32 %v5307_v45, %v5308_v52  ;;  %v5450_v51 = vsel %vm4602_vm13, %v4455_v43, -inf  ;;  %v19630_v39 = vcombine.low %v19621_v6, %v6098_v15  ;;  %v5445_v33 = vmax.f32 %v5443_v44, %v5444_v29  ;;  %v22534_v15 = vld [vmem:[#allocation9_spill] sm:$0xff] }
 0x387   : > { %v5316_v57 = vmax.f32 %v5314_v28, %v5315_v61  ;;  %v5323_v27 = vmax.f32 %v5321_v63, %v5322_v62  ;;  %v5329_v60 = vrot.slane %v5328_v59, 1  ;;  %v6079_v63 = vld [vmem:[#allocation3 + $0x3c] sm:$0x1]  ;;  %v5457_v61 = vsel %vm4602_vm13, %v4454_v25, -inf }
 0x388   : > { %v5551_v38 = vmax.f32 %v5309_v49, %v5365_v35  ;;  %v5464_v43 = vsel %vm4602_vm13, %v4456_v1, -inf  ;;  %v6154_v44 = vshll.u32 %v19627_v42, 16  ;;  %v5446_v25 = vrot.slane %v5445_v33, 2  ;;  %v22535_v1 = vld [vmem:[#allocation17_spill] sm:$0xff] }
 0x389   : > { %v5330_v48 = vmax.f32 %v5328_v59, %v5329_v60  ;;  %v5552_v2 = vmax.f32 %v5316_v57, %v5372_v14  ;;  %v5553_v45 = vmax.f32 %v5323_v27, %v5379_v9  ;;  %v5451_v59 = vrot.slane %v5450_v51, 4 }
 0x38a   : > { %v15246_v19 = vpack.c.bf16 %v5551_v38, %v5551_v38  ;;  %v6152_v57 = vshrl.u32 %v19627_v42, 16  ;;  %v6161_v60 = vshll.u32 %v19630_v39, 16  ;;  %v6076_v38 = vld [vmem:[#allocation3 + $0x38] sm:$0xf]  ;;  %v5458_v41 = vrot.slane %v5457_v61, 4 }
 0x38b   : > { %v5554_v58 = vmax.f32 %v5330_v48, %v5386_v47  ;;  %v15247_v35 = vpack.c.bf16 %v5552_v2, %v5552_v2  ;;  %v15248_v52 = vpack.c.bf16 %v5553_v45, %v5553_v45  ;;  %v6159_v29 = vshrl.u32 %v19630_v39, 16 }
 0x38c   : > { %v5939_v28 = vunpack.c.l.b16 %v15246_v19  ;;  %v5465_v2 = vrot.slane %v5464_v43, 4  ;;  %v6156_v45 = vrot.slane %v6154_v44, 1  ;;  %v6163_v19 = vrot.slane %v6161_v60, 1  ;;  %v22537_v44 = vld [vmem:[#allocation20_spill] sm:$0xff] }
 0x38d   : > { %v5940_v49 = vunpack.c.l.b16 %v15247_v35  ;;  %v15264_v9 = vpack.c.bf16 %v5554_v58, %v5554_v58  ;;  %v5941_v62 = vunpack.c.l.b16 %v15248_v52  ;;  %v16859_v58 = vadd.f32 %v22535_v1, %v22534_v15  ;;  %v5658_v35 = vld [vmem:[#allocation3 + $0x40] sm:$0x1] }
 0x38e   : > { %v5996_v14 = vsel %vm5957_vm1, %v5939_v28, %v19591_v0  ;;  %v5452_v28 = vmax.f32 %v5450_v51, %v5451_v59  ;;  %v22538_v15 = vld [vmem:[#allocation10_spill] sm:$0xff]  ;;  %v5659_v51 = vsel %vm18882_vm12, 0, %v5658_v35 }
 0x38f   : > { %v5997_v47 = vsel %vm5959_vm3, %v5940_v49, %v5996_v14  ;;  %v6080_v27 = vsel %vm18882_vm12, %v15264_v9, %v6079_v63  ;;  %v6157_v63 = vor.u32 %v6156_v45, %v6152_v57  ;;  %v6164_v49 = vor.u32 %v6163_v19, %v6159_v29  ;;  %v5689_v14 = vld [vmem:[#allocation3 + $0x44] sm:$0x1]  ;;  %5660 = vst [vmem:[#allocation3 + $0x40] sm:$0x1] %v5659_v51 }
 0x390   : > { %v5998_v0 = vsel %vm5961_vm4, %v5941_v62, %v5997_v47  ;;  %6081 = vst [vmem:[#allocation3 + $0x3c] sm:$0x1] %v6080_v27  ;;  %v19648_v9 = vmax.f32 %v5445_v33, %v5446_v25  ;;  %v5459_v62 = vmax.f32 %v5457_v61, %v5458_v41  ;;  %v16860_v47 = vadd.f32 %v16859_v58, %v19415_v46  ;;  %v22536_v27 = vld [vmem:[#allocation14_spill] sm:$0xff] }
 0x391   : > { %v6017_v48 = vpack.c.b16 %v5998_v0, %v5998_v0  ;;  %v16863_v60 = vadd.f32 %v22537_v44, %v22536_v27  ;;  %v5466_v0 = vmax.f32 %v5464_v43, %v5465_v2  ;;  %v14622_v18 = vcombine.low %v6157_v63, %v6164_v49  ;;  %v22539_v1 = vld [vmem:[#allocation18_spill] sm:$0xff]  ;;  %v17416_v43 = vld [vmem:[%s22363_s3 + $0x88] sm:$0xff]   ;;  %v17419_v2 = vld [vmem:[%s22363_s3 + $0x90] sm:$0xff]  }
 0x392   : > { %v16867_v34 = vadd.f32 %v22539_v1, %v22538_v15  ;;  %v19657_v59 = vmax.f32 %v16860_v47, 0.0  ;;  %v14621_v33 = vcombine.low %v19623_v30, %v19621_v6  ;;  %v5690_v46 = vsel %vm18869_vm11, 0, %v5689_v14 }
 0x393   : > { %v6077_v52 = vsel %vm19057_vm7, %v6017_v48, %v6076_v38  ;;  %v16864_v61 = vadd.f32 %v16863_v60, %v19469_v56  ;;  %v5453_v57 = vrot.slane %v5452_v28, 2  ;;  %6479 = vmatprep.mubr.bf16.mxu0 %v14622_v18  ;;  %5691 = vst [vmem:[#allocation3 + $0x44] sm:$0x1] %v5690_v46  ;;  %v5460_v25 = vrot.slane %v5459_v62, 2 }
 0x394   : > { %6078 = vst [vmem:[#allocation3 + $0x38] sm:$0xf] %v6077_v52  ;;  %22540 = vst [vmem:[#allocation5_spill] sm:$0xff] %v19657_v59  ;;  %v19668_v38 = vadd.f32 %v16867_v34, %v19474_v22  ;;  %v4406_v6 = vcombine.high %v19657_v59, %v19657_v59  ;;  %v4413_v56 = vrot.slane %v19657_v59, %v18924_v54  ;;  %6480 = vmatmul.mubr.bf16.vlgmr.msra.gmra.mrb[96].mxu0 %v14621_v33  ;;  %v7080_v59 = vld [vmem:[#allocation3 + $0x1c] sm:$0x1] }
 0x395   : > { %v19674_v30 = vmax.f32 %v16864_v61, 0.0  ;;  %v5448_v41 = vrot.slane %v19648_v9, 1  ;;  %v5467_v29 = vrot.slane %v5466_v0, 2  ;;  %16510 = vmatpush3.bf16.msra.mxu0 %v19539_v8  ;;  %v5454_v45 = vmax.f32 %v5452_v28, %v5453_v57 }
 0x396   : > { %v4420_v18 = vrot.slane %v4406_v6, %v18924_v54  ;;  %v4421_v22 = vcombine.high %v4413_v56, %v4413_v56  ;;  %v5387_v34 = vsel %vm4602_vm13, %v4413_v56, -inf  ;;  %16511 = vmatprep.subr.bf16.mxu0 %v17416_v43  ;;  %v5461_v35 = vmax.f32 %v5459_v62, %v5460_v25  ;;  %v17424_v62 = vld [vmem:[%s22363_s3 + $0x98] sm:$0xff]  }
 0x397   : > { %22541 = vst [vmem:[#allocation11_spill] sm:$0xff] %v19674_v30  ;;  %v5388_v19 = vrot.slane %v5387_v34, 4  ;;  %v4457_v58 = vcombine.high %v19674_v30, %v19674_v30  ;;  %v4464_v8 = vrot.slane %v19674_v30, %v18924_v54  ;;  %v5468_v28 = vmax.f32 %v5466_v0, %v5467_v29 }
 0x398   : > { %v4422_v52 = vcombine.high %v4420_v18, %v4420_v18  ;;  %v5394_v63 = vsel %vm4602_vm13, %v4421_v22, -inf  ;;  %v5401_v49 = vsel %vm4602_vm13, %v4420_v18, -inf  ;;  %v5455_v57 = vrot.slane %v5454_v45, 1 }
 0x399   : > { %v5389_v14 = vmax.f32 %v5387_v34, %v5388_v19  ;;  %v5395_v47 = vrot.slane %v5394_v63, 4  ;;  %v5402_v27 = vrot.slane %v5401_v49, 4  ;;  %v4471_v44 = vrot.slane %v4457_v58, %v18924_v54  ;;  %16512 = vmatpush3.bf16.msra.mxu0 %v17416_v43 }
 0x39a   : > { %v5408_v60 = vsel %vm4602_vm13, %v4422_v52, -inf  ;;  %v4472_v15 = vcombine.high %v4464_v8, %v4464_v8  ;;  %v5471_v1 = vsel %vm4602_vm13, %v4464_v8, -inf  ;;  %16513 = vmatprep.subr.bf16.mxu0 %v17419_v2  ;;  %v5462_v25 = vrot.slane %v5461_v35, 1  ;;  %v17425_v8 = vld [vmem:[%s22363_s3 + $0xa0] sm:$0xff]  }
 0x39b   : > { %v5390_v51 = vrot.slane %v5389_v14, 2  ;;  %v5396_v33 = vmax.f32 %v5394_v63, %v5395_v47  ;;  %v5403_v61 = vmax.f32 %v5401_v49, %v5402_v27  ;;  %v5409_v46 = vrot.slane %v5408_v60, 4 }
 0x39c   : > { %v4473_v6 = vcombine.high %v4471_v44, %v4471_v44  ;;  %v5478_v43 = vsel %vm4602_vm13, %v4472_v15, -inf  ;;  %v5449_v22 = vmax.f32 %v19648_v9, %v5448_v41  ;;  %v5469_v34 = vrot.slane %v5468_v28, 1 }
 0x39d   : > { %v5391_v0 = vmax.f32 %v5389_v14, %v5390_v51  ;;  %v5397_v56 = vrot.slane %v5396_v33, 2  ;;  %v5404_v29 = vrot.slane %v5403_v61, 2  ;;  %v5410_v18 = vmax.f32 %v5408_v60, %v5409_v46  ;;  %16514 = vmatpush3.bf16.msra.mxu0 %v17419_v2 }
 0x39e   : > { %v5472_v19 = vrot.slane %v5471_v1, 4  ;;  %v5485_v58 = vsel %vm4602_vm13, %v4471_v44, -inf  ;;  %16515 = vmatprep.subr.bf16.mxu0 %v17424_v62  ;;  %v5456_v14 = vmax.f32 %v5454_v45, %v5455_v57  ;;  %v5463_v27 = vmax.f32 %v5461_v35, %v5462_v25 }
 0x39f   : > { %v5392_v52 = vrot.slane %v5391_v0, 1  ;;  %v5398_v63 = vmax.f32 %v5396_v33, %v5397_v56  ;;  %v5405_v49 = vmax.f32 %v5403_v61, %v5404_v29  ;;  %v5411_v47 = vrot.slane %v5410_v18, 2  ;;  %v17426_v33 = vld [vmem:[%s22363_s3 + $0xa8] sm:$0xff]  }
 0x3a0   : > { %v5479_v15 = vrot.slane %v5478_v43, 4  ;;  %v5492_v2 = vsel %vm4602_vm13, %v4473_v6, -inf  ;;  %v5470_v44 = vmax.f32 %v5468_v28, %v5469_v34  ;;  %v5473_v46 = vmax.f32 %v5471_v1, %v5472_v19  ;;  %v17429_v1 = vld [vmem:[%s22363_s3 + $0xb0] sm:$0xff]  }
 0x3a1   : > { %v5393_v60 = vmax.f32 %v5391_v0, %v5392_v52  ;;  %v5399_v9 = vrot.slane %v5398_v63, 1  ;;  %v5406_v41 = vrot.slane %v5405_v49, 1  ;;  %v5412_v51 = vmax.f32 %v5410_v18, %v5411_v47  ;;  %16516 = vmatpush3.bf16.msra.mxu0 %v17424_v62 }
 0x3a2   : > { %v5486_v48 = vrot.slane %v5485_v58, 4  ;;  %16517 = vmatprep.subr.bf16.mxu0 %v17425_v8  ;;  %v5480_v57 = vmax.f32 %v5478_v43, %v5479_v15  ;;  %v5493_v25 = vrot.slane %v5492_v2, 4  ;;  %v5474_v62 = vrot.slane %v5473_v46, 2  ;;  %v19713_v43 = vld [vmem:[#allocation3 + $0x10] sm:$0xf] }
 0x3a3   : > { %v5400_v61 = vmax.f32 %v5398_v63, %v5399_v9  ;;  %v5407_v56 = vmax.f32 %v5405_v49, %v5406_v41  ;;  %v5413_v45 = vrot.slane %v5412_v51, 1  ;;  %v5555_v35 = vmax.f32 %v5393_v60, %v5449_v22  ;;  %v6100_v15 = vld [vmem:[#allocation3 + $0x14] sm:$0x1]  ;;  %v19715_v60 = vld [vmem:[#allocation3 + $0x18] sm:$0xf] }
 0x3a4   : > { %v19708_v28 = vmax.f32 %v19668_v38, 0.0  ;;  %v5487_v22 = vmax.f32 %v5485_v58, %v5486_v48  ;;  %v5481_v63 = vrot.slane %v5480_v57, 2  ;;  %v5494_v49 = vmax.f32 %v5492_v2, %v5493_v25  ;;  %v17434_v48 = vld [vmem:[%s22363_s3 + $0xb8] sm:$0xff]  }
 0x3a5   : > { %v5414_v6 = vmax.f32 %v5412_v51, %v5413_v45  ;;  %v5556_v0 = vmax.f32 %v5400_v61, %v5456_v14  ;;  %v5557_v29 = vmax.f32 %v5407_v56, %v5463_v27  ;;  %v15250_v52 = vpack.c.bf16 %v5555_v35, %v5555_v35  ;;  %16518 = vmatpush3.bf16.msra.mxu0 %v17425_v8  ;;  %v6102_v56 = vld [vmem:[#allocation3 + $0x1c] sm:$0x1] }
 0x3a6   : > { %22542 = vst [vmem:[#allocation8_spill] sm:$0xff] %v19708_v28  ;;  %16519 = vmatprep.subr.bf16.mxu0 %v17426_v33  ;;  %v5475_v38 = vmax.f32 %v5473_v46, %v5474_v62  ;;  %v19718_v9 = vcombine.low %v19713_v43, %v6100_v15  ;;  %v5488_v41 = vrot.slane %v5487_v22, 2  ;;  %v5495_v61 = vrot.slane %v5494_v49, 2  ;;  %v17435_v62 = vld [vmem:[%s22363_s3 + $0x100] sm:$0xff]  }
 0x3a7   : > { %v5558_v18 = vmax.f32 %v5414_v6, %v5470_v44  ;;  %v15251_v34 = vpack.c.bf16 %v5556_v0, %v5556_v0  ;;  %v15252_v19 = vpack.c.bf16 %v5557_v29, %v5557_v29  ;;  %v5943_v14 = vunpack.c.l.b16 %v15250_v52  ;;  %v19726_v44 = vld [vmem:[#allocation3 + $0x10] sm:$0xf]  ;;  %v7078_v0 = vld [vmem:[#allocation3 + $0x14] sm:$0x1] }
 0x3a8   : > { %v4423_v35 = vcombine.high %v19708_v28, %v19708_v28  ;;  %v4430_v25 = vrot.slane %v19708_v28, %v18924_v54  ;;  %v19737_v6 = vcombine.low %v19715_v60, %v6102_v56  ;;  %v5476_v29 = vrot.slane %v5475_v38, 1  ;;  %v19753_v56 = vld [vmem:[#allocation3 + $0x18] sm:$0xf] }
 0x3a9   : > { %v15253_v47 = vpack.c.bf16 %v5558_v18, %v5558_v18  ;;  %v5944_v8 = vunpack.c.l.b16 %v15251_v34  ;;  %v5945_v27 = vunpack.c.l.b16 %v15252_v19  ;;  %16520 = vmatpush3.bf16.msra.mxu0 %v17426_v33  ;;  %v5482_v33 = vmax.f32 %v5480_v57, %v5481_v63 }
 0x3aa   : > { %16521 = vmatprep.subr.bf16.mxu0 %v17429_v1  ;;  %v6168_v52 = vshll.u32 %v19718_v9, 16  ;;  %v19741_v57 = vcombine.low %v19726_v44, %v7078_v0  ;;  %v5489_v18 = vmax.f32 %v5487_v22, %v5488_v41  ;;  %v4437_v34 = vrot.slane %v4423_v35, %v18924_v54 }
 0x3ab   : > { %v5946_v58 = vunpack.c.l.b16 %v15253_v47  ;;  %v5999_v2 = vsel %vm5951_vm14, %v5944_v8, %v5943_v14  ;;  %v4438_v19 = vcombine.high %v4430_v25, %v4430_v25  ;;  %v5415_v63 = vsel %vm4602_vm13, %v4430_v25, -inf }
 0x3ac   : > { %v6000_v46 = vsel %vm5953_vm15, %v5945_v27, %v5999_v2  ;;  %v5483_v47 = vrot.slane %v5482_v33, 1  ;;  %v5496_v14 = vmax.f32 %v5494_v49, %v5495_v61  ;;  %v6166_v8 = vshrl.u32 %v19718_v9, 16 }
 0x3ad   : > { %v19730_v45 = vsel %vm5955_vm0, %v5946_v58, %v6000_v46  ;;  %16522 = vmatpush3.bf16.msra.mxu0 %v17429_v1  ;;  %v5416_v1 = vrot.slane %v5415_v63, 4  ;;  %v4439_v27 = vcombine.high %v4437_v34, %v4437_v34  ;;  %v5422_v15 = vsel %vm4602_vm13, %v4438_v19, -inf }
 0x3ae   : > { %16523 = vmatprep.subr.bf16.mxu0 %v17434_v48  ;;  %v5429_v58 = vsel %vm4602_vm13, %v4437_v34, -inf  ;;  %v6175_v2 = vshll.u32 %v19737_v6, 16  ;;  %v5423_v22 = vrot.slane %v5422_v15, 4  ;;  %v6173_v54 = vshrl.u32 %v19737_v6, 16 }
 0x3af   : > { %v5417_v46 = vmax.f32 %v5415_v63, %v5416_v1  ;;  %v5430_v41 = vrot.slane %v5429_v58, 4  ;;  %v5477_v49 = vmax.f32 %v5475_v38, %v5476_v29  ;;  %v5490_v61 = vrot.slane %v5489_v18, 1 }
 0x3b0   : > { %v5436_v35 = vsel %vm4602_vm13, %v4439_v27, -inf  ;;  %v6170_v25 = vrot.slane %v6168_v52, 1  ;;  %v5424_v19 = vmax.f32 %v5422_v15, %v5423_v22  ;;  %v5484_v31 = vmax.f32 %v5482_v33, %v5483_v47 }
 0x3b1   : > { %16524 = vmatpush3.bf16.msra.mxu0 %v17434_v48  ;;  %v5418_v0 = vrot.slane %v5417_v46, 2  ;;  %v5431_v51 = vmax.f32 %v5429_v58, %v5430_v41  ;;  %v5437_v34 = vrot.slane %v5436_v35, 4  ;;  %v5497_v48 = vrot.slane %v5496_v14, 1 }
 0x3b2   : > { %15853 = vmatprep.subr.bf16.mxu0 %v17435_v62  ;;  %v6177_v63 = vrot.slane %v6175_v2, 1  ;;  %v19757_v1 = vcombine.low %v19753_v56, %v7080_v59  ;;  %v5425_v30 = vrot.slane %v5424_v19, 2  ;;  %v5491_v38 = vmax.f32 %v5489_v18, %v5490_v61  ;;  %v19763_v18 = vld [vmem:[#allocation3 + $0x28] sm:$0xf] }
 0x3b3   : > { %v5419_v28 = vmax.f32 %v5417_v46, %v5418_v0  ;;  %v5432_v17 = vrot.slane %v5431_v51, 2  ;;  %v5438_v62 = vmax.f32 %v5436_v35, %v5437_v34  ;;  %v6171_v29 = vor.u32 %v6170_v25, %v6166_v8  ;;  %v6106_v35 = vld [vmem:[#allocation3 + $0x2c] sm:$0x1]  ;;  %v19769_v25 = vld [vmem:[#allocation3 + $0x20] sm:$0xf] }
 0x3b4   : > { %v6178_v5 = vor.u32 %v6177_v63, %v6173_v54  ;;  %v7136_v52 = vshll.u32 %v19741_v57, 16  ;;  %v5426_v15 = vmax.f32 %v5424_v19, %v5425_v30  ;;  %v5498_v41 = vmax.f32 %v5496_v14, %v5497_v48 }
 0x3b5   : > { %v5420_v27 = vrot.slane %v5419_v28, 1  ;;  %v5433_v58 = vmax.f32 %v5431_v51, %v5432_v17  ;;  %v5439_v22 = vrot.slane %v5438_v62, 2  ;;  %v7143_v2 = vshll.u32 %v19757_v1, 16  ;;  %v6104_v51 = vld [vmem:[#allocation3 + $0x24] sm:$0x1] }
 0x3b6   : > { %v14625_v33 = vcombine.low %v6171_v29, %v6178_v5  ;;  %v7138_v47 = vrot.slane %v7136_v52, 1  ;;  %v5427_v16 = vrot.slane %v5426_v15, 1  ;;  %v7134_v8 = vshrl.u32 %v19741_v57, 16  ;;  %v19777_v52 = vld [vmem:[#allocation3 + $0x28] sm:$0xf] }
 0x3b7   : > { %v5421_v59 = vmax.f32 %v5419_v28, %v5420_v27  ;;  %v5434_v46 = vrot.slane %v5433_v58, 1  ;;  %v5440_v0 = vmax.f32 %v5438_v62, %v5439_v22  ;;  %v7141_v30 = vshrl.u32 %v19757_v1, 16 }
 0x3b8   : > { %6487 = vmatprep.mubr.bf16.mxu0 %v14625_v33  ;;  %v7145_v17 = vrot.slane %v7143_v2, 1  ;;  %v14624_v5 = vcombine.low %v19713_v43, %v19715_v60  ;;  %v5428_v14 = vmax.f32 %v5426_v15, %v5427_v16  ;;  %v7139_v19 = vor.u32 %v7138_v47, %v7134_v8  ;;  %v7082_v16 = vld [vmem:[#allocation3 + $0x24] sm:$0x1] }
 0x3b9   : > { %v5435_v54 = vmax.f32 %v5433_v58, %v5434_v46  ;;  %v5441_v28 = vrot.slane %v5440_v0, 1  ;;  %v5559_v61 = vmax.f32 %v5421_v59, %v5477_v49  ;;  %v19772_v48 = vcombine.low %v19761_v40, %v6104_v51  ;;  %v7084_v59 = vld [vmem:[#allocation3 + $0x2c] sm:$0x1] }
 0x3ba   : > { %v7146_v34 = vor.u32 %v7145_v17, %v7141_v30  ;;  %6488 = vmatmul.mubr.bf16.gmra.mrb[100].mxu0 %v14624_v5  ;;  %v19775_v63 = vcombine.low %v19763_v18, %v6106_v35  ;;  %v5560_v29 = vmax.f32 %v5428_v14, %v5484_v31  ;;  %v14805_v27 = vcombine.low %v19726_v44, %v19753_v56  ;;  %v6085_v31 = vld [vmem:[#allocation3 + $0x44] sm:$0x1]  ;;  %v19793_v17 = vld [vmem:[#allocation3 + $0x30] sm:$0xf] }
 0x3bb   : > { %v5442_v62 = vmax.f32 %v5440_v0, %v5441_v28  ;;  %v5561_v43 = vmax.f32 %v5435_v54, %v5491_v38  ;;  %v15254_v60 = vpack.c.bf16 %v5559_v61, %v5559_v61  ;;  %v6182_v15 = vshll.u32 %v19772_v48, 16  ;;  %v6108_v28 = vld [vmem:[#allocation3 + $0x34] sm:$0x1]  ;;  %v19797_v61 = vld [vmem:[#allocation3 + $0x38] sm:$0xf] }
 0x3bc   : > { %v14806_v49 = vcombine.low %v7139_v19, %v7146_v34  ;;  %v19783_v58 = vcombine.low %v19769_v25, %v7082_v16  ;;  %v15255_v33 = vpack.c.bf16 %v5560_v29, %v5560_v29  ;;  %v6180_v38 = vshrl.u32 %v19772_v48, 16  ;;  %v19805_v29 = vld [vmem:[#allocation3 + $0x38] sm:$0xf] }
 0x3bd   : > { %v5562_v22 = vmax.f32 %v5442_v62, %v5498_v41  ;;  %v15256_v47 = vpack.c.bf16 %v5561_v43, %v5561_v43  ;;  %v5947_v2 = vunpack.c.l.b16 %v15254_v60  ;;  %v6184_v46 = vrot.slane %v6182_v15, 1  ;;  %v19803_v62 = vld [vmem:[#allocation3 + $0x30] sm:$0xf]  ;;  %v6082_v60 = vld [vmem:[#allocation3 + $0x40] sm:$0xf] }
 0x3be   : > { %7462 = vmatprep.mubr.bf16.mxu1 %v14806_v49  ;;  %v6189_v0 = vshll.u32 %v19775_v63, 16  ;;  %v19788_v8 = vcombine.low %v19777_v52, %v7084_v59  ;;  %v5948_v44 = vunpack.c.l.b16 %v15255_v33  ;;  %v6187_v41 = vshrl.u32 %v19775_v63, 16  ;;  %v6110_v15 = vld [vmem:[#allocation3 + $0x3c] sm:$0x1]  ;;  %v7086_v59 = vld [vmem:[#allocation3 + $0x34] sm:$0x1] }
 0x3bf   : > { %v6002_v56 = vsel %vm5957_vm1, %v5947_v2, %v19730_v45  ;;  %v15265_v30 = vpack.c.bf16 %v5562_v22, %v5562_v22  ;;  %7463 = vmatmul.mubr.bf16.vlgmr.msra.gmra.mrb[128].mxu1 %v14805_v27  ;;  %v5949_v5 = vunpack.c.l.b16 %v15256_v47  ;;  %v7148_v14 = vshrl.u32 %v19783_v58, 16 }
 0x3c0   : > { %v6191_v51 = vrot.slane %v6189_v0, 1  ;;  %v7150_v54 = vshll.u32 %v19783_v58, 16  ;;  %v6003_v35 = vsel %vm5959_vm3, %v5948_v44, %v6002_v56  ;;  %v6185_v19 = vor.u32 %v6184_v46, %v6180_v38 }
 0x3c1   : > { %v6086_v45 = vsel %vm18882_vm12, %v15265_v30, %v6085_v31  ;;  %v7157_v34 = vshll.u32 %v19788_v8, 16  ;;  %v6004_v43 = vsel %vm5961_vm4, %v5949_v5, %v6003_v35  ;;  %v7155_v27 = vshrl.u32 %v19788_v8, 16  ;;  %v7088_v31 = vld [vmem:[#allocation3 + $0x3c] sm:$0x1] }
 0x3c2   : > { %6087 = vst [vmem:[#allocation3 + $0x44] sm:$0x1] %v6086_v45  ;;  %v6192_v16 = vor.u32 %v6191_v51, %v6187_v41  ;;  %v7152_v49 = vrot.slane %v7150_v54, 1  ;;  %v6019_v22 = vpack.c.b16 %v6004_v43, %v6004_v43  ;;  %v19810_v47 = vcombine.low %v19793_v17, %v6108_v28  ;;  %v5661_v54 = vld [vmem:[#allocation3 + $0x48] sm:$0x1] }
 0x3c3   : > { %v7159_v33 = vrot.slane %v7157_v34, 1  ;;  %v19813_v2 = vcombine.low %v19797_v61, %v6110_v15  ;;  %v14627_v46 = vcombine.low %v19761_v40, %v19763_v18  ;;  %v19818_v0 = vcombine.low %v19803_v62, %v7086_v59 }
 0x3c4   : > { %v14628_v38 = vcombine.low %v6185_v19, %v6192_v16  ;;  %v19821_v44 = vcombine.low %v19805_v29, %v7088_v31  ;;  %v6083_v56 = vsel %vm19057_vm7, %v6019_v22, %v6082_v60  ;;  %v7153_v30 = vor.u32 %v7152_v49, %v7148_v14  ;;  %v5692_v19 = vld [vmem:[#allocation3 + $0x4c] sm:$0x1] }
 0x3c5   : > { %v7160_v41 = vor.u32 %v7159_v33, %v7155_v27  ;;  %v6196_v5 = vshll.u32 %v19810_v47, 16  ;;  %6084 = vst [vmem:[#allocation3 + $0x40] sm:$0xf] %v6083_v56  ;;  %v14808_v51 = vcombine.low %v19769_v25, %v19777_v52  ;;  %v6203_v40 = vshll.u32 %v19813_v2, 16 }
 0x3c6   : > { %6495 = vmatprep.mubr.bf16.mxu0 %v14628_v38  ;;  %v7164_v18 = vshll.u32 %v19818_v0, 16  ;;  %v6194_v35 = vshrl.u32 %v19810_v47, 16  ;;  %v7171_v14 = vshll.u32 %v19821_v44, 16  ;;  %v6201_v34 = vshrl.u32 %v19813_v2, 16 }
 0x3c7   : > { %v14809_v28 = vcombine.low %v7153_v30, %v7160_v41  ;;  %6496 = vmatmul.mubr.bf16.gmra.mrb[104].mxu0 %v14627_v46  ;;  %v6198_v45 = vrot.slane %v6196_v5, 1  ;;  %v6205_v43 = vrot.slane %v6203_v40, 1  ;;  %v7162_v60 = vshrl.u32 %v19818_v0, 16  ;;  %v19841_v46 = vld [vmem:[#allocation3 + $0x10] sm:$0xf] }
 0x3c8   : > { %v7166_v16 = vrot.slane %v7164_v18, 1  ;;  %v7169_v52 = vshrl.u32 %v19821_v44, 16  ;;  %v7173_v49 = vrot.slane %v7171_v14, 1  ;;  %v6207_v27 = vrot.slane %v19627_v42, 1  ;;  %v19843_v30 = vld [vmem:[#allocation3 + $0x8] sm:$0xf] }
 0x3c9   : > { %7470 = vmatprep.mubr.bf16.mxu1 %v14809_v28  ;;  %v6199_v25 = vor.u32 %v6198_v45, %v6194_v35  ;;  %v6206_v15 = vor.u32 %v6205_v43, %v6201_v34  ;;  %v6208_v22 = vrot.slane %v19630_v39, 1  ;;  %v5662_v33 = vsel %vm18882_vm12, 0, %v5661_v54  ;;  %v7090_v5 = vld [vmem:[#allocation3 + $0x44] sm:$0x1]  ;;  %v6586_v54 = vld [vmem:[#allocation3 + $0xc] sm:$0x1] }
 0x3ca   : > { %7471 = vmatmul.mubr.bf16.gmra.mrb[132].mxu1 %v14808_v51  ;;  %v5693_v59 = vsel %vm18869_vm11, 0, %v5692_v19  ;;  %v7167_v31 = vor.u32 %v7166_v16, %v7162_v60  ;;  %v7174_v38 = vor.u32 %v7173_v49, %v7169_v52  ;;  %5663 = vst [vmem:[#allocation3 + $0x48] sm:$0x1] %v5662_v33  ;;  %v14630_v41 = vcombine.low %v19793_v17, %v19797_v61  ;;  %v6588_v51 = vld [vmem:[#allocation3 + $0x14] sm:$0x1] }
 0x3cb   : > { %5694 = vst [vmem:[#allocation3 + $0x4c] sm:$0x1] %v5693_v59  ;;  %v14631_v56 = vcombine.low %v6199_v25, %v6206_v15  ;;  %v14623_v40 = vcombine.low %v6207_v27, %v6208_v22  ;;  %v19850_v18 = vcombine.low %v19841_v46, %v6588_v51  ;;  %v14811_v28 = vcombine.low %v19803_v62, %v19805_v29  ;;  %v17438_v62 = vld [vmem:[%s22363_s3 + $0xc0] sm:$0xff]  }
 0x3cc   : > { %v14812_v42 = vcombine.low %v7167_v31, %v7174_v38  ;;  %v7089_v39 = vld [vmem:[#allocation3 + $0x40] sm:$0xf]  ;;  %v19856_v17 = vcombine.low %v19843_v30, %v6586_v54  ;;  %v6210_v61 = vrot.slane %v19737_v6, 1  ;;  %v6212_v19 = vrot.slane %v19775_v63, 1  ;;  %v17440_v63 = vld [vmem:[%s22363_s3 + $0x108] sm:$0xff]  }
 0x3cd   : > { %6503 = vmatprep.mubr.bf16.mxu0 %v14631_v56  ;;  %v19847_v4 = vcombine.low %v7089_v39, %v7090_v5  ;;  %v6651_v34 = vshll.u32 %v19850_v18, 16  ;;  %v6209_v16 = vrot.slane %v19718_v9, 1  ;;  %v6211_v29 = vrot.slane %v19772_v48, 1  ;;  %v17441_v48 = vld [vmem:[%s22363_s3 + $0xc8] sm:$0xff]   ;;  %v17442_v56 = vld [vmem:[%s22363_s3 + $0x110] sm:$0xff]  }
 0x3ce   : > { %7478 = vmatprep.mubr.bf16.mxu1 %v14812_v42  ;;  %v6644_v25 = vshll.u32 %v19856_v17, 16  ;;  %v6649_v31 = vshrl.u32 %v19850_v18, 16  ;;  %v6214_v42 = vrot.slane %v19813_v2, 1  ;;  %v17446_v2 = vld [vmem:[%s22363_s3 + $0x118] sm:$0xff]  }
 0x3cf   : > { %6504 = vmatmul.mubr.bf16.gmra.mrb[108].mxu0 %v14630_v41  ;;  %v7178_v35 = vshll.u32 %v19847_v4, 16  ;;  %v7176_v6 = vshrl.u32 %v19847_v4, 16  ;;  %v14626_v27 = vcombine.low %v6209_v16, %v6210_v61  ;;  %v14629_v15 = vcombine.low %v6211_v29, %v6212_v19 }
 0x3d0   : > { %16525 = vmatprep.mubr.bf16.mxu0 %v14623_v40  ;;  %v6653_v22 = vrot.slane %v6651_v34, 1  ;;  %v6646_v59 = vrot.slane %v6644_v25, 1  ;;  %v6642_v41 = vshrl.u32 %v19856_v17, 16  ;;  %v6213_v40 = vrot.slane %v19810_v47, 1  ;;  %v17447_v47 = vld [vmem:[%s22363_s3 + $0xd8] sm:$0xff]  }
 0x3d1   : > { %v7091_v45 = vld [vmem:[#allocation3 + $0x48] sm:$0xf]  ;;  %v7180_v60 = vrot.slane %v7178_v35, 1  ;;  %v7191_v19 = vrot.slane %v19783_v58, 1  ;;  %v7192_v34 = vrot.slane %v19788_v8, 1  ;;  %v7193_v16 = vrot.slane %v19818_v0, 1 }
 0x3d2   : > { %7479 = vmatmul.mubr.bf16.gmra.mrb[136].mxu1 %v14811_v28  ;;  %v7092_v14 = vld [vmem:[#allocation3 + $0x4c] sm:$0x1]  ;;  %v6654_v5 = vor.u32 %v6653_v22, %v6649_v31  ;;  %v14814_v54 = vcombine.low %v7089_v39, %v7091_v45  ;;  %v17443_v28 = vld [vmem:[%s22363_s3 + $0xd0] sm:$0xff]   ;;  %v6647_v35 = vor.u32 %v6646_v59, %v6642_v41  ;;  %v14632_v61 = vcombine.low %v6213_v40, %v6214_v42  ;;  %v17450_v0 = vld [vmem:[%s22363_s3 + $0x128] sm:$0xff]  }
 0x3d3   : > { %v14756_v43 = vcombine.low %v7091_v45, %v7092_v14  ;;  %v7181_v9 = vor.u32 %v7180_v60, %v7176_v6  ;;  %v7189_v39 = vrot.slane %v19741_v57, 1  ;;  %v7190_v45 = vrot.slane %v19757_v1, 1  ;;  %v17448_v60 = vld [vmem:[%s22363_s3 + $0x120] sm:$0xff]   ;;  %v19904_v6 = vld [vmem:[#allocation3 + $0x20] sm:$0xf] }
 0x3d4   : > { %v14714_v14 = vcombine.low %v6647_v35, %v6654_v5  ;;  %v7195_v29 = vrot.slane %v19847_v4, 1  ;;  %v19902_v57 = vcombine.low %v7191_v19, %v7192_v34  ;;  %v17449_v8 = vld [vmem:[%s22363_s3 + $0xe0] sm:$0xff]   ;;  %v6592_v4 = vld [vmem:[#allocation3 + $0x24] sm:$0x1]  ;;  %v17460_v19 = vld [vmem:[%s22363_s3 + $0x148] sm:$0xff]  }
 0x3d5   : > { %v7183_v52 = vshrl.u32 %v14756_v43, 16  ;;  %v7185_v49 = vshll.u32 %v14756_v43, 16  ;;  %v19900_v25 = vcombine.low %v7189_v39, %v7190_v45  ;;  %v7196_v1 = vrot.slane %v14756_v43, 1  ;;  %v17454_v59 = vld [vmem:[%s22363_s3 + $0x138] sm:$0xff]   ;;  %v6593_v31 = vld [vmem:[#allocation3 + $0x28] sm:$0xf] }
 0x3d6   : > { %v19919_v43 = vcombine.low %v19904_v6, %v6592_v4  ;;  %v6594_v41 = vld [vmem:[#allocation3 + $0x2c] sm:$0x1]  ;;  %v17455_v5 = vld [vmem:[%s22363_s3 + $0xf8] sm:$0xff]   ;;  %v14713_v45 = vcombine.low %v19843_v30, %v19841_v46  ;;  %v6597_v34 = vld [vmem:[#allocation3 + $0x38] sm:$0xf] }
 0x3d7   : > { %v7187_v33 = vrot.slane %v7185_v49, 1  ;;  %16526 = vmatmul.mubr.bf16.vlgmr.msra.gmra.mrb[112].mxu0 %v14626_v27  ;;  %v6590_v49 = vld [vmem:[#allocation3 + $0x1c] sm:$0x1]  ;;  %v17451_v27 = vld [vmem:[%s22363_s3 + $0xe8] sm:$0xff]  }
 0x3d8   : > { %15854 = vmatpush3.bf16.msra.mxu0 %v17438_v62  ;;  %16529 = vmatprep.mubr.bf16.mxu0 %v14629_v15  ;;  %v7194_v62 = vrot.slane %v19821_v44, 1  ;;  %v19916_v44 = vld [vmem:[#allocation3 + $0x18] sm:$0xf]  ;;  %v6665_v22 = vshll.u32 %v19919_v43, 16  ;;  %v6663_v40 = vshrl.u32 %v19919_v43, 16 }
 0x3d9   : > { %v7188_v38 = vor.u32 %v7187_v33, %v7183_v52  ;;  %15855 = vmatprep.subr.bf16.mxu0 %v17440_v63  ;;  %v19911_v52 = vcombine.low %v7195_v29, %v7196_v1  ;;  %v19925_v63 = vcombine.low %v19916_v44, %v6590_v49  ;;  %v17452_v15 = vld [vmem:[%s22363_s3 + $0x130] sm:$0xff]  }
 0x3da   : > { %v19906_v58 = vcombine.low %v7193_v16, %v7194_v62  ;;  %v17453_v33 = vld [vmem:[%s22363_s3 + $0xf0] sm:$0xff]  }
 0x3db   : > { %v14815_v51 = vcombine.low %v7181_v9, %v7188_v38  ;;  %v19931_v9 = vld [vmem:[#allocation3 + $0x30] sm:$0xf]  ;;  %v6596_v38 = vld [vmem:[#allocation3 + $0x34] sm:$0x1]  ;;  %v6656_v35 = vshrl.u32 %v19925_v63, 16  ;;  %v17462_v46 = vld [vmem:[%s22363_s3 + $0x150] sm:$0xff]  }
 0x3dc   : > { %15856 = vmatpush3.bf16.msra.mxu0 %v17441_v48  ;;  %v6658_v48 = vshll.u32 %v19925_v63, 16  ;;  %v19941_v42 = vcombine.low %v19931_v9, %v6596_v38  ;;  %v6598_v1 = vld [vmem:[#allocation3 + $0x3c] sm:$0x1] }
 0x3dd   : > { %7486 = vmatprep.mubr.bf16.mxu1 %v14815_v51  ;;  %15857 = vmatprep.subr.bf16.mxu0 %v17442_v56  ;;  %v6667_v56 = vrot.slane %v6665_v22, 1  ;;  %v19963_v4 = vcombine.low %v6597_v34, %v6598_v1  ;;  %v17479_v1 = vld [vmem:[%s22363_s3 + $0x228] sm:$0xff]  }
 0x3de   : > { %7487 = vmatmul.mubr.bf16.gmra.mrb[140].mxu1 %v14814_v54  ;;  %v6660_v51 = vrot.slane %v6658_v48, 1  ;;  %v19947_v54 = vcombine.low %v6593_v31, %v6594_v41  ;;  %v17465_v48 = vld [vmem:[%s22363_s3 + $0x158] sm:$0xff]  }
 0x3df   : > { %16530 = vmatmul.mubr.bf16.gmra.mrb[116].mxu0 %v14632_v61  ;;  %v6668_v61 = vor.u32 %v6667_v56, %v6663_v40  ;;  %v6686_v22 = vshll.u32 %v19963_v4, 16  ;;  %v14719_v40 = vcombine.low %v6593_v31, %v19931_v9  ;;  %v17473_v31 = vld [vmem:[%s22363_s3 + $0x178] sm:$0xff]  }
 0x3e0   : > { %15858 = vmatpush3.bf16.msra.mxu0 %v17443_v28  ;;  %6970 = vmatprep.mubr.bf16.mxu0 %v14714_v14  ;;  %v17457_v28 = vld [vmem:[%s22363_s3 + $0x140] sm:$0xff]   ;;  %v6599_v14 = vld [vmem:[#allocation3 + $0x40] sm:$0xf]  ;;  %v6672_v39 = vshll.u32 %v19947_v54, 16  ;;  %v6670_v30 = vshrl.u32 %v19947_v54, 16 }
 0x3e1   : > { %15859 = vmatprep.subr.bf16.mxu0 %v17446_v2  ;;  %v6679_v2 = vshll.u32 %v19941_v42, 16  ;;  %v6688_v56 = vrot.slane %v6686_v22, 1  ;;  %v14722_v9 = vcombine.low %v6597_v34, %v6599_v14 }
 0x3e3   : > { %v6681_v62 = vrot.slane %v6679_v2, 1  ;;  %v6698_v2 = vrot.slane %v19850_v18, 1  ;;  %v17474_v18 = vld [vmem:[%s22363_s3 + $0x200] sm:$0xff]  }
 0x3e4   : > { %15860 = vmatpush3.bf16.msra.mxu0 %v17447_v47  ;;  %v6661_v47 = vor.u32 %v6660_v51, %v6656_v35 }
 0x3e5   : > { %15861 = vmatprep.subr.bf16.mxu0 %v17448_v60  ;;  %v6600_v60 = vld [vmem:[#allocation3 + $0x44] sm:$0x1] }
 0x3e6   : > { %v14717_v16 = vcombine.low %v6661_v47, %v6668_v61  ;;  %v19960_v29 = vcombine.low %v6599_v14, %v6600_v60  ;;  %v17472_v61 = vld [vmem:[%s22363_s3 + $0x170] sm:$0xff]   ;;  %v6697_v47 = vrot.slane %v19856_v17, 1  ;;  %v6699_v17 = vrot.slane %v19925_v63, 1  ;;  %v17475_v60 = vld [vmem:[%s22363_s3 + $0x208] sm:$0xff]  }
 0x3e7   : > { %v6701_v14 = vrot.slane %v19947_v54, 1  ;;  %v17476_v63 = vld [vmem:[%s22363_s3 + $0x210] sm:$0xff]  }
 0x3e8   : > { %15862 = vmatpush3.bf16.msra.mxu0 %v17449_v8  ;;  %v6674_v8 = vrot.slane %v6672_v39, 1  ;;  %v6691_v41 = vshrl.u32 %v19960_v29, 16  ;;  %v14715_v39 = vcombine.low %v6697_v47, %v6698_v2 }
 0x3e9   : > { %15863 = vmatprep.subr.bf16.mxu0 %v17450_v0  ;;  %v6677_v0 = vshrl.u32 %v19941_v42, 16 }
 0x3eb   : > { %v6682_v49 = vor.u32 %v6681_v62, %v6677_v0  ;;  %v17477_v62 = vld [vmem:[%s22363_s3 + $0x218] sm:$0xff]  }
 0x3ec   : > { %15864 = vmatpush3.bf16.msra.mxu0 %v17451_v27  ;;  %v6693_v27 = vshll.u32 %v19960_v29, 16 }
 0x3ed   : > { %15865 = vmatprep.subr.bf16.mxu0 %v17452_v15  ;;  %v6675_v15 = vor.u32 %v6674_v8, %v6670_v30  ;;  %v17480_v8 = vld [vmem:[%s22363_s3 + $0x230] sm:$0xff]  }
 0x3ee   : > { %v6695_v38 = vrot.slane %v6693_v27, 1 }
 0x3f0   : > { %15866 = vmatpush3.bf16.msra.mxu0 %v17453_v33  ;;  %v14716_v33 = vcombine.low %v19916_v44, %v19904_v6  ;;  %v6684_v6 = vshrl.u32 %v19963_v4, 16  ;;  %v6696_v44 = vor.u32 %v6695_v38, %v6691_v41 }
 0x3f1   : > { %15867 = vmatprep.subr.bf16.mxu0 %v17454_v59  ;;  %v14720_v59 = vcombine.low %v6675_v15, %v6682_v49 }
 0x3f2   : > { %v6689_v51 = vor.u32 %v6688_v56, %v6684_v6 }
 0x3f4   : > { %15868 = vmatpush3.bf16.msra.mxu0 %v17455_v5  ;;  %v17467_v5 = vld [vmem:[%s22363_s3 + $0x160] sm:$0xff]   ;;  %v14723_v35 = vcombine.low %v6689_v51, %v6696_v44 }
 0x3f5   : > { %16533 = vmatprep.subr.bf16.mxu0 %v17457_v28 }
 0x3f7   : > { %6971 = vmatmul.mubr.bf16.vlgmr.msra.gmra.mrb[120].mxu0 %v14713_v45  ;;  %v6700_v45 = vrot.slane %v19919_v43, 1  ;;  %v6704_v43 = vrot.slane %v19960_v29, 1  ;;  %v17478_v29 = vld [vmem:[%s22363_s3 + $0x220] sm:$0xff]  }
 0x3f8   : > { %6978 = vmatprep.mubr.bf16.mxu0 %v14717_v16  ;;  %16534 = vmatpush3.bf16.msra.mxu0 %v17457_v28  ;;  %v17470_v28 = vld [vmem:[%s22363_s3 + $0x168] sm:$0xff]  }
 0x3f9   : > { %16535 = vmatprep.subr.bf16.mxu0 %v17460_v19  ;;  %v14718_v34 = vcombine.low %v6699_v17, %v6700_v45 }
 0x3fc   : > { %16536 = vmatpush3.bf16.msra.mxu0 %v17460_v19  ;;  %v6702_v19 = vrot.slane %v19941_v42, 1  ;;  %v6703_v42 = vrot.slane %v19963_v4, 1 }
 0x3fd   : > { %16537 = vmatprep.subr.bf16.mxu0 %v17462_v46 }
 0x3fe   : > { %v14721_v16 = vcombine.low %v6701_v14, %v6702_v19  ;;  %v14724_v54 = vcombine.low %v6703_v42, %v6704_v43 }
 0x3ff   : > { %6979 = vmatmul.mubr.bf16.gmra.mrb[124].mxu0 %v14716_v33 }
 0x400   : > { %6986 = vmatprep.mubr.bf16.mxu0 %v14720_v59  ;;  %16538 = vmatpush3.bf16.msra.mxu0 %v17462_v46 }
 0x401   : > { %16539 = vmatprep.subr.bf16.mxu0 %v17465_v48 }
 0x404   : > { %16540 = vmatpush3.bf16.msra.mxu0 %v17465_v48 }
 0x405   : > { %16541 = vmatprep.subr.bf16.mxu0 %v17467_v5 }
 0x407   : > { %6987 = vmatmul.mubr.bf16.gmra.mrb[128].mxu0 %v14719_v40 }
 0x408   : > { %6994 = vmatprep.mubr.bf16.mxu0 %v14723_v35  ;;  %16542 = vmatpush3.bf16.msra.mxu0 %v17467_v5 }
 0x409   : > { %16543 = vmatprep.subr.bf16.mxu0 %v17470_v28 }
 0x40c   : > { %16544 = vmatpush3.bf16.msra.mxu0 %v17470_v28 }
 0x40d   : > { %16545 = vmatprep.subr.bf16.mxu0 %v17472_v61 }
 0x40f   : > { %6995 = vmatmul.mubr.bf16.gmra.mrb[132].mxu0 %v14722_v9 }
 0x410   : > { %16546 = vmatpush3.bf16.msra.mxu0 %v17472_v61  ;;  %16549 = vmatprep.mubr.bf16.mxu0 %v14715_v39 }
 0x411   : > { %16547 = vmatprep.subr.bf16.mxu0 %v17473_v31 }
 0x414   : > { %16548 = vmatpush3.bf16.msra.mxu0 %v17473_v31 }
 0x415   : > { %16557 = vmatprep.subr.bf16.mxu0 %v17474_v18 }
 0x417   : > { %16550 = vmatmul.mubr.bf16.vlgmr.msra.gmra.mrb[112].mxu0 %v14718_v34 }
 0x418   : > { %16553 = vmatprep.mubr.bf16.mxu0 %v14721_v16  ;;  %16558 = vmatpush3.bf16.msra.mxu0 %v17474_v18 }
 0x419   : > { %16559 = vmatprep.subr.bf16.mxu0 %v17475_v60 }
 0x41c   : > { %16560 = vmatpush3.bf16.msra.mxu0 %v17475_v60 }
 0x41d   : > { %16561 = vmatprep.subr.bf16.mxu0 %v17476_v63 }
 0x41f   : > { %16554 = vmatmul.mubr.bf16.gmra.mrb[116].mxu0 %v14724_v54 }
 0x420   : > { %16562 = vmatpush3.bf16.msra.mxu0 %v17476_v63  ;;  %16573 = vmatprep.mubr.bf16.mxu0 %v19900_v25  ;;  %v17481_v25 = vld [vmem:[%s22363_s3 + $0x238] sm:$0xff]  }
 0x421   : > { %16563 = vmatprep.subr.bf16.mxu0 %v17477_v62 }
 0x424   : > { %16564 = vmatpush3.bf16.msra.mxu0 %v17477_v62 }
 0x425   : > { %16565 = vmatprep.subr.bf16.mxu0 %v17478_v29 }
 0x428   : > { %16566 = vmatpush3.bf16.msra.mxu0 %v17478_v29 }
 0x429   : > { %16567 = vmatprep.subr.bf16.mxu0 %v17479_v1 }
 0x42c   : > { %16568 = vmatpush3.bf16.msra.mxu0 %v17479_v1 }
 0x42d   : > { %16569 = vmatprep.subr.bf16.mxu0 %v17480_v8 }
 0x430   : > { %16570 = vmatpush3.bf16.msra.mxu0 %v17480_v8 }
 0x431   : > { %16571 = vmatprep.subr.bf16.mxu0 %v17481_v25 }
 0x434   : > { %16572 = vmatpush3.bf16.msra.mxu0 %v17481_v25 }
 0x437   : > { %16574 = vmatmul.mubr.bf16.vlgmr.msra.gmra.mrb[112].mxu0 %v19902_v57 }
 0x438   : > { %16577 = vmatprep.mubr.bf16.mxu0 %v19906_v58 }
 0x43f   : > { %16578 = vmatmul.mubr.bf16.gmra.mrb[116].mxu0 %v19911_v52 }
 0x467   : > { %v15817_v0 = vpop.f32.mrb[96].mxu0 }
 0x468   : > { %v15818_v4 = vpop.f32.mrb[97].mxu0 }
 0x469   : > { %v15819_v46 = vadd.f32 %v15818_v4, %v15817_v0  ;;  %v15820_v30 = vpop.f32.mrb[98].mxu0  ;;  %v14612_v4 = vld [vmem:[%s22364_s4] ss:$0 sm:$0xff] }
 0x46a   : > { %v15821_v49 = vpop.f32.mrb[99].mxu0 }
 0x46b   : > { %v15822_v27 = vadd.f32 %v15821_v49, %v15820_v30 }
 0x48d   : > { %v15823_v15 = vpop.f32.mrb[100].mxu0 }
 0x48e   : > { %v15824_v22 = vpop.f32.mrb[101].mxu0 }
 0x48f   : > { %v15825_v33 = vadd.f32 %v15824_v22, %v15823_v15  ;;  %v15826_v48 = vpop.f32.mrb[102].mxu0  ;;  %v16873_v15 = vadd.f32 %v15819_v46, %v14612_v4 }
 0x490   : > { %v15827_v59 = vpop.f32.mrb[103].mxu0 }
 0x491   : > { %v15828_v38 = vadd.f32 %v15827_v59, %v15826_v48 }
 0x492   : > { %v15921_v56 = vpop.f32.mrb[128].mxu1 }
 0x493   : > { %v15922_v41 = vpop.f32.mrb[129].mxu1 }
 0x494   : > { %v15923_v5 = vadd.f32 %v15922_v41, %v15921_v56  ;;  %v15924_v57 = vpop.f32.mrb[130].mxu1  ;;  %v16881_v56 = vadd.f32 %v15822_v27, %v14612_v4 }
 0x495   : > { %v15925_v6 = vpop.f32.mrb[131].mxu1 }
 0x496   : > { %v15926_v58 = vadd.f32 %v15925_v6, %v15924_v57 }
 0x49a   : > { %v15829_v44 = vpop.f32.mrb[104].mxu0 }
 0x49b   : > { %v15830_v52 = vpop.f32.mrb[105].mxu0 }
 0x49c   : > { %v15831_v51 = vadd.f32 %v15830_v52, %v15829_v44  ;;  %v15832_v40 = vpop.f32.mrb[106].mxu0 }
 0x49d   : > { %v15927_v28 = vpop.f32.mrb[132].mxu1  ;;  %v15833_v35 = vpop.f32.mrb[107].mxu0 }
 0x49e   : > { %v15928_v61 = vpop.f32.mrb[133].mxu1  ;;  %v15834_v2 = vadd.f32 %v15833_v35, %v15832_v40  ;;  %v16869_v35 = vadd.f32 %v15825_v33, %v14612_v4  ;;  %v16889_v27 = vadd.f32 %v15831_v51, %v14612_v4 }
 0x49f   : > { %v15929_v47 = vadd.f32 %v15928_v61, %v15927_v28  ;;  %v15930_v9 = vpop.f32.mrb[134].mxu1 }
 0x4a0   : > { %v15931_v31 = vpop.f32.mrb[135].mxu1 }
 0x4a1   : > { %v15932_v39 = vadd.f32 %v15931_v31, %v15930_v9 }
 0x4a2   : > { %v15835_v45 = vpop.f32.mrb[108].mxu0 }
 0x4a3   : > { %v15836_v18 = vpop.f32.mrb[109].mxu0 }
 0x4a4   : > { %v15837_v19 = vadd.f32 %v15836_v18, %v15835_v45  ;;  %v15838_v17 = vpop.f32.mrb[110].mxu0  ;;  %v16877_v45 = vadd.f32 %v15828_v38, %v14612_v4 }
 0x4a5   : > { %v15933_v14 = vpop.f32.mrb[136].mxu1  ;;  %v15839_v34 = vpop.f32.mrb[111].mxu0 }
 0x4a6   : > { %v15934_v60 = vpop.f32.mrb[137].mxu1  ;;  %v15840_v16 = vadd.f32 %v15839_v34, %v15838_v17  ;;  %v16885_v38 = vadd.f32 %v15837_v19, %v14612_v4 }
 0x4a7   : > { %v15935_v43 = vadd.f32 %v15934_v60, %v15933_v14  ;;  %v15936_v63 = vpop.f32.mrb[138].mxu1 }
 0x4a8   : > { %v15937_v42 = vpop.f32.mrb[139].mxu1 }
 0x4a9   : > { %v15938_v54 = vadd.f32 %v15937_v42, %v15936_v63 }
 0x4b1   : > { %v15939_v62 = vpop.f32.mrb[140].mxu1 }
 0x4b2   : > { %v15940_v29 = vpop.f32.mrb[141].mxu1 }
 0x4b3   : > { %v15941_v1 = vadd.f32 %v15940_v29, %v15939_v62  ;;  %v15942_v8 = vpop.f32.mrb[142].mxu1 }
 0x4b4   : > { %v15943_v25 = vpop.f32.mrb[143].mxu1 }
 0x4b5   : > { %v15944_v0 = vadd.f32 %v15943_v25, %v15942_v8 }
 0x4ca   : > { %v15869_v30 = vpop.f32.mrb[120].mxu0 }
 0x4cb   : > { %v15870_v49 = vpop.f32.mrb[121].mxu0 }
 0x4cc   : > { %v15871_v22 = vadd.f32 %v15870_v49, %v15869_v30  ;;  %v15872_v48 = vpop.f32.mrb[122].mxu0 }
 0x4cd   : > { %v15873_v59 = vpop.f32.mrb[123].mxu0 }
 0x4ce   : > { %v16874_v41 = vadd.f32 %v16873_v15, %v15871_v22  ;;  %v15874_v57 = vadd.f32 %v15873_v59, %v15872_v48 }
 0x4d0   : > { %v16882_v6 = vadd.f32 %v16881_v56, %v15874_v57  ;;  %v16875_v44 = vadd.f32 %v16874_v41, %v15923_v5  ;;  %v16897_v5 = vadd.f32 %v15834_v2, %v14612_v4 }
 0x4d2   : > { %v15875_v52 = vpop.f32.mrb[124].mxu0  ;;  %v16883_v40 = vadd.f32 %v16882_v6, %v15926_v58 }
 0x4d3   : > { %v15876_v28 = vpop.f32.mrb[125].mxu0 }
 0x4d4   : > { %v15877_v61 = vadd.f32 %v15876_v28, %v15875_v52  ;;  %v15878_v9 = vpop.f32.mrb[126].mxu0 }
 0x4d5   : > { %v15879_v31 = vpop.f32.mrb[127].mxu0 }
 0x4d6   : > { %v16870_v18 = vadd.f32 %v16869_v35, %v15877_v61  ;;  %v15880_v17 = vadd.f32 %v15879_v31, %v15878_v9 }
 0x4d8   : > { %v16878_v14 = vadd.f32 %v16877_v45, %v15880_v17  ;;  %v16871_v46 = vadd.f32 %v16870_v18, %v15929_v47  ;;  %v16893_v47 = vadd.f32 %v15840_v16, %v14612_v4 }
 0x4da   : > { %v15881_v34 = vpop.f32.mrb[128].mxu0  ;;  %v16879_v60 = vadd.f32 %v16878_v14, %v15932_v39 }
 0x4db   : > { %v15882_v63 = vpop.f32.mrb[129].mxu0 }
 0x4dc   : > { %v15883_v42 = vadd.f32 %v15882_v63, %v15881_v34  ;;  %v15884_v62 = vpop.f32.mrb[130].mxu0 }
 0x4dd   : > { %v15885_v29 = vpop.f32.mrb[131].mxu0 }
 0x4de   : > { %v16890_v8 = vadd.f32 %v16889_v27, %v15883_v42  ;;  %v15886_v58 = vadd.f32 %v15885_v29, %v15884_v62  ;;  %v17721_v29 = vmov 1966171168  }
 0x4e0   : > { %v16898_v25 = vadd.f32 %v16897_v5, %v15886_v58  ;;  %v16891_v33 = vadd.f32 %v16890_v8, %v15935_v43  ;;  %v7602_v5 = vunpack.c.l.s4 %v17721_v29  ;;  %v22543_v58 = vld [vmem:[#allocation25_spill] sm:$0xff]  ;;  %v22555_v29 = vpack.c.bf16 %v19146_v13, %v19098_v23 }
 0x4e2   : > { %v15887_v30 = vpop.f32.mrb[132].mxu0  ;;  %v16899_v49 = vadd.f32 %v16898_v25, %v15938_v54  ;;  %v7603_v8 = vunpack.c.0.s8 %v7602_v5 }
 0x4e3   : > { %v15888_v15 = vpop.f32.mrb[133].mxu0 }
 0x4e4   : > { %v15889_v22 = vadd.f32 %v15888_v15, %v15887_v30  ;;  %v15890_v48 = vpop.f32.mrb[134].mxu0  ;;  %v20031_v25 = vsub.s32 %v7603_v8, %v22543_v58 }
 0x4e5   : > { %v15891_v59 = vpop.f32.mrb[135].mxu0 }
 0x4e6   : > { %v16886_v56 = vadd.f32 %v16885_v38, %v15889_v22  ;;  %v15892_v39 = vadd.f32 %v15891_v59, %v15890_v48  ;;  %v22547_v22 = vld [vmem:[#allocation30_spill] sm:$0xff]  ;;  %v8896_v5 = vrot.slane %v22555_v29, %v20031_v25 }
 0x4e7   : > { %v14877_v48 = vpack.c.bf16 %v22547_v22, %v22547_v22 }
 0x4e8   : > { %v16894_v41 = vadd.f32 %v16893_v47, %v15892_v39  ;;  %v16887_v51 = vadd.f32 %v16886_v56, %v15941_v1  ;;  %v22548_v47 = vld [vmem:[#allocation28_spill] sm:$0xff] }
 0x4e9   : > { %v22549_v56 = vpack.c.bf16 %v22547_v22, %v22548_v47  ;;  %v22567_v22 = vld [vmem:[#allocation23_spill] sm:$0xff] }
 0x4ea   : > { %v16895_v57 = vadd.f32 %v16894_v41, %v15944_v0  ;;  %v22550_v41 = vld [vmem:[#allocation33_spill] sm:$0xff] }
 0x4eb   : > { %v8651_v39 = vrot.slane %v22549_v56, %v20031_v25 }
 0x50a   : > { %v16575_v6 = vpop.f32.mrb[112].mxu0 }
 0x50b   : > { %v16872_v52 = vadd.f32 %v16871_v46, %v16575_v6  ;;  %v7529_v2 = vpop.f32.mrb[113].mxu0  ;;  %v8658_v6 = vrot.slane %v14877_v48, %v20031_v25 }
 0x50c   : > { %v16876_v28 = vadd.f32 %v16875_v44, %v7529_v2  ;;  %v16576_v35 = vpop.f32.mrb[114].mxu0 }
 0x50d   : > { %v16880_v61 = vadd.f32 %v16879_v60, %v16576_v35  ;;  %v7532_v43 = vpop.f32.mrb[115].mxu0  ;;  %v7570_v54 = vmax.f32 %v16872_v52, 0.0  ;;  %v8659_v35 = vcombine.high %v8651_v39, %v8651_v39 }
 0x50e   : > { %v16884_v9 = vadd.f32 %v16883_v40, %v7532_v43  ;;  %v7568_v19 = vmax.f32 %v16876_v28, 0.0  ;;  %v14879_v28 = vpack.c.bf16 %v19096_v53, %v19096_v53 }
 0x50f   : > { %v7571_v31 = vmax.f32 %v16880_v61, 0.0  ;;  %v22551_v61 = vld [vmem:[#allocation31_spill] sm:$0xff] }
 0x510   : > { %v7569_v45 = vmax.f32 %v16884_v9, 0.0  ;;  %v22552_v43 = vpack.c.bf16 %v22550_v41, %v22551_v61 }
 0x511   : > { %v17191_v18 = vpack.i.bf16 %v7571_v31, %v7570_v54 }
 0x512   : > { %v16579_v17 = vpop.f32.mrb[116].mxu0  ;;  %v17186_v16 = vpack.i.bf16 %v7569_v45, %v7568_v19  ;;  %v8798_v9 = vrot.slane %v22552_v43, %v20031_v25  ;;  %v8660_v45 = vcombine.high %v8658_v6, %v8658_v6 }
 0x513   : > { %v16888_v4 = vadd.f32 %v16887_v51, %v16579_v17  ;;  %v7545_v14 = vpop.f32.mrb[117].mxu0  ;;  %v14880_v51 = vpack.c.bf16 %v22550_v41, %v22550_v41  ;;  %v14882_v17 = vpack.c.bf16 %v19146_v13, %v19146_v13 }
 0x514   : > { %v16892_v34 = vadd.f32 %v16891_v33, %v7545_v14  ;;  %v16580_v1 = vpop.f32.mrb[118].mxu0  ;;  %17187 = vrot.lane.b32.xlu0 %v17186_v16, %s17720_s26  ;;  %v22544_v33 = vld [vmem:[#allocation29_spill] sm:$0xff]  ;;  %v22553_v14 = vld [vmem:[#allocation32_spill] sm:$0xff] }
 0x515   : > { %v16896_v0 = vadd.f32 %v16895_v57, %v16580_v1  ;;  %v7548_v46 = vpop.f32.mrb[119].mxu0  ;;  %v7574_v63 = vmax.f32 %v16888_v4, 0.0  ;;  %v14878_v30 = vpack.c.bf16 %v22544_v33, %v22544_v33  ;;  %v8805_v54 = vrot.slane %v14880_v51, %v20031_v25 }
 0x516   : > { %v16900_v44 = vadd.f32 %v16899_v49, %v7548_v46  ;;  %v7572_v27 = vmax.f32 %v16892_v34, 0.0  ;;  %v22545_v49 = vld [vmem:[#allocation26_spill] sm:$0xff]  ;;  %v20073_v4 = vrot.slane %v8651_v39, %v20031_v25  ;;  %v22554_v34 = vpack.c.bf16 %v19096_v53, %v22553_v14 }
 0x517   : > { %v7575_v60 = vmax.f32 %v16896_v0, 0.0  ;;  %v22546_v15 = vpack.c.bf16 %v22544_v33, %v22545_v49  ;;  %v8707_v59 = vrot.slane %v14878_v30, %v20031_v25  ;;  %v8756_v0 = vrot.slane %v14879_v28, %v20031_v25 }
 0x518   : > { %v7573_v40 = vmax.f32 %v16900_v44, 0.0  ;;  %17192 = vrot.lane.b32.xlu0 %v17191_v18, %s17720_s26  ;;  %v8749_v1 = vrot.slane %v22554_v34, %v20031_v25  ;;  %v20081_v46 = vrot.slane %v8658_v6, %v20031_v25  ;;  %v20084_v44 = vrot.slane %v8659_v35, %v20031_v25 }
 0x519   : > { %v17201_v42 = vpack.i.bf16 %v7575_v60, %v7574_v63  ;;  %v8700_v38 = vrot.slane %v22546_v15, %v20031_v25  ;;  %v8709_v52 = vcombine.high %v8707_v59, %v8707_v59  ;;  %v20060_v31 = vrot.slane %v8707_v59, %v20031_v25 }
 0x51a   : > { %v17196_v62 = vpack.i.bf16 %v7573_v40, %v7572_v27  ;;  %v8806_v63 = vcombine.high %v8798_v9, %v8798_v9  ;;  %v8807_v60 = vcombine.high %v8805_v54, %v8805_v54  ;;  %v20094_v53 = vrot.slane %v8798_v9, %v20031_v25 }
 0x51b   : > { %v8708_v57 = vcombine.high %v8700_v38, %v8700_v38  ;;  %v20050_v2 = vrot.slane %v8700_v38, %v20031_v25  ;;  %v20066_v18 = vrot.slane %v8709_v52, %v20031_v25  ;;  %v8903_v8 = vrot.slane %v14882_v17, %v20031_v25 }
 0x51c   : > { %17197 = vrot.lane.b32.xlu1 %v17196_v62, %s17720_s26  ;;  %v14881_v33 = vpack.c.bf16 %v19189_v12, %v19189_v12  ;;  %v20108_v49 = vrot.slane %v8805_v54, %v20031_v25  ;;  %v8757_v15 = vcombine.high %v8749_v1, %v8749_v1  ;;  %v8758_v38 = vcombine.high %v8756_v0, %v8756_v0 }
 0x51d   : > { %v20063_v19 = vrot.slane %v8708_v57, %v20031_v25  ;;  %v20115_v13 = vrot.slane %v8806_v63, %v20031_v25  ;;  %v20118_v48 = vrot.slane %v8807_v60, %v20031_v25  ;;  %v20125_v56 = vrot.slane %v8749_v1, %v20031_v25 }
 0x51e   : > { %v22556_v39 = vpack.c.bf16 %v19189_v12, %v19137_v20  ;;  %v8904_v51 = vcombine.high %v8896_v5, %v8896_v5  ;;  %v8905_v57 = vcombine.high %v8903_v8, %v8903_v8  ;;  %v8854_v6 = vrot.slane %v14881_v33, %v20031_v25 }
 0x51f   : > { %v14884_v52 = vpack.c.bf16 %v19247_v3, %v19247_v3  ;;  %v20137_v35 = vrot.slane %v8756_v0, %v20031_v25  ;;  %v20140_v61 = vrot.slane %v8757_v15, %v20031_v25  ;;  %v20143_v43 = vrot.slane %v8758_v38, %v20031_v25 }
 0x520   : > { %17202 = vrot.lane.b32.xlu1 %v17201_v42, %s17720_s26  ;;  %v20091_v42 = vrot.slane %v8660_v45, %v20031_v25  ;;  %v8847_v41 = vrot.slane %v22556_v39, %v20031_v25  ;;  %v20150_v9 = vrot.slane %v8896_v5, %v20031_v25  ;;  %v14883_v54 = vpack.c.bf16 %v19280_v7, %v19280_v7  ;;  %v22592_v5 = vld [vmem:[#allocation8_spill] sm:$0xff] }
 0x521   : > { %v20157_v17 = vrot.slane %v8903_v8, %v20031_v25  ;;  %v22559_v34 = vpack.c.bf16 %v19247_v3, %v19203_v55  ;;  %v20164_v0 = vrot.slane %v8904_v51, %v20031_v25  ;;  %v20167_v63 = vrot.slane %v8905_v57, %v20031_v25 }
 0x522   : > { %22557 = vst [vmem:[#allocation16_spill] sm:$0xff] %v20150_v9  ;;  %v8855_v14 = vcombine.high %v8847_v41, %v8847_v41  ;;  %v8856_v60 = vcombine.high %v8854_v6, %v8854_v6  ;;  %v9001_v29 = vrot.slane %v14884_v52, %v20031_v25  ;;  %v20177_v55 = vrot.slane %v8847_v41, %v20031_v25 }
 0x523   : > { %22558 = vst [vmem:[#allocation6_spill] sm:$0xff] %v20157_v17  ;;  %v8994_v1 = vrot.slane %v22559_v34, %v20031_v25  ;;  %22560 = vst [vmem:[#allocation12_spill] sm:$0xff] %v20164_v0  ;;  %v22562_v15 = vpack.c.bf16 %v19280_v7, %v19232_v32  ;;  %v8952_v39 = vrot.slane %v14883_v54, %v20031_v25 }
 0x524   : > { %22561 = vst [vmem:[#allocation13_spill] sm:$0xff] %v20167_v63  ;;  %v14886_v51 = vpack.c.bf16 %v19338_v21, %v19338_v21  ;;  %v20191_v52 = vrot.slane %v8854_v6, %v20031_v25  ;;  %v20194_v41 = vrot.slane %v8855_v14, %v20031_v25  ;;  %v20201_v7 = vrot.slane %v8856_v60, %v20031_v25 }
 0x525   : > { %v8945_v38 = vrot.slane %v22562_v15, %v20031_v25  ;;  %v9002_v34 = vcombine.high %v8994_v1, %v8994_v1  ;;  %v9003_v54 = vcombine.high %v9001_v29, %v9001_v29  ;;  %v20206_v6 = vrot.slane %v8994_v1, %v20031_v25 }
 0x526   : > { %v22563_v14 = vpack.c.bf16 %v19338_v21, %v19310_v10  ;;  %v14885_v3 = vpack.c.bf16 %v19375_v24, %v19375_v24  ;;  %v20215_v32 = vrot.slane %v9001_v29, %v20031_v25  ;;  %v8954_v62 = vcombine.high %v8952_v39, %v8952_v39 }
 0x527   : > { %v8953_v60 = vcombine.high %v8945_v38, %v8945_v38  ;;  %v9099_v27 = vrot.slane %v14886_v51, %v20031_v25  ;;  %v20223_v40 = vrot.slane %v9002_v34, %v20031_v25  ;;  %v14888_v10 = vpack.c.bf16 %v19452_v50, %v19452_v50 }
 0x528   : > { %v9092_v57 = vrot.slane %v22563_v14, %v20031_v25  ;;  %v20230_v29 = vrot.slane %v9003_v54, %v20031_v25  ;;  %v20233_v51 = vrot.slane %v8945_v38, %v20031_v25  ;;  %v22564_v14 = vpack.c.bf16 %v19375_v24, %v19325_v36 }
 0x529   : > { %v20242_v1 = vrot.slane %v8952_v39, %v20031_v25  ;;  %v9050_v21 = vrot.slane %v14885_v3, %v20031_v25  ;;  %v20248_v38 = vrot.slane %v8953_v60, %v20031_v25  ;;  %v20251_v59 = vrot.slane %v8954_v62, %v20031_v25  ;;  %v22571_v62 = vld [vmem:[#allocation27_spill] sm:$0xff] }
 0x52a   : > { %v9043_v15 = vrot.slane %v22564_v14, %v20031_v25  ;;  %v9100_v16 = vcombine.high %v9092_v57, %v9092_v57  ;;  %v9101_v36 = vcombine.high %v9099_v27, %v9099_v27  ;;  %v20256_v14 = vrot.slane %v9092_v57, %v20031_v25 }
 0x52b   : > { %v22566_v3 = vpack.c.bf16 %v19452_v50, %v19417_v37  ;;  %v9197_v54 = vrot.slane %v14888_v10, %v20031_v25  ;;  %v14887_v24 = vpack.c.bf16 %v22567_v22, %v22567_v22  ;;  %v20272_v23 = vrot.slane %v9099_v27, %v20031_v25 }
 0x52c   : > { %22565 = vst [vmem:[#allocation19_spill] sm:$0xff] %v20256_v14  ;;  %v9051_v34 = vcombine.high %v9043_v15, %v9043_v15  ;;  %v20275_v37 = vrot.slane %v9100_v16, %v20031_v25  ;;  %v9052_v50 = vcombine.high %v9050_v21, %v9050_v21  ;;  %v20282_v60 = vrot.slane %v9101_v36, %v20031_v25  ;;  %v22575_v36 = vld [vmem:[#allocation21_spill] sm:$0xff] }
 0x52d   : > { %v9190_v39 = vrot.slane %v22566_v3, %v20031_v25  ;;  %22568 = vst [vmem:[#allocation9_spill] sm:$0xff] %v20272_v23  ;;  %v14890_v30 = vpack.c.bf16 %v22571_v62, %v22571_v62  ;;  %v20289_v57 = vrot.slane %v9043_v15, %v20031_v25  ;;  %v9199_v12 = vcombine.high %v9197_v54, %v9197_v54  ;;  %v22588_v23 = vld [vmem:[#allocation11_spill] sm:$0xff] }
 0x52e   : > { %22569 = vst [vmem:[#allocation17_spill] sm:$0xff] %v20275_v37  ;;  %22570 = vst [vmem:[#allocation14_spill] sm:$0xff] %v20282_v60  ;;  %v20292_v28 = vrot.slane %v9050_v21, %v20031_v25  ;;  %v20295_v10 = vrot.slane %v9051_v34, %v20031_v25  ;;  %v22576_v3 = vpack.c.bf16 %v22567_v22, %v22575_v36  ;;  %v22584_v34 = vld [vmem:[#allocation7_spill] sm:$0xff] }
 0x52f   : > { %22572 = vst [vmem:[#allocation20_spill] sm:$0xff] %v20289_v57  ;;  %v9198_v16 = vcombine.high %v9190_v39, %v9190_v39  ;;  %v9148_v20 = vrot.slane %v14887_v24, %v20031_v25  ;;  %v20307_v47 = vrot.slane %v9052_v50, %v20031_v25  ;;  %v20310_v21 = vrot.slane %v9190_v39, %v20031_v25  ;;  %v22580_v24 = vld [vmem:[#allocation22_spill] sm:$0xff]  ;;  %v22586_v50 = vld [vmem:[#allocation24_spill] sm:$0xff] }
 0x530   : > { %22573 = vst [vmem:[#allocation10_spill] sm:$0xff] %v20292_v28  ;;  %22574 = vst [vmem:[#allocation18_spill] sm:$0xff] %v20295_v10  ;;  %v9141_v33 = vrot.slane %v22576_v3, %v20031_v25  ;;  %v20315_v22 = vrot.slane %v9197_v54, %v20031_v25  ;;  %v22581_v3 = vpack.c.bf16 %v22571_v62, %v22580_v24 }
 0x531   : > { %22577 = vst [vmem:[#allocation25_spill] sm:$0xff] %v20307_v47  ;;  %22578 = vst [vmem:[#allocation29_spill] sm:$0xff] %v20310_v21  ;;  %v9295_v27 = vrot.slane %v14890_v30, %v20031_v25  ;;  %v20325_v15 = vrot.slane %v9198_v16, %v20031_v25  ;;  %v20328_v39 = vrot.slane %v9199_v12, %v20031_v25 }
 0x532   : > { %22579 = vst [vmem:[#allocation26_spill] sm:$0xff] %v20315_v22  ;;  %v9288_v36 = vrot.slane %v22581_v3, %v20031_v25  ;;  %v14889_v54 = vpack.c.bf16 %v22584_v34, %v22584_v34  ;;  %v9149_v24 = vcombine.high %v9141_v33, %v9141_v33  ;;  %v9150_v30 = vcombine.high %v9148_v20, %v9148_v20 }
 0x533   : > { %22582 = vst [vmem:[#allocation30_spill] sm:$0xff] %v20325_v15  ;;  %22583 = vst [vmem:[#allocation28_spill] sm:$0xff] %v20328_v39  ;;  %v20341_v12 = vrot.slane %v9141_v33, %v20031_v25  ;;  %v22587_v8 = vpack.c.bf16 %v22584_v34, %v22586_v50  ;;  %v9297_v60 = vcombine.high %v9295_v27, %v9295_v27  ;;  %v17722_v39 = vmov 1935823168  }
 0x534   : > { %v9296_v62 = vcombine.high %v9288_v36, %v9288_v36  ;;  %v14892_v37 = vpack.c.bf16 %v22588_v23, %v22588_v23  ;;  %v20356_v16 = vrot.slane %v9148_v20, %v20031_v25  ;;  %v9246_v34 = vrot.slane %v14889_v54, %v20031_v25 }
 0x535   : > { %22585 = vst [vmem:[#allocation33_spill] sm:$0xff] %v20341_v12  ;;  %v9239_v45 = vrot.slane %v22587_v8, %v20031_v25  ;;  %v20360_v8 = vrot.slane %v9149_v24, %v20031_v25  ;;  %v20363_v50 = vrot.slane %v9150_v30, %v20031_v25  ;;  %v14891_v14 = vpack.c.bf16 %v22592_v5, %v22592_v5  ;;  %v22597_v30 = vld [vmem:[#allocation15_spill] sm:$0xff] }
 0x536   : > { %22589 = vst [vmem:[#allocation31_spill] sm:$0xff] %v20356_v16  ;;  %v20370_v47 = vrot.slane %v9288_v36, %v20031_v25  ;;  %v20373_v20 = vrot.slane %v9295_v27, %v20031_v25  ;;  %v20376_v54 = vrot.slane %v9296_v62, %v20031_v25  ;;  %v20379_v24 = vrot.slane %v9297_v60, %v20031_v25 }
 0x537   : > { %22590 = vst [vmem:[#allocation32_spill] sm:$0xff] %v20360_v8  ;;  %22591 = vst [vmem:[#allocation23_spill] sm:$0xff] %v20363_v50  ;;  %v9247_v33 = vcombine.high %v9239_v45, %v9239_v45  ;;  %v22598_v28 = vpack.c.bf16 %v22588_v23, %v22597_v30  ;;  %v9393_v3 = vrot.slane %v14892_v37, %v20031_v25  ;;  %v9815_v62 = vunpack.c.l.s4 %v17722_v39  ;;  %v22600_v23 = vld [vmem:[#allocation5_spill] sm:$0xff] }
 0x538   : > { %22593 = vst [vmem:[#allocation27_spill] sm:$0xff] %v20370_v47  ;;  %22594 = vst [vmem:[#allocation21_spill] sm:$0xff] %v20373_v20  ;;  %v9248_v57 = vcombine.high %v9246_v34, %v9246_v34  ;;  %v20389_v27 = vrot.slane %v9239_v45, %v20031_v25  ;;  %v9344_v30 = vrot.slane %v14891_v14, %v20031_v25 }
 0x539   : > { %22595 = vst [vmem:[#allocation22_spill] sm:$0xff] %v20376_v54  ;;  %22596 = vst [vmem:[#allocation7_spill] sm:$0xff] %v20379_v24  ;;  %v9386_v10 = vrot.slane %v22598_v28, %v20031_v25  ;;  %v22601_v28 = vpack.c.bf16 %v22592_v5, %v22600_v23  ;;  %v20405_v39 = vrot.slane %v9246_v34, %v20031_v25  ;;  %v20420_v34 = vsub.s32 0, %v22543_v58 }
 0x53a   : > { %22599 = vst [vmem:[#allocation24_spill] sm:$0xff] %v20389_v27  ;;  %v20408_v60 = vrot.slane %v9247_v33, %v20031_v25  ;;  %v9395_v14 = vcombine.high %v9393_v3, %v9393_v3  ;;  %v9816_v36 = vunpack.c.0.s8 %v9815_v62  ;;  %v20426_v22 = vrot.slane %v9393_v3, %v20031_v25 }
 0x53b   : > { %v9337_v37 = vrot.slane %v22601_v28, %v20031_v25  ;;  %22602 = vst [vmem:[#allocation11_spill] sm:$0xff] %v20405_v39  ;;  %v9394_v23 = vcombine.high %v9386_v10, %v9386_v10  ;;  %v20415_v28 = vrot.slane %v9248_v57, %v20031_v25  ;;  %v20423_v33 = vrot.slane %v9386_v10, %v20031_v25 }
 0x53c   : > { %22603 = vst [vmem:[#allocation8_spill] sm:$0xff] %v20408_v60  ;;  %22606 = vst [vmem:[#allocation34_spill] sm:$0xff] %v20426_v22  ;;  %v9346_v5 = vcombine.high %v9344_v30, %v9344_v30  ;;  %v20436_v10 = vrot.slane %v9395_v14, %v20031_v25  ;;  %v20442_v62 = vrot.slane %v9344_v30, %v20031_v25 }
 0x53d   : > { %22604 = vst [vmem:[#allocation15_spill] sm:$0xff] %v20415_v28  ;;  %22605 = vst [vmem:[#allocation5_spill] sm:$0xff] %v20423_v33  ;;  %v9345_v20 = vcombine.high %v9337_v37, %v9337_v37  ;;  %v20433_v27 = vrot.slane %v9394_v23, %v20031_v25  ;;  %v20439_v3 = vrot.slane %v9337_v37, %v20031_v25 }
 0x53e   : > { %22608 = vst [vmem:[#allocation36_spill] sm:$0xff] %v20436_v10  ;;  %22610 = vst [vmem:[#allocation38_spill] sm:$0xff] %v20442_v62  ;;  %v20447_v39 = vsub.s32 %v9816_v36, %v22543_v58  ;;  %v20457_v30 = vrot.slane %v9346_v5, %v20031_v25 }
 0x53f   : > { %22607 = vst [vmem:[#allocation35_spill] sm:$0xff] %v20433_v27  ;;  %22609 = vst [vmem:[#allocation37_spill] sm:$0xff] %v20439_v3  ;;  %v20454_v37 = vrot.slane %v9345_v20, %v20031_v25 }
 0x540   : > { %22612 = vst [vmem:[#allocation40_spill] sm:$0xff] %v20457_v30 }
 0x541   : > { %22611 = vst [vmem:[#allocation39_spill] sm:$0xff] %v20454_v37 }
 0x586   : > { %v17188_v24 = vpop.permute.xlu0 %17187 }
 0x587   : > { %v17190_v45 = vunpack.i.h.bf16 %v17188_v24  ;;  %v17189_v47 = vunpack.i.l.bf16 %v17188_v24 }
 0x589   : > { %v14841_v54 = vpack.c.bf16 %v17190_v45, %v17190_v45  ;;  %v7592_v24 = vpack.c.bf16 %v17190_v45, %v17189_v47 }
 0x58a   : > { %v17193_v60 = vpop.permute.xlu0 %17192 }
 0x58b   : > { %v7614_v57 = vrot.slane %v14841_v54, %v20031_v25  ;;  %v7607_v58 = vrot.slane %v7592_v24, %v20031_v25  ;;  %v20461_v36 = vunpack.i.h.bf16 %v17193_v60  ;;  %v17194_v47 = vunpack.i.l.bf16 %v17193_v60 }
 0x58d   : > { %v7616_v23 = vcombine.high %v7614_v57, %v7614_v57  ;;  %v7630_v54 = vrot.slane %v7614_v57, %v20031_v25  ;;  %v7615_v28 = vcombine.high %v7607_v58, %v7607_v58  ;;  %v20473_v24 = vrot.slane %v7607_v58, %v20031_v25 }
 0x58e   : > { %v20482_v20 = vpack.c.bf16 %v20461_v36, %v17194_v47 }
 0x58f   : > { %v7644_v5 = vrot.slane %v7616_v23, %v20031_v25  ;;  %v7646_v10 = vcombine.high %v7630_v54, %v7630_v54  ;;  %v7805_v57 = vunpack.i.h.s16 %v7630_v54  ;;  %v14849_v22 = vpack.i.b16 %v7630_v54, %v7630_v54 }
 0x590   : > { %v20486_v58 = vrot.slane %v7615_v28, %v20031_v25  ;;  %v20490_v60 = vcombine.high %v20473_v24, %v20473_v24 }
 0x591   : > { %v7648_v27 = vcombine.high %v7644_v5, %v7644_v5  ;;  %v7807_v47 = vunpack.i.h.s16 %v7644_v5  ;;  %v7809_v33 = vunpack.i.h.s16 %v7646_v10  ;;  %v7869_v30 = vpack.i.b16 %v7805_v57, %v7805_v57 }
 0x592   : > { %v14850_v23 = vpack.i.b16 %v7644_v5, %v7644_v5  ;;  %v14851_v62 = vpack.i.b16 %v7646_v10, %v7646_v10  ;;  %v7959_v54 = vrot.slane %v14849_v22, %v20420_v34  ;;  %v20498_v28 = vcombine.high %v20486_v58, %v20486_v58 }
 0x593   : > { %v7811_v37 = vunpack.i.h.s16 %v7648_v27  ;;  %v7871_v3 = vpack.i.b16 %v7807_v47, %v7807_v47  ;;  %v7873_v15 = vpack.i.b16 %v7809_v33, %v7809_v33  ;;  %v14852_v21 = vpack.i.b16 %v7648_v27, %v7648_v27 }
 0x594   : > { %v7963_v45 = vrot.slane %v7869_v30, %v20420_v34  ;;  %v7967_v14 = vrot.slane %v14850_v23, %v20420_v34  ;;  %v7975_v50 = vrot.slane %v14851_v62, %v20420_v34  ;;  %v8237_v16 = vpack.i.b16 %v7959_v54, %v7959_v54 }
 0x595   : > { %v7875_v57 = vpack.i.b16 %v7811_v37, %v7811_v37  ;;  %v7971_v10 = vrot.slane %v7871_v3, %v20420_v34  ;;  %v7979_v22 = vrot.slane %v7873_v15, %v20420_v34  ;;  %v7983_v5 = vrot.slane %v14852_v21, %v20420_v34 }
 0x596   : > { %v8242_v8 = vrot.slane %v8237_v16, %v20420_v34  ;;  %v8244_v12 = vpack.i.b16 %v7963_v45, %v7963_v45  ;;  %v8251_v47 = vpack.i.b16 %v7967_v14, %v7967_v14  ;;  %v8265_v33 = vpack.i.b16 %v7975_v50, %v7975_v50 }
 0x597   : > { %v7987_v27 = vrot.slane %v7875_v57, %v20420_v34  ;;  %v8258_v30 = vpack.i.b16 %v7971_v10, %v7971_v10  ;;  %v8272_v63 = vpack.i.b16 %v7979_v22, %v7979_v22  ;;  %v8279_v23 = vpack.i.b16 %v7983_v5, %v7983_v5 }
 0x598   : > { %v8249_v62 = vrot.slane %v8244_v12, %v20420_v34  ;;  %v8256_v37 = vrot.slane %v8251_v47, %v20420_v34  ;;  %v8270_v3 = vrot.slane %v8265_v33, %v20420_v34  ;;  %v9572_v15 = vadd.bf16 %v20125_v56, %v8242_v8 }
 0x599   : > { %v8263_v21 = vrot.slane %v8258_v30, %v20420_v34  ;;  %v8277_v16 = vrot.slane %v8272_v63, %v20420_v34  ;;  %v8284_v14 = vrot.slane %v8279_v23, %v20420_v34  ;;  %v8286_v50 = vpack.i.b16 %v7987_v27, %v7987_v27 }
 0x59a   : > { %v9573_v45 = vadd.bf16 %v20140_v61, %v8249_v62  ;;  %v22613_v54 = vcombine.high %v20125_v56, %v20125_v56  ;;  %v9576_v12 = vadd.bf16 %v20137_v35, %v8270_v3  ;;  %v9580_v10 = vadd.bf16 %v20094_v53, %v8242_v8 }
 0x59b   : > { %v8291_v22 = vrot.slane %v8286_v50, %v20420_v34  ;;  %v22614_v5 = vcombine.high %v20140_v61, %v20140_v61  ;;  %v9577_v63 = vadd.bf16 %v20143_v43, %v8277_v16  ;;  %v22615_v33 = vcombine.high %v20137_v35, %v20137_v35 }
 0x59c   : > { %v9574_v57 = vadd.bf16 %v22613_v54, %v8256_v37  ;;  %v9581_v30 = vadd.bf16 %v20115_v13, %v8249_v62  ;;  %v22616_v56 = vcombine.high %v20094_v53, %v20094_v53  ;;  %v22617_v8 = vcombine.high %v20115_v13, %v20115_v13 }
 0x59d   : > { %v9575_v47 = vadd.bf16 %v22614_v5, %v8263_v21  ;;  %v9578_v27 = vadd.bf16 %v22615_v33, %v8284_v14  ;;  %v9584_v54 = vadd.bf16 %v20108_v49, %v8270_v3  ;;  %v22618_v61 = vcombine.high %v20143_v43, %v20143_v43 }
 0x59e   : > { %v9582_v23 = vadd.bf16 %v22616_v56, %v8256_v37  ;;  %v9583_v50 = vadd.bf16 %v22617_v8, %v8263_v21  ;;  %v9585_v17 = vadd.bf16 %v20118_v48, %v8277_v16  ;;  %v22619_v35 = vcombine.high %v20108_v49, %v20108_v49 }
 0x59f   : > { %v9579_v5 = vadd.bf16 %v22618_v61, %v8291_v22  ;;  %v22620_v53 = vcombine.high %v20118_v48, %v20118_v48  ;;  %v9908_v33 = vcombine.low %v9572_v15, %v9574_v57  ;;  %v9909_v56 = vcombine.low %v9573_v45, %v9575_v47 }
 0x5a0   : > { %v9586_v62 = vadd.bf16 %v22619_v35, %v8284_v14  ;;  %v9932_v13 = vcombine.low %v9576_v12, %v9578_v27  ;;  %v9956_v21 = vcombine.low %v9580_v10, %v9582_v23  ;;  %v9957_v3 = vcombine.low %v9581_v30, %v9583_v50 }
 0x5a1   : > { %v9587_v37 = vadd.bf16 %v22620_v53, %v8291_v22  ;;  %v9933_v8 = vcombine.low %v9577_v63, %v9579_v5  ;;  %v9916_v43 = vrot.slane %v9908_v33, %v20447_v39  ;;  %v9923_v16 = vrot.slane %v9909_v56, %v20447_v39 }
 0x5a2   : > { %v9980_v0 = vcombine.low %v9584_v54, %v9586_v62  ;;  %v9940_v61 = vrot.slane %v9932_v13, %v20447_v39  ;;  %v9964_v49 = vrot.slane %v9956_v21, %v20447_v39  ;;  %v9971_v48 = vrot.slane %v9957_v3, %v20447_v39 }
 0x5a3   : > { %v9981_v9 = vcombine.low %v9585_v17, %v9587_v37  ;;  %v9947_v14 = vrot.slane %v9933_v8, %v20447_v39  ;;  %v9924_v57 = vcombine.low %v9916_v43, %v9923_v16  ;;  %v7799_v12 = vunpack.i.h.s16 %v20486_v58 }
 0x5a4   : > { %v9988_v15 = vrot.slane %v9980_v0, %v20447_v39  ;;  %v7801_v17 = vunpack.i.h.s16 %v20490_v60  ;;  %v7803_v10 = vunpack.i.h.s16 %v20498_v28  ;;  %v9972_v47 = vcombine.low %v9964_v49, %v9971_v48  ;;  %v10914_v49 = vld [vmem:[#allocation2 + $0x24] sm:$0xf] }
 0x5a5   : > { %v9995_v45 = vrot.slane %v9981_v9, %v20447_v39  ;;  %v9948_v22 = vcombine.low %v9940_v61, %v9947_v14  ;;  %v22621_v27 = vunpack.i.h.s16 %v20473_v24  ;;  %v9931_v23 = vrot.slane %v9924_v57, %v20447_v39  ;;  %v10921_v57 = vld [vmem:[#allocation2 + $0x30] sm:$0xf] }
 0x5a6   : > { %v14846_v0 = vpack.i.b16 %v20486_v58, %v20486_v58  ;;  %v7863_v9 = vpack.i.b16 %v7799_v12, %v7799_v12  ;;  %v14847_v50 = vpack.i.b16 %v20490_v60, %v20490_v60  ;;  %v9979_v5 = vrot.slane %v9972_v47, %v20447_v39  ;;  %v10925_v47 = vld [vmem:[#allocation2 + $0x38] sm:$0x1] }
 0x5a7   : > { %v9996_v63 = vcombine.low %v9988_v15, %v9995_v45  ;;  %v7861_v30 = vpack.i.b16 %v22621_v27, %v22621_v27  ;;  %v9955_v54 = vrot.slane %v9948_v22, %v20447_v39  ;;  %v7865_v62 = vpack.i.b16 %v7801_v17, %v7801_v17  ;;  %v10918_v45 = vld [vmem:[#allocation2 + $0x2c] sm:$0x1] }
 0x5a8   : > { %v10615_v53 = vshrl.u32 %v9931_v23, 16  ;;  %v10618_v37 = vshll.u32 %v9931_v23, 16  ;;  %v14848_v33 = vpack.i.b16 %v20498_v28, %v20498_v28  ;;  %v7867_v56 = vpack.i.b16 %v7803_v10, %v7803_v10 }
 0x5a9   : > { %v10003_v35 = vrot.slane %v9996_v63, %v20447_v39  ;;  %v10623_v13 = vshrl.u32 %v9955_v54, 16  ;;  %v10626_v21 = vshll.u32 %v9955_v54, 16  ;;  %v10632_v58 = vshrl.u32 %v9979_v5, 16 }
 0x5aa   : > { %v10635_v8 = vshll.u32 %v9979_v5, 16  ;;  %v10617_v3 = vrot.slane %v10615_v53, 7  ;;  %v22622_v16 = vpack.i.b16 %v20473_v24, %v20473_v24  ;;  %v7931_v15 = vrot.slane %v7861_v30, %v20420_v34 }
 0x5ab   : > { %v10640_v43 = vshrl.u32 %v10003_v35, 16  ;;  %v10643_v60 = vshll.u32 %v10003_v35, 16  ;;  %v10625_v14 = vrot.slane %v10623_v13, 7  ;;  %v10634_v48 = vrot.slane %v10632_v58, 7 }
 0x5ac   : > { %v7927_v61 = vrot.slane %v22622_v16, %v20420_v34  ;;  %v7935_v28 = vrot.slane %v14846_v0, %v20420_v34  ;;  %v10620_v12 = vor.u32 %v10618_v37, %v10617_v3  ;;  %v10621_v17 = vrot.slane %v10617_v3, 4 }
 0x5ad   : > { %v10642_v10 = vrot.slane %v10640_v43, 7  ;;  %v7939_v22 = vrot.slane %v7863_v9, %v20420_v34  ;;  %v10628_v63 = vor.u32 %v10626_v21, %v10625_v14  ;;  %v10630_v27 = vrot.slane %v10625_v14, 4 }
 0x5ae   : > { %v10637_v23 = vor.u32 %v10635_v8, %v10634_v48  ;;  %v10638_v24 = vrot.slane %v10634_v48, 4  ;;  %v10915_v35 = vsel %vm19057_vm7, %v10620_v12, %v10914_v49  ;;  %v7943_v30 = vrot.slane %v14847_v50, %v20420_v34 }
 0x5af   : > { %v10645_v54 = vor.u32 %v10643_v60, %v10642_v10  ;;  %v10647_v5 = vrot.slane %v10642_v10, 4  ;;  %v10629_v53 = vsel %vm17847_vm5, %v10621_v17, %v10628_v63  ;;  %v10919_v37 = vsel %vm18882_vm12, %v10630_v27, %v10918_v45  ;;  %10916 = vst [vmem:[#allocation2 + $0x24] sm:$0xf] %v10915_v35 }
 0x5b0   : > { %v10922_v9 = vsel %vm19057_vm7, %v10637_v23, %v10921_v57  ;;  %v7947_v13 = vrot.slane %v7865_v62, %v20420_v34  ;;  %10917 = vst [vmem:[#allocation2 + $0x28] sm:$0xf] %v10629_v53  ;;  %v7951_v50 = vrot.slane %v14848_v33, %v20420_v34  ;;  %v7955_v8 = vrot.slane %v7867_v56, %v20420_v34 }
 0x5b1   : > { %v10646_v21 = vsel %vm17847_vm5, %v10638_v24, %v10645_v54  ;;  %v10926_v58 = vsel %vm18882_vm12, %v10647_v5, %v10925_v47  ;;  %10920 = vst [vmem:[#allocation2 + $0x2c] sm:$0x1] %v10919_v37  ;;  %10923 = vst [vmem:[#allocation2 + $0x30] sm:$0xf] %v10922_v9  ;;  %v8181_v3 = vpack.i.b16 %v7927_v61, %v7927_v61 }
 0x5b2   : > { %10924 = vst [vmem:[#allocation2 + $0x34] sm:$0xf] %v10646_v21  ;;  %v8188_v43 = vpack.i.b16 %v7931_v15, %v7931_v15  ;;  %v8195_v60 = vpack.i.b16 %v7935_v28, %v7935_v28  ;;  %v8202_v16 = vpack.i.b16 %v7939_v22, %v7939_v22  ;;  %10927 = vst [vmem:[#allocation2 + $0x38] sm:$0x1] %v10926_v58 }
 0x5b3   : > { %v8209_v62 = vpack.i.b16 %v7943_v30, %v7943_v30  ;;  %v8216_v49 = vpack.i.b16 %v7947_v13, %v7947_v13  ;;  %v8223_v14 = vpack.i.b16 %v7951_v50, %v7951_v50  ;;  %v8230_v48 = vpack.i.b16 %v7955_v8, %v7955_v8 }
 0x5b4   : > { %v8186_v45 = vrot.slane %v8181_v3, %v20420_v34  ;;  %v8193_v57 = vrot.slane %v8188_v43, %v20420_v34  ;;  %v8200_v33 = vrot.slane %v8195_v60, %v20420_v34  ;;  %v8207_v56 = vrot.slane %v8202_v16, %v20420_v34 }
 0x5b5   : > { %v8214_v12 = vrot.slane %v8209_v62, %v20420_v34  ;;  %v8221_v61 = vrot.slane %v8216_v49, %v20420_v34  ;;  %v8228_v15 = vrot.slane %v8223_v14, %v20420_v34  ;;  %v8235_v28 = vrot.slane %v8230_v48, %v20420_v34 }
 0x5b6   : > { %v9556_v17 = vadd.bf16 %v20073_v4, %v8186_v45  ;;  %v9557_v10 = vadd.bf16 %v20084_v44, %v8193_v57  ;;  %v22624_v22 = vcombine.high %v20073_v4, %v20073_v4  ;;  %v22625_v63 = vcombine.high %v20084_v44, %v20084_v44 }
 0x5b7   : > { %v9560_v23 = vadd.bf16 %v20081_v46, %v8214_v12  ;;  %v9561_v24 = vadd.bf16 %v20091_v42, %v8221_v61  ;;  %v22626_v54 = vcombine.high %v20081_v46, %v20081_v46  ;;  %v22627_v35 = vcombine.high %v20091_v42, %v20091_v42 }
 0x5b8   : > { %v9558_v47 = vadd.bf16 %v22624_v22, %v8200_v33  ;;  %v9559_v27 = vadd.bf16 %v22625_v63, %v8207_v56  ;;  %v9564_v53 = vadd.bf16 %v20050_v2, %v8186_v45  ;;  %v9565_v4 = vadd.bf16 %v20063_v19, %v8193_v57  ;;  %v20638_v57 = vpop.permute.xlu1 %17197 }
 0x5b9   : > { %v9562_v5 = vadd.bf16 %v22626_v54, %v8228_v15  ;;  %v9563_v30 = vadd.bf16 %v22627_v35, %v8235_v28  ;;  %v22628_v44 = vcombine.high %v20050_v2, %v20050_v2  ;;  %v22629_v9 = vcombine.high %v20063_v19, %v20063_v19 }
 0x5ba   : > { %v9568_v21 = vadd.bf16 %v20060_v31, %v8214_v12  ;;  %v9569_v46 = vadd.bf16 %v20066_v18, %v8221_v61  ;;  %v22630_v42 = vcombine.high %v20060_v31, %v20060_v31  ;;  %v22631_v50 = vcombine.high %v20066_v18, %v20066_v18 }
 0x5bb   : > { %v9566_v37 = vadd.bf16 %v22628_v44, %v8200_v33  ;;  %v9567_v13 = vadd.bf16 %v22629_v9, %v8207_v56  ;;  %v9812_v3 = vcombine.low %v9556_v17, %v9558_v47  ;;  %v9813_v43 = vcombine.low %v9557_v10, %v9559_v27 }
 0x5bc   : > { %v9570_v58 = vadd.bf16 %v22630_v42, %v8228_v15  ;;  %v9571_v8 = vadd.bf16 %v22631_v50, %v8235_v28  ;;  %v9836_v2 = vcombine.low %v9560_v23, %v9562_v5  ;;  %v9837_v60 = vcombine.low %v9561_v24, %v9563_v30 }
 0x5bd   : > { %v9860_v16 = vcombine.low %v9564_v53, %v9566_v37  ;;  %v9861_v62 = vcombine.low %v9565_v4, %v9567_v13  ;;  %v9820_v14 = vrot.slane %v9812_v3, %v20447_v39  ;;  %v9827_v48 = vrot.slane %v9813_v43, %v20447_v39  ;;  %v10900_v3 = vld [vmem:[#allocation2 + $0xc] sm:$0xf]  ;;  %v10904_v43 = vld [vmem:[#allocation2 + $0x14] sm:$0x1] }
 0x5be   : > { %v9884_v19 = vcombine.low %v9568_v21, %v9570_v58  ;;  %v9885_v49 = vcombine.low %v9569_v46, %v9571_v8  ;;  %v9844_v45 = vrot.slane %v9836_v2, %v20447_v39  ;;  %v9851_v31 = vrot.slane %v9837_v60, %v20447_v39 }
 0x5bf   : > { %v9868_v18 = vrot.slane %v9860_v16, %v20447_v39  ;;  %v9875_v33 = vrot.slane %v9861_v62, %v20447_v39  ;;  %v9828_v61 = vcombine.low %v9820_v14, %v9827_v48  ;;  %v22632_v28 = vpack.c.bf16 %v20461_v36, %v20461_v36 }
 0x5c0   : > { %v9892_v56 = vrot.slane %v9884_v19, %v20447_v39  ;;  %v9899_v12 = vrot.slane %v9885_v49, %v20447_v39  ;;  %v9852_v15 = vcombine.low %v9844_v45, %v9851_v31  ;;  %v20650_v10 = vrot.slane %v20482_v20, %v20031_v25  ;;  %v10907_v19 = vld [vmem:[#allocation2 + $0x18] sm:$0xf]  ;;  %v10911_v49 = vld [vmem:[#allocation2 + $0x20] sm:$0x1] }
 0x5c1   : > { %v7663_v17 = vrot.slane %v22632_v28, %v20031_v25  ;;  %v9876_v22 = vcombine.low %v9868_v18, %v9875_v33  ;;  %v20653_v63 = vunpack.i.h.bf16 %v20638_v57  ;;  %v17199_v27 = vunpack.i.l.bf16 %v20638_v57 }
 0x5c2   : > { %v9900_v47 = vcombine.low %v9892_v56, %v9899_v12  ;;  %v9835_v23 = vrot.slane %v9828_v61, %v20447_v39  ;;  %v9859_v24 = vrot.slane %v9852_v15, %v20447_v39  ;;  %v7664_v20 = vcombine.high %v20650_v10, %v20650_v10 }
 0x5c3   : > { %v7665_v54 = vcombine.high %v7663_v17, %v7663_v17  ;;  %v7679_v5 = vrot.slane %v7663_v17, %v20031_v25  ;;  %v9883_v36 = vrot.slane %v9876_v22, %v20447_v39  ;;  %v20665_v30 = vrot.slane %v20650_v10, %v20031_v25  ;;  %v17492_v10 = vld [vmem:[%s22365_s5 + $0x18] sm:$0xff]  }
 0x5c4   : > { %v9907_v35 = vrot.slane %v9900_v47, %v20447_v39  ;;  %v10581_v53 = vshrl.u32 %v9835_v23, 16  ;;  %v10584_v4 = vshll.u32 %v9835_v23, 16  ;;  %v10589_v44 = vshrl.u32 %v9859_v24, 16 }
 0x5c5   : > { %v10592_v37 = vshll.u32 %v9859_v24, 16  ;;  %v10598_v9 = vshrl.u32 %v9883_v36, 16  ;;  %v10601_v13 = vshll.u32 %v9883_v36, 16  ;;  %v7693_v50 = vrot.slane %v7665_v54, %v20031_v25 }
 0x5c6   : > { %v10606_v21 = vshrl.u32 %v9907_v35, 16  ;;  %v10609_v46 = vshll.u32 %v9907_v35, 16  ;;  %v10583_v42 = vrot.slane %v10581_v53, 7  ;;  %v10591_v58 = vrot.slane %v10589_v44, 7 }
 0x5c7   : > { %v7695_v8 = vcombine.high %v7679_v5, %v7679_v5  ;;  %v10600_v2 = vrot.slane %v10598_v9, 7  ;;  %v7821_v16 = vunpack.i.h.s16 %v7679_v5  ;;  %v14857_v62 = vpack.i.b16 %v7679_v5, %v7679_v5 }
 0x5c8   : > { %v10608_v60 = vrot.slane %v10606_v21, 7  ;;  %v10586_v14 = vor.u32 %v10584_v4, %v10583_v42  ;;  %v10587_v48 = vrot.slane %v10583_v42, 4  ;;  %v10594_v45 = vor.u32 %v10592_v37, %v10591_v58 }
 0x5c9   : > { %v10596_v31 = vrot.slane %v10591_v58, 4  ;;  %v10603_v18 = vor.u32 %v10601_v13, %v10600_v2  ;;  %v10604_v33 = vrot.slane %v10600_v2, 4  ;;  %v7697_v17 = vcombine.high %v7693_v50, %v7693_v50 }
 0x5ca   : > { %v10611_v56 = vor.u32 %v10609_v46, %v10608_v60  ;;  %v10613_v12 = vrot.slane %v10608_v60, 4  ;;  %v10595_v61 = vsel %vm17847_vm5, %v10587_v48, %v10594_v45  ;;  %v10901_v15 = vsel %vm19057_vm7, %v10586_v14, %v10900_v3  ;;  %v17483_v48 = vld [vmem:[%s22365_s5] sm:$0xff]  }
 0x5cb   : > { %v10905_v28 = vsel %vm18882_vm12, %v10596_v31, %v10904_v43  ;;  %10902 = vst [vmem:[#allocation2 + $0xc] sm:$0xf] %v10901_v15  ;;  %10903 = vst [vmem:[#allocation2 + $0x10] sm:$0xf] %v10595_v61  ;;  %v10908_v47 = vsel %vm19057_vm7, %v10603_v18, %v10907_v19  ;;  %v7823_v24 = vunpack.i.h.s16 %v7693_v50  ;;  %v7825_v54 = vunpack.i.h.s16 %v7695_v8 }
 0x5cc   : > { %v10612_v22 = vsel %vm17847_vm5, %v10604_v33, %v10611_v56  ;;  %v10912_v23 = vsel %vm18882_vm12, %v10613_v12, %v10911_v49  ;;  %10906 = vst [vmem:[#allocation2 + $0x14] sm:$0x1] %v10905_v28  ;;  %10909 = vst [vmem:[#allocation2 + $0x18] sm:$0xf] %v10908_v47  ;;  %v7827_v5 = vunpack.i.h.s16 %v7697_v17  ;;  %v7885_v36 = vpack.i.b16 %v7821_v16, %v7821_v16  ;;  %v17482_v16 = vld [vmem:[%s22365_s5 + $0x40] sm:$0xff]  }
 0x5cd   : > { %10910 = vst [vmem:[#allocation2 + $0x1c] sm:$0xf] %v10612_v22  ;;  %10913 = vst [vmem:[#allocation2 + $0x20] sm:$0x1] %v10912_v23  ;;  %v14858_v35 = vpack.i.b16 %v7693_v50, %v7693_v50  ;;  %v7887_v53 = vpack.i.b16 %v7823_v24, %v7823_v24  ;;  %v14859_v4 = vpack.i.b16 %v7695_v8, %v7695_v8  ;;  %15957 = vmatprep.subr.bf16.mxu1 %v17482_v16  ;;  %v17484_v28 = vld [vmem:[%s22365_s5 + $0x80] sm:$0xff]   ;;  %v17488_v16 = vld [vmem:[%s22365_s5 + $0x50] sm:$0xff]  }
 0x5ce   : > { %v14860_v44 = vpack.i.b16 %v7697_v17, %v7697_v17  ;;  %v8023_v37 = vrot.slane %v14857_v62, %v20420_v34  ;;  %v7889_v9 = vpack.i.b16 %v7825_v54, %v7825_v54  ;;  %v7891_v13 = vpack.i.b16 %v7827_v5, %v7827_v5  ;;  %15958 = vmatpush3.bf16.msra.mxu1 %v17483_v48  ;;  %v17485_v54 = vld [vmem:[%s22365_s5 + $0x48] sm:$0xff]  }
 0x5cf   : > { %v8027_v21 = vrot.slane %v7885_v36, %v20420_v34  ;;  %v8031_v46 = vrot.slane %v14858_v35, %v20420_v34  ;;  %v8035_v42 = vrot.slane %v7887_v53, %v20420_v34  ;;  %v8039_v58 = vrot.slane %v14859_v4, %v20420_v34  ;;  %16581 = vmatprep.subr.bf16.mxu0 %v17484_v28 }
 0x5d0   : > { %v8047_v3 = vrot.slane %v14860_v44, %v20420_v34  ;;  %v8349_v43 = vpack.i.b16 %v8023_v37, %v8023_v37  ;;  %v8043_v50 = vrot.slane %v7889_v9, %v20420_v34  ;;  %v8051_v8 = vrot.slane %v7891_v13, %v20420_v34  ;;  %15959 = vmatprep.subr.bf16.mxu1 %v17485_v54 }
 0x5d1   : > { %v8356_v2 = vpack.i.b16 %v8027_v21, %v8027_v21  ;;  %v8363_v60 = vpack.i.b16 %v8031_v46, %v8031_v46  ;;  %v8370_v19 = vpack.i.b16 %v8035_v42, %v8035_v42  ;;  %v8377_v49 = vpack.i.b16 %v8039_v58, %v8039_v58  ;;  %16582 = vmatpush3.bf16.msra.mxu0 %v17484_v28 }
 0x5d2   : > { %v8354_v62 = vrot.slane %v8349_v43, %v20420_v34  ;;  %v8391_v14 = vpack.i.b16 %v8047_v3, %v8047_v3  ;;  %v8384_v18 = vpack.i.b16 %v8043_v50, %v8043_v50  ;;  %v8398_v33 = vpack.i.b16 %v8051_v8, %v8051_v8  ;;  %v17487_v50 = vld [vmem:[%s22365_s5 + $0x88] sm:$0xff]  }
 0x5d3   : > { %v8361_v45 = vrot.slane %v8356_v2, %v20420_v34  ;;  %v8368_v31 = vrot.slane %v8363_v60, %v20420_v34  ;;  %v8375_v56 = vrot.slane %v8370_v19, %v20420_v34  ;;  %v8382_v12 = vrot.slane %v8377_v49, %v20420_v34  ;;  %16583 = vmatprep.subr.bf16.mxu0 %v17487_v50 }
 0x5d4   : > { %v8396_v61 = vrot.slane %v8391_v14, %v20420_v34  ;;  %v9604_v15 = vadd.bf16 %v20233_v51, %v8354_v62  ;;  %v8389_v17 = vrot.slane %v8384_v18, %v20420_v34  ;;  %v8403_v22 = vrot.slane %v8398_v33, %v20420_v34  ;;  %v17489_v14 = vld [vmem:[%s22365_s5 + $0x10] sm:$0xff]  }
 0x5d5   : > { %v9605_v47 = vadd.bf16 %v20248_v38, %v8361_v45  ;;  %v22633_v23 = vcombine.high %v20233_v51, %v20233_v51  ;;  %v22634_v5 = vcombine.high %v20248_v38, %v20248_v38  ;;  %v9608_v35 = vadd.bf16 %v20242_v1, %v8382_v12  ;;  %v17486_v51 = vld [vmem:[%s22365_s5 + $0x8] sm:$0xff]   ;;  %16584 = vmatpush3.bf16.msra.mxu0 %v17487_v50  ;;  %v10942_v50 = vld [vmem:[#allocation2 + $0x54] sm:$0xf] }
 0x5d6   : > { %v22635_v53 = vcombine.high %v20242_v1, %v20242_v1  ;;  %v9612_v44 = vadd.bf16 %v20206_v6, %v8354_v62  ;;  %v9609_v37 = vadd.bf16 %v20251_v59, %v8389_v17  ;;  %v22636_v9 = vcombine.high %v20251_v59, %v20251_v59  ;;  %15960 = vmatpush3.bf16.msra.mxu1 %v17486_v51 }
 0x5d7   : > { %v9606_v24 = vadd.bf16 %v22633_v23, %v8368_v31  ;;  %v9607_v36 = vadd.bf16 %v22634_v5, %v8375_v56  ;;  %v9613_v13 = vadd.bf16 %v20223_v40, %v8361_v45  ;;  %v22637_v21 = vcombine.high %v20206_v6, %v20206_v6  ;;  %15961 = vmatprep.subr.bf16.mxu1 %v17488_v16 }
 0x5d8   : > { %v9610_v4 = vadd.bf16 %v22635_v53, %v8396_v61  ;;  %v9611_v38 = vadd.bf16 %v22636_v9, %v8403_v22  ;;  %v22638_v46 = vcombine.high %v20223_v40, %v20223_v40  ;;  %v9616_v58 = vadd.bf16 %v20215_v32, %v8382_v12  ;;  %v17493_v9 = vld [vmem:[%s22365_s5 + $0x98] sm:$0xff]  }
 0x5d9   : > { %v9614_v1 = vadd.bf16 %v22637_v21, %v8368_v31  ;;  %v9617_v3 = vadd.bf16 %v20230_v29, %v8389_v17  ;;  %v22639_v43 = vcombine.high %v20215_v32, %v20215_v32  ;;  %v22640_v6 = vcombine.high %v20230_v29, %v20230_v29 }
 0x5da   : > { %v9615_v42 = vadd.bf16 %v22638_v46, %v8375_v56  ;;  %v10100_v2 = vcombine.low %v9604_v15, %v9606_v24  ;;  %v10101_v40 = vcombine.low %v9605_v47, %v9607_v36  ;;  %v10124_v60 = vcombine.low %v9608_v35, %v9610_v4  ;;  %15962 = vmatpush3.bf16.msra.mxu1 %v17489_v14  ;;  %v17491_v47 = vld [vmem:[%s22365_s5 + $0x58] sm:$0xff]   ;;  %v17494_v46 = vld [vmem:[%s22365_s5 + $0x60] sm:$0xff]  }
 0x5db   : > { %v9618_v59 = vadd.bf16 %v22639_v43, %v8396_v61  ;;  %v9619_v8 = vadd.bf16 %v22640_v6, %v8403_v22  ;;  %v10125_v62 = vcombine.low %v9609_v37, %v9611_v38  ;;  %v10148_v32 = vcombine.low %v9612_v44, %v9614_v1  ;;  %v17490_v61 = vld [vmem:[%s22365_s5 + $0x90] sm:$0xff]   ;;  %15963 = vmatprep.subr.bf16.mxu1 %v17491_v47  ;;  %v10949_v14 = vld [vmem:[#allocation2 + $0x60] sm:$0xf] }
 0x5dc   : > { %v10149_v19 = vcombine.low %v9613_v13, %v9615_v42  ;;  %v10108_v29 = vrot.slane %v10100_v2, %v20447_v39  ;;  %v10115_v48 = vrot.slane %v10101_v40, %v20447_v39  ;;  %v10132_v45 = vrot.slane %v10124_v60, %v20447_v39  ;;  %16585 = vmatprep.subr.bf16.mxu0 %v17490_v61  ;;  %v10946_v60 = vld [vmem:[#allocation2 + $0x5c] sm:$0x1] }
 0x5dd   : > { %v10172_v49 = vcombine.low %v9616_v58, %v9618_v59  ;;  %v10173_v31 = vcombine.low %v9617_v3, %v9619_v8  ;;  %v10139_v18 = vrot.slane %v10125_v62, %v20447_v39  ;;  %v10156_v33 = vrot.slane %v10148_v32, %v20447_v39  ;;  %16586 = vmatpush3.bf16.msra.mxu0 %v17490_v61  ;;  %v17495_v59 = vld [vmem:[%s22365_s5 + $0x20] sm:$0xff]  }
 0x5de   : > { %v10163_v56 = vrot.slane %v10149_v19, %v20447_v39  ;;  %v10116_v15 = vcombine.low %v10108_v29, %v10115_v48  ;;  %v20767_v17 = vrot.slane %v7664_v20, %v20031_v25  ;;  %v20771_v22 = vcombine.high %v20665_v30, %v20665_v30  ;;  %15964 = vmatpush3.bf16.msra.mxu1 %v17492_v10 }
 0x5df   : > { %v10180_v12 = vrot.slane %v10172_v49, %v20447_v39  ;;  %v10187_v28 = vrot.slane %v10173_v31, %v20447_v39  ;;  %v10140_v23 = vcombine.low %v10132_v45, %v10139_v18  ;;  %v7813_v54 = vunpack.i.h.s16 %v20665_v30  ;;  %16587 = vmatprep.subr.bf16.mxu0 %v17493_v9  ;;  %15965 = vmatprep.subr.bf16.mxu1 %v17494_v46  ;;  %v17496_v49 = vld [vmem:[%s22365_s5 + $0xa0] sm:$0xff]   ;;  %v17497_v18 = vld [vmem:[%s22365_s5 + $0x68] sm:$0xff]  }
 0x5e0   : > { %v10164_v24 = vcombine.low %v10156_v33, %v10163_v56  ;;  %v14853_v5 = vpack.i.b16 %v20665_v30, %v20665_v30  ;;  %v10123_v20 = vrot.slane %v10116_v15, %v20447_v39  ;;  %v20785_v35 = vcombine.high %v20767_v17, %v20767_v17  ;;  %v10953_v33 = vld [vmem:[#allocation2 + $0x68] sm:$0x1]  ;;  %v17501_v30 = vld [vmem:[%s22365_s5 + $0x30] sm:$0xff]  }
 0x5e1   : > { %v10188_v36 = vcombine.low %v10180_v12, %v10187_v28  ;;  %v7815_v53 = vunpack.i.h.s16 %v20767_v17  ;;  %v10147_v4 = vrot.slane %v10140_v23, %v20447_v39  ;;  %v7817_v51 = vunpack.i.h.s16 %v20771_v22  ;;  %16588 = vmatpush3.bf16.msra.mxu0 %v17493_v9  ;;  %v17498_v28 = vld [vmem:[%s22365_s5 + $0x28] sm:$0xff]  }
 0x5e2   : > { %v10171_v44 = vrot.slane %v10164_v24, %v20447_v39  ;;  %v7877_v37 = vpack.i.b16 %v7813_v54, %v7813_v54  ;;  %v10683_v13 = vshrl.u32 %v10123_v20, 16  ;;  %v10686_v21 = vshll.u32 %v10123_v20, 16  ;;  %15966 = vmatpush3.bf16.msra.mxu1 %v17495_v59  ;;  %16589 = vmatprep.subr.bf16.mxu0 %v17496_v49  ;;  %v17502_v59 = vld [vmem:[%s22365_s5 + $0xb0] sm:$0xff]  }
 0x5e3   : > { %v10195_v38 = vrot.slane %v10188_v36, %v20447_v39  ;;  %v7819_v1 = vunpack.i.h.s16 %v20785_v35  ;;  %v10691_v42 = vshrl.u32 %v10147_v4, 16  ;;  %v10694_v58 = vshll.u32 %v10147_v4, 16  ;;  %15967 = vmatprep.subr.bf16.mxu1 %v17497_v18  ;;  %v17499_v36 = vld [vmem:[%s22365_s5 + $0xa8] sm:$0xff]  }
 0x5e4   : > { %v10700_v3 = vshrl.u32 %v10171_v44, 16  ;;  %v10703_v43 = vshll.u32 %v10171_v44, 16  ;;  %v10685_v6 = vrot.slane %v10683_v13, 7  ;;  %v14854_v40 = vpack.i.b16 %v20767_v17, %v20767_v17 }
 0x5e5   : > { %v10708_v8 = vshrl.u32 %v10195_v38, 16  ;;  %v10711_v2 = vshll.u32 %v10195_v38, 16  ;;  %v10693_v16 = vrot.slane %v10691_v42, 7  ;;  %v7879_v32 = vpack.i.b16 %v7815_v53, %v7815_v53  ;;  %16590 = vmatpush3.bf16.msra.mxu0 %v17496_v49 }
 0x5e6   : > { %v10702_v62 = vrot.slane %v10700_v3, 7  ;;  %v14855_v19 = vpack.i.b16 %v20771_v22, %v20771_v22  ;;  %v10688_v29 = vor.u32 %v10686_v21, %v10685_v6  ;;  %v10689_v48 = vrot.slane %v10685_v6, 4  ;;  %15968 = vmatpush3.bf16.msra.mxu1 %v17498_v28  ;;  %16591 = vmatprep.subr.bf16.mxu0 %v17499_v36 }
 0x5e7   : > { %v10710_v45 = vrot.slane %v10708_v8, 7  ;;  %v7881_v31 = vpack.i.b16 %v7817_v51, %v7817_v51  ;;  %v10696_v56 = vor.u32 %v10694_v58, %v10693_v16  ;;  %v10698_v12 = vrot.slane %v10693_v16, 4  ;;  %v17500_v51 = vld [vmem:[%s22365_s5 + $0x70] sm:$0xff]  }
 0x5e8   : > { %v10705_v61 = vor.u32 %v10703_v43, %v10702_v62  ;;  %v10706_v15 = vrot.slane %v10702_v62, 4  ;;  %v10943_v47 = vsel %vm19057_vm7, %v10688_v29, %v10942_v50  ;;  %v14856_v23 = vpack.i.b16 %v20785_v35, %v20785_v35  ;;  %15969 = vmatprep.subr.bf16.mxu1 %v17500_v51 }
 0x5e9   : > { %v10713_v17 = vor.u32 %v10711_v2, %v10710_v45  ;;  %v10715_v22 = vrot.slane %v10710_v45, 4  ;;  %v10697_v24 = vsel %vm17847_vm5, %v10689_v48, %v10696_v56  ;;  %10944 = vst [vmem:[#allocation2 + $0x54] sm:$0xf] %v10943_v47  ;;  %v10947_v54 = vsel %vm18882_vm12, %v10698_v12, %v10946_v60  ;;  %16592 = vmatpush3.bf16.msra.mxu0 %v17499_v36  ;;  %v22646_v47 = vld [vmem:[#allocation12_spill] sm:$0xff]  ;;  %v22649_v36 = vld [vmem:[#allocation6_spill] sm:$0xff] }
 0x5ea   : > { %v10950_v10 = vsel %vm19057_vm7, %v10705_v61, %v10949_v14  ;;  %v7883_v20 = vpack.i.b16 %v7819_v1, %v7819_v1  ;;  %10945 = vst [vmem:[#allocation2 + $0x58] sm:$0xf] %v10697_v24  ;;  %v7991_v4 = vrot.slane %v14853_v5, %v20420_v34  ;;  %v7995_v44 = vrot.slane %v7877_v37, %v20420_v34  ;;  %v17507_v61 = vld [vmem:[%s22365_s5 + $0xb8] sm:$0xff]  }
 0x5eb   : > { %v10714_v35 = vsel %vm17847_vm5, %v10706_v15, %v10713_v17  ;;  %10951 = vst [vmem:[#allocation2 + $0x60] sm:$0xf] %v10950_v10  ;;  %v10954_v53 = vsel %vm18882_vm12, %v10715_v22, %v10953_v33  ;;  %10948 = vst [vmem:[#allocation2 + $0x5c] sm:$0x1] %v10947_v54  ;;  %v7999_v9 = vrot.slane %v14854_v40, %v20420_v34  ;;  %15970 = vmatpush3.bf16.msra.mxu1 %v17501_v30  ;;  %v17503_v40 = vld [vmem:[%s22365_s5 + $0x78] sm:$0xff]   ;;  %v22645_v22 = vld [vmem:[#allocation16_spill] sm:$0xff] }
 0x5ec   : > { %10952 = vst [vmem:[#allocation2 + $0x64] sm:$0xf] %v10714_v35  ;;  %v8003_v38 = vrot.slane %v7879_v32, %v20420_v34  ;;  %v8007_v13 = vrot.slane %v14855_v19, %v20420_v34  ;;  %v8011_v21 = vrot.slane %v7881_v31, %v20420_v34  ;;  %10955 = vst [vmem:[#allocation2 + $0x68] sm:$0x1] %v10954_v53  ;;  %16593 = vmatprep.subr.bf16.mxu0 %v17502_v59  ;;  %v17504_v19 = vld [vmem:[%s22365_s5 + $0x38] sm:$0xff]   ;;  %v22650_v35 = vld [vmem:[#allocation13_spill] sm:$0xff] }
 0x5ed   : > { %v8015_v5 = vrot.slane %v14856_v23, %v20420_v34  ;;  %v8019_v37 = vrot.slane %v7883_v20, %v20420_v34  ;;  %v8293_v1 = vpack.i.b16 %v7991_v4, %v7991_v4  ;;  %v8300_v46 = vpack.i.b16 %v7995_v44, %v7995_v44  ;;  %15971 = vmatprep.subr.bf16.mxu1 %v17503_v40 }
 0x5ee   : > { %v8307_v42 = vpack.i.b16 %v7999_v9, %v7999_v9  ;;  %v8314_v58 = vpack.i.b16 %v8003_v38, %v8003_v38  ;;  %v8321_v3 = vpack.i.b16 %v8007_v13, %v8007_v13  ;;  %v8328_v43 = vpack.i.b16 %v8011_v21, %v8011_v21  ;;  %16594 = vmatpush3.bf16.msra.mxu0 %v17502_v59 }
 0x5ef   : > { %v8298_v50 = vrot.slane %v8293_v1, %v20420_v34  ;;  %v8305_v6 = vrot.slane %v8300_v46, %v20420_v34  ;;  %v8335_v8 = vpack.i.b16 %v8015_v5, %v8015_v5  ;;  %v8342_v2 = vpack.i.b16 %v8019_v37, %v8019_v37  ;;  %15972 = vmatpush3.bf16.msra.mxu1 %v17504_v19 }
 0x5f0   : > { %v8312_v60 = vrot.slane %v8307_v42, %v20420_v34  ;;  %v8319_v16 = vrot.slane %v8314_v58, %v20420_v34  ;;  %v8326_v62 = vrot.slane %v8321_v3, %v20420_v34  ;;  %v8333_v32 = vrot.slane %v8328_v43, %v20420_v34  ;;  %16595 = vmatprep.subr.bf16.mxu0 %v17507_v61  ;;  %v20906_v3 = vpop.permute.xlu1 %17202 }
 0x5f1   : > { %v8340_v49 = vrot.slane %v8335_v8, %v20420_v34  ;;  %v8347_v14 = vrot.slane %v8342_v2, %v20420_v34  ;;  %v9588_v29 = vadd.bf16 %v20177_v55, %v8298_v50  ;;  %v9589_v48 = vadd.bf16 %v20194_v41, %v8305_v6 }
 0x5f2   : > { %v22641_v45 = vcombine.high %v20177_v55, %v20177_v55  ;;  %v22642_v18 = vcombine.high %v20194_v41, %v20194_v41  ;;  %v9592_v56 = vadd.bf16 %v20191_v52, %v8326_v62  ;;  %v9593_v12 = vadd.bf16 %v20201_v7, %v8333_v32  ;;  %16596 = vmatpush3.bf16.msra.mxu0 %v17507_v61 }
 0x5f3   : > { %v22643_v15 = vcombine.high %v20191_v52, %v20191_v52  ;;  %v22644_v55 = vcombine.high %v20201_v7, %v20201_v7  ;;  %v9596_v41 = vadd.bf16 %v22645_v22, %v8298_v50  ;;  %v9597_v23 = vadd.bf16 %v22646_v47, %v8305_v6  ;;  %v17510_v7 = vld [vmem:[%s22365_s5 + $0x100] sm:$0xff]  }
 0x5f4   : > { %v9590_v31 = vadd.bf16 %v22641_v45, %v8312_v60  ;;  %v9591_v33 = vadd.bf16 %v22642_v18, %v8319_v16  ;;  %v22647_v24 = vcombine.high %v22645_v22, %v22645_v22  ;;  %v22648_v10 = vcombine.high %v22646_v47, %v22646_v47  ;;  %16093 = vmatprep.subr.bf16.mxu0 %v17510_v7  ;;  %v10928_v47 = vld [vmem:[#allocation2 + $0x3c] sm:$0xf] }
 0x5f5   : > { %v9594_v28 = vadd.bf16 %v22643_v15, %v8340_v49  ;;  %v9595_v17 = vadd.bf16 %v22644_v55, %v8347_v14  ;;  %v9600_v52 = vadd.bf16 %v22649_v36, %v8326_v62  ;;  %v9601_v53 = vadd.bf16 %v22650_v35, %v8333_v32 }
 0x5f6   : > { %v9598_v54 = vadd.bf16 %v22647_v24, %v8312_v60  ;;  %v9599_v20 = vadd.bf16 %v22648_v10, %v8319_v16  ;;  %v22651_v4 = vcombine.high %v22649_v36, %v22649_v36  ;;  %v22652_v51 = vcombine.high %v22650_v35, %v22650_v35  ;;  %v10935_v36 = vld [vmem:[#allocation2 + $0x48] sm:$0xf] }
 0x5f7   : > { %v10004_v38 = vcombine.low %v9588_v29, %v9590_v31  ;;  %v10005_v13 = vcombine.low %v9589_v48, %v9591_v33  ;;  %v10028_v21 = vcombine.low %v9592_v56, %v9594_v28  ;;  %v10029_v30 = vcombine.low %v9593_v12, %v9595_v17 }
 0x5f8   : > { %v9602_v44 = vadd.bf16 %v22651_v4, %v8340_v49  ;;  %v9603_v9 = vadd.bf16 %v22652_v51, %v8347_v14  ;;  %v10052_v5 = vcombine.low %v9596_v41, %v9598_v54  ;;  %v10053_v37 = vcombine.low %v9597_v23, %v9599_v20  ;;  %v10932_v20 = vld [vmem:[#allocation2 + $0x44] sm:$0x1]  ;;  %v10939_v4 = vld [vmem:[#allocation2 + $0x50] sm:$0x1] }
 0x5f9   : > { %v10012_v1 = vrot.slane %v10004_v38, %v20447_v39  ;;  %v10019_v46 = vrot.slane %v10005_v13, %v20447_v39  ;;  %v10036_v43 = vrot.slane %v10028_v21, %v20447_v39  ;;  %v10043_v59 = vrot.slane %v10029_v30, %v20447_v39 }
 0x5fa   : > { %v10076_v42 = vcombine.low %v9600_v52, %v9602_v44  ;;  %v10077_v58 = vcombine.low %v9601_v53, %v9603_v9  ;;  %v10060_v50 = vrot.slane %v10052_v5, %v20447_v39  ;;  %v10067_v6 = vrot.slane %v10053_v37, %v20447_v39 }
 0x5fb   : > { %v10020_v8 = vcombine.low %v10012_v1, %v10019_v46  ;;  %v14843_v60 = vpack.c.bf16 %v20653_v63, %v20653_v63  ;;  %v10044_v16 = vcombine.low %v10036_v43, %v10043_v59  ;;  %v7594_v32 = vpack.c.bf16 %v20653_v63, %v17199_v27 }
 0x5fc   : > { %v10084_v2 = vrot.slane %v10076_v42, %v20447_v39  ;;  %v10091_v40 = vrot.slane %v10077_v58, %v20447_v39  ;;  %v10068_v62 = vcombine.low %v10060_v50, %v10067_v6  ;;  %v20920_v19 = vunpack.i.h.bf16 %v20906_v3 }
 0x5fd   : > { %v10027_v49 = vrot.slane %v10020_v8, %v20447_v39  ;;  %v7712_v29 = vrot.slane %v14843_v60, %v20031_v25  ;;  %v17204_v48 = vunpack.i.l.bf16 %v20906_v3  ;;  %v10051_v45 = vrot.slane %v10044_v16, %v20447_v39 }
 0x5fe   : > { %v10092_v14 = vcombine.low %v10084_v2, %v10091_v40  ;;  %v10075_v31 = vrot.slane %v10068_v62, %v20447_v39  ;;  %v20928_v18 = vrot.slane %v7594_v32, %v20031_v25  ;;  %v14844_v57 = vpack.c.bf16 %v20920_v19, %v20920_v19 }
 0x5ff   : > { %v10649_v27 = vshrl.u32 %v10027_v49, 16  ;;  %v10652_v33 = vshll.u32 %v10027_v49, 16  ;;  %v7714_v56 = vcombine.high %v7712_v29, %v7712_v29  ;;  %v10657_v12 = vshrl.u32 %v10051_v45, 16 }
 0x600   : > { %v10099_v63 = vrot.slane %v10092_v14, %v20447_v39  ;;  %v10660_v61 = vshll.u32 %v10051_v45, 16  ;;  %v10666_v15 = vshrl.u32 %v10075_v31, 16  ;;  %v10669_v28 = vshll.u32 %v10075_v31, 16 }
 0x601   : > { %v10651_v55 = vrot.slane %v10649_v27, 7  ;;  %v7728_v41 = vrot.slane %v7712_v29, %v20031_v25  ;;  %v10659_v23 = vrot.slane %v10657_v12, 7  ;;  %v7742_v54 = vrot.slane %v7714_v56, %v20031_v25 }
 0x602   : > { %v10674_v17 = vshrl.u32 %v10099_v63, 16  ;;  %v10677_v22 = vshll.u32 %v10099_v63, 16  ;;  %v10668_v24 = vrot.slane %v10666_v15, 7  ;;  %v7713_v10 = vcombine.high %v20928_v18, %v20928_v18 }
 0x603   : > { %v10654_v52 = vor.u32 %v10652_v33, %v10651_v55  ;;  %v10655_v35 = vrot.slane %v10651_v55, 4  ;;  %v7744_v7 = vcombine.high %v7728_v41, %v7728_v41  ;;  %v10662_v44 = vor.u32 %v10660_v61, %v10659_v23 }
 0x604   : > { %v10676_v53 = vrot.slane %v10674_v17, 7  ;;  %v10664_v51 = vrot.slane %v10659_v23, 4  ;;  %v10671_v9 = vor.u32 %v10669_v28, %v10668_v24  ;;  %v10672_v38 = vrot.slane %v10668_v24, 4 }
 0x605   : > { %v10929_v30 = vsel %vm19057_vm7, %v10654_v52, %v10928_v47  ;;  %v7746_v5 = vcombine.high %v7742_v54, %v7742_v54  ;;  %v10663_v37 = vsel %vm17847_vm5, %v10655_v35, %v10662_v44  ;;  %v7837_v42 = vunpack.i.h.s16 %v7728_v41 }
 0x606   : > { %v10679_v13 = vor.u32 %v10677_v22, %v10676_v53  ;;  %v10681_v21 = vrot.slane %v10676_v53, 4  ;;  %10930 = vst [vmem:[#allocation2 + $0x3c] sm:$0xf] %v10929_v30  ;;  %v10933_v1 = vsel %vm18882_vm12, %v10664_v51, %v10932_v20  ;;  %v10936_v46 = vsel %vm19057_vm7, %v10671_v9, %v10935_v36  ;;  %10931 = vst [vmem:[#allocation2 + $0x40] sm:$0xf] %v10663_v37  ;;  %v22653_v53 = vld [vmem:[#allocation33_spill] sm:$0xff] }
 0x607   : > { %10937 = vst [vmem:[#allocation2 + $0x48] sm:$0xf] %v10936_v46  ;;  %10934 = vst [vmem:[#allocation2 + $0x44] sm:$0x1] %v10933_v1  ;;  %v7839_v59 = vunpack.i.h.s16 %v7742_v54  ;;  %v7841_v50 = vunpack.i.h.s16 %v7744_v7  ;;  %v7843_v6 = vunpack.i.h.s16 %v7746_v5  ;;  %v14865_v8 = vpack.i.b16 %v7728_v41, %v7728_v41 }
 0x608   : > { %v10680_v58 = vsel %vm17847_vm5, %v10672_v38, %v10679_v13  ;;  %v10940_v43 = vsel %vm18882_vm12, %v10681_v21, %v10939_v4  ;;  %v7901_v2 = vpack.i.b16 %v7837_v42, %v7837_v42  ;;  %v14866_v40 = vpack.i.b16 %v7742_v54, %v7742_v54  ;;  %v22654_v4 = vld [vmem:[#allocation32_spill] sm:$0xff]  ;;  %v22657_v21 = vld [vmem:[#allocation31_spill] sm:$0xff] }
 0x609   : > { %10938 = vst [vmem:[#allocation2 + $0x4c] sm:$0xf] %v10680_v58  ;;  %10941 = vst [vmem:[#allocation2 + $0x50] sm:$0x1] %v10940_v43  ;;  %v7903_v60 = vpack.i.b16 %v7839_v59, %v7839_v59  ;;  %v14867_v16 = vpack.i.b16 %v7744_v7, %v7744_v7  ;;  %v7905_v62 = vpack.i.b16 %v7841_v50, %v7841_v50  ;;  %v22661_v43 = vld [vmem:[#allocation29_spill] sm:$0xff]  ;;  %v22662_v50 = vld [vmem:[#allocation30_spill] sm:$0xff] }
 0x60a   : > { %v14868_v32 = vpack.i.b16 %v7746_v5, %v7746_v5  ;;  %v7907_v49 = vpack.i.b16 %v7843_v6, %v7843_v6  ;;  %v8087_v14 = vrot.slane %v14865_v8, %v20420_v34  ;;  %v8091_v29 = vrot.slane %v7901_v2, %v20420_v34  ;;  %v22658_v5 = vld [vmem:[#allocation23_spill] sm:$0xff] }
 0x60b   : > { %v8095_v45 = vrot.slane %v14866_v40, %v20420_v34  ;;  %v8099_v31 = vrot.slane %v7903_v60, %v20420_v34  ;;  %v8103_v63 = vrot.slane %v14867_v16, %v20420_v34  ;;  %v8107_v27 = vrot.slane %v7905_v62, %v20420_v34  ;;  %v22665_v16 = vld [vmem:[#allocation26_spill] sm:$0xff] }
 0x60c   : > { %v8111_v33 = vrot.slane %v14868_v32, %v20420_v34  ;;  %v8115_v56 = vrot.slane %v7907_v49, %v20420_v34  ;;  %v8461_v12 = vpack.i.b16 %v8087_v14, %v8087_v14  ;;  %v8468_v61 = vpack.i.b16 %v8091_v29, %v8091_v29  ;;  %v22666_v32 = vld [vmem:[#allocation28_spill] sm:$0xff] }
 0x60d   : > { %v8475_v15 = vpack.i.b16 %v8095_v45, %v8095_v45  ;;  %v8482_v28 = vpack.i.b16 %v8099_v31, %v8099_v31  ;;  %v8489_v55 = vpack.i.b16 %v8103_v63, %v8103_v63  ;;  %v8496_v17 = vpack.i.b16 %v8107_v27, %v8107_v27 }
 0x60e   : > { %v8503_v22 = vpack.i.b16 %v8111_v33, %v8111_v33  ;;  %v8466_v41 = vrot.slane %v8461_v12, %v20420_v34  ;;  %v8473_v47 = vrot.slane %v8468_v61, %v20420_v34  ;;  %v8510_v24 = vpack.i.b16 %v8115_v56, %v8115_v56 }
 0x60f   : > { %v8480_v23 = vrot.slane %v8475_v15, %v20420_v34  ;;  %v8487_v54 = vrot.slane %v8482_v28, %v20420_v34  ;;  %v8494_v20 = vrot.slane %v8489_v55, %v20420_v34  ;;  %v8501_v36 = vrot.slane %v8496_v17, %v20420_v34 }
 0x610   : > { %v8508_v52 = vrot.slane %v8503_v22, %v20420_v34  ;;  %v8515_v35 = vrot.slane %v8510_v24, %v20420_v34  ;;  %v9636_v7 = vadd.bf16 %v22653_v53, %v8466_v41  ;;  %v9637_v44 = vadd.bf16 %v22654_v4, %v8473_v47 }
 0x611   : > { %v22655_v51 = vcombine.high %v22653_v53, %v22653_v53  ;;  %v22656_v38 = vcombine.high %v22654_v4, %v22654_v4  ;;  %v9640_v30 = vadd.bf16 %v22657_v21, %v8494_v20  ;;  %v9641_v37 = vadd.bf16 %v22658_v5, %v8501_v36 }
 0x612   : > { %v22659_v1 = vcombine.high %v22657_v21, %v22657_v21  ;;  %v22660_v42 = vcombine.high %v22658_v5, %v22658_v5  ;;  %v9644_v59 = vadd.bf16 %v22661_v43, %v8466_v41  ;;  %v9645_v6 = vadd.bf16 %v22662_v50, %v8473_v47 }
 0x613   : > { %v9638_v9 = vadd.bf16 %v22655_v51, %v8480_v23  ;;  %v9639_v13 = vadd.bf16 %v22656_v38, %v8487_v54  ;;  %v22663_v8 = vcombine.high %v22661_v43, %v22661_v43  ;;  %v22664_v40 = vcombine.high %v22662_v50, %v22662_v50 }
 0x614   : > { %v9642_v46 = vadd.bf16 %v22659_v1, %v8508_v52  ;;  %v9643_v58 = vadd.bf16 %v22660_v42, %v8515_v35  ;;  %v9648_v62 = vadd.bf16 %v22665_v16, %v8494_v20  ;;  %v9649_v49 = vadd.bf16 %v22666_v32, %v8501_v36 }
 0x615   : > { %v9646_v2 = vadd.bf16 %v22663_v8, %v8480_v23  ;;  %v9647_v60 = vadd.bf16 %v22664_v40, %v8487_v54  ;;  %v22667_v14 = vcombine.high %v22665_v16, %v22665_v16  ;;  %v22668_v45 = vcombine.high %v22666_v32, %v22666_v32  ;;  %v10974_v40 = vld [vmem:[#allocation2 + $0x8c] sm:$0x1] }
 0x616   : > { %v10292_v63 = vcombine.low %v9636_v7, %v9638_v9  ;;  %v10293_v27 = vcombine.low %v9637_v44, %v9639_v13  ;;  %v10316_v33 = vcombine.low %v9640_v30, %v9642_v46  ;;  %v10317_v56 = vcombine.low %v9641_v37, %v9643_v58 }
 0x617   : > { %v9650_v29 = vadd.bf16 %v22667_v14, %v8508_v52  ;;  %v9651_v31 = vadd.bf16 %v22668_v45, %v8515_v35  ;;  %v10340_v12 = vcombine.low %v9644_v59, %v9646_v2  ;;  %v10341_v61 = vcombine.low %v9645_v6, %v9647_v60  ;;  %v10970_v59 = vld [vmem:[#allocation2 + $0x84] sm:$0xf]  ;;  %v10977_v60 = vld [vmem:[#allocation2 + $0x90] sm:$0xf]  ;;  %v10981_v14 = vld [vmem:[#allocation2 + $0x98] sm:$0x1] }
 0x618   : > { %v10300_v28 = vrot.slane %v10292_v63, %v20447_v39  ;;  %v10307_v55 = vrot.slane %v10293_v27, %v20447_v39  ;;  %v10324_v17 = vrot.slane %v10316_v33, %v20447_v39  ;;  %v10331_v41 = vrot.slane %v10317_v56, %v20447_v39 }
 0x619   : > { %v10364_v15 = vcombine.low %v9648_v62, %v9650_v29  ;;  %v10365_v22 = vcombine.low %v9649_v49, %v9651_v31  ;;  %v10348_v47 = vrot.slane %v10340_v12, %v20447_v39  ;;  %v10355_v23 = vrot.slane %v10341_v61, %v20447_v39 }
 0x61a   : > { %v10308_v54 = vcombine.low %v10300_v28, %v10307_v55  ;;  %v7721_v36 = vrot.slane %v20928_v18, %v20031_v25  ;;  %v7735_v52 = vrot.slane %v7713_v10, %v20031_v25  ;;  %v10332_v35 = vcombine.low %v10324_v17, %v10331_v41 }
 0x61b   : > { %v10372_v24 = vrot.slane %v10364_v15, %v20447_v39  ;;  %v10379_v20 = vrot.slane %v10365_v22, %v20447_v39  ;;  %v10356_v53 = vcombine.low %v10348_v47, %v10355_v23  ;;  %v21015_v7 = vrot.slane %v14844_v57, %v20031_v25 }
 0x61c   : > { %v21020_v4 = vpack.c.bf16 %v20920_v19, %v17204_v48  ;;  %v10315_v44 = vrot.slane %v10308_v54, %v20447_v39  ;;  %v7743_v9 = vcombine.high %v7721_v36, %v7721_v36  ;;  %v7745_v38 = vcombine.high %v7735_v52, %v7735_v52 }
 0x61d   : > { %v10380_v51 = vcombine.low %v10372_v24, %v10379_v20  ;;  %v10339_v18 = vrot.slane %v10332_v35, %v20447_v39  ;;  %v10363_v10 = vrot.slane %v10356_v53, %v20447_v39  ;;  %v7829_v13 = vunpack.i.h.s16 %v7721_v36 }
 0x61e   : > { %v7831_v21 = vunpack.i.h.s16 %v7735_v52  ;;  %v10751_v57 = vshrl.u32 %v10315_v44, 16  ;;  %v10754_v5 = vshll.u32 %v10315_v44, 16  ;;  %v7833_v37 = vunpack.i.h.s16 %v7743_v9 }
 0x61f   : > { %v10387_v30 = vrot.slane %v10380_v51, %v20447_v39  ;;  %v10759_v3 = vshrl.u32 %v10339_v18, 16  ;;  %v10762_v1 = vshll.u32 %v10339_v18, 16  ;;  %v10768_v19 = vshrl.u32 %v10363_v10, 16 }
 0x620   : > { %v10771_v48 = vshll.u32 %v10363_v10, 16  ;;  %v10753_v46 = vrot.slane %v10751_v57, 7  ;;  %v7835_v43 = vunpack.i.h.s16 %v7745_v38  ;;  %v14861_v8 = vpack.i.b16 %v7721_v36, %v7721_v36 }
 0x621   : > { %v10776_v42 = vshrl.u32 %v10387_v30, 16  ;;  %v10779_v58 = vshll.u32 %v10387_v30, 16  ;;  %v10761_v50 = vrot.slane %v10759_v3, 7  ;;  %v10770_v6 = vrot.slane %v10768_v19, 7 }
 0x622   : > { %v7893_v2 = vpack.i.b16 %v7829_v13, %v7829_v13  ;;  %v10756_v16 = vor.u32 %v10754_v5, %v10753_v46  ;;  %v10757_v62 = vrot.slane %v10753_v46, 4  ;;  %v14862_v49 = vpack.i.b16 %v7735_v52, %v7735_v52 }
 0x623   : > { %v10778_v32 = vrot.slane %v10776_v42, 7  ;;  %v10764_v29 = vor.u32 %v10762_v1, %v10761_v50  ;;  %v10766_v45 = vrot.slane %v10761_v50, 4  ;;  %v10773_v31 = vor.u32 %v10771_v48, %v10770_v6  ;;  %v22669_v42 = vld [vmem:[#allocation20_spill] sm:$0xff] }
 0x624   : > { %v10774_v63 = vrot.slane %v10770_v6, 4  ;;  %v10971_v56 = vsel %vm19057_vm7, %v10756_v16, %v10970_v59  ;;  %v7895_v12 = vpack.i.b16 %v7831_v21, %v7831_v21  ;;  %v14863_v55 = vpack.i.b16 %v7743_v9, %v7743_v9  ;;  %v22674_v16 = vld [vmem:[#allocation25_spill] sm:$0xff] }
 0x625   : > { %v10781_v27 = vor.u32 %v10779_v58, %v10778_v32  ;;  %v10783_v33 = vrot.slane %v10778_v32, 4  ;;  %v10765_v61 = vsel %vm17847_vm5, %v10757_v62, %v10764_v29  ;;  %v10975_v15 = vsel %vm18882_vm12, %v10766_v45, %v10974_v40  ;;  %10972 = vst [vmem:[#allocation2 + $0x84] sm:$0xf] %v10971_v56  ;;  %v22673_v40 = vld [vmem:[#allocation10_spill] sm:$0xff]  ;;  %v22677_v45 = vld [vmem:[#allocation19_spill] sm:$0xff] }
 0x626   : > { %v10978_v28 = vsel %vm19057_vm7, %v10773_v31, %v10977_v60  ;;  %10973 = vst [vmem:[#allocation2 + $0x88] sm:$0xf] %v10765_v61  ;;  %v7897_v41 = vpack.i.b16 %v7833_v37, %v7833_v37  ;;  %v14864_v47 = vpack.i.b16 %v7745_v38, %v7745_v38  ;;  %10976 = vst [vmem:[#allocation2 + $0x8c] sm:$0x1] %v10975_v15  ;;  %v22681_v15 = vld [vmem:[#allocation9_spill] sm:$0xff] }
 0x627   : > { %v10782_v17 = vsel %vm17847_vm5, %v10774_v63, %v10781_v27  ;;  %v10982_v22 = vsel %vm18882_vm12, %v10783_v33, %v10981_v14  ;;  %10979 = vst [vmem:[#allocation2 + $0x90] sm:$0xf] %v10978_v28  ;;  %v7899_v23 = vpack.i.b16 %v7835_v43, %v7835_v43  ;;  %v8055_v24 = vrot.slane %v14861_v8, %v20420_v34  ;;  %v22670_v43 = vld [vmem:[#allocation18_spill] sm:$0xff]  ;;  %v22678_v63 = vld [vmem:[#allocation17_spill] sm:$0xff] }
 0x628   : > { %10980 = vst [vmem:[#allocation2 + $0x94] sm:$0xf] %v10782_v17  ;;  %v8059_v54 = vrot.slane %v7893_v2, %v20420_v34  ;;  %v8063_v20 = vrot.slane %v14862_v49, %v20420_v34  ;;  %10983 = vst [vmem:[#allocation2 + $0x98] sm:$0x1] %v10982_v22  ;;  %v8067_v36 = vrot.slane %v7895_v12, %v20420_v34 }
 0x629   : > { %v8071_v52 = vrot.slane %v14863_v55, %v20420_v34  ;;  %v8075_v35 = vrot.slane %v7897_v41, %v20420_v34  ;;  %v8079_v53 = vrot.slane %v14864_v47, %v20420_v34  ;;  %v8083_v44 = vrot.slane %v7899_v23, %v20420_v34  ;;  %v22682_v55 = vld [vmem:[#allocation14_spill] sm:$0xff] }
 0x62a   : > { %v8405_v51 = vpack.i.b16 %v8055_v24, %v8055_v24  ;;  %v8412_v9 = vpack.i.b16 %v8059_v54, %v8059_v54  ;;  %v8419_v38 = vpack.i.b16 %v8063_v20, %v8063_v20  ;;  %v8426_v18 = vpack.i.b16 %v8067_v36, %v8067_v36  ;;  %v17556_v36 = vld [vmem:[%s22365_s5 + $0x1c0] sm:$0xff]  }
 0x62b   : > { %v8433_v10 = vpack.i.b16 %v8071_v52, %v8071_v52  ;;  %v8440_v13 = vpack.i.b16 %v8075_v35, %v8075_v35  ;;  %v8447_v21 = vpack.i.b16 %v8079_v53, %v8079_v53  ;;  %v8454_v37 = vpack.i.b16 %v8083_v44, %v8083_v44  ;;  %16229 = vmatprep.subr.bf16.mxu1 %v17556_v36 }
 0x62c   : > { %v8410_v30 = vrot.slane %v8405_v51, %v20420_v34  ;;  %v8417_v57 = vrot.slane %v8412_v9, %v20420_v34  ;;  %v8424_v5 = vrot.slane %v8419_v38, %v20420_v34  ;;  %v8431_v3 = vrot.slane %v8426_v18, %v20420_v34 }
 0x62d   : > { %v8438_v1 = vrot.slane %v8433_v10, %v20420_v34  ;;  %v8445_v19 = vrot.slane %v8440_v13, %v20420_v34  ;;  %v8452_v48 = vrot.slane %v8447_v21, %v20420_v34  ;;  %v8459_v46 = vrot.slane %v8454_v37, %v20420_v34  ;;  %v21092_v10 = vld [vmem:[#allocation2] sm:$0xff]  }
 0x62e   : > { %v9620_v58 = vadd.bf16 %v22669_v42, %v8410_v30  ;;  %v9621_v59 = vadd.bf16 %v22670_v43, %v8417_v57  ;;  %v22671_v50 = vcombine.high %v22669_v42, %v22669_v42  ;;  %v22672_v8 = vcombine.high %v22670_v43, %v22670_v43 }
 0x62f   : > { %v9624_v60 = vadd.bf16 %v22673_v40, %v8438_v1  ;;  %v9625_v62 = vadd.bf16 %v22674_v16, %v8445_v19  ;;  %v22675_v32 = vcombine.high %v22673_v40, %v22673_v40  ;;  %v22676_v14 = vcombine.high %v22674_v16, %v22674_v16 }
 0x630   : > { %v9622_v6 = vadd.bf16 %v22671_v50, %v8424_v5  ;;  %v9623_v2 = vadd.bf16 %v22672_v8, %v8431_v3  ;;  %v9628_v31 = vadd.bf16 %v22677_v45, %v8410_v30  ;;  %v9629_v27 = vadd.bf16 %v22678_v63, %v8417_v57 }
 0x631   : > { %v9626_v49 = vadd.bf16 %v22675_v32, %v8452_v48  ;;  %v9627_v29 = vadd.bf16 %v22676_v14, %v8459_v46  ;;  %v22679_v33 = vcombine.high %v22677_v45, %v22677_v45  ;;  %v22680_v12 = vcombine.high %v22678_v63, %v22678_v63 }
 0x632   : > { %v9632_v28 = vadd.bf16 %v22681_v15, %v8438_v1  ;;  %v9633_v17 = vadd.bf16 %v22682_v55, %v8445_v19  ;;  %v22683_v22 = vcombine.high %v22681_v15, %v22681_v15  ;;  %v22684_v47 = vcombine.high %v22682_v55, %v22682_v55  ;;  %v10960_v15 = vld [vmem:[#allocation2 + $0x74] sm:$0x1] }
 0x633   : > { %v9630_v56 = vadd.bf16 %v22679_v33, %v8424_v5  ;;  %v9631_v61 = vadd.bf16 %v22680_v12, %v8431_v3  ;;  %v10196_v24 = vcombine.low %v9620_v58, %v9622_v6  ;;  %v10197_v54 = vcombine.low %v9621_v59, %v9623_v2 }
 0x634   : > { %v9634_v41 = vadd.bf16 %v22683_v22, %v8452_v48  ;;  %v9635_v23 = vadd.bf16 %v22684_v47, %v8459_v46  ;;  %v10220_v20 = vcombine.low %v9624_v60, %v9626_v49  ;;  %v10221_v52 = vcombine.low %v9625_v62, %v9627_v29  ;;  %v10967_v47 = vld [vmem:[#allocation2 + $0x80] sm:$0x1] }
 0x635   : > { %v10244_v35 = vcombine.low %v9628_v31, %v9630_v56  ;;  %v10245_v53 = vcombine.low %v9629_v27, %v9631_v61  ;;  %v10204_v51 = vrot.slane %v10196_v24, %v20447_v39  ;;  %v10211_v9 = vrot.slane %v10197_v54, %v20447_v39  ;;  %v10956_v27 = vld [vmem:[#allocation2 + $0x6c] sm:$0xf] }
 0x636   : > { %v10268_v44 = vcombine.low %v9632_v28, %v9634_v41  ;;  %v10228_v38 = vrot.slane %v10220_v20, %v20447_v39  ;;  %v10269_v18 = vcombine.low %v9633_v17, %v9635_v23  ;;  %v10235_v13 = vrot.slane %v10221_v52, %v20447_v39  ;;  %v10963_v28 = vld [vmem:[#allocation2 + $0x78] sm:$0xf] }
 0x637   : > { %v10252_v21 = vrot.slane %v10244_v35, %v20447_v39  ;;  %v10259_v30 = vrot.slane %v10245_v53, %v20447_v39  ;;  %v10212_v5 = vcombine.low %v10204_v51, %v10211_v9  ;;  %v7763_v3 = vcombine.high %v21015_v7, %v21015_v7 }
 0x638   : > { %v10276_v57 = vrot.slane %v10268_v44, %v20447_v39  ;;  %v10283_v37 = vrot.slane %v10269_v18, %v20447_v39  ;;  %v7777_v1 = vrot.slane %v21015_v7, %v20031_v25  ;;  %v10236_v19 = vcombine.low %v10228_v38, %v10235_v13 }
 0x639   : > { %v10260_v48 = vcombine.low %v10252_v21, %v10259_v30  ;;  %v21105_v46 = vrot.slane %v21020_v4, %v20031_v25  ;;  %v11212_v42 = vshrl.u32 %v21092_v10, 16  ;;  %v10219_v58 = vrot.slane %v10212_v5, %v20447_v39 }
 0x63a   : > { %v10284_v43 = vcombine.low %v10276_v57, %v10283_v37  ;;  %v7791_v59 = vrot.slane %v7763_v3, %v20031_v25  ;;  %v7793_v50 = vcombine.high %v7777_v1, %v7777_v1  ;;  %v10243_v6 = vrot.slane %v10236_v19, %v20447_v39 }
 0x63b   : > { %v10267_v8 = vrot.slane %v10260_v48, %v20447_v39  ;;  %v7853_v2 = vunpack.i.h.s16 %v7777_v1  ;;  %v14873_v7 = vpack.i.b16 %v7777_v1, %v7777_v1  ;;  %v10717_v60 = vshrl.u32 %v10219_v58, 16 }
 0x63c   : > { %v10291_v40 = vrot.slane %v10284_v43, %v20447_v39  ;;  %v10720_v16 = vshll.u32 %v10219_v58, 16  ;;  %v7795_v4 = vcombine.high %v7791_v59, %v7791_v59  ;;  %v10725_v62 = vshrl.u32 %v10243_v6, 16 }
 0x63d   : > { %v10728_v32 = vshll.u32 %v10243_v6, 16  ;;  %v10734_v49 = vshrl.u32 %v10267_v8, 16  ;;  %v10737_v14 = vshll.u32 %v10267_v8, 16  ;;  %v10719_v29 = vrot.slane %v10717_v60, 7 }
 0x63e   : > { %v10742_v45 = vshrl.u32 %v10291_v40, 16  ;;  %v10745_v31 = vshll.u32 %v10291_v40, 16  ;;  %v7855_v63 = vunpack.i.h.s16 %v7791_v59  ;;  %v10727_v33 = vrot.slane %v10725_v62, 7 }
 0x63f   : > { %v10736_v56 = vrot.slane %v10734_v49, 7  ;;  %v7857_v12 = vunpack.i.h.s16 %v7793_v50  ;;  %v7859_v61 = vunpack.i.h.s16 %v7795_v4  ;;  %v10722_v55 = vor.u32 %v10720_v16, %v10719_v29 }
 0x640   : > { %v10723_v17 = vrot.slane %v10719_v29, 4  ;;  %v10744_v22 = vrot.slane %v10742_v45, 7  ;;  %v7917_v41 = vpack.i.b16 %v7853_v2, %v7853_v2  ;;  %v10730_v23 = vor.u32 %v10728_v32, %v10727_v33 }
 0x641   : > { %v10732_v24 = vrot.slane %v10727_v33, 4  ;;  %v10739_v54 = vor.u32 %v10737_v14, %v10736_v56  ;;  %v10740_v20 = vrot.slane %v10736_v56, 4  ;;  %v10957_v35 = vsel %vm19057_vm7, %v10722_v55, %v10956_v27  ;;  %v22686_v33 = vld [vmem:[#allocation39_spill] sm:$0xff]  ;;  %v22689_v55 = vld [vmem:[#allocation38_spill] sm:$0xff] }
 0x642   : > { %v10747_v36 = vor.u32 %v10745_v31, %v10744_v22  ;;  %v10749_v52 = vrot.slane %v10744_v22, 4  ;;  %v14874_v53 = vpack.i.b16 %v7791_v59, %v7791_v59  ;;  %v10731_v44 = vsel %vm17847_vm5, %v10723_v17, %v10730_v23  ;;  %10958 = vst [vmem:[#allocation2 + $0x6c] sm:$0xf] %v10957_v35  ;;  %v22690_v22 = vld [vmem:[#allocation40_spill] sm:$0xff] }
 0x643   : > { %v10961_v51 = vsel %vm18882_vm12, %v10732_v24, %v10960_v15  ;;  %v10964_v9 = vsel %vm19057_vm7, %v10739_v54, %v10963_v28  ;;  %v7919_v38 = vpack.i.b16 %v7855_v63, %v7855_v63  ;;  %10959 = vst [vmem:[#allocation2 + $0x70] sm:$0xf] %v10731_v44  ;;  %v14875_v21 = vpack.i.b16 %v7793_v50, %v7793_v50  ;;  %v22685_v63 = vld [vmem:[#allocation37_spill] sm:$0xff] }
 0x644   : > { %v10748_v18 = vsel %vm17847_vm5, %v10740_v20, %v10747_v36  ;;  %v10968_v13 = vsel %vm18882_vm12, %v10749_v52, %v10967_v47  ;;  %10962 = vst [vmem:[#allocation2 + $0x74] sm:$0x1] %v10961_v51  ;;  %10965 = vst [vmem:[#allocation2 + $0x78] sm:$0xf] %v10964_v9  ;;  %v7921_v30 = vpack.i.b16 %v7857_v12, %v7857_v12  ;;  %v22693_v20 = vld [vmem:[#allocation5_spill] sm:$0xff]  ;;  %v22694_v52 = vld [vmem:[#allocation35_spill] sm:$0xff] }
 0x645   : > { %10966 = vst [vmem:[#allocation2 + $0x7c] sm:$0xf] %v10748_v18  ;;  %10969 = vst [vmem:[#allocation2 + $0x80] sm:$0x1] %v10968_v13  ;;  %v14876_v57 = vpack.i.b16 %v7795_v4, %v7795_v4  ;;  %v7923_v5 = vpack.i.b16 %v7859_v61, %v7859_v61  ;;  %v8151_v37 = vrot.slane %v14873_v7, %v20420_v34  ;;  %v22698_v13 = vld [vmem:[#allocation36_spill] sm:$0xff] }
 0x646   : > { %v8155_v3 = vrot.slane %v7917_v41, %v20420_v34  ;;  %v8159_v1 = vrot.slane %v14874_v53, %v20420_v34  ;;  %v8163_v19 = vrot.slane %v7919_v38, %v20420_v34  ;;  %v8167_v48 = vrot.slane %v14875_v21, %v20420_v34  ;;  %v22697_v38 = vld [vmem:[#allocation34_spill] sm:$0xff] }
 0x647   : > { %v8171_v58 = vrot.slane %v7921_v30, %v20420_v34  ;;  %v8175_v43 = vrot.slane %v14876_v57, %v20420_v34  ;;  %v8179_v59 = vrot.slane %v7923_v5, %v20420_v34  ;;  %v8573_v50 = vpack.i.b16 %v8151_v37, %v8151_v37 }
 0x648   : > { %v8580_v6 = vpack.i.b16 %v8155_v3, %v8155_v3  ;;  %v8587_v8 = vpack.i.b16 %v8159_v1, %v8159_v1  ;;  %v8594_v2 = vpack.i.b16 %v8163_v19, %v8163_v19  ;;  %v8601_v40 = vpack.i.b16 %v8167_v48, %v8167_v48 }
 0x649   : > { %v8608_v7 = vpack.i.b16 %v8171_v58, %v8171_v58  ;;  %v8578_v60 = vrot.slane %v8573_v50, %v20420_v34  ;;  %v8615_v4 = vpack.i.b16 %v8175_v43, %v8175_v43  ;;  %v8622_v62 = vpack.i.b16 %v8179_v59, %v8179_v59 }
 0x64a   : > { %v8585_v16 = vrot.slane %v8580_v6, %v20420_v34  ;;  %v8592_v32 = vrot.slane %v8587_v8, %v20420_v34  ;;  %v8599_v49 = vrot.slane %v8594_v2, %v20420_v34  ;;  %v8606_v14 = vrot.slane %v8601_v40, %v20420_v34  ;;  %v21175_v2 = vld [vmem:[#allocation2 + $0x8] ss:$0 sps:$4 sm:$0x11]  }
 0x64b   : > { %v8613_v29 = vrot.slane %v8608_v7, %v20420_v34  ;;  %v8620_v45 = vrot.slane %v8615_v4, %v20420_v34  ;;  %v8627_v31 = vrot.slane %v8622_v62, %v20420_v34  ;;  %v9668_v27 = vadd.bf16 %v22685_v63, %v8578_v60 }
 0x64c   : > { %v9669_v56 = vadd.bf16 %v22686_v33, %v8585_v16  ;;  %v22687_v12 = vcombine.high %v22685_v63, %v22685_v63  ;;  %v22688_v15 = vcombine.high %v22686_v33, %v22686_v33  ;;  %v9672_v17 = vadd.bf16 %v22689_v55, %v8606_v14 }
 0x64d   : > { %v9673_v41 = vadd.bf16 %v22690_v22, %v8613_v29  ;;  %v22691_v47 = vcombine.high %v22689_v55, %v22689_v55  ;;  %v22692_v24 = vcombine.high %v22690_v22, %v22690_v22  ;;  %v9676_v36 = vadd.bf16 %v22693_v20, %v8578_v60 }
 0x64e   : > { %v9670_v61 = vadd.bf16 %v22687_v12, %v8592_v32  ;;  %v9671_v28 = vadd.bf16 %v22688_v15, %v8599_v49  ;;  %v9677_v35 = vadd.bf16 %v22694_v52, %v8585_v16  ;;  %v22695_v53 = vcombine.high %v22693_v20, %v22693_v20 }
 0x64f   : > { %v9674_v23 = vadd.bf16 %v22691_v47, %v8620_v45  ;;  %v9675_v54 = vadd.bf16 %v22692_v24, %v8627_v31  ;;  %v22696_v51 = vcombine.high %v22694_v52, %v22694_v52  ;;  %v9680_v18 = vadd.bf16 %v22697_v38, %v8606_v14  ;;  %v10998_v52 = vld [vmem:[#allocation2 + $0xb4] sm:$0xf] }
 0x650   : > { %v9678_v44 = vadd.bf16 %v22695_v53, %v8592_v32  ;;  %v9681_v21 = vadd.bf16 %v22698_v13, %v8613_v29  ;;  %v22699_v30 = vcombine.high %v22697_v38, %v22697_v38  ;;  %v22700_v5 = vcombine.high %v22698_v13, %v22698_v13  ;;  %v11005_v38 = vld [vmem:[#allocation2 + $0xc0] sm:$0xf] }
 0x651   : > { %v9679_v9 = vadd.bf16 %v22696_v51, %v8599_v49  ;;  %v10484_v3 = vcombine.low %v9668_v27, %v9670_v61  ;;  %v10485_v1 = vcombine.low %v9669_v56, %v9671_v28  ;;  %v10508_v19 = vcombine.low %v9672_v17, %v9674_v23 }
 0x652   : > { %v9682_v57 = vadd.bf16 %v22699_v30, %v8620_v45  ;;  %v9683_v37 = vadd.bf16 %v22700_v5, %v8627_v31  ;;  %v10509_v48 = vcombine.low %v9673_v41, %v9675_v54  ;;  %v10532_v58 = vcombine.low %v9676_v36, %v9678_v44 }
 0x653   : > { %v10533_v43 = vcombine.low %v9677_v35, %v9679_v9  ;;  %v10492_v59 = vrot.slane %v10484_v3, %v20447_v39  ;;  %v10499_v50 = vrot.slane %v10485_v1, %v20447_v39  ;;  %v10516_v40 = vrot.slane %v10508_v19, %v20447_v39  ;;  %v11002_v9 = vld [vmem:[#allocation2 + $0xbc] sm:$0x1] }
 0x654   : > { %v10556_v6 = vcombine.low %v9680_v18, %v9682_v57  ;;  %v10557_v8 = vcombine.low %v9681_v21, %v9683_v37  ;;  %v10523_v7 = vrot.slane %v10509_v48, %v20447_v39  ;;  %v10540_v60 = vrot.slane %v10532_v58, %v20447_v39  ;;  %v11009_v57 = vld [vmem:[#allocation2 + $0xc8] sm:$0x1] }
 0x655   : > { %v10547_v16 = vrot.slane %v10533_v43, %v20447_v39  ;;  %v10500_v4 = vcombine.low %v10492_v59, %v10499_v50  ;;  %v7762_v49 = vcombine.high %v21105_v46, %v21105_v46  ;;  %v7770_v45 = vrot.slane %v21105_v46, %v20031_v25 }
 0x656   : > { %v10564_v62 = vrot.slane %v10556_v6, %v20447_v39  ;;  %v10571_v32 = vrot.slane %v10557_v8, %v20447_v39  ;;  %v10524_v14 = vcombine.low %v10516_v40, %v10523_v7  ;;  %v11214_v31 = vshll.u32 %v21092_v10, 16 }
 0x657   : > { %v10548_v29 = vcombine.low %v10540_v60, %v10547_v16  ;;  %v10507_v63 = vrot.slane %v10500_v4, %v20447_v39  ;;  %v7784_v33 = vrot.slane %v7762_v49, %v20031_v25  ;;  %v11219_v56 = vshll.u32 %v21175_v2, 16 }
 0x658   : > { %v10572_v27 = vcombine.low %v10564_v62, %v10571_v32  ;;  %v10531_v12 = vrot.slane %v10524_v14, %v20447_v39  ;;  %v7792_v15 = vcombine.high %v7770_v45, %v7770_v45  ;;  %v7845_v28 = vunpack.i.h.s16 %v7770_v45 }
 0x659   : > { %v10555_v61 = vrot.slane %v10548_v29, %v20447_v39  ;;  %v10819_v17 = vshrl.u32 %v10507_v63, 16  ;;  %v10822_v22 = vshll.u32 %v10507_v63, 16  ;;  %v7794_v46 = vcombine.high %v7784_v33, %v7784_v33 }
 0x65a   : > { %v10579_v55 = vrot.slane %v10572_v27, %v20447_v39  ;;  %v10827_v41 = vshrl.u32 %v10531_v12, 16  ;;  %v10830_v47 = vshll.u32 %v10531_v12, 16  ;;  %v7847_v36 = vunpack.i.h.s16 %v7784_v33 }
 0x65b   : > { %v10836_v23 = vshrl.u32 %v10555_v61, 16  ;;  %v10839_v24 = vshll.u32 %v10555_v61, 16  ;;  %v10821_v54 = vrot.slane %v10819_v17, 7  ;;  %v7849_v44 = vunpack.i.h.s16 %v7792_v15 }
 0x65c   : > { %v10844_v20 = vshrl.u32 %v10579_v55, 16  ;;  %v10847_v25 = vshll.u32 %v10579_v55, 16  ;;  %v10829_v35 = vrot.slane %v10827_v41, 7  ;;  %v7851_v51 = vunpack.i.h.s16 %v7794_v46 }
 0x65d   : > { %v10838_v53 = vrot.slane %v10836_v23, 7  ;;  %v10824_v18 = vor.u32 %v10822_v22, %v10821_v54  ;;  %v10825_v13 = vrot.slane %v10821_v54, 4  ;;  %v14869_v30 = vpack.i.b16 %v7770_v45, %v7770_v45 }
 0x65e   : > { %v10846_v21 = vrot.slane %v10844_v20, 7  ;;  %v10832_v5 = vor.u32 %v10830_v47, %v10829_v35  ;;  %v10834_v37 = vrot.slane %v10829_v35, 4  ;;  %v7909_v43 = vpack.i.b16 %v7845_v28, %v7845_v28  ;;  %v22701_v35 = vld [vmem:[#allocation24_spill] sm:$0xff] }
 0x65f   : > { %v10841_v3 = vor.u32 %v10839_v24, %v10838_v53  ;;  %v10842_v1 = vrot.slane %v10838_v53, 4  ;;  %v10999_v58 = vsel %vm19057_vm7, %v10824_v18, %v10998_v52  ;;  %v14870_v8 = vpack.i.b16 %v7784_v33, %v7784_v33 }
 0x660   : > { %v10849_v19 = vor.u32 %v10847_v25, %v10846_v21  ;;  %v10851_v48 = vrot.slane %v10846_v21, 4  ;;  %v10833_v59 = vsel %vm17847_vm5, %v10825_v13, %v10832_v5  ;;  %11000 = vst [vmem:[#allocation2 + $0xb4] sm:$0xf] %v10999_v58  ;;  %v11003_v50 = vsel %vm18882_vm12, %v10834_v37, %v11002_v9  ;;  %v22705_v21 = vld [vmem:[#allocation11_spill] sm:$0xff]  ;;  %v22710_v58 = vld [vmem:[#allocation22_spill] sm:$0xff] }
 0x661   : > { %v11006_v6 = vsel %vm19057_vm7, %v10841_v3, %v11005_v38  ;;  %11001 = vst [vmem:[#allocation2 + $0xb8] sm:$0xf] %v10833_v59  ;;  %v7911_v60 = vpack.i.b16 %v7847_v36, %v7847_v36  ;;  %v14871_v16 = vpack.i.b16 %v7792_v15, %v7792_v15  ;;  %11004 = vst [vmem:[#allocation2 + $0xbc] sm:$0x1] %v11003_v50 }
 0x662   : > { %v10850_v40 = vsel %vm17847_vm5, %v10842_v1, %v10849_v19  ;;  %11007 = vst [vmem:[#allocation2 + $0xc0] sm:$0xf] %v11006_v6  ;;  %v11010_v7 = vsel %vm18882_vm12, %v10851_v48, %v11009_v57  ;;  %v7913_v4 = vpack.i.b16 %v7849_v44, %v7849_v44  ;;  %v14872_v62 = vpack.i.b16 %v7794_v46, %v7794_v46  ;;  %v22702_v44 = vld [vmem:[#allocation8_spill] sm:$0xff]  ;;  %v22706_v57 = vld [vmem:[#allocation15_spill] sm:$0xff] }
 0x663   : > { %11008 = vst [vmem:[#allocation2 + $0xc4] sm:$0xf] %v10850_v40  ;;  %v7915_v32 = vpack.i.b16 %v7851_v51, %v7851_v51  ;;  %v8119_v49 = vrot.slane %v14869_v30, %v20420_v34  ;;  %11011 = vst [vmem:[#allocation2 + $0xc8] sm:$0x1] %v11010_v7  ;;  %v8123_v14 = vrot.slane %v7909_v43, %v20420_v34  ;;  %v22709_v19 = vld [vmem:[#allocation27_spill] sm:$0xff]  ;;  %v22713_v40 = vld [vmem:[#allocation21_spill] sm:$0xff] }
 0x664   : > { %v8127_v29 = vrot.slane %v14870_v8, %v20420_v34  ;;  %v8131_v45 = vrot.slane %v7911_v60, %v20420_v34  ;;  %v8135_v63 = vrot.slane %v14871_v16, %v20420_v34  ;;  %v8139_v27 = vrot.slane %v7913_v4, %v20420_v34  ;;  %v22714_v60 = vld [vmem:[#allocation7_spill] sm:$0xff] }
 0x665   : > { %v8143_v33 = vrot.slane %v14872_v62, %v20420_v34  ;;  %v8147_v12 = vrot.slane %v7915_v32, %v20420_v34  ;;  %v8517_v61 = vpack.i.b16 %v8119_v49, %v8119_v49  ;;  %v8524_v15 = vpack.i.b16 %v8123_v14, %v8123_v14 }
 0x666   : > { %v8531_v28 = vpack.i.b16 %v8127_v29, %v8127_v29  ;;  %v8538_v55 = vpack.i.b16 %v8131_v45, %v8131_v45  ;;  %v8545_v17 = vpack.i.b16 %v8135_v63, %v8135_v63  ;;  %v8552_v46 = vpack.i.b16 %v8139_v27, %v8139_v27 }
 0x667   : > { %v8522_v22 = vrot.slane %v8517_v61, %v20420_v34  ;;  %v8559_v41 = vpack.i.b16 %v8143_v33, %v8143_v33  ;;  %v8566_v47 = vpack.i.b16 %v8147_v12, %v8147_v12  ;;  %v8529_v23 = vrot.slane %v8524_v15, %v20420_v34 }
 0x668   : > { %v8536_v24 = vrot.slane %v8531_v28, %v20420_v34  ;;  %v8543_v54 = vrot.slane %v8538_v55, %v20420_v34  ;;  %v8550_v20 = vrot.slane %v8545_v17, %v20420_v34  ;;  %v8557_v25 = vrot.slane %v8552_v46, %v20420_v34  ;;  %v21259_v46 = vld [vmem:[#allocation2 + $0xc] sm:$0xff]  }
 0x669   : > { %v8564_v36 = vrot.slane %v8559_v41, %v20420_v34  ;;  %v8571_v52 = vrot.slane %v8566_v47, %v20420_v34  ;;  %v9652_v53 = vadd.bf16 %v22701_v35, %v8522_v22  ;;  %v9653_v51 = vadd.bf16 %v22702_v44, %v8529_v23  ;;  %v21261_v41 = vld [vmem:[#allocation2 + $0x14] ss:$0 sps:$4 sm:$0x11]  }
 0x66a   : > { %v22703_v9 = vcombine.high %v22701_v35, %v22701_v35  ;;  %v22704_v18 = vcombine.high %v22702_v44, %v22702_v44  ;;  %v9656_v30 = vadd.bf16 %v22705_v21, %v8550_v20  ;;  %v9657_v5 = vadd.bf16 %v22706_v57, %v8557_v25 }
 0x66b   : > { %v22707_v37 = vcombine.high %v22705_v21, %v22705_v21  ;;  %v22708_v3 = vcombine.high %v22706_v57, %v22706_v57  ;;  %v9660_v48 = vadd.bf16 %v22709_v19, %v8522_v22  ;;  %v9661_v43 = vadd.bf16 %v22710_v58, %v8529_v23  ;;  %v21287_v57 = vld [vmem:[#allocation2 + $0x20] ss:$0 sps:$4 sm:$0x11]  }
 0x66c   : > { %v9654_v38 = vadd.bf16 %v22703_v9, %v8536_v24  ;;  %v9655_v13 = vadd.bf16 %v22704_v18, %v8543_v54  ;;  %v22711_v59 = vcombine.high %v22709_v19, %v22709_v19  ;;  %v22712_v6 = vcombine.high %v22710_v58, %v22710_v58  ;;  %v10988_v19 = vld [vmem:[#allocation2 + $0xa4] sm:$0x1] }
 0x66d   : > { %v9658_v34 = vadd.bf16 %v22707_v37, %v8564_v36  ;;  %v9659_v1 = vadd.bf16 %v22708_v3, %v8571_v52  ;;  %v9664_v7 = vadd.bf16 %v22713_v40, %v8550_v20  ;;  %v9665_v16 = vadd.bf16 %v22714_v60, %v8557_v25 }
 0x66e   : > { %v9662_v50 = vadd.bf16 %v22711_v59, %v8536_v24  ;;  %v9663_v8 = vadd.bf16 %v22712_v6, %v8543_v54  ;;  %v22715_v4 = vcombine.high %v22713_v40, %v22713_v40  ;;  %v22716_v32 = vcombine.high %v22714_v60, %v22714_v60  ;;  %v10991_v6 = vld [vmem:[#allocation2 + $0xa8] sm:$0xf] }
 0x66f   : > { %v10388_v14 = vcombine.low %v9652_v53, %v9654_v38  ;;  %v10389_v29 = vcombine.low %v9653_v51, %v9655_v13  ;;  %v10412_v45 = vcombine.low %v9656_v30, %v9658_v34  ;;  %v10413_v63 = vcombine.low %v9657_v5, %v9659_v1  ;;  %v21278_v13 = vld [vmem:[#allocation2 + $0x18] sm:$0xff]   ;;  %v17563_v5 = vld [vmem:[%s22365_s5 + $0x1c8] sm:$0xff]   ;;  %v17513_v1 = vld [vmem:[%s22365_s5 + $0xc0] sm:$0xff]  }
 0x670   : > { %v9666_v62 = vadd.bf16 %v22715_v4, %v8564_v36  ;;  %v9667_v49 = vadd.bf16 %v22716_v32, %v8571_v52  ;;  %v10436_v27 = vcombine.low %v9660_v48, %v9662_v50  ;;  %v10437_v12 = vcombine.low %v9661_v43, %v9663_v8  ;;  %v17516_v50 = vld [vmem:[%s22365_s5 + $0x108] sm:$0xff]   ;;  %v10995_v8 = vld [vmem:[#allocation2 + $0xb0] sm:$0x1] }
 0x671   : > { %v10396_v33 = vrot.slane %v10388_v14, %v20447_v39  ;;  %v10403_v28 = vrot.slane %v10389_v29, %v20447_v39  ;;  %v10420_v55 = vrot.slane %v10412_v45, %v20447_v39  ;;  %v10427_v17 = vrot.slane %v10413_v63, %v20447_v39  ;;  %v17564_v4 = vld [vmem:[%s22365_s5 + $0x188] sm:$0xff]   ;;  %v17570_v14 = vld [vmem:[%s22365_s5 + $0x1d0] sm:$0xff]  }
 0x672   : > { %v10460_v61 = vcombine.low %v9664_v7, %v9666_v62  ;;  %v10461_v15 = vcombine.low %v9665_v16, %v9667_v49  ;;  %v10444_v22 = vrot.slane %v10436_v27, %v20447_v39  ;;  %v10451_v47 = vrot.slane %v10437_v12, %v20447_v39  ;;  %v17519_v12 = vld [vmem:[%s22365_s5 + $0xc8] sm:$0xff]  }
 0x673   : > { %v11216_v54 = vrot.slane %v11214_v31, 1  ;;  %v10404_v20 = vcombine.low %v10396_v33, %v10403_v28  ;;  %v10428_v25 = vcombine.low %v10420_v55, %v10427_v17  ;;  %v11221_v36 = vrot.slane %v11219_v56, 1  ;;  %v17557_v56 = vld [vmem:[%s22365_s5 + $0x180] sm:$0xff]   ;;  %v21308_v33 = vld [vmem:[#allocation2 + $0x2c] ss:$0 sps:$4 sm:$0x11]  }
 0x674   : > { %v10468_v23 = vrot.slane %v10460_v61, %v20447_v39  ;;  %v10475_v24 = vrot.slane %v10461_v15, %v20447_v39  ;;  %v11419_v52 = vrot.slane %v21092_v10, 1  ;;  %v10452_v35 = vcombine.low %v10444_v22, %v10451_v47  ;;  %v21313_v17 = vld [vmem:[#allocation2 + $0x24] sm:$0xff]   ;;  %v21315_v22 = vld [vmem:[#allocation2 + $0x30] sm:$0xff]  }
 0x675   : > { %v11217_v44 = vor.u32 %v11216_v54, %v11212_v42  ;;  %v11420_v51 = vrot.slane %v21175_v2, 1  ;;  %v10411_v9 = vrot.slane %v10404_v20, %v20447_v39  ;;  %v10435_v38 = vrot.slane %v10428_v25, %v20447_v39  ;;  %v17522_v47 = vld [vmem:[%s22365_s5 + $0x110] sm:$0xff]   ;;  %v21327_v25 = vld [vmem:[#allocation2 + $0x38] ss:$0 sps:$4 sm:$0x11]  }
 0x676   : > { %v10476_v53 = vcombine.low %v10468_v23, %v10475_v24  ;;  %v11422_v31 = vrot.slane %v21259_v46, 1  ;;  %v11423_v18 = vrot.slane %v21261_v41, 1  ;;  %v10459_v21 = vrot.slane %v10452_v35, %v20447_v39 }
 0x677   : > { %v11222_v2 = vsel %vm1007_vm8, %v11217_v44, %v11221_v36  ;;  %v11421_v30 = vsel %vm1216_vm9, %v11419_v52, %v11420_v51  ;;  %v10785_v37 = vshrl.u32 %v10411_v9, 16  ;;  %v10788_v34 = vshll.u32 %v10411_v9, 16  ;;  %v17571_v36 = vld [vmem:[%s22365_s5 + $0x190] sm:$0xff]   ;;  %v17577_v51 = vld [vmem:[%s22365_s5 + $0x1d8] sm:$0xff]  }
 0x678   : > { %v10483_v42 = vrot.slane %v10476_v53, %v20447_v39  ;;  %v10793_v3 = vshrl.u32 %v10435_v38, 16  ;;  %11707 = vmatprep.mubr.bf16.mxu1 %v11222_v2  ;;  %16597 = vmatprep.mubr.bf16.mxu0 %v11421_v30  ;;  %v10984_v39 = vld [vmem:[#allocation2 + $0x9c] sm:$0xf]  ;;  %v10796_v48 = vshll.u32 %v10435_v38, 16  ;;  %v10802_v58 = vshrl.u32 %v10459_v21, 16 }
 0x679   : > { %v10805_v43 = vshll.u32 %v10459_v21, 16  ;;  %11708 = vmatmul.mubr.bf16.vlgmr.msra.gmra.mrb[144].mxu1 %v21092_v10  ;;  %v10787_v40 = vrot.slane %v10785_v37, 7  ;;  %v11424_v60 = vsel %vm1216_vm9, %v11422_v31, %v11423_v18  ;;  %v11425_v16 = vrot.slane %v21278_v13, 1  ;;  %v17525_v21 = vld [vmem:[%s22365_s5 + $0xd0] sm:$0xff]   ;;  %v21354_v30 = vld [vmem:[#allocation2 + $0x3c] sm:$0xff]  }
 0x67a   : > { %v10810_v59 = vshrl.u32 %v10483_v42, 16  ;;  %v10795_v7 = vrot.slane %v10793_v3, 7  ;;  %16230 = vmatpush3.bf16.msra.mxu1 %v17557_v56  ;;  %v10804_v62 = vrot.slane %v10802_v58, 7  ;;  %v10813_v10 = vshll.u32 %v10483_v42, 16  ;;  %16598 = vmatmul.mubr.bf16.vlgmr.msra.gmra.mrb[136].mxu0 %v11424_v60 }
 0x67b   : > { %v11426_v49 = vrot.slane %v21287_v57, 1  ;;  %16231 = vmatprep.subr.bf16.mxu1 %v17563_v5  ;;  %v10790_v29 = vor.u32 %v10788_v34, %v10787_v40  ;;  %v10791_v45 = vrot.slane %v10787_v40, 4  ;;  %16094 = vmatpush3.bf16.msra.mxu0 %v17513_v1  ;;  %v11226_v44 = vshll.u32 %v21259_v46, 16  ;;  %v21361_v1 = vld [vmem:[#allocation2 + $0x44] ss:$0 sps:$4 sm:$0x11]  }
 0x67c   : > { %v10812_v32 = vrot.slane %v10810_v59, 7  ;;  %v10798_v63 = vor.u32 %v10796_v48, %v10795_v7  ;;  %v10800_v27 = vrot.slane %v10795_v7, 4  ;;  %v10807_v61 = vor.u32 %v10805_v43, %v10804_v62  ;;  %16095 = vmatprep.subr.bf16.mxu0 %v17516_v50  ;;  %v21364_v48 = vld [vmem:[#allocation2 + $0x48] sm:$0xff]   ;;  %v21366_v58 = vld [vmem:[#allocation2 + $0x50] ss:$0 sps:$4 sm:$0x11]  }
 0x67d   : > { %v10808_v15 = vrot.slane %v10804_v62, 4  ;;  %v10985_v24 = vsel %vm19057_vm7, %v10790_v29, %v10984_v39  ;;  %v11427_v20 = vsel %vm1216_vm9, %v11425_v16, %v11426_v49  ;;  %v11224_v0 = vshrl.u32 %v21259_v46, 16  ;;  %v17578_v43 = vld [vmem:[%s22365_s5 + $0x198] sm:$0xff]   ;;  %v17534_v7 = vld [vmem:[%s22365_s5 + $0x120] sm:$0xff]  }
 0x67e   : > { %v10815_v28 = vor.u32 %v10813_v10, %v10812_v32  ;;  %v10817_v55 = vrot.slane %v10812_v32, 4  ;;  %v10799_v23 = vsel %vm17847_vm5, %v10791_v45, %v10798_v63  ;;  %v10989_v54 = vsel %vm18882_vm12, %v10800_v27, %v10988_v19  ;;  %16232 = vmatpush3.bf16.msra.mxu1 %v17564_v4  ;;  %10986 = vst [vmem:[#allocation2 + $0x9c] sm:$0xf] %v10985_v24  ;;  %v17580_v10 = vld [vmem:[%s22365_s5 + $0x1a0] sm:$0xff]   ;;  %v17540_v63 = vld [vmem:[%s22365_s5 + $0x128] sm:$0xff]  }
 0x67f   : > { %10987 = vst [vmem:[#allocation2 + $0xa0] sm:$0xf] %v10799_v23  ;;  %v10992_v35 = vsel %vm19057_vm7, %v10807_v61, %v10991_v6  ;;  %10990 = vst [vmem:[#allocation2 + $0xa4] sm:$0x1] %v10989_v54  ;;  %16601 = vmatprep.mubr.bf16.mxu0 %v11427_v20  ;;  %16233 = vmatprep.subr.bf16.mxu1 %v17570_v14  ;;  %v11231_v11 = vshll.u32 %v21261_v41, 16  ;;  %v11238_v9 = vshll.u32 %v21278_v13, 16 }
 0x680   : > { %v10816_v52 = vsel %vm17847_vm5, %v10808_v15, %v10815_v28  ;;  %v10996_v53 = vsel %vm18882_vm12, %v10817_v55, %v10995_v8  ;;  %10993 = vst [vmem:[#allocation2 + $0xa8] sm:$0xf] %v10992_v35  ;;  %v11243_v26 = vshll.u32 %v21287_v57, 16  ;;  %16096 = vmatpush3.bf16.msra.mxu0 %v17519_v12  ;;  %v11228_v38 = vrot.slane %v11226_v44, 1  ;;  %v17528_v57 = vld [vmem:[%s22365_s5 + $0x118] sm:$0xff]   ;;  %v17579_v8 = vld [vmem:[%s22365_s5 + $0x1e0] sm:$0xff]  }
 0x681   : > { %10994 = vst [vmem:[#allocation2 + $0xac] sm:$0xf] %v10816_v52  ;;  %10997 = vst [vmem:[#allocation2 + $0xb0] sm:$0x1] %v10996_v53  ;;  %v11428_v31 = vrot.slane %v21313_v17, 1  ;;  %v11429_v18 = vrot.slane %v21308_v33, 1  ;;  %16097 = vmatprep.subr.bf16.mxu0 %v17522_v47 }
 0x682   : > { %v11431_v56 = vrot.slane %v21315_v22, 1  ;;  %v11236_v42 = vshrl.u32 %v21278_v13, 16  ;;  %v11240_v41 = vrot.slane %v11238_v9, 1  ;;  %v11432_v2 = vrot.slane %v21327_v25, 1  ;;  %16234 = vmatpush3.bf16.msra.mxu1 %v17571_v36  ;;  %v17531_v6 = vld [vmem:[%s22365_s5 + $0xd8] sm:$0xff]   ;;  %v17537_v45 = vld [vmem:[%s22365_s5 + $0xe0] sm:$0xff]  }
 0x683   : > { %v11229_v5 = vor.u32 %v11228_v38, %v11224_v0  ;;  %v11233_v37 = vrot.slane %v11231_v11, 1  ;;  %v11430_v34 = vsel %vm1216_vm9, %v11428_v31, %v11429_v18  ;;  %v11250_v3 = vshll.u32 %v21313_v17, 16  ;;  %16235 = vmatprep.subr.bf16.mxu1 %v17577_v51  ;;  %v21394_v29 = vld [vmem:[#allocation2 + $0x5c] ss:$0 sps:$4 sm:$0x11]   ;;  %v17584_v27 = vld [vmem:[%s22365_s5 + $0x1e8] sm:$0xff]  }
 0x684   : > { %v11241_v39 = vor.u32 %v11240_v41, %v11236_v42  ;;  %16602 = vmatmul.mubr.bf16.gmra.mrb[140].mxu0 %v11430_v34  ;;  %v11433_v19 = vsel %vm1216_vm9, %v11431_v56, %v11432_v2  ;;  %v11245_v50 = vrot.slane %v11243_v26, 1  ;;  %v11434_v40 = vrot.slane %v21354_v30, 1  ;;  %v21407_v15 = vld [vmem:[#allocation2 + $0x60] sm:$0xff]   ;;  %v21410_v55 = vld [vmem:[#allocation2 + $0x68] ss:$0 sps:$4 sm:$0x11]  }
 0x685   : > { %v11234_v59 = vsel %vm1007_vm8, %v11229_v5, %v11233_v37  ;;  %16605 = vmatprep.mubr.bf16.mxu0 %v11433_v19  ;;  %16098 = vmatpush3.bf16.msra.mxu0 %v17525_v21  ;;  %v11252_v16 = vrot.slane %v11250_v3, 1  ;;  %v11435_v4 = vrot.slane %v21361_v1, 1  ;;  %v11437_v62 = vrot.slane %v21364_v48, 1  ;;  %v17585_v47 = vld [vmem:[%s22365_s5 + $0x1a8] sm:$0xff]   ;;  %v17586_v54 = vld [vmem:[%s22365_s5 + $0x1f0] sm:$0xff]   ;;  %v17552_v26 = vld [vmem:[%s22365_s5 + $0x138] sm:$0xff]  }
 0x686   : > { %11715 = vmatprep.mubr.bf16.mxu1 %v11234_v59  ;;  %16099 = vmatprep.subr.bf16.mxu0 %v17528_v57  ;;  %v11246_v60 = vsel %vm1007_vm8, %v11241_v39, %v11245_v50  ;;  %v11438_v32 = vrot.slane %v21366_v58, 1  ;;  %v11248_v49 = vshrl.u32 %v21313_v17, 16  ;;  %v11255_v14 = vshll.u32 %v21308_v33, 16  ;;  %v17543_v24 = vld [vmem:[%s22365_s5 + $0xe8] sm:$0xff]   ;;  %v17546_v20 = vld [vmem:[%s22365_s5 + $0x130] sm:$0xff]   ;;  %v17592_v38 = vld [vmem:[%s22365_s5 + $0x1f8] sm:$0xff]  }
 0x687   : > { %11716 = vmatmul.mubr.bf16.gmra.mrb[148].mxu1 %v21259_v46  ;;  %v21392_v46 = vld [vmem:[#allocation2 + $0x54] sm:$0xff]   ;;  %v11436_v12 = vsel %vm1216_vm9, %v11434_v40, %v11435_v4  ;;  %v11262_v61 = vshll.u32 %v21315_v22, 16  ;;  %v11441_v53 = vrot.slane %v21394_v29, 1  ;;  %v11443_v44 = vrot.slane %v21407_v15, 1  ;;  %v21446_v56 = vld [vmem:[#allocation2 + $0x6c] sm:$0xff]   ;;  %v21464_v34 = vld [vmem:[%s22365_s5 + $0x140] sm:$0xff]  }
 0x688   : > { %11723 = vmatprep.mubr.bf16.mxu1 %v11246_v60  ;;  %16236 = vmatpush3.bf16.msra.mxu1 %v17578_v43  ;;  %v11253_v33 = vor.u32 %v11252_v16, %v11248_v49  ;;  %v11439_v28 = vsel %vm1216_vm9, %v11437_v62, %v11438_v32  ;;  %v11257_v23 = vrot.slane %v11255_v14, 1  ;;  %v11440_v35 = vrot.slane %v21392_v46, 1  ;;  %v17587_v0 = vld [vmem:[%s22365_s5 + $0x1b0] sm:$0xff]   ;;  %v21450_v42 = vld [vmem:[#allocation2 + $0x78] sm:$0xff]   ;;  %v21477_v60 = vld [vmem:[#allocation2 + $0x84] sm:$0xff]  }
 0x689   : > { %16100 = vmatpush3.bf16.msra.mxu0 %v17531_v6  ;;  %16237 = vmatprep.subr.bf16.mxu1 %v17579_v8  ;;  %v11264_v52 = vrot.slane %v11262_v61, 1  ;;  %v11444_v51 = vrot.slane %v21410_v55, 1  ;;  %v11260_v11 = vshrl.u32 %v21315_v22, 16  ;;  %v17549_v9 = vld [vmem:[%s22365_s5 + $0xf0] sm:$0xff]   ;;  %v17593_v57 = vld [vmem:[%s22365_s5 + $0x1b8] sm:$0xff]   ;;  %v11446_v19 = vrot.slane %v21446_v56, 1 }
 0x68a   : > { %16101 = vmatprep.subr.bf16.mxu0 %v17534_v7  ;;  %v11258_v36 = vsel %vm1007_vm8, %v11253_v33, %v11257_v23  ;;  %v11442_v18 = vsel %vm1216_vm9, %v11440_v35, %v11441_v53  ;;  %v21448_v21 = vld [vmem:[#allocation2 + $0x74] ss:$0 sps:$4 sm:$0x11]   ;;  %v21453_v2 = vld [vmem:[#allocation2 + $0x80] ss:$0 sps:$4 sm:$0x11]  }
 0x68b   : > { %v11265_v31 = vor.u32 %v11264_v52, %v11260_v11  ;;  %v11445_v41 = vsel %vm1216_vm9, %v11443_v44, %v11444_v51  ;;  %v17553_v37 = vld [vmem:[%s22365_s5 + $0xf8] sm:$0xff]   ;;  %v11447_v43 = vrot.slane %v21448_v21, 1  ;;  %v11449_v59 = vrot.slane %v21450_v42, 1  ;;  %v21479_v16 = vld [vmem:[#allocation2 + $0x8c] ss:$0 sps:$4 sm:$0x11]  }
 0x68c   : > { %16606 = vmatmul.mubr.bf16.gmra.mrb[144].mxu0 %v11436_v12  ;;  %16238 = vmatpush3.bf16.msra.mxu1 %v17580_v10  ;;  %v11450_v50 = vrot.slane %v21453_v2, 1  ;;  %v11272_v6 = vshrl.u32 %v21354_v30, 16  ;;  %v11279_v8 = vshll.u32 %v21361_v1, 16  ;;  %v11286_v7 = vshll.u32 %v21364_v48, 16  ;;  %v21482_v62 = vld [vmem:[#allocation2 + $0x90] sm:$0xff]  }
 0x68d   : > { %16609 = vmatprep.mubr.bf16.mxu0 %v11439_v28  ;;  %16102 = vmatpush3.bf16.msra.mxu0 %v17537_v45  ;;  %v11448_v40 = vsel %vm1216_vm9, %v11446_v19, %v11447_v43  ;;  %v21484_v32 = vld [vmem:[#allocation2 + $0x98] ss:$0 sps:$4 sm:$0x11]   ;;  %v11452_v14 = vrot.slane %v21477_v60, 1  ;;  %v11453_v45 = vrot.slane %v21479_v16, 1  ;;  %v11284_v33 = vshrl.u32 %v21364_v48, 16 }
 0x68e   : > { %16103 = vmatprep.subr.bf16.mxu0 %v17540_v63  ;;  %16239 = vmatprep.subr.bf16.mxu1 %v17584_v27  ;;  %v11451_v4 = vsel %vm1216_vm9, %v11449_v59, %v11450_v50  ;;  %v11281_v1 = vrot.slane %v11279_v8, 1  ;;  %v11288_v49 = vrot.slane %v11286_v7, 1  ;;  %v11455_v63 = vrot.slane %v21482_v62, 1  ;;  %v21498_v23 = vld [vmem:[#allocation2 + $0xa4] ss:$0 sps:$4 sm:$0x11]  }
 0x68f   : > { %11724 = vmatmul.mubr.bf16.gmra.mrb[152].mxu1 %v21278_v13  ;;  %v11267_v13 = vshll.u32 %v21327_v25, 16  ;;  %v11274_v25 = vshll.u32 %v21354_v30, 16  ;;  %v11456_v27 = vrot.slane %v21484_v32, 1  ;;  %v11291_v12 = vshll.u32 %v21366_v58, 16 }
 0x690   : > { %11731 = vmatprep.mubr.bf16.mxu1 %v11258_v36  ;;  %16240 = vmatpush3.bf16.msra.mxu1 %v17585_v47  ;;  %v11289_v61 = vor.u32 %v11288_v49, %v11284_v33  ;;  %v11454_v28 = vsel %vm1216_vm9, %v11452_v14, %v11453_v45  ;;  %v21496_v47 = vld [vmem:[#allocation2 + $0x9c] sm:$0xff]   ;;  %v21505_v36 = vld [vmem:[#allocation2 + $0xc] sm:$0xff]   ;;  %v11459_v44 = vrot.slane %v21498_v23, 1  ;;  %v11308_v8 = vshrl.u32 %v21407_v15, 16  ;;  %v21541_v14 = vld [vmem:[#allocation2 + $0x24] sm:$0xff]  }
 0x691   : > { %16104 = vmatpush3.bf16.msra.mxu0 %v17543_v24  ;;  %16241 = vmatprep.subr.bf16.mxu1 %v17586_v54  ;;  %v11269_v5 = vrot.slane %v11267_v13, 1  ;;  %v11276_v39 = vrot.slane %v11274_v25, 1  ;;  %v11457_v24 = vsel %vm1216_vm9, %v11455_v63, %v11456_v27  ;;  %v21501_v54 = vld [vmem:[#allocation2 + $0xa8] sm:$0xff]   ;;  %v11293_v52 = vrot.slane %v11291_v12, 1 }
 0x692   : > { %16105 = vmatprep.subr.bf16.mxu0 %v17546_v20  ;;  %v21503_v20 = vld [vmem:[#allocation2 + $0xb0] ss:$0 sps:$4 sm:$0x11]   ;;  %v11458_v53 = vrot.slane %v21496_v47, 1  ;;  %v11461_v51 = vrot.slane %v21501_v54, 1  ;;  %v12224_v11 = vshll.u32 %v21505_v36, 16 }
 0x693   : > { %v11270_v3 = vsel %vm1007_vm8, %v11265_v31, %v11269_v5  ;;  %v11294_v58 = vsel %vm1007_vm8, %v11289_v61, %v11293_v52  ;;  %v11296_v13 = vshrl.u32 %v21392_v46, 16  ;;  %v11310_v31 = vshll.u32 %v21407_v15, 16  ;;  %v21522_v25 = vld [vmem:[#allocation2 + $0xbc] ss:$0 sps:$4 sm:$0x11]  }
 0x694   : > { %16610 = vmatmul.mubr.bf16.gmra.mrb[148].mxu0 %v11442_v18  ;;  %16242 = vmatpush3.bf16.msra.mxu1 %v17587_v0  ;;  %v11462_v0 = vrot.slane %v21503_v20, 1  ;;  %v21520_v18 = vld [vmem:[#allocation2 + $0xb4] sm:$0xff]   ;;  %v11465_v59 = vrot.slane %v21522_v25, 1  ;;  %v21536_v7 = vld [vmem:[#allocation2 + $0x20] ss:$0 sps:$4 sm:$0x11]  }
 0x695   : > { %16613 = vmatprep.mubr.bf16.mxu0 %v11445_v41  ;;  %16106 = vmatpush3.bf16.msra.mxu0 %v17549_v9  ;;  %v11303_v9 = vshll.u32 %v21394_v29, 16  ;;  %v21525_v5 = vld [vmem:[#allocation2 + $0x18] sm:$0xff]   ;;  %v12222_v29 = vshrl.u32 %v21505_v36, 16  ;;  %v11312_v19 = vrot.slane %v11310_v31, 1  ;;  %v11464_v43 = vrot.slane %v21520_v18, 1 }
 0x696   : > { %16107 = vmatprep.subr.bf16.mxu0 %v17552_v26  ;;  %16243 = vmatprep.subr.bf16.mxu1 %v17592_v38  ;;  %v21516_v26 = vld [vmem:[#allocation2 + $0x14] ss:$0 sps:$4 sm:$0x11]   ;;  %v11460_v38 = vsel %vm1216_vm9, %v11458_v53, %v11459_v44  ;;  %v11463_v41 = vsel %vm1216_vm9, %v11461_v51, %v11462_v0  ;;  %v12234_v63 = vshrl.u32 %v21525_v5, 16  ;;  %v12248_v61 = vshll.u32 %v21541_v14, 16 }
 0x697   : > { %11732 = vmatmul.mubr.bf16.gmra.mrb[156].mxu1 %v21313_v17  ;;  %v11277_v17 = vor.u32 %v11276_v39, %v11272_v6  ;;  %v12236_v6 = vshll.u32 %v21525_v5, 16  ;;  %v21550_v52 = vld [vmem:[#allocation2 + $0x2c] ss:$0 sps:$4 sm:$0x11]   ;;  %v21558_v51 = vld [vmem:[#allocation2 + $0x30] sm:$0xff]  }
 0x698   : > { %11739 = vmatprep.mubr.bf16.mxu1 %v11270_v3  ;;  %16244 = vmatpush3.bf16.msra.mxu1 %v17593_v57  ;;  %v12226_v57 = vrot.slane %v12224_v11, 1  ;;  %v12229_v3 = vshll.u32 %v21516_v26, 16  ;;  %v12250_v44 = vrot.slane %v12248_v61, 1  ;;  %v12253_v11 = vshll.u32 %v21550_v52, 16 }
 0x699   : > { %16108 = vmatpush3.bf16.msra.mxu0 %v17553_v37  ;;  %v11282_v10 = vsel %vm1007_vm8, %v11277_v17, %v11281_v1  ;;  %v11305_v37 = vrot.slane %v11303_v9, 1  ;;  %v11315_v17 = vshll.u32 %v21410_v55, 16  ;;  %v11322_v1 = vshll.u32 %v21446_v56, 16 }
 0x69a   : > { %16629 = vmatprep.subr.bf16.mxu0 %v21464_v34  ;;  %v12227_v50 = vor.u32 %v12226_v57, %v12222_v29  ;;  %v12238_v49 = vrot.slane %v12236_v6, 1  ;;  %v12241_v55 = vshll.u32 %v21536_v7, 16  ;;  %v12260_v31 = vshll.u32 %v21558_v51, 16  ;;  %v17596_v6 = vld [vmem:[%s22365_s5 + $0x160] sm:$0xff]  }
 0x69b   : > { %v11317_v45 = vrot.slane %v11315_v17, 1  ;;  %v11324_v33 = vrot.slane %v11322_v1, 1  ;;  %v12255_v57 = vrot.slane %v12253_v11, 1  ;;  %v11344_v1 = vshrl.u32 %v21477_v60, 16 }
 0x69c   : > { %16614 = vmatmul.mubr.bf16.gmra.mrb[152].mxu0 %v11448_v40  ;;  %v12231_v40 = vrot.slane %v12229_v3, 1  ;;  %v12239_v12 = vor.u32 %v12238_v49, %v12234_v63  ;;  %v11346_v3 = vshll.u32 %v21477_v60, 16  ;;  %v11358_v63 = vshll.u32 %v21482_v62, 16 }
 0x69d   : > { %16617 = vmatprep.mubr.bf16.mxu0 %v11451_v4  ;;  %v11313_v4 = vor.u32 %v11312_v19, %v11308_v8 }
 0x69e   : > { %v11348_v17 = vrot.slane %v11346_v3, 1 }
 0x69f   : > { %11740 = vmatmul.mubr.bf16.gmra.mrb[160].mxu1 %v21315_v22  ;;  %v11298_v22 = vshll.u32 %v21392_v46, 16  ;;  %v11318_v27 = vsel %vm1007_vm8, %v11313_v4, %v11317_v45  ;;  %v11351_v4 = vshll.u32 %v21479_v16, 16  ;;  %v17605_v45 = vld [vmem:[%s22365_s5 + $0x168] sm:$0xff]  }
 0x6a0   : > { %11747 = vmatprep.mubr.bf16.mxu1 %v11282_v10  ;;  %v12232_v10 = vsel %vm1007_vm8, %v12227_v50, %v12231_v40 }
 0x6a1   : > { %v11300_v35 = vrot.slane %v11298_v22, 1  ;;  %v11327_v22 = vshll.u32 %v21448_v21, 16  ;;  %v12246_v21 = vshrl.u32 %v21541_v14, 16 }
 0x6a3   : > { %v11329_v0 = vrot.slane %v11327_v22, 1  ;;  %v12430_v22 = vrot.slane %v21516_v26, 1  ;;  %v12432_v26 = vrot.slane %v21525_v5, 1 }
 0x6a4   : > { %16618 = vmatmul.mubr.bf16.gmra.mrb[156].mxu0 %v11454_v28  ;;  %v11320_v28 = vshrl.u32 %v21446_v56, 16 }
 0x6a5   : > { %16621 = vmatprep.mubr.bf16.mxu0 %v11457_v24  ;;  %v12243_v24 = vrot.slane %v12241_v55, 1 }
 0x6a7   : > { %11748 = vmatmul.mubr.bf16.gmra.mrb[164].mxu1 %v21354_v30  ;;  %v11301_v30 = vor.u32 %v11300_v35, %v11296_v13  ;;  %v11325_v35 = vor.u32 %v11324_v33, %v11320_v28  ;;  %v12244_v53 = vsel %vm1007_vm8, %v12239_v12, %v12243_v24  ;;  %v17572_v13 = vld [vmem:[%s22365_s5 + $0x150] sm:$0xff]   ;;  %v21597_v33 = vld [vmem:[#allocation2 + $0x48] sm:$0xff]   ;;  %v12429_v28 = vrot.slane %v21505_v36, 1 }
 0x6a8   : > { %11755 = vmatprep.mubr.bf16.mxu1 %v11294_v58  ;;  %v17565_v58 = vld [vmem:[%s22365_s5 + $0x148] sm:$0xff]   ;;  %v17614_v24 = vld [vmem:[%s22365_s5 + $0x170] sm:$0xff]   ;;  %v12282_v3 = vshrl.u32 %v21597_v33, 16 }
 0x6a9   : > { %v11306_v39 = vsel %vm1007_vm8, %v11301_v30, %v11305_v37  ;;  %v11330_v9 = vsel %vm1007_vm8, %v11325_v35, %v11329_v0  ;;  %v21571_v37 = vld [vmem:[#allocation2 + $0x38] ss:$0 sps:$4 sm:$0x11]   ;;  %v11360_v35 = vrot.slane %v11358_v63, 1  ;;  %v12433_v0 = vrot.slane %v21536_v7, 1  ;;  %v21661_v63 = vld [vmem:[#allocation2 + $0x60] sm:$0xff]  }
 0x6aa   : > { %v12265_v50 = vshll.u32 %v21571_v37, 16 }
 0x6ac   : > { %16622 = vmatmul.mubr.bf16.gmra.mrb[160].mxu0 %v11460_v38  ;;  %v12251_v38 = vor.u32 %v12250_v44, %v12246_v21  ;;  %v12267_v49 = vrot.slane %v12265_v50, 1  ;;  %v11356_v44 = vshrl.u32 %v21482_v62, 16  ;;  %v11363_v21 = vshll.u32 %v21484_v32, 16 }
 0x6ad   : > { %16625 = vmatprep.mubr.bf16.mxu0 %v11463_v41  ;;  %v11339_v41 = vshll.u32 %v21453_v2, 16  ;;  %v12444_v50 = vrot.slane %v21597_v33, 1 }
 0x6ae   : > { %v12256_v19 = vsel %vm1007_vm8, %v12251_v38, %v12255_v57  ;;  %v17623_v38 = vld [vmem:[%s22365_s5 + $0x178] sm:$0xff]   ;;  %v11361_v7 = vor.u32 %v11360_v35, %v11356_v44 }
 0x6af   : > { %11756 = vmatmul.mubr.bf16.gmra.mrb[168].mxu1 %v21364_v48  ;;  %v11466_v48 = vsel %vm1216_vm9, %v11464_v43, %v11465_v59  ;;  %v12262_v43 = vrot.slane %v12260_v31, 1  ;;  %v11341_v2 = vrot.slane %v11339_v41, 1  ;;  %v12258_v59 = vshrl.u32 %v21558_v51, 16 }
 0x6b0   : > { %11763 = vmatprep.mubr.bf16.mxu1 %v11306_v39  ;;  %v21577_v39 = vld [vmem:[#allocation2 + $0x3c] sm:$0xff]   ;;  %v12439_v41 = vrot.slane %v21571_v37, 1 }
 0x6b1   : > { %v12272_v40 = vshll.u32 %v21577_v39, 16  ;;  %v12270_v12 = vshrl.u32 %v21577_v39, 16  ;;  %v12441_v57 = vrot.slane %v21577_v39, 1 }
 0x6b3   : > { %v12274_v55 = vrot.slane %v12272_v40, 1  ;;  %v11368_v40 = vshrl.u32 %v21496_v47, 16 }
 0x6b4   : > { %16626 = vmatmul.mubr.bf16.gmra.mrb[164].mxu0 %v11466_v48  ;;  %v12263_v48 = vor.u32 %v12262_v43, %v12258_v59  ;;  %v21638_v43 = vld [vmem:[%s22365_s5 + $0x200] sm:$0xff]  }
 0x6b5   : > { %12718 = vmatprep.mubr.bf16.mxu0 %v12232_v10  ;;  %v17569_v10 = vld [vmem:[#allocation2 + $0x44] ss:$0 sps:$4 sm:$0x11]  }
 0x6b6   : > { %v12268_v16 = vsel %vm1007_vm8, %v12263_v48, %v12267_v49  ;;  %v12277_v61 = vshll.u32 %v17569_v10, 16  ;;  %v11382_v49 = vshll.u32 %v21501_v54, 16 }
 0x6b7   : > { %11764 = vmatmul.mubr.bf16.gmra.mrb[172].mxu1 %v21392_v46  ;;  %v11334_v46 = vshll.u32 %v21450_v42, 16 }
 0x6b8   : > { %11771 = vmatprep.mubr.bf16.mxu1 %v11318_v27  ;;  %v11353_v27 = vrot.slane %v11351_v4, 1  ;;  %v12279_v11 = vrot.slane %v12277_v61, 1  ;;  %v11375_v4 = vshll.u32 %v21498_v23, 16 }
 0x6b9   : > { %v11336_v30 = vrot.slane %v11334_v46, 1  ;;  %v12275_v46 = vor.u32 %v12274_v55, %v12270_v12  ;;  %v11384_v12 = vrot.slane %v11382_v49, 1  ;;  %v21709_v49 = vld [vmem:[#allocation2 + $0x84] sm:$0xff]  }
 0x6ba   : > { %v11377_v23 = vrot.slane %v11375_v4, 1 }
 0x6bb   : > { %v12280_v32 = vsel %vm1007_vm8, %v12275_v46, %v12279_v11  ;;  %v11394_v46 = vshll.u32 %v21520_v18, 16 }
 0x6bc   : > { %12719 = vmatmul.mubr.bf16.vlgmr.msra.gmra.mrb[168].mxu0 %v21505_v36  ;;  %v12284_v36 = vshll.u32 %v21597_v33, 16 }
 0x6bd   : > { %12726 = vmatprep.mubr.bf16.mxu0 %v12244_v53  ;;  %16630 = vmatpush3.bf16.msra.mxu0 %v21464_v34  ;;  %v11332_v34 = vshrl.u32 %v21450_v42, 16  ;;  %v21608_v53 = vsel %vm1216_vm9, %v12429_v28, %v12430_v22  ;;  %v11380_v28 = vshrl.u32 %v21501_v54, 16  ;;  %v11387_v22 = vshll.u32 %v21503_v20, 16 }
 0x6be   : > { %16631 = vmatprep.subr.bf16.mxu0 %v17565_v58  ;;  %v11396_v11 = vrot.slane %v11394_v46, 1 }
 0x6bf   : > { %11772 = vmatmul.mubr.bf16.gmra.mrb[176].mxu1 %v21407_v15  ;;  %v17581_v15 = vld [vmem:[%s22365_s5 + $0x158] sm:$0xff]   ;;  %v11337_v29 = vor.u32 %v11336_v30, %v11332_v34  ;;  %v17574_v30 = vld [vmem:[#allocation2 + $0x50] ss:$0 sps:$4 sm:$0x11]   ;;  %v11385_v35 = vor.u32 %v11384_v12, %v11380_v28 }
 0x6c0   : > { %11779 = vmatprep.mubr.bf16.mxu1 %v11330_v9  ;;  %v11370_v9 = vshll.u32 %v21496_v47, 16  ;;  %v21630_v34 = vld [vmem:[#allocation2 + $0x54] sm:$0xff]  }
 0x6c1   : > { %16632 = vmatpush3.bf16.msra.mxu0 %v17565_v58  ;;  %v11342_v8 = vsel %vm1007_vm8, %v11337_v29, %v11341_v2  ;;  %v11365_v29 = vrot.slane %v11363_v21, 1  ;;  %v12294_v55 = vshrl.u32 %v21630_v34, 16  ;;  %v21717_v12 = vld [vmem:[#allocation2 + $0x30] sm:$0xff]  }
 0x6c2   : > { %16633 = vmatprep.subr.bf16.mxu0 %v17572_v13  ;;  %v11372_v59 = vrot.slane %v11370_v9, 1  ;;  %v11392_v9 = vshrl.u32 %v21520_v18, 16 }
 0x6c3   : > { %v11366_v2 = vsel %vm1007_vm8, %v11361_v7, %v11365_v29  ;;  %v21686_v7 = vld [vmem:[#allocation2 + $0x74] ss:$0 sps:$4 sm:$0x11]  }
 0x6c4   : > { %12727 = vmatmul.mubr.bf16.gmra.mrb[172].mxu0 %v21525_v5  ;;  %v21622_v5 = vsel %vm1216_vm9, %v12432_v26, %v12433_v0  ;;  %v11389_v26 = vrot.slane %v11387_v22, 1  ;;  %v12306_v0 = vshrl.u32 %v21661_v63, 16 }
 0x6c5   : > { %12734 = vmatprep.mubr.bf16.mxu0 %v12256_v19  ;;  %16634 = vmatpush3.bf16.msra.mxu0 %v17572_v13  ;;  %v12436_v13 = vrot.slane %v21550_v52, 1  ;;  %v12286_v52 = vrot.slane %v12284_v36, 1  ;;  %v12289_v19 = vshll.u32 %v17574_v30, 16  ;;  %v21675_v36 = vld [vmem:[#allocation2 + $0x6c] sm:$0xff]  }
 0x6c6   : > { %16635 = vmatprep.subr.bf16.mxu0 %v17581_v15  ;;  %v11390_v20 = vsel %vm1007_vm8, %v11385_v35, %v11389_v26  ;;  %v12318_v29 = vshrl.u32 %v21675_v36, 16  ;;  %v21722_v35 = vld [vmem:[#allocation2 + $0x8c] ss:$0 sps:$4 sm:$0x11]   ;;  %v21727_v26 = vld [vmem:[#allocation2 + $0x90] sm:$0xff]  }
 0x6c7   : > { %11780 = vmatmul.mubr.bf16.gmra.mrb[180].mxu1 %v21446_v56  ;;  %v11349_v56 = vor.u32 %v11348_v17, %v11344_v1  ;;  %v12296_v17 = vshll.u32 %v21630_v34, 16  ;;  %v12291_v1 = vrot.slane %v12289_v19, 1 }
 0x6c8   : > { %11787 = vmatprep.mubr.bf16.mxu1 %v11342_v8  ;;  %v12287_v8 = vor.u32 %v12286_v52, %v12282_v3 }
 0x6c9   : > { %16636 = vmatpush3.bf16.msra.mxu0 %v17581_v15  ;;  %v11354_v58 = vsel %vm1007_vm8, %v11349_v56, %v11353_v27  ;;  %v12442_v15 = vrot.slane %v17569_v10, 1  ;;  %v11373_v10 = vor.u32 %v11372_v59, %v11368_v40  ;;  %v12298_v56 = vrot.slane %v12296_v17, 1  ;;  %v21704_v40 = vld [vmem:[#allocation2 + $0x80] ss:$0 sps:$4 sm:$0x11]  }
 0x6ca   : > { %16637 = vmatprep.subr.bf16.mxu0 %v17596_v6 }
 0x6cb   : > { %v21644_v37 = vsel %vm1216_vm9, %v12441_v57, %v12442_v15  ;;  %v12299_v61 = vor.u32 %v12298_v56, %v12294_v55  ;;  %v21693_v15 = vld [vmem:[#allocation2 + $0x20] ss:$0 sps:$4 sm:$0x11]   ;;  %v21711_v56 = vld [vmem:[#allocation2 + $0x2c] ss:$0 sps:$4 sm:$0x11]  }
 0x6cc   : > { %12735 = vmatmul.mubr.bf16.gmra.mrb[176].mxu0 %v21541_v14  ;;  %v12337_v55 = vshll.u32 %v21704_v40, 16  ;;  %v13252_v22 = vshll.u32 %v21711_v56, 16 }
 0x6cd   : > { %12742 = vmatprep.mubr.bf16.mxu0 %v12268_v16  ;;  %16638 = vmatpush3.bf16.msra.mxu0 %v17596_v6  ;;  %v12445_v6 = vrot.slane %v17574_v30, 1  ;;  %v11378_v16 = vsel %vm1007_vm8, %v11373_v10, %v11377_v23  ;;  %v11399_v30 = vshll.u32 %v21522_v25, 16  ;;  %v12325_v25 = vshll.u32 %v21686_v7, 16 }
 0x6ce   : > { %16639 = vmatprep.subr.bf16.mxu0 %v17605_v45 }
 0x6cf   : > { %11788 = vmatmul.mubr.bf16.gmra.mrb[184].mxu1 %v21450_v42  ;;  %v12435_v42 = vrot.slane %v21541_v14, 1  ;;  %v12438_v14 = vrot.slane %v21558_v51, 1  ;;  %v21653_v48 = vsel %vm1216_vm9, %v12444_v50, %v12445_v6  ;;  %v11401_v57 = vrot.slane %v11399_v30, 1 }
 0x6d0   : > { %11795 = vmatprep.mubr.bf16.mxu1 %v11354_v58  ;;  %v21670_v58 = vld [vmem:[#allocation2 + $0x68] ss:$0 sps:$4 sm:$0x11]   ;;  %v12327_v17 = vrot.slane %v12325_v25, 1 }
 0x6d1   : > { %16640 = vmatpush3.bf16.msra.mxu0 %v17605_v45  ;;  %v21626_v31 = vsel %vm1216_vm9, %v12435_v42, %v12436_v13  ;;  %v12292_v45 = vsel %vm1007_vm8, %v12287_v8, %v12291_v1  ;;  %v12313_v21 = vshll.u32 %v21670_v58, 16  ;;  %v21681_v42 = vld [vmem:[#allocation2 + $0x18] sm:$0xff]   ;;  %v12320_v13 = vshll.u32 %v21675_v36, 16 }
 0x6d2   : > { %16641 = vmatprep.subr.bf16.mxu0 %v17614_v24  ;;  %v13233_v6 = vshrl.u32 %v21681_v42, 16  ;;  %v13240_v8 = vshll.u32 %v21693_v15, 16 }
 0x6d3   : > { %v12322_v52 = vrot.slane %v12320_v13, 1 }
 0x6d4   : > { %12743 = vmatmul.mubr.bf16.gmra.mrb[180].mxu0 %v21558_v51  ;;  %v21641_v51 = vsel %vm1216_vm9, %v12438_v14, %v12439_v41  ;;  %v13235_v14 = vshll.u32 %v21681_v42, 16  ;;  %v21691_v41 = vld [vmem:[#allocation2 + $0x78] sm:$0xff]  }
 0x6d5   : > { %12750 = vmatprep.mubr.bf16.mxu0 %v12280_v32  ;;  %16642 = vmatpush3.bf16.msra.mxu0 %v17614_v24  ;;  %v11397_v32 = vor.u32 %v11396_v11, %v11392_v9  ;;  %v12323_v59 = vor.u32 %v12322_v52, %v12318_v29  ;;  %v12332_v50 = vshll.u32 %v21691_v41, 16  ;;  %v12330_v23 = vshrl.u32 %v21691_v41, 16  ;;  %v21735_v9 = vld [vmem:[#allocation2 + $0x3c] sm:$0xff]   ;;  %v21740_v52 = vld [vmem:[#allocation2 + $0x98] ss:$0 sps:$4 sm:$0x11]  }
 0x6d6   : > { %16643 = vmatprep.subr.bf16.mxu0 %v17623_v38  ;;  %v13237_v19 = vrot.slane %v13235_v14, 1  ;;  %v12349_v11 = vshll.u32 %v21722_v35, 16  ;;  %v13271_v29 = vshll.u32 %v21735_v9, 16 }
 0x6d7   : > { %11796 = vmatmul.mubr.bf16.gmra.mrb[188].mxu1 %v21477_v60  ;;  %v21655_v60 = vld [vmem:[#allocation2 + $0x5c] ss:$0 sps:$4 sm:$0x11]   ;;  %v11402_v3 = vsel %vm1007_vm8, %v11397_v32, %v11401_v57  ;;  %v12334_v10 = vrot.slane %v12332_v50, 1  ;;  %v13257_v32 = vshrl.u32 %v21717_v12, 16 }
 0x6d8   : > { %11803 = vmatprep.mubr.bf16.mxu1 %v11366_v2  ;;  %v12301_v27 = vshll.u32 %v21655_v60, 16  ;;  %v21699_v2 = vld [vmem:[#allocation2 + $0x24] sm:$0xff]   ;;  %v13238_v4 = vor.u32 %v13237_v19, %v13233_v6  ;;  %v21745_v19 = vld [vmem:[#allocation2 + $0x9c] sm:$0xff]   ;;  %v12354_v6 = vshrl.u32 %v21727_v26, 16 }
 0x6d9   : > { %16644 = vmatpush3.bf16.msra.mxu0 %v17623_v38  ;;  %v12315_v38 = vrot.slane %v12313_v21, 1  ;;  %v13247_v1 = vshll.u32 %v21699_v2, 16  ;;  %v13245_v28 = vshrl.u32 %v21699_v2, 16  ;;  %v21729_v21 = vld [vmem:[#allocation2 + $0x38] ss:$0 sps:$4 sm:$0x11]  }
 0x6da   : > { %16677 = vmatprep.subr.bf16.mxu0 %v21638_v43  ;;  %v12303_v24 = vrot.slane %v12301_v27, 1  ;;  %v13264_v14 = vshll.u32 %v21729_v21, 16  ;;  %v21747_v50 = vld [vmem:[#allocation2 + $0x44] ss:$0 sps:$4 sm:$0x11]  }
 0x6dc   : > { %12751 = vmatmul.mubr.bf16.gmra.mrb[184].mxu0 %v21577_v39  ;;  %v12308_v39 = vshll.u32 %v21661_v63, 16 }
 0x6dd   : > { %12758 = vmatprep.mubr.bf16.mxu0 %v12292_v45  ;;  %v13242_v45 = vrot.slane %v13240_v8, 1  ;;  %v12361_v8 = vshll.u32 %v21740_v52, 16 }
 0x6de   : > { %v12310_v44 = vrot.slane %v12308_v39, 1  ;;  %v12344_v39 = vshll.u32 %v21709_v49, 16 }
 0x6df   : > { %11804 = vmatmul.mubr.bf16.gmra.mrb[192].mxu1 %v21482_v62  ;;  %v12304_v62 = vsel %vm1007_vm8, %v12299_v61, %v12303_v24  ;;  %v13243_v27 = vsel %vm1007_vm8, %v13238_v4, %v13242_v45  ;;  %v12335_v61 = vor.u32 %v12334_v10, %v12330_v23  ;;  %v12339_v24 = vrot.slane %v12337_v55, 1 }
 0x6e0   : > { %11811 = vmatprep.mubr.bf16.mxu1 %v11378_v16  ;;  %v13249_v16 = vrot.slane %v13247_v1, 1  ;;  %v13273_v4 = vrot.slane %v13271_v29, 1  ;;  %v21753_v1 = vld [vmem:[#allocation2 + $0x48] sm:$0xff]   ;;  %v12368_v10 = vshll.u32 %v21745_v19, 16  ;;  %v13269_v45 = vshrl.u32 %v21735_v9, 16 }
 0x6e1   : > { %v13276_v23 = vshll.u32 %v21747_v50, 16  ;;  %v12363_v55 = vrot.slane %v12361_v8, 1 }
 0x6e2   : > { %v13250_v46 = vor.u32 %v13249_v16, %v13245_v28  ;;  %v13274_v16 = vor.u32 %v13273_v4, %v13269_v45  ;;  %v12370_v28 = vrot.slane %v12368_v10, 1 }
 0x6e4   : > { %12759 = vmatmul.mubr.bf16.gmra.mrb[188].mxu0 %v21597_v33  ;;  %v12311_v33 = vor.u32 %v12310_v44, %v12306_v0  ;;  %v12346_v44 = vrot.slane %v12344_v39, 1  ;;  %v13254_v0 = vrot.slane %v13252_v22, 1  ;;  %v21763_v22 = vld [vmem:[#allocation2 + $0xa8] sm:$0xff]  }
 0x6e5   : > { %12766 = vmatprep.mubr.bf16.mxu0 %v12304_v62  ;;  %v13259_v62 = vshll.u32 %v21717_v12, 16 }
 0x6e7   : > { %11812 = vmatmul.mubr.bf16.gmra.mrb[196].mxu1 %v21496_v47  ;;  %v12316_v47 = vsel %vm1007_vm8, %v12311_v33, %v12315_v38  ;;  %v13255_v33 = vsel %vm1007_vm8, %v13250_v46, %v13254_v0  ;;  %v13261_v13 = vrot.slane %v13259_v62, 1  ;;  %v12356_v38 = vshll.u32 %v21727_v26, 16  ;;  %v21765_v46 = vld [vmem:[#allocation2 + $0x50] ss:$0 sps:$4 sm:$0x11]  }
 0x6e8   : > { %11819 = vmatprep.mubr.bf16.mxu1 %v11390_v20  ;;  %v12342_v20 = vshrl.u32 %v21709_v49, 16  ;;  %v12366_v62 = vshrl.u32 %v21745_v19, 16 }
 0x6e9   : > { %v13262_v57 = vor.u32 %v13261_v13, %v13257_v32  ;;  %v13281_v13 = vshrl.u32 %v21753_v1, 16  ;;  %v21776_v32 = vld [vmem:[#allocation2 + $0xb0] ss:$0 sps:$4 sm:$0x11]  }
 0x6ea   : > { %v12347_v30 = vor.u32 %v12346_v44, %v12342_v20  ;;  %v21771_v20 = vld [vmem:[#allocation2 + $0x54] sm:$0xff]   ;;  %v12385_v8 = vshll.u32 %v21776_v32, 16 }
 0x6ec   : > { %12767 = vmatmul.mubr.bf16.gmra.mrb[192].mxu0 %v21630_v34 }
 0x6ed   : > { %12774 = vmatprep.mubr.bf16.mxu0 %v12316_v47  ;;  %v12351_v47 = vrot.slane %v12349_v11, 1  ;;  %v12371_v11 = vor.u32 %v12370_v28, %v12366_v62 }
 0x6ef   : > { %11820 = vmatmul.mubr.bf16.gmra.mrb[200].mxu1 %v21501_v54  ;;  %v12328_v54 = vsel %vm1007_vm8, %v12323_v59, %v12327_v17  ;;  %v12352_v25 = vsel %vm1007_vm8, %v12347_v30, %v12351_v47  ;;  %v13266_v59 = vrot.slane %v13264_v14, 1  ;;  %v13288_v30 = vshll.u32 %v21765_v46, 16 }
 0x6f0   : > { %11827 = vmatprep.mubr.bf16.mxu1 %v11402_v3  ;;  %v12358_v3 = vrot.slane %v12356_v38, 1  ;;  %v13295_v47 = vshll.u32 %v21771_v20, 16 }
 0x6f1   : > { %v13267_v17 = vsel %vm1007_vm8, %v13262_v57, %v13266_v59  ;;  %v21783_v59 = vld [vmem:[#allocation2 + $0x5c] ss:$0 sps:$4 sm:$0x11]  }
 0x6f2   : > { %v13297_v4 = vrot.slane %v13295_v47, 1 }
 0x6f4   : > { %12775 = vmatmul.mubr.bf16.gmra.mrb[196].mxu0 %v21661_v63 }
 0x6f5   : > { %12782 = vmatprep.mubr.bf16.mxu0 %v12328_v54  ;;  %v12359_v54 = vor.u32 %v12358_v3, %v12354_v6  ;;  %v13290_v3 = vrot.slane %v13288_v30, 1  ;;  %v12378_v6 = vshrl.u32 %v21763_v22, 16 }
 0x6f7   : > { %11828 = vmatmul.mubr.bf16.gmra.mrb[204].mxu1 %v21520_v18  ;;  %v12340_v18 = vsel %vm1007_vm8, %v12335_v61, %v12339_v24  ;;  %v13283_v61 = vshll.u32 %v21753_v1, 16  ;;  %v12364_v39 = vsel %vm1007_vm8, %v12359_v54, %v12363_v55  ;;  %v13278_v24 = vrot.slane %v13276_v23, 1  ;;  %v21789_v54 = vld [vmem:[#allocation2 + $0x60] sm:$0xff]  }
 0x6f8   : > { %13729 = vmatprep.mubr.bf16.mxu1 %v13243_v27  ;;  %v21758_v27 = vld [vmem:[#allocation2 + $0xa4] ss:$0 sps:$4 sm:$0x11]   ;;  %v13293_v23 = vshrl.u32 %v21771_v20, 16  ;;  %v13300_v55 = vshll.u32 %v21783_v59, 16  ;;  %v13307_v28 = vshll.u32 %v21789_v54, 16 }
 0x6f9   : > { %v13279_v44 = vsel %vm1007_vm8, %v13274_v16, %v13278_v24  ;;  %v13285_v0 = vrot.slane %v13283_v61, 1  ;;  %v12387_v16 = vrot.slane %v12385_v8, 1  ;;  %v21794_v61 = vld [vmem:[#allocation2 + $0xbc] ss:$0 sps:$4 sm:$0x11]  }
 0x6fa   : > { %v13309_v30 = vrot.slane %v13307_v28, 1 }
 0x6fb   : > { %v13286_v14 = vor.u32 %v13285_v0, %v13281_v13  ;;  %v21801_v0 = vld [vmem:[#allocation2 + $0x68] ss:$0 sps:$4 sm:$0x11]  }
 0x6fc   : > { %12783 = vmatmul.mubr.bf16.gmra.mrb[200].mxu0 %v21675_v36 }
 0x6fd   : > { %12790 = vmatprep.mubr.bf16.mxu0 %v12340_v18  ;;  %v12373_v18 = vshll.u32 %v21758_v27, 16 }
 0x6ff   : > { %13730 = vmatmul.mubr.bf16.vlgmr.msra.gmra.mrb[208].mxu1 %v21681_v42  ;;  %v12375_v38 = vrot.slane %v12373_v18, 1  ;;  %v21799_v18 = vld [vmem:[#allocation2 + $0xc0] sm:$0xff]  }
 0x700   : > { %13737 = vmatprep.mubr.bf16.mxu1 %v13255_v33  ;;  %v12380_v33 = vshll.u32 %v21763_v22, 16  ;;  %v12404_v47 = vshll.u32 %v21799_v18, 16 }
 0x701   : > { %v12376_v57 = vsel %vm1007_vm8, %v12371_v11, %v12375_v38  ;;  %v21807_v38 = vld [vmem:[#allocation2 + $0x6c] sm:$0xff]  }
 0x702   : > { %v12382_v29 = vrot.slane %v12380_v33, 1  ;;  %v12397_v33 = vshll.u32 %v21794_v61, 16 }
 0x704   : > { %12791 = vmatmul.mubr.bf16.gmra.mrb[204].mxu0 %v21691_v41  ;;  %v12383_v10 = vor.u32 %v12382_v29, %v12378_v6  ;;  %v13312_v29 = vshll.u32 %v21801_v0, 16  ;;  %v21812_v6 = vld [vmem:[#allocation2 + $0xc8] ss:$0 sps:$4 sm:$0x11]  }
 0x705   : > { %12798 = vmatprep.mubr.bf16.mxu0 %v12352_v25  ;;  %v21781_v25 = vld [vmem:[#allocation2 + $0xb4] sm:$0xff]  }
 0x706   : > { %v12392_v45 = vshll.u32 %v21781_v25, 16  ;;  %v12388_v24 = vsel %vm1007_vm8, %v12383_v10, %v12387_v16  ;;  %v12390_v11 = vshrl.u32 %v21781_v25, 16  ;;  %v12406_v10 = vrot.slane %v12404_v47, 1 }
 0x707   : > { %13738 = vmatmul.mubr.bf16.gmra.mrb[212].mxu1 %v21699_v2  ;;  %v12409_v16 = vshll.u32 %v21812_v6, 16 }
 0x708   : > { %13745 = vmatprep.mubr.bf16.mxu1 %v13267_v17  ;;  %v13291_v17 = vsel %vm1007_vm8, %v13286_v14, %v13290_v3  ;;  %v12394_v62 = vrot.slane %v12392_v45, 1  ;;  %v12399_v3 = vrot.slane %v12397_v33, 1  ;;  %v13314_v45 = vrot.slane %v13312_v29, 1 }
 0x709   : > { %v12411_v33 = vrot.slane %v12409_v16, 1  ;;  %v21841_v16 = vld [vmem:[#allocation2 + $0x8c] ss:$0 sps:$4 sm:$0x11]  }
 0x70a   : > { %v12395_v14 = vor.u32 %v12394_v62, %v12390_v11 }
 0x70c   : > { %12799 = vmatmul.mubr.bf16.gmra.mrb[208].mxu0 %v21709_v49 }
 0x70d   : > { %12806 = vmatprep.mubr.bf16.mxu0 %v12364_v39  ;;  %v13298_v39 = vor.u32 %v13297_v4, %v13293_v23  ;;  %v12400_v4 = vsel %vm1007_vm8, %v12395_v14, %v12399_v3  ;;  %v21817_v23 = vld [vmem:[#allocation2 + $0x74] ss:$0 sps:$4 sm:$0x11]  }
 0x70e   : > { %v13324_v11 = vshll.u32 %v21817_v23, 16 }
 0x70f   : > { %13746 = vmatmul.mubr.bf16.gmra.mrb[216].mxu1 %v21717_v12 }
 0x710   : > { %13753 = vmatprep.mubr.bf16.mxu1 %v13279_v44  ;;  %v13302_v44 = vrot.slane %v13300_v55, 1  ;;  %v12402_v55 = vshrl.u32 %v21799_v18, 16  ;;  %v13326_v47 = vrot.slane %v13324_v11, 1  ;;  %v13348_v11 = vshll.u32 %v21841_v16, 16 }
 0x712   : > { %v13303_v13 = vsel %vm1007_vm8, %v13298_v39, %v13302_v44  ;;  %v12407_v62 = vor.u32 %v12406_v10, %v12402_v55  ;;  %v13317_v44 = vshrl.u32 %v21807_v38, 16 }
 0x714   : > { %12807 = vmatmul.mubr.bf16.gmra.mrb[212].mxu0 %v21727_v26  ;;  %v12412_v14 = vsel %vm1007_vm8, %v12407_v62, %v12411_v33  ;;  %v21845_v62 = vld [vmem:[#allocation2 + $0x90] sm:$0xff]   ;;  %v17633_v33 = vld [vmem:[%s22365_s5 + $0x208] sm:$0xff]  }
 0x715   : > { %12814 = vmatprep.mubr.bf16.mxu0 %v12376_v57  ;;  %v13305_v57 = vshrl.u32 %v21789_v54, 16 }
 0x717   : > { %13754 = vmatmul.mubr.bf16.gmra.mrb[220].mxu1 %v21735_v9  ;;  %v13310_v8 = vor.u32 %v13309_v30, %v13305_v57  ;;  %v21830_v57 = vld [vmem:[#allocation2 + $0x80] ss:$0 sps:$4 sm:$0x11]  }
 0x718   : > { %13761 = vmatprep.mubr.bf16.mxu1 %v13291_v17  ;;  %v13319_v17 = vshll.u32 %v21807_v38, 16 }
 0x719   : > { %v13315_v39 = vsel %vm1007_vm8, %v13310_v8, %v13314_v45  ;;  %v21834_v8 = vld [vmem:[#allocation2 + $0x84] sm:$0xff]  }
 0x71a   : > { %v13321_v28 = vrot.slane %v13319_v17, 1  ;;  %v13343_v45 = vshll.u32 %v21834_v8, 16 }
 0x71c   : > { %12815 = vmatmul.mubr.bf16.gmra.mrb[216].mxu0 %v21745_v19 }
 0x71d   : > { %12822 = vmatprep.mubr.bf16.mxu0 %v12388_v24  ;;  %v21823_v24 = vld [vmem:[#allocation2 + $0x78] sm:$0xff]  }
 0x71e   : > { %v13331_v30 = vshll.u32 %v21823_v24, 16  ;;  %v13329_v17 = vshrl.u32 %v21823_v24, 16 }
 0x71f   : > { %13762 = vmatmul.mubr.bf16.gmra.mrb[224].mxu1 %v21753_v1 }
 0x720   : > { %13769 = vmatprep.mubr.bf16.mxu1 %v13303_v13  ;;  %v13322_v13 = vor.u32 %v13321_v28, %v13317_v44  ;;  %v13333_v3 = vrot.slane %v13331_v30, 1  ;;  %v13345_v28 = vrot.slane %v13343_v45, 1  ;;  %v13341_v44 = vshrl.u32 %v21834_v8, 16 }
 0x721   : > { %v13350_v30 = vrot.slane %v13348_v11, 1  ;;  %v21880_v11 = vld [vmem:[#allocation2 + $0xa8] sm:$0xff]  }
 0x722   : > { %v13327_v29 = vsel %vm1007_vm8, %v13322_v13, %v13326_v47  ;;  %v13334_v10 = vor.u32 %v13333_v3, %v13329_v17  ;;  %v13346_v13 = vor.u32 %v13345_v28, %v13341_v44  ;;  %v17636_v47 = vld [vmem:[%s22365_s5 + $0x210] sm:$0xff]   ;;  %v21863_v17 = vld [vmem:[#allocation2 + $0x9c] sm:$0xff]  }
 0x724   : > { %12823 = vmatmul.mubr.bf16.gmra.mrb[220].mxu0 %v21763_v22 }
 0x725   : > { %12830 = vmatprep.mubr.bf16.mxu0 %v12400_v4  ;;  %v13336_v4 = vshll.u32 %v21830_v57, 16 }
 0x727   : > { %13770 = vmatmul.mubr.bf16.gmra.mrb[228].mxu1 %v21771_v20  ;;  %v13338_v55 = vrot.slane %v13336_v4, 1 }
 0x728   : > { %13777 = vmatprep.mubr.bf16.mxu1 %v13315_v39 }
 0x729   : > { %v13339_v39 = vsel %vm1007_vm8, %v13334_v10, %v13338_v55  ;;  %v13367_v10 = vshll.u32 %v21863_v17, 16  ;;  %v21873_v55 = vld [vmem:[#allocation2 + $0xa4] ss:$0 sps:$4 sm:$0x11]  }
 0x72b   : > { %v13369_v44 = vrot.slane %v13367_v10, 1 }
 0x72c   : > { %12831 = vmatmul.mubr.bf16.gmra.mrb[224].mxu0 %v21781_v25 }
 0x72d   : > { %12838 = vmatprep.mubr.bf16.mxu0 %v12412_v14  ;;  %v21856_v14 = vld [vmem:[#allocation2 + $0x98] ss:$0 sps:$4 sm:$0x11]  }
 0x72f   : > { %13778 = vmatmul.mubr.bf16.gmra.mrb[232].mxu1 %v21789_v54 }
 0x730   : > { %13785 = vmatprep.mubr.bf16.mxu1 %v13327_v29  ;;  %v13351_v29 = vsel %vm1007_vm8, %v13346_v13, %v13350_v30  ;;  %v13372_v13 = vshll.u32 %v21873_v55, 16 }
 0x734   : > { %12839 = vmatmul.mubr.bf16.gmra.mrb[228].mxu0 %v21799_v18 }
 0x735   : > { %16645 = vmatprep.mubr.bf16.mxu0 %v21608_v53  ;;  %v13355_v53 = vshll.u32 %v21845_v62, 16 }
 0x737   : > { %13786 = vmatmul.mubr.bf16.gmra.mrb[236].mxu1 %v21807_v38  ;;  %v13357_v3 = vrot.slane %v13355_v53, 1  ;;  %v17645_v53 = vld [vmem:[%s22365_s5 + $0x228] sm:$0xff]  }
 0x738   : > { %13793 = vmatprep.mubr.bf16.mxu1 %v13339_v39  ;;  %v17642_v39 = vld [vmem:[%s22365_s5 + $0x220] sm:$0xff]  }
 0x73c   : > { %16646 = vmatmul.mubr.bf16.vlgmr.msra.gmra.mrb[136].mxu0 %v21622_v5  ;;  %v13353_v5 = vshrl.u32 %v21845_v62, 16 }
 0x73d   : > { %16649 = vmatprep.mubr.bf16.mxu0 %v21626_v31  ;;  %16678 = vmatpush3.bf16.msra.mxu0 %v21638_v43  ;;  %v13360_v31 = vshll.u32 %v21856_v14, 16  ;;  %v17639_v43 = vld [vmem:[%s22365_s5 + $0x218] sm:$0xff]  }
 0x73e   : > { %16679 = vmatprep.subr.bf16.mxu0 %v17633_v33  ;;  %v13358_v4 = vor.u32 %v13357_v3, %v13353_v5  ;;  %v13374_v3 = vrot.slane %v13372_v13, 1  ;;  %v21892_v5 = vld [vmem:[#allocation2 + $0xb0] ss:$0 sps:$4 sm:$0x11]   ;;  %v13377_v13 = vshrl.u32 %v21880_v11, 16 }
 0x73f   : > { %13794 = vmatmul.mubr.bf16.gmra.mrb[240].mxu1 %v21823_v24  ;;  %v13362_v45 = vrot.slane %v13360_v31, 1 }
 0x740   : > { %13801 = vmatprep.mubr.bf16.mxu1 %v13351_v29 }
 0x741   : > { %16680 = vmatpush3.bf16.msra.mxu0 %v17633_v33  ;;  %v13363_v28 = vsel %vm1007_vm8, %v13358_v4, %v13362_v45  ;;  %v13365_v33 = vshrl.u32 %v21863_v17, 16  ;;  %v17646_v4 = vld [vmem:[%s22365_s5 + $0x230] sm:$0xff]  }
 0x742   : > { %16681 = vmatprep.subr.bf16.mxu0 %v17636_v47 }
 0x743   : > { %v13370_v30 = vor.u32 %v13369_v44, %v13365_v33  ;;  %v12451_v44 = vrot.slane %v21670_v58, 1  ;;  %v12454_v33 = vrot.slane %v21686_v7, 1  ;;  %v21917_v7 = vld [vmem:[#allocation2 + $0xbc] ss:$0 sps:$4 sm:$0x11]  }
 0x744   : > { %16650 = vmatmul.mubr.bf16.gmra.mrb[140].mxu0 %v21641_v51  ;;  %v12447_v51 = vrot.slane %v21630_v34, 1 }
 0x745   : > { %16653 = vmatprep.mubr.bf16.mxu0 %v21644_v37  ;;  %16682 = vmatpush3.bf16.msra.mxu0 %v17636_v47  ;;  %v12448_v37 = vrot.slane %v21655_v60, 1  ;;  %v13379_v47 = vshll.u32 %v21880_v11, 16 }
 0x746   : > { %16683 = vmatprep.subr.bf16.mxu0 %v17639_v43 }
 0x747   : > { %13802 = vmatmul.mubr.bf16.gmra.mrb[244].mxu1 %v21834_v8  ;;  %v12449_v29 = vsel %vm1216_vm9, %v12447_v51, %v12448_v37  ;;  %v13381_v10 = vrot.slane %v13379_v47, 1  ;;  %v21903_v51 = vld [vmem:[#allocation2 + $0xb4] sm:$0xff]   ;;  %v12453_v37 = vrot.slane %v21675_v36, 1 }
 0x748   : > { %13809 = vmatprep.mubr.bf16.mxu1 %v13363_v28  ;;  %v12450_v28 = vrot.slane %v21661_v63, 1  ;;  %v17649_v63 = vld [vmem:[%s22365_s5 + $0x238] sm:$0xff]   ;;  %v13391_v47 = vshll.u32 %v21903_v51, 16 }
 0x749   : > { %16684 = vmatpush3.bf16.msra.mxu0 %v17639_v43  ;;  %v13382_v58 = vor.u32 %v13381_v10, %v13377_v13  ;;  %v12455_v36 = vsel %vm1216_vm9, %v12453_v37, %v12454_v33  ;;  %v12459_v10 = vrot.slane %v21709_v49, 1 }
 0x74a   : > { %16685 = vmatprep.subr.bf16.mxu0 %v17642_v39 }
 0x74c   : > { %16654 = vmatmul.mubr.bf16.gmra.mrb[144].mxu0 %v21653_v48  ;;  %v15973_v34 = vpop.f32.mrb[144].mxu1  ;;  %v13375_v48 = vsel %vm1007_vm8, %v13370_v30, %v13374_v3  ;;  %v12452_v30 = vsel %vm1216_vm9, %v12450_v28, %v12451_v44  ;;  %v13393_v3 = vrot.slane %v13391_v47, 1  ;;  %v13389_v28 = vshrl.u32 %v21903_v51, 16  ;;  %v21936_v47 = vld [vmem:[#allocation2 + $0xcc] sm:$0xff]  }
 0x74d   : > { %16657 = vmatprep.mubr.bf16.mxu0 %v12449_v29  ;;  %v15974_v60 = vpop.f32.mrb[145].mxu1  ;;  %16686 = vmatpush3.bf16.msra.mxu0 %v17642_v39  ;;  %v13384_v29 = vshll.u32 %v21892_v5, 16 }
 0x74e   : > { %v21894_v31 = vadd.f32 %v15974_v60, %v15973_v34  ;;  %v15976_v43 = vpop.f32.mrb[146].mxu1  ;;  %16687 = vmatprep.subr.bf16.mxu0 %v17645_v53  ;;  %v12456_v60 = vrot.slane %v21691_v41, 1  ;;  %v13394_v33 = vor.u32 %v13393_v3, %v13389_v28  ;;  %v12463_v3 = vrot.slane %v21740_v52, 1  ;;  %v21948_v28 = vld [vmem:[#allocation2 + $0xd4] ss:$0 sps:$4 sm:$0x11]  }
 0x74f   : > { %13810 = vmatmul.mubr.bf16.gmra.mrb[248].mxu1 %v21845_v62  ;;  %v15977_v45 = vpop.f32.mrb[147].mxu1  ;;  %v13386_v34 = vrot.slane %v13384_v29, 1 }
 0x750   : > { %13817 = vmatprep.mubr.bf16.mxu1 %v13375_v48  ;;  %v21905_v39 = vadd.f32 %v15977_v45, %v15976_v43  ;;  %v12457_v43 = vrot.slane %v21704_v40, 1  ;;  %v21923_v48 = vld [vmem:[#allocation2 + $0xc0] sm:$0xff]   ;;  %v12460_v45 = vrot.slane %v21722_v35, 1 }
 0x751   : > { %16688 = vmatpush3.bf16.msra.mxu0 %v17645_v53  ;;  %v13387_v53 = vsel %vm1007_vm8, %v13382_v58, %v13386_v34  ;;  %v13403_v41 = vshll.u32 %v21923_v48, 16 }
 0x752   : > { %16689 = vmatprep.subr.bf16.mxu0 %v17646_v4  ;;  %v12458_v13 = vsel %vm1216_vm9, %v12456_v60, %v12457_v43  ;;  %v12461_v49 = vsel %vm1216_vm9, %v12459_v10, %v12460_v45  ;;  %v12465_v60 = vrot.slane %v21745_v19, 1  ;;  %v12466_v43 = vrot.slane %v21758_v27, 1 }
 0x753   : > { %v13405_v34 = vrot.slane %v13403_v41, 1  ;;  %v13401_v10 = vshrl.u32 %v21923_v48, 16 }
 0x754   : > { %16658 = vmatmul.mubr.bf16.gmra.mrb[148].mxu0 %v12452_v30  ;;  %v21934_v30 = vld [vmem:[#allocation2 + $0xc8] ss:$0 sps:$4 sm:$0x11]   ;;  %v12467_v19 = vsel %vm1216_vm9, %v12465_v60, %v12466_v43  ;;  %v12472_v60 = vrot.slane %v21794_v61, 1  ;;  %v12475_v61 = vrot.slane %v21812_v6, 1  ;;  %v13446_v6 = vrot.slane %v21717_v12, 1 }
 0x755   : > { %16661 = vmatprep.mubr.bf16.mxu0 %v12455_v36  ;;  %16690 = vmatpush3.bf16.msra.mxu0 %v17646_v4  ;;  %v13396_v4 = vshll.u32 %v21917_v7, 16  ;;  %v13408_v45 = vshll.u32 %v21934_v30, 16  ;;  %v13452_v12 = vrot.slane %v21753_v1, 1  ;;  %v13458_v1 = vrot.slane %v21789_v54, 1 }
 0x756   : > { %16691 = vmatprep.subr.bf16.mxu0 %v17649_v63  ;;  %v13462_v54 = vrot.slane %v21817_v23, 1 }
 0x757   : > { %13818 = vmatmul.mubr.bf16.gmra.mrb[252].mxu1 %v21863_v17  ;;  %v13398_v35 = vrot.slane %v13396_v4, 1  ;;  %v13415_v4 = vshll.u32 %v21936_v47, 16  ;;  %v13410_v41 = vrot.slane %v13408_v45, 1 }
 0x758   : > { %13825 = vmatprep.mubr.bf16.mxu1 %v13387_v53  ;;  %v12462_v53 = vrot.slane %v21727_v26, 1 }
 0x759   : > { %16692 = vmatpush3.bf16.msra.mxu0 %v17649_v63  ;;  %v13399_v36 = vsel %vm1007_vm8, %v13394_v33, %v13398_v35  ;;  %v13406_v33 = vor.u32 %v13405_v34, %v13401_v10  ;;  %v12468_v34 = vrot.slane %v21763_v22, 1 }
 0x75a   : > { %v15979_v44 = vpop.f32.mrb[148].mxu1  ;;  %v12464_v26 = vsel %vm1216_vm9, %v12462_v53, %v12463_v3  ;;  %v12469_v53 = vrot.slane %v21776_v32, 1  ;;  %v12471_v3 = vrot.slane %v21781_v25, 1  ;;  %v12474_v25 = vrot.slane %v21799_v18, 1 }
 0x75b   : > { %v15980_v37 = vpop.f32.mrb[149].mxu1 }
 0x75c   : > { %v21931_v40 = vadd.f32 %v15980_v37, %v15979_v44  ;;  %v15982_v29 = vpop.f32.mrb[150].mxu1  ;;  %16662 = vmatmul.mubr.bf16.gmra.mrb[152].mxu0 %v12458_v13 }
 0x75d   : > { %v15983_v58 = vpop.f32.mrb[151].mxu1  ;;  %16665 = vmatprep.mubr.bf16.mxu0 %v12461_v49  ;;  %v13417_v49 = vrot.slane %v13415_v4, 1 }
 0x75e   : > { %v21938_v63 = vadd.f32 %v15983_v58, %v15982_v29  ;;  %v13413_v29 = vshrl.u32 %v21936_v47, 16  ;;  %v13420_v58 = vshll.u32 %v21948_v28, 16 }
 0x75f   : > { %13826 = vmatmul.mubr.bf16.gmra.mrb[0].mxu1 %v21880_v11 }
 0x760   : > { %13833 = vmatprep.mubr.bf16.mxu1 %v13399_v36  ;;  %v13411_v36 = vsel %vm1007_vm8, %v13406_v33, %v13410_v41  ;;  %v13418_v43 = vor.u32 %v13417_v49, %v13413_v29  ;;  %v13422_v10 = vrot.slane %v13420_v58, 1  ;;  %v12473_v33 = vsel %vm1216_vm9, %v12471_v3, %v12472_v60 }
 0x761   : > { %v12476_v49 = vsel %vm1216_vm9, %v12474_v25, %v12475_v61  ;;  %v13447_v3 = vrot.slane %v21729_v21, 1  ;;  %v13453_v21 = vrot.slane %v21765_v46, 1  ;;  %v13459_v46 = vrot.slane %v21801_v0, 1  ;;  %v22019_v0 = vld [vmem:[%s22366_s6] ss:$0 sm:$0xff] }
 0x762   : > { %v15985_v44 = vpop.f32.mrb[152].mxu1  ;;  %v13423_v32 = vsel %vm1007_vm8, %v13418_v43, %v13422_v10 }
 0x763   : > { %v15986_v37 = vpop.f32.mrb[153].mxu1 }
 0x764   : > { %v21952_v13 = vadd.f32 %v15986_v37, %v15985_v44  ;;  %v15988_v52 = vpop.f32.mrb[154].mxu1  ;;  %16666 = vmatmul.mubr.bf16.gmra.mrb[156].mxu0 %v12464_v26  ;;  %v12470_v44 = vsel %vm1216_vm9, %v12468_v34, %v12469_v53 }
 0x765   : > { %v15989_v27 = vpop.f32.mrb[155].mxu1  ;;  %16669 = vmatprep.mubr.bf16.mxu0 %v12467_v19  ;;  %v13440_v19 = vrot.slane %v21681_v42, 1  ;;  %v13443_v42 = vrot.slane %v21699_v2, 1  ;;  %v13449_v2 = vrot.slane %v21735_v9, 1  ;;  %v13455_v9 = vrot.slane %v21771_v20, 1 }
 0x766   : > { %v21957_v35 = vadd.f32 %v15989_v27, %v15988_v52  ;;  %v13441_v27 = vrot.slane %v21693_v15, 1  ;;  %v13444_v15 = vrot.slane %v21711_v56, 1  ;;  %v13450_v56 = vrot.slane %v21747_v50, 1 }
 0x767   : > { %13834 = vmatmul.mubr.bf16.gmra.mrb[4].mxu1 %v21903_v51  ;;  %v13456_v50 = vrot.slane %v21783_v59, 1  ;;  %v13461_v59 = vrot.slane %v21807_v38, 1  ;;  %v16913_v38 = vadd.f32 %v21905_v39, %v22019_v0  ;;  %v13467_v39 = vrot.slane %v21834_v8, 1 }
 0x768   : > { %13841 = vmatprep.mubr.bf16.mxu1 %v13411_v36  ;;  %v13442_v34 = vsel %vm1216_vm9, %v13440_v19, %v13441_v27  ;;  %v13445_v10 = vsel %vm1216_vm9, %v13443_v42, %v13444_v15  ;;  %v13451_v25 = vsel %vm1216_vm9, %v13449_v2, %v13450_v56  ;;  %v13454_v27 = vsel %vm1216_vm9, %v13452_v12, %v13453_v21 }
 0x769   : > { %v13460_v15 = vsel %vm1216_vm9, %v13458_v1, %v13459_v46  ;;  %v13471_v1 = vrot.slane %v21856_v14, 1  ;;  %v16901_v46 = vadd.f32 %v21931_v40, %v22019_v0 }
 0x76a   : > { %v15991_v45 = vpop.f32.mrb[156].mxu1 }
 0x76b   : > { %v15992_v4 = vpop.f32.mrb[157].mxu1 }
 0x76c   : > { %v21966_v37 = vadd.f32 %v15992_v4, %v15991_v45  ;;  %v15994_v26 = vpop.f32.mrb[158].mxu1  ;;  %16670 = vmatmul.mubr.bf16.gmra.mrb[160].mxu0 %v12470_v44  ;;  %v13448_v44 = vsel %vm1216_vm9, %v13446_v6, %v13447_v3 }
 0x76d   : > { %v15995_v22 = vpop.f32.mrb[159].mxu1  ;;  %16673 = vmatprep.mubr.bf16.mxu0 %v12473_v33 }
 0x76e   : > { %v21970_v52 = vadd.f32 %v15995_v22, %v15994_v26 }
 0x76f   : > { %13842 = vmatmul.mubr.bf16.gmra.mrb[8].mxu1 %v21923_v48 }
 0x770   : > { %13849 = vmatprep.mubr.bf16.mxu1 %v13423_v32 }
 0x772   : > { %v15997_v41 = vpop.f32.mrb[160].mxu1 }
 0x773   : > { %v15998_v29 = vpop.f32.mrb[161].mxu1 }
 0x774   : > { %v21978_v58 = vadd.f32 %v15998_v29, %v15997_v41  ;;  %v16000_v36 = vpop.f32.mrb[162].mxu1  ;;  %16674 = vmatmul.mubr.bf16.gmra.mrb[164].mxu0 %v12476_v49 }
 0x775   : > { %v16001_v53 = vpop.f32.mrb[163].mxu1  ;;  %16693 = vmatprep.mubr.bf16.mxu0 %v13442_v34  ;;  %v13457_v34 = vsel %vm1216_vm9, %v13455_v9, %v13456_v50  ;;  %v13470_v50 = vrot.slane %v21845_v62, 1 }
 0x776   : > { %v21981_v18 = vadd.f32 %v16001_v53, %v16000_v36 }
 0x777   : > { %13850 = vmatmul.mubr.bf16.gmra.mrb[12].mxu1 %v21936_v47  ;;  %v13472_v14 = vsel %vm1216_vm9, %v13470_v50, %v13471_v1  ;;  %v13482_v1 = vrot.slane %v21923_v48, 1 }
 0x77a   : > { %v16003_v60 = vpop.f32.mrb[164].mxu1 }
 0x77b   : > { %v16004_v43 = vpop.f32.mrb[165].mxu1 }
 0x77c   : > { %v21989_v45 = vadd.f32 %v16004_v43, %v16003_v60  ;;  %v16006_v4 = vpop.f32.mrb[166].mxu1  ;;  %16694 = vmatmul.mubr.bf16.vlgmr.msra.gmra.mrb[136].mxu0 %v13445_v10  ;;  %v13464_v43 = vrot.slane %v21823_v24, 1  ;;  %v13465_v10 = vrot.slane %v21830_v57, 1 }
 0x77d   : > { %v16007_v26 = vpop.f32.mrb[167].mxu1  ;;  %16697 = vmatprep.mubr.bf16.mxu0 %v13448_v44 }
 0x77e   : > { %v21992_v33 = vadd.f32 %v16007_v26, %v16006_v4  ;;  %v16905_v4 = vadd.f32 %v21894_v31, %v22019_v0  ;;  %v13466_v57 = vsel %vm1216_vm9, %v13464_v43, %v13465_v10  ;;  %v13474_v10 = vrot.slane %v21873_v55, 1 }
 0x782   : > { %v16009_v22 = vpop.f32.mrb[168].mxu1 }
 0x783   : > { %v16010_v32 = vpop.f32.mrb[169].mxu1 }
 0x784   : > { %v21999_v61 = vadd.f32 %v16010_v32, %v16009_v22  ;;  %v16012_v19 = vpop.f32.mrb[170].mxu1  ;;  %16698 = vmatmul.mubr.bf16.gmra.mrb[140].mxu0 %v13451_v25  ;;  %v13463_v22 = vsel %vm1216_vm9, %v13461_v59, %v13462_v54 }
 0x785   : > { %v16013_v41 = vpop.f32.mrb[171].mxu1  ;;  %16701 = vmatprep.mubr.bf16.mxu0 %v13454_v27 }
 0x786   : > { %v22002_v29 = vadd.f32 %v16013_v41, %v16012_v19  ;;  %v13468_v41 = vrot.slane %v21841_v16, 1 }
 0x788   : > { %v13469_v16 = vsel %vm1216_vm9, %v13467_v39, %v13468_v41 }
 0x78a   : > { %v16015_v49 = vpop.f32.mrb[172].mxu1 }
 0x78b   : > { %v16016_v36 = vpop.f32.mrb[173].mxu1 }
 0x78c   : > { %v22009_v53 = vadd.f32 %v16016_v36, %v16015_v49  ;;  %v16018_v42 = vpop.f32.mrb[174].mxu1  ;;  %16702 = vmatmul.mubr.bf16.gmra.mrb[144].mxu0 %v13457_v34 }
 0x78d   : > { %v16019_v6 = vpop.f32.mrb[175].mxu1  ;;  %16705 = vmatprep.mubr.bf16.mxu0 %v13460_v15  ;;  %v16909_v15 = vadd.f32 %v21938_v63, %v22019_v0  ;;  %v13473_v63 = vrot.slane %v21863_v17, 1 }
 0x78e   : > { %v22012_v3 = vadd.f32 %v16019_v6, %v16018_v42 }
 0x78f   : > { %v16109_v20 = vpop.f32.mrb[168].mxu0  ;;  %v13475_v55 = vsel %vm1216_vm9, %v13473_v63, %v13474_v10 }
 0x790   : > { %v16110_v60 = vpop.f32.mrb[169].mxu0 }
 0x791   : > { %v16111_v44 = vadd.f32 %v16110_v60, %v16109_v20  ;;  %v16112_v26 = vpop.f32.mrb[170].mxu0 }
 0x792   : > { %v16021_v2 = vpop.f32.mrb[176].mxu1  ;;  %v16113_v56 = vpop.f32.mrb[171].mxu0 }
 0x793   : > { %v16022_v23 = vpop.f32.mrb[177].mxu1  ;;  %v22027_v12 = vadd.f32 %v16905_v4, %v16111_v44  ;;  %v16114_v21 = vadd.f32 %v16113_v56, %v16112_v26  ;;  %v13476_v44 = vrot.slane %v21880_v11, 1  ;;  %v13477_v26 = vrot.slane %v21892_v5, 1 }
 0x794   : > { %v22030_v32 = vadd.f32 %v16022_v23, %v16021_v2  ;;  %v16024_v24 = vpop.f32.mrb[178].mxu1  ;;  %16706 = vmatmul.mubr.bf16.gmra.mrb[148].mxu0 %v13463_v22  ;;  %v16921_v2 = vadd.f32 %v21952_v13, %v22019_v0  ;;  %v16929_v22 = vadd.f32 %v21957_v35, %v22019_v0  ;;  %v13479_v35 = vrot.slane %v21903_v51, 1 }
 0x795   : > { %v16025_v31 = vpop.f32.mrb[179].mxu1  ;;  %v22033_v25 = vadd.f32 %v16913_v38, %v16114_v21  ;;  %16709 = vmatprep.mubr.bf16.mxu0 %v13466_v57  ;;  %v13478_v5 = vsel %vm1216_vm9, %v13476_v44, %v13477_v26 }
 0x796   : > { %v22035_v19 = vadd.f32 %v16025_v31, %v16024_v24 }
 0x797   : > { %v16115_v27 = vpop.f32.mrb[172].mxu0 }
 0x798   : > { %v16116_v9 = vpop.f32.mrb[173].mxu0 }
 0x799   : > { %v16117_v49 = vadd.f32 %v16116_v9, %v16115_v27  ;;  %v16118_v36 = vpop.f32.mrb[174].mxu0  ;;  %v13480_v9 = vrot.slane %v21917_v7, 1 }
 0x79a   : > { %v16027_v34 = vpop.f32.mrb[180].mxu1  ;;  %v16119_v42 = vpop.f32.mrb[175].mxu0 }
 0x79b   : > { %v16028_v6 = vpop.f32.mrb[181].mxu1  ;;  %v22045_v20 = vadd.f32 %v16901_v46, %v16117_v49  ;;  %v16120_v8 = vadd.f32 %v16119_v42, %v16118_v36  ;;  %v13483_v46 = vrot.slane %v21934_v30, 1  ;;  %v16917_v49 = vadd.f32 %v21966_v37, %v22019_v0 }
 0x79c   : > { %v22048_v59 = vadd.f32 %v16028_v6, %v16027_v34  ;;  %v16030_v62 = vpop.f32.mrb[182].mxu1  ;;  %16710 = vmatmul.mubr.bf16.gmra.mrb[152].mxu0 %v13469_v16  ;;  %v16925_v6 = vadd.f32 %v21970_v52, %v22019_v0  ;;  %v13481_v7 = vsel %vm1216_vm9, %v13479_v35, %v13480_v9  ;;  %v13486_v52 = vrot.slane %v21948_v28, 1 }
 0x79d   : > { %v16031_v40 = vpop.f32.mrb[183].mxu1  ;;  %v22051_v54 = vadd.f32 %v16909_v15, %v16120_v8  ;;  %16713 = vmatprep.mubr.bf16.mxu0 %v13472_v14  ;;  %v13484_v30 = vsel %vm1216_vm9, %v13482_v1, %v13483_v46 }
 0x79e   : > { %v22053_v60 = vadd.f32 %v16031_v40, %v16030_v62  ;;  %v13485_v40 = vrot.slane %v21936_v47, 1 }
 0x79f   : > { %v16121_v43 = vpop.f32.mrb[176].mxu0 }
 0x7a0   : > { %v16122_v4 = vpop.f32.mrb[177].mxu0 }
 0x7a1   : > { %v16123_v56 = vadd.f32 %v16122_v4, %v16121_v43  ;;  %v16124_v38 = vpop.f32.mrb[178].mxu0  ;;  %v16937_v4 = vadd.f32 %v21978_v58, %v22019_v0 }
 0x7a2   : > { %v16033_v23 = vpop.f32.mrb[184].mxu1  ;;  %v16125_v21 = vpop.f32.mrb[179].mxu0 }
 0x7a3   : > { %v16034_v24 = vpop.f32.mrb[185].mxu1  ;;  %v22063_v57 = vadd.f32 %v16921_v2, %v16123_v56  ;;  %v16126_v17 = vadd.f32 %v16125_v21, %v16124_v38  ;;  %v13487_v2 = vsel %vm1216_vm9, %v13485_v40, %v13486_v52 }
 0x7a4   : > { %v22066_v31 = vadd.f32 %v16034_v24, %v16033_v23  ;;  %v16036_v11 = vpop.f32.mrb[186].mxu1  ;;  %16714 = vmatmul.mubr.bf16.gmra.mrb[156].mxu0 %v13475_v55  ;;  %v16945_v23 = vadd.f32 %v21981_v18, %v22019_v0 }
 0x7a5   : > { %v16037_v13 = vpop.f32.mrb[187].mxu1  ;;  %v22069_v27 = vadd.f32 %v16929_v22, %v16126_v17  ;;  %16717 = vmatprep.mubr.bf16.mxu0 %v13478_v5 }
 0x7a6   : > { %v22071_v39 = vadd.f32 %v16037_v13, %v16036_v11  ;;  %v16933_v13 = vadd.f32 %v21989_v45, %v22019_v0 }
 0x7a7   : > { %v16127_v41 = vpop.f32.mrb[180].mxu0 }
 0x7a8   : > { %v16128_v50 = vpop.f32.mrb[181].mxu0 }
 0x7a9   : > { %v16129_v36 = vadd.f32 %v16128_v50, %v16127_v41  ;;  %v16130_v34 = vpop.f32.mrb[182].mxu0  ;;  %v16941_v50 = vadd.f32 %v21992_v33, %v22019_v0 }
 0x7aa   : > { %v16039_v42 = vpop.f32.mrb[188].mxu1  ;;  %v16131_v15 = vpop.f32.mrb[183].mxu0 }
 0x7ab   : > { %v16040_v8 = vpop.f32.mrb[189].mxu1  ;;  %v22081_v16 = vadd.f32 %v16917_v49, %v16129_v36  ;;  %v16132_v51 = vadd.f32 %v16131_v15, %v16130_v34 }
 0x7ac   : > { %v22084_v62 = vadd.f32 %v16040_v8, %v16039_v42  ;;  %v16042_v48 = vpop.f32.mrb[190].mxu1  ;;  %16718 = vmatmul.mubr.bf16.gmra.mrb[160].mxu0 %v13481_v7 }
 0x7ad   : > { %v16043_v37 = vpop.f32.mrb[191].mxu1  ;;  %v22087_v14 = vadd.f32 %v16925_v6, %v16132_v51  ;;  %16721 = vmatprep.mubr.bf16.mxu0 %v13484_v30  ;;  %v16953_v51 = vadd.f32 %v21999_v61, %v22019_v0 }
 0x7ae   : > { %v22091_v43 = vadd.f32 %v16043_v37, %v16042_v48  ;;  %v16961_v37 = vadd.f32 %v22002_v29, %v22019_v0 }
 0x7af   : > { %v16133_v63 = vpop.f32.mrb[184].mxu0 }
 0x7b0   : > { %v16134_v10 = vpop.f32.mrb[185].mxu0 }
 0x7b1   : > { %v16135_v44 = vadd.f32 %v16134_v10, %v16133_v63  ;;  %v16136_v26 = vpop.f32.mrb[186].mxu0 }
 0x7b2   : > { %v16045_v56 = vpop.f32.mrb[192].mxu1  ;;  %v16137_v38 = vpop.f32.mrb[187].mxu0 }
 0x7b3   : > { %v16046_v21 = vpop.f32.mrb[193].mxu1  ;;  %v22098_v47 = vadd.f32 %v16937_v4, %v16135_v44  ;;  %v16138_v28 = vadd.f32 %v16137_v38, %v16136_v26  ;;  %v16949_v38 = vadd.f32 %v22009_v53, %v22019_v0 }
 0x7b4   : > { %v22100_v22 = vadd.f32 %v16046_v21, %v16045_v56  ;;  %v16048_v24 = vpop.f32.mrb[194].mxu1  ;;  %16722 = vmatmul.mubr.bf16.gmra.mrb[164].mxu0 %v13487_v2 }
 0x7b5   : > { %v16049_v17 = vpop.f32.mrb[195].mxu1  ;;  %v22102_v55 = vadd.f32 %v16945_v23, %v16138_v28 }
 0x7b6   : > { %v22104_v58 = vadd.f32 %v16049_v17, %v16048_v24  ;;  %v16957_v24 = vadd.f32 %v22012_v3, %v22019_v0 }
 0x7b7   : > { %v16139_v11 = vpop.f32.mrb[188].mxu0 }
 0x7b8   : > { %v16140_v5 = vpop.f32.mrb[189].mxu0 }
 0x7b9   : > { %v16141_v41 = vadd.f32 %v16140_v5, %v16139_v11  ;;  %v16142_v18 = vpop.f32.mrb[190].mxu0 }
 0x7ba   : > { %v16051_v35 = vpop.f32.mrb[196].mxu1  ;;  %v16143_v9 = vpop.f32.mrb[191].mxu0 }
 0x7bb   : > { %v16052_v1 = vpop.f32.mrb[197].mxu1  ;;  %v22110_v46 = vadd.f32 %v16933_v13, %v16141_v41  ;;  %v16144_v49 = vadd.f32 %v16143_v9, %v16142_v18 }
 0x7bc   : > { %v22112_v36 = vadd.f32 %v16052_v1, %v16051_v35  ;;  %v16054_v34 = vpop.f32.mrb[198].mxu1  ;;  %v16969_v1 = vadd.f32 %v22030_v32, %v22019_v0 }
 0x7bd   : > { %v16055_v42 = vpop.f32.mrb[199].mxu1  ;;  %v22114_v15 = vadd.f32 %v16941_v50, %v16144_v49 }
 0x7be   : > { %v22116_v6 = vadd.f32 %v16055_v42, %v16054_v34 }
 0x7bf   : > { %v16145_v45 = vpop.f32.mrb[192].mxu0 }
 0x7c0   : > { %v16146_v8 = vpop.f32.mrb[193].mxu0 }
 0x7c1   : > { %v16147_v7 = vadd.f32 %v16146_v8, %v16145_v45  ;;  %v16148_v48 = vpop.f32.mrb[194].mxu0  ;;  %v16977_v45 = vadd.f32 %v22035_v19, %v22019_v0  ;;  %v16965_v19 = vadd.f32 %v22048_v59, %v22019_v0 }
 0x7c2   : > { %v16057_v33 = vpop.f32.mrb[200].mxu1  ;;  %v16149_v30 = vpop.f32.mrb[195].mxu0 }
 0x7c3   : > { %v16058_v40 = vpop.f32.mrb[201].mxu1  ;;  %v22122_v52 = vadd.f32 %v16953_v51, %v16147_v7  ;;  %v16150_v63 = vadd.f32 %v16149_v30, %v16148_v48 }
 0x7c4   : > { %v22124_v10 = vadd.f32 %v16058_v40, %v16057_v33  ;;  %v16060_v4 = vpop.f32.mrb[202].mxu1 }
 0x7c5   : > { %v16061_v44 = vpop.f32.mrb[203].mxu1  ;;  %v22126_v26 = vadd.f32 %v16961_v37, %v16150_v63 }
 0x7c6   : > { %v22128_v2 = vadd.f32 %v16061_v44, %v16060_v4 }
 0x7c7   : > { %v16151_v61 = vpop.f32.mrb[196].mxu0 }
 0x7c8   : > { %v16152_v56 = vpop.f32.mrb[197].mxu0 }
 0x7c9   : > { %v16153_v23 = vadd.f32 %v16152_v56, %v16151_v61  ;;  %v16154_v21 = vpop.f32.mrb[198].mxu0 }
 0x7ca   : > { %v16063_v29 = vpop.f32.mrb[204].mxu1  ;;  %v16155_v28 = vpop.f32.mrb[199].mxu0 }
 0x7cb   : > { %v16064_v17 = vpop.f32.mrb[205].mxu1  ;;  %v22134_v11 = vadd.f32 %v16949_v38, %v16153_v23  ;;  %v16156_v5 = vadd.f32 %v16155_v28, %v16154_v21  ;;  %v16973_v21 = vadd.f32 %v22053_v60, %v22019_v0  ;;  %v16985_v60 = vadd.f32 %v22066_v31, %v22019_v0 }
 0x7cc   : > { %v22136_v13 = vadd.f32 %v16064_v17, %v16063_v29  ;;  %v16066_v41 = vpop.f32.mrb[206].mxu1 }
 0x7cd   : > { %v16067_v18 = vpop.f32.mrb[207].mxu1  ;;  %v22138_v35 = vadd.f32 %v16957_v24, %v16156_v5 }
 0x7ce   : > { %v22140_v9 = vadd.f32 %v16067_v18, %v16066_v41 }
 0x7cf   : > { %v16157_v53 = vpop.f32.mrb[200].mxu0 }
 0x7d0   : > { %v16158_v50 = vpop.f32.mrb[201].mxu0 }
 0x7d1   : > { %v16159_v49 = vadd.f32 %v16158_v50, %v16157_v53  ;;  %v16160_v34 = vpop.f32.mrb[202].mxu0 }
 0x7d2   : > { %v16245_v3 = vpop.f32.mrb[208].mxu1  ;;  %v16161_v42 = vpop.f32.mrb[203].mxu0 }
 0x7d3   : > { %v16246_v8 = vpop.f32.mrb[209].mxu1  ;;  %v22146_v51 = vadd.f32 %v16969_v1, %v16159_v49  ;;  %v16162_v7 = vadd.f32 %v16161_v42, %v16160_v34  ;;  %v16993_v42 = vadd.f32 %v22071_v39, %v22019_v0  ;;  %v16981_v39 = vadd.f32 %v22084_v62, %v22019_v0 }
 0x7d4   : > { %v16247_v48 = vadd.f32 %v16246_v8, %v16245_v3  ;;  %v16248_v33 = vpop.f32.mrb[210].mxu1 }
 0x7d5   : > { %v16249_v30 = vpop.f32.mrb[211].mxu1  ;;  %v22148_v37 = vadd.f32 %v16977_v45, %v16162_v7 }
 0x7d6   : > { %v16250_v40 = vadd.f32 %v16249_v30, %v16248_v33  ;;  %v22151_v63 = vadd.f32 %v22027_v12, %v16247_v48 }
 0x7d7   : > { %v16163_v32 = vpop.f32.mrb[204].mxu0 }
 0x7d8   : > { %v16164_v4 = vpop.f32.mrb[205].mxu0  ;;  %v22154_v44 = vadd.f32 %v22033_v25, %v16250_v40 }
 0x7d9   : > { %v16165_v61 = vadd.f32 %v16164_v4, %v16163_v32  ;;  %v16166_v56 = vpop.f32.mrb[206].mxu0 }
 0x7da   : > { %v16251_v38 = vpop.f32.mrb[212].mxu1  ;;  %v16167_v23 = vpop.f32.mrb[207].mxu0 }
 0x7db   : > { %v16252_v29 = vpop.f32.mrb[213].mxu1  ;;  %v22160_v28 = vadd.f32 %v16965_v19, %v16165_v61  ;;  %v16168_v12 = vadd.f32 %v16167_v23, %v16166_v56  ;;  %v16989_v23 = vadd.f32 %v22091_v43, %v22019_v0  ;;  %v17001_v43 = vadd.f32 %v22100_v22, %v22019_v0 }
 0x7dc   : > { %v16253_v24 = vadd.f32 %v16252_v29, %v16251_v38  ;;  %v16254_v17 = vpop.f32.mrb[214].mxu1 }
 0x7dd   : > { %v16255_v5 = vpop.f32.mrb[215].mxu1  ;;  %v22162_v41 = vadd.f32 %v16973_v21, %v16168_v12 }
 0x7de   : > { %v16256_v25 = vadd.f32 %v16255_v5, %v16254_v17  ;;  %v22165_v18 = vadd.f32 %v22045_v20, %v16253_v24 }
 0x7df   : > { %v16169_v59 = vpop.f32.mrb[208].mxu0 }
 0x7e0   : > { %v16170_v53 = vpop.f32.mrb[209].mxu0  ;;  %v22168_v50 = vadd.f32 %v22051_v54, %v16256_v25 }
 0x7e1   : > { %v16171_v1 = vadd.f32 %v16170_v53, %v16169_v59  ;;  %v16172_v49 = vpop.f32.mrb[210].mxu0 }
 0x7e2   : > { %v16257_v34 = vpop.f32.mrb[216].mxu1  ;;  %v16173_v3 = vpop.f32.mrb[211].mxu0 }
 0x7e3   : > { %v16258_v45 = vpop.f32.mrb[217].mxu1  ;;  %v22174_v8 = vadd.f32 %v16985_v60, %v16171_v1  ;;  %v16174_v20 = vadd.f32 %v16173_v3, %v16172_v49  ;;  %v17009_v3 = vadd.f32 %v22104_v58, %v22019_v0  ;;  %v16997_v58 = vadd.f32 %v22112_v36, %v22019_v0 }
 0x7e4   : > { %v16259_v7 = vadd.f32 %v16258_v45, %v16257_v34  ;;  %v16260_v48 = vpop.f32.mrb[218].mxu1 }
 0x7e5   : > { %v16261_v33 = vpop.f32.mrb[219].mxu1  ;;  %v22176_v30 = vadd.f32 %v16993_v42, %v16174_v20 }
 0x7e6   : > { %v16262_v54 = vadd.f32 %v16261_v33, %v16260_v48  ;;  %v22179_v40 = vadd.f32 %v22063_v57, %v16259_v7 }
 0x7e7   : > { %v16175_v31 = vpop.f32.mrb[212].mxu0 }
 0x7e8   : > { %v16176_v32 = vpop.f32.mrb[213].mxu0  ;;  %v22182_v4 = vadd.f32 %v22069_v27, %v16262_v54 }
 0x7e9   : > { %v16177_v19 = vadd.f32 %v16176_v32, %v16175_v31  ;;  %v16178_v61 = vpop.f32.mrb[214].mxu0 }
 0x7ea   : > { %v16263_v56 = vpop.f32.mrb[220].mxu1  ;;  %v16179_v38 = vpop.f32.mrb[215].mxu0 }
 0x7eb   : > { %v16264_v21 = vpop.f32.mrb[221].mxu1  ;;  %v22188_v29 = vadd.f32 %v16981_v39, %v16177_v19  ;;  %v16180_v57 = vadd.f32 %v16179_v38, %v16178_v61  ;;  %v17005_v38 = vadd.f32 %v22116_v6, %v22019_v0  ;;  %v17017_v6 = vadd.f32 %v22124_v10, %v22019_v0 }
 0x7ec   : > { %v16265_v12 = vadd.f32 %v16264_v21, %v16263_v56  ;;  %v16266_v24 = vpop.f32.mrb[222].mxu1 }
 0x7ed   : > { %v16267_v17 = vpop.f32.mrb[223].mxu1  ;;  %v22190_v5 = vadd.f32 %v16989_v23, %v16180_v57 }
 0x7ee   : > { %v16268_v27 = vadd.f32 %v16267_v17, %v16266_v24  ;;  %v22193_v25 = vadd.f32 %v22081_v16, %v16265_v12 }
 0x7ef   : > { %v16181_v62 = vpop.f32.mrb[216].mxu0 }
 0x7f0   : > { %v16182_v59 = vpop.f32.mrb[217].mxu0  ;;  %v22196_v53 = vadd.f32 %v22087_v14, %v16268_v27 }
 0x7f1   : > { %v16183_v60 = vadd.f32 %v16182_v59, %v16181_v62  ;;  %v16184_v1 = vpop.f32.mrb[218].mxu0 }
 0x7f2   : > { %v16269_v49 = vpop.f32.mrb[224].mxu1  ;;  %v16185_v34 = vpop.f32.mrb[219].mxu0 }
 0x7f3   : > { %v16270_v42 = vpop.f32.mrb[225].mxu1  ;;  %v22202_v45 = vadd.f32 %v17001_v43, %v16183_v60  ;;  %v16186_v16 = vadd.f32 %v16185_v34, %v16184_v1  ;;  %v17025_v34 = vadd.f32 %v22128_v2, %v22019_v0  ;;  %v17013_v2 = vadd.f32 %v22136_v13, %v22019_v0 }
 0x7f4   : > { %v16271_v20 = vadd.f32 %v16270_v42, %v16269_v49  ;;  %v16272_v7 = vpop.f32.mrb[226].mxu1 }
 0x7f5   : > { %v16273_v48 = vpop.f32.mrb[227].mxu1  ;;  %v22204_v33 = vadd.f32 %v17009_v3, %v16186_v16 }
 0x7f6   : > { %v16274_v14 = vadd.f32 %v16273_v48, %v16272_v7  ;;  %v22207_v54 = vadd.f32 %v22098_v47, %v16271_v20 }
 0x7f7   : > { %v16187_v22 = vpop.f32.mrb[220].mxu0 }
 0x7f8   : > { %v16188_v31 = vpop.f32.mrb[221].mxu0  ;;  %v22210_v32 = vadd.f32 %v22102_v55, %v16274_v14 }
 0x7f9   : > { %v16189_v39 = vadd.f32 %v16188_v31, %v16187_v22  ;;  %v16190_v19 = vpop.f32.mrb[222].mxu0 }
 0x7fa   : > { %v16275_v61 = vpop.f32.mrb[228].mxu1  ;;  %v16191_v56 = vpop.f32.mrb[223].mxu0 }
 0x7fb   : > { %v16276_v23 = vpop.f32.mrb[229].mxu1  ;;  %v22216_v21 = vadd.f32 %v16997_v58, %v16189_v39  ;;  %v16192_v47 = vadd.f32 %v16191_v56, %v16190_v19  ;;  %v17021_v56 = vadd.f32 %v22140_v9, %v22019_v0 }
 0x7fc   : > { %v16277_v57 = vadd.f32 %v16276_v23, %v16275_v61  ;;  %v16278_v12 = vpop.f32.mrb[230].mxu1 }
 0x7fd   : > { %v16279_v24 = vpop.f32.mrb[231].mxu1  ;;  %v22218_v17 = vadd.f32 %v17005_v38, %v16192_v47 }
 0x7fe   : > { %v16280_v55 = vadd.f32 %v16279_v24, %v16278_v12  ;;  %v22221_v27 = vadd.f32 %v22110_v46, %v16277_v57 }
 0x7ff   : > { %v16193_v36 = vpop.f32.mrb[224].mxu0 }
 0x800   : > { %v16194_v62 = vpop.f32.mrb[225].mxu0  ;;  %v22224_v59 = vadd.f32 %v22114_v15, %v16280_v55 }
 0x801   : > { %v16195_v43 = vadd.f32 %v16194_v62, %v16193_v36  ;;  %v16196_v60 = vpop.f32.mrb[226].mxu0 }
 0x802   : > { %v16281_v1 = vpop.f32.mrb[232].mxu1  ;;  %v16197_v49 = vpop.f32.mrb[227].mxu0 }
 0x803   : > { %v16282_v3 = vpop.f32.mrb[233].mxu1  ;;  %v22230_v42 = vadd.f32 %v17017_v6, %v16195_v43  ;;  %v16198_v46 = vadd.f32 %v16197_v49, %v16196_v60 }
 0x804   : > { %v16283_v16 = vadd.f32 %v16282_v3, %v16281_v1  ;;  %v16284_v20 = vpop.f32.mrb[234].mxu1 }
 0x805   : > { %v16285_v7 = vpop.f32.mrb[235].mxu1  ;;  %v22232_v48 = vadd.f32 %v17025_v34, %v16198_v46 }
 0x806   : > { %v16286_v15 = vadd.f32 %v16285_v7, %v16284_v20  ;;  %v22235_v14 = vadd.f32 %v22122_v52, %v16283_v16 }
 0x807   : > { %v16199_v10 = vpop.f32.mrb[228].mxu0 }
 0x808   : > { %v16200_v22 = vpop.f32.mrb[229].mxu0  ;;  %v22238_v31 = vadd.f32 %v22126_v26, %v16286_v15 }
 0x809   : > { %v16201_v58 = vadd.f32 %v16200_v22, %v16199_v10  ;;  %v16202_v39 = vpop.f32.mrb[230].mxu0 }
 0x80a   : > { %v16287_v19 = vpop.f32.mrb[236].mxu1  ;;  %v16203_v61 = vpop.f32.mrb[231].mxu0 }
 0x80b   : > { %v16288_v38 = vpop.f32.mrb[237].mxu1  ;;  %v22244_v23 = vadd.f32 %v17013_v2, %v16201_v58  ;;  %v16204_v52 = vadd.f32 %v16203_v61, %v16202_v39 }
 0x80c   : > { %v16289_v47 = vadd.f32 %v16288_v38, %v16287_v19  ;;  %v16290_v57 = vpop.f32.mrb[238].mxu1 }
 0x80d   : > { %v16291_v12 = vpop.f32.mrb[239].mxu1  ;;  %v22246_v24 = vadd.f32 %v17021_v56, %v16204_v52 }
 0x80e   : > { %v16292_v26 = vadd.f32 %v16291_v12, %v16290_v57  ;;  %v22249_v55 = vadd.f32 %v22134_v11, %v16289_v47 }
 0x810   : > { %v22252_v13 = vadd.f32 %v22138_v35, %v16292_v26 }
 0x812   : > { %v16293_v36 = vpop.f32.mrb[240].mxu1 }
 0x813   : > { %v16294_v62 = vpop.f32.mrb[241].mxu1 }
 0x814   : > { %v16295_v6 = vadd.f32 %v16294_v62, %v16293_v36  ;;  %v16296_v0 = vpop.f32.mrb[242].mxu1 }
 0x815   : > { %v16297_v9 = vpop.f32.mrb[243].mxu1 }
 0x816   : > { %v16298_v43 = vadd.f32 %v16297_v9, %v16296_v0  ;;  %v22255_v60 = vadd.f32 %v22146_v51, %v16295_v6 }
 0x818   : > { %v22258_v1 = vadd.f32 %v22148_v37, %v16298_v43 }
 0x81a   : > { %v16299_v49 = vpop.f32.mrb[244].mxu1 }
 0x81b   : > { %v16300_v34 = vpop.f32.mrb[245].mxu1 }
 0x81c   : > { %v16301_v3 = vadd.f32 %v16300_v34, %v16299_v49  ;;  %v16302_v11 = vpop.f32.mrb[246].mxu1 }
 0x81d   : > { %v16303_v46 = vpop.f32.mrb[247].mxu1 }
 0x81e   : > { %v16304_v16 = vadd.f32 %v16303_v46, %v16302_v11  ;;  %v22261_v35 = vadd.f32 %v22160_v28, %v16301_v3 }
 0x820   : > { %v22264_v20 = vadd.f32 %v22162_v41, %v16304_v16 }
 0x822   : > { %v16305_v7 = vpop.f32.mrb[248].mxu1 }
 0x823   : > { %v16306_v15 = vpop.f32.mrb[249].mxu1 }
 0x824   : > { %v16307_v10 = vadd.f32 %v16306_v15, %v16305_v7  ;;  %v16308_v51 = vpop.f32.mrb[250].mxu1 }
 0x825   : > { %v16309_v22 = vpop.f32.mrb[251].mxu1 }
 0x826   : > { %v16310_v2 = vadd.f32 %v16309_v22, %v16308_v51  ;;  %v22267_v37 = vadd.f32 %v22174_v8, %v16307_v10 }
 0x828   : > { %v22270_v58 = vadd.f32 %v22176_v30, %v16310_v2 }
 0x82a   : > { %v16311_v39 = vpop.f32.mrb[252].mxu1 }
 0x82b   : > { %v16312_v19 = vpop.f32.mrb[253].mxu1 }
 0x82c   : > { %v16313_v61 = vadd.f32 %v16312_v19, %v16311_v39  ;;  %v16314_v28 = vpop.f32.mrb[254].mxu1 }
 0x82d   : > { %v16315_v56 = vpop.f32.mrb[255].mxu1 }
 0x82e   : > { %v16316_v38 = vadd.f32 %v16315_v56, %v16314_v28  ;;  %v22273_v41 = vadd.f32 %v22188_v29, %v16313_v61 }
 0x830   : > { %v22276_v52 = vadd.f32 %v22190_v5, %v16316_v38 }
 0x832   : > { %v16317_v47 = vpop.f32.mrb[0].mxu1 }
 0x833   : > { %v16318_v57 = vpop.f32.mrb[1].mxu1 }
 0x834   : > { %v16319_v12 = vadd.f32 %v16318_v57, %v16317_v47  ;;  %v16320_v8 = vpop.f32.mrb[2].mxu1 }
 0x835   : > { %v16321_v26 = vpop.f32.mrb[3].mxu1 }
 0x836   : > { %v16322_v36 = vadd.f32 %v16321_v26, %v16320_v8  ;;  %v22279_v30 = vadd.f32 %v22202_v45, %v16319_v12 }
 0x838   : > { %v22282_v62 = vadd.f32 %v22204_v33, %v16322_v36 }
 0x83a   : > { %v16323_v6 = vpop.f32.mrb[4].mxu1 }
 0x83b   : > { %v16324_v0 = vpop.f32.mrb[5].mxu1 }
 0x83c   : > { %v16325_v9 = vadd.f32 %v16324_v0, %v16323_v6  ;;  %v16326_v29 = vpop.f32.mrb[6].mxu1 }
 0x83d   : > { %v16327_v43 = vpop.f32.mrb[7].mxu1 }
 0x83e   : > { %v16328_v49 = vadd.f32 %v16327_v43, %v16326_v29  ;;  %v22285_v5 = vadd.f32 %v22216_v21, %v16325_v9 }
 0x840   : > { %v22288_v34 = vadd.f32 %v22218_v17, %v16328_v49 }
 0x842   : > { %v16329_v3 = vpop.f32.mrb[8].mxu1 }
 0x843   : > { %v16330_v11 = vpop.f32.mrb[9].mxu1 }
 0x844   : > { %v16331_v46 = vadd.f32 %v16330_v11, %v16329_v3  ;;  %v16332_v45 = vpop.f32.mrb[10].mxu1 }
 0x845   : > { %v16333_v16 = vpop.f32.mrb[11].mxu1 }
 0x846   : > { %v16334_v7 = vadd.f32 %v16333_v16, %v16332_v45  ;;  %v22291_v33 = vadd.f32 %v22230_v42, %v16331_v46 }
 0x848   : > { %v22294_v15 = vadd.f32 %v22232_v48, %v16334_v7 }
 0x84a   : > { %v16335_v10 = vpop.f32.mrb[12].mxu1 }
 0x84b   : > { %v16336_v51 = vpop.f32.mrb[13].mxu1 }
 0x84c   : > { %v16337_v21 = vadd.f32 %v16336_v51, %v16335_v10  ;;  %v16338_v22 = vpop.f32.mrb[14].mxu1 }
 0x84d   : > { %v16339_v2 = vpop.f32.mrb[15].mxu1 }
 0x84e   : > { %v16340_v17 = vadd.f32 %v16339_v2, %v16338_v22  ;;  %v22297_v39 = vadd.f32 %v22244_v23, %v16337_v21 }
 0x84f   : > { %v16695_v19 = vpop.f32.mrb[136].mxu0 }
 0x850   : > { %v16904_v61 = vadd.f32 %v22165_v18, %v16695_v19  ;;  %v13892_v28 = vpop.f32.mrb[137].mxu0  ;;  %v22301_v42 = vadd.f32 %v22246_v24, %v16340_v17 }
 0x851   : > { %v16908_v48 = vadd.f32 %v22151_v63, %v13892_v28  ;;  %v16696_v56 = vpop.f32.mrb[138].mxu0 }
 0x852   : > { %v16912_v38 = vadd.f32 %v22168_v50, %v16696_v56  ;;  %v13895_v47 = vpop.f32.mrb[139].mxu0 }
 0x853   : > { %v16916_v18 = vadd.f32 %v22154_v44, %v13895_v47 }
 0x854   : > { %v15306_v23 = vpack.c.bf16 %v16912_v38, %v16904_v61 }
 0x855   : > { %v15301_v24 = vpack.c.bf16 %v16916_v18, %v16908_v48 }
 0x856   : > { %15378 = vst [vmem:[%s22310_s13 + $0x8] sm:$0xff] %v15306_v23  }
 0x857   : > { %15302 = vst [vmem:[%s22310_s13] sm:$0xff] %v15301_v24   ;;  %v16699_v63 = vpop.f32.mrb[140].mxu0 }
 0x858   : > { %v16920_v50 = vadd.f32 %v22193_v25, %v16699_v63  ;;  %v13908_v57 = vpop.f32.mrb[141].mxu0 }
 0x859   : > { %v16924_v12 = vadd.f32 %v22179_v40, %v13908_v57  ;;  %v16700_v8 = vpop.f32.mrb[142].mxu0 }
 0x85a   : > { %v16928_v26 = vadd.f32 %v22196_v53, %v16700_v8  ;;  %v13911_v36 = vpop.f32.mrb[143].mxu0 }
 0x85b   : > { %v16932_v6 = vadd.f32 %v22182_v4, %v13911_v36 }
 0x85c   : > { %v15316_v44 = vpack.c.bf16 %v16928_v26, %v16920_v50 }
 0x85d   : > { %v15311_v0 = vpack.c.bf16 %v16932_v6, %v16924_v12 }
 0x85e   : > { %15380 = vst [vmem:[%s22310_s13 + $0x18] sm:$0xff] %v15316_v44  }
 0x85f   : > { %15379 = vst [vmem:[%s22310_s13 + $0x10] sm:$0xff] %v15311_v0   ;;  %v16703_v9 = vpop.f32.mrb[144].mxu0 }
 0x860   : > { %v16936_v29 = vadd.f32 %v22221_v27, %v16703_v9  ;;  %v13924_v43 = vpop.f32.mrb[145].mxu0 }
 0x861   : > { %v16940_v25 = vadd.f32 %v22207_v54, %v13924_v43  ;;  %v16704_v49 = vpop.f32.mrb[146].mxu0 }
 0x862   : > { %v16944_v40 = vadd.f32 %v22224_v59, %v16704_v49  ;;  %v13927_v3 = vpop.f32.mrb[147].mxu0 }
 0x863   : > { %v16948_v53 = vadd.f32 %v22210_v32, %v13927_v3 }
 0x864   : > { %v15326_v4 = vpack.c.bf16 %v16944_v40, %v16936_v29 }
 0x865   : > { %v15321_v11 = vpack.c.bf16 %v16948_v53, %v16940_v25 }
 0x866   : > { %15382 = vst [vmem:[%s22310_s13 + $0x28] sm:$0xff] %v15326_v4  }
 0x867   : > { %15381 = vst [vmem:[%s22310_s13 + $0x20] sm:$0xff] %v15321_v11   ;;  %v16707_v46 = vpop.f32.mrb[148].mxu0 }
 0x868   : > { %v16952_v45 = vadd.f32 %v22249_v55, %v16707_v46  ;;  %v13940_v16 = vpop.f32.mrb[149].mxu0 }
 0x869   : > { %v16956_v27 = vadd.f32 %v22235_v14, %v13940_v16  ;;  %v16708_v7 = vpop.f32.mrb[150].mxu0 }
 0x86a   : > { %v16960_v54 = vadd.f32 %v22252_v13, %v16708_v7  ;;  %v13943_v10 = vpop.f32.mrb[151].mxu0 }
 0x86b   : > { %v16964_v59 = vadd.f32 %v22238_v31, %v13943_v10 }
 0x86c   : > { %v15336_v32 = vpack.c.bf16 %v16960_v54, %v16952_v45 }
 0x86d   : > { %v15331_v51 = vpack.c.bf16 %v16964_v59, %v16956_v27 }
 0x86e   : > { %15384 = vst [vmem:[%s22310_s13 + $0x38] sm:$0xff] %v15336_v32  }
 0x86f   : > { %15383 = vst [vmem:[%s22310_s13 + $0x30] sm:$0xff] %v15331_v51   ;;  %v16711_v21 = vpop.f32.mrb[152].mxu0 }
 0x870   : > { %v16968_v22 = vadd.f32 %v22261_v35, %v16711_v21  ;;  %v13956_v2 = vpop.f32.mrb[153].mxu0 }
 0x871   : > { %v16972_v55 = vadd.f32 %v22255_v60, %v13956_v2  ;;  %v16712_v17 = vpop.f32.mrb[154].mxu0 }
 0x872   : > { %v16976_v14 = vadd.f32 %v22264_v20, %v16712_v17  ;;  %v13959_v19 = vpop.f32.mrb[155].mxu0 }
 0x873   : > { %v16980_v13 = vadd.f32 %v22258_v1, %v13959_v19 }
 0x874   : > { %v15346_v31 = vpack.c.bf16 %v16976_v14, %v16968_v22 }
 0x875   : > { %v15341_v61 = vpack.c.bf16 %v16980_v13, %v16972_v55 }
 0x876   : > { %15386 = vst [vmem:[%s22310_s13 + $0x48] sm:$0xff] %v15346_v31  }
 0x877   : > { %15385 = vst [vmem:[%s22310_s13 + $0x40] sm:$0xff] %v15341_v61   ;;  %v16715_v28 = vpop.f32.mrb[156].mxu0 }
 0x878   : > { %v16984_v48 = vadd.f32 %v22273_v41, %v16715_v28  ;;  %v13972_v56 = vpop.f32.mrb[157].mxu0 }
 0x879   : > { %v16988_v35 = vadd.f32 %v22267_v37, %v13972_v56  ;;  %v16716_v38 = vpop.f32.mrb[158].mxu0 }
 0x87a   : > { %v16992_v60 = vadd.f32 %v22276_v52, %v16716_v38  ;;  %v13975_v47 = vpop.f32.mrb[159].mxu0 }
 0x87b   : > { %v16996_v20 = vadd.f32 %v22270_v58, %v13975_v47 }
 0x87c   : > { %v15356_v1 = vpack.c.bf16 %v16992_v60, %v16984_v48 }
 0x87d   : > { %v15351_v18 = vpack.c.bf16 %v16996_v20, %v16988_v35 }
 0x87e   : > { %15388 = vst [vmem:[%s22310_s13 + $0x58] sm:$0xff] %v15356_v1  }
 0x87f   : > { %15387 = vst [vmem:[%s22310_s13 + $0x50] sm:$0xff] %v15351_v18   ;;  %v16719_v23 = vpop.f32.mrb[160].mxu0 }
 0x880   : > { %v17000_v24 = vadd.f32 %v22285_v5, %v16719_v23  ;;  %v13988_v63 = vpop.f32.mrb[161].mxu0 }
 0x881   : > { %v17004_v41 = vadd.f32 %v22279_v30, %v13988_v63  ;;  %v16720_v50 = vpop.f32.mrb[162].mxu0 }
 0x882   : > { %v17008_v37 = vadd.f32 %v22288_v34, %v16720_v50  ;;  %v13991_v57 = vpop.f32.mrb[163].mxu0 }
 0x883   : > { %v17012_v52 = vadd.f32 %v22282_v62, %v13991_v57 }
 0x884   : > { %v15366_v58 = vpack.c.bf16 %v17008_v37, %v17000_v24 }
 0x885   : > { %v15361_v12 = vpack.c.bf16 %v17012_v52, %v17004_v41 }
 0x886   : > { %15390 = vst [vmem:[%s22310_s13 + $0x68] sm:$0xff] %v15366_v58  }
 0x887   : > { %15389 = vst [vmem:[%s22310_s13 + $0x60] sm:$0xff] %v15361_v12   ;;  %v16723_v8 = vpop.f32.mrb[164].mxu0 }
 0x888   : > { %v17016_v26 = vadd.f32 %v22297_v39, %v16723_v8  ;;  %v14004_v36 = vpop.f32.mrb[165].mxu0 }
 0x889   : > { %v17020_v5 = vadd.f32 %v22291_v33, %v14004_v36  ;;  %v16724_v6 = vpop.f32.mrb[166].mxu0 }
 0x88a   : > { %v17024_v30 = vadd.f32 %v22301_v42, %v16724_v6  ;;  %v14007_v44 = vpop.f32.mrb[167].mxu0 }
 0x88b   : > { %v17028_v34 = vadd.f32 %v22294_v15, %v14007_v44 }
 0x88c   : > { %v15376_v0 = vpack.c.bf16 %v17024_v30, %v17016_v26 }
 0x88d   : > { %v15371_v9 = vpack.c.bf16 %v17028_v34, %v17020_v5 }
 0x88e   : > { %15392 = vst [vmem:[%s22310_s13 + $0x78] sm:$0xff] %v15376_v0  }
 0x88f   : > { %15391 = vst [vmem:[%s22310_s13 + $0x70] sm:$0xff] %v15371_v9  }
 0x890 PF: > { %s17_s24 = sadd.s32 1, %s17716_s24  }
 0x891   : > { %p14_p4 = scmp.ge.s32.totalorder %s17_s24, 4  }
 0x893   :  { %16 = sbr.rel (!%p14_p4) target bundleno = 1 (0x1), region = 89 }

</bundles_post_ra>
